<compile_context>
chip_gen: v6e
topology: v6e:2x2x1
jax: 0.10.0
libtpu: 0.0.40
codegen_flags: <defaults>
</compile_context>

<pallas_src>
import jax
import jax.numpy as jnp
from jax import lax
from jax.experimental import pallas as pl
from jax.experimental.pallas import tpu as pltpu

NEG_SLOPE = 0.01  # nn.LeakyReLU default negative_slope


# ----------------------------------------------------------------------------
# Pallas kernel: wavefronted stacked GRU + Linear -> LeakyReLU -> Linear
# ----------------------------------------------------------------------------
def make_leakynet_kernel(L, B, H, OP, num_layers, mm_dtype):
    """OP = lane-padded output width (multiple of 128)."""

    def kernel(*refs):
        n_in = 2 + 4 * num_layers + 4
        x_ref, h0_ref = refs[0], refs[1]
        layer_refs = refs[2:2 + 4 * num_layers]
        lin_w_ref, lin_b_ref, out_w_ref, out_b_ref = refs[2 + 4 * num_layers:n_in]
        logits_ref, hout_ref = refs[n_in], refs[n_in + 1]
        xg_ref, hseq_ref = refs[n_in + 2], refs[n_in + 3]

        # ---- Layer-0 input-gate projection for ALL timesteps at once -------
        # One big MXU op off the serial critical path.  f32 accumulate; the
        # r/z halves of b_hh_0 are already folded into b_ih_0 on the prep side.
        w_ih0_ref, _, b_ih0_ref, _ = layer_refs[0:4]
        xg_ref[...] = (
            jnp.dot(x_ref[...], w_ih0_ref[...],
                    preferred_element_type=jnp.float32)
            + b_ih0_ref[...])                                    # (L*B, 3H) f32

        # ---- Hoist per-layer weights / pre-broadcast biases (once) ---------
        w_hh, w_ih, b_ih_b, b_hn_b, h_init = [], [], [], [], []
        for l in range(num_layers):
            w_ih_ref, w_hh_ref, b_ih_ref, b_hn_ref = layer_refs[4 * l:4 * l + 4]
            w_hh.append(w_hh_ref[...])                           # (H, 3H) mm_dtype
            w_ih.append(w_ih_ref[...] if l > 0 else None)        # (H, 3H) mm_dtype
            b_ih_b.append(jnp.broadcast_to(b_ih_ref[...], (B, 3 * H))
                          if l > 0 else None)                    # (B, 3H) f32
            b_hn_b.append(jnp.broadcast_to(b_hn_ref[...], (B, H)))  # (B, H) f32
            h_init.append(h0_ref[l])                             # (B, H)  f32

        # ---- Wavefronted recurrence: all layers advance inside one step ----
        # h_{0,t+1} depends only on h_{0,t}; h_{l,t} depends on h_{l-1,t} and
        # h_{l,t-1}.  With the loop fully unrolled, consecutive steps of the
        # different layers' chains are independent and the scheduler can
        # overlap one chain's MXU push with the other's EUP/VPU tail.
        def step(t, hs):
            row = pl.multiple_of(t * B, B)
            new_hs = []
            inp = None
            for l in range(num_layers):
                if l == 0:
                    gi = xg_ref[pl.ds(row, B), :]                # (B, 3H) f32
                else:
                    gi = (jnp.dot(inp.astype(mm_dtype), w_ih[l],
                                  preferred_element_type=jnp.float32)
                          + b_ih_b[l])                           # (B, 3H) f32
                h = hs[l]
                # TODO(synk): weight-stationary w_hh via pltpu.matmul_push_rhs
                # (once per layer) + matmul_acc_lhs per unrolled step would
                # drop the per-step RHS staging from this serial chain; the
                # mapping is generation-specific (2x256 tiles on v6e/v7x,
                # 3x128 MXUs on v5e), so it is left on the jnp.dot path here.
                gh = jnp.dot(h.astype(mm_dtype), w_hh[l],
                             preferred_element_type=jnp.float32)  # (B, 3H) f32
                r = jax.nn.sigmoid(gi[:, 0:H] + gh[:, 0:H])
                z = jax.nn.sigmoid(gi[:, H:2 * H] + gh[:, H:2 * H])
                n = jnp.tanh(gi[:, 2 * H:3 * H]
                             + r * (gh[:, 2 * H:3 * H] + b_hn_b[l]))
                h_new = (1.0 - z) * n + z * h
                new_hs.append(h_new)
                inp = h_new
            hseq_ref[pl.ds(row, B), :] = new_hs[-1]              # final layer only
            return tuple(new_hs)

        # L is static & tiny: fully unroll so the interleaved chains are
        # visible to the scheduler instead of serializing behind a rolled loop.
        hs_last = lax.fori_loop(0, L, step, tuple(h_init), unroll=True)
        for l in range(num_layers):
            hout_ref[l] = hs_last[l]

        # ---- Linear -> LeakyReLU -> Linear (lane-dense padded head) --------
        rnn_out = hseq_ref[...].astype(mm_dtype)                 # (L*B, H)
        pre = jnp.dot(rnn_out, lin_w_ref[...],
                      preferred_element_type=jnp.float32) + lin_b_ref[...]
        leaky = jnp.where(pre >= 0.0, pre, NEG_SLOPE * pre)
        logits_ref[...] = (
            jnp.dot(leaky.astype(mm_dtype), out_w_ref[...],
                    preferred_element_type=jnp.float32)
            + out_b_ref[...])                                    # (L*B, OP) f32

    return kernel


# ----------------------------------------------------------------------------
# One-time parameter preparation (transposes, folding, padding, casts)
# ----------------------------------------------------------------------------
def prepare_leakynet_params(params, mm_dtype=jnp.bfloat16):
    """Do all parameter massaging ONCE, off the per-call hot path."""
    f32 = jnp.float32
    H = params["rnn_hid_dim"]
    num_layers = params["num_layers"]
    O = params["out_b"].shape[0]
    OP = ((O + 127) // 128) * 128            # lane-dense padded output width

    prepped = {
        "num_layers": num_layers,
        "rnn_hid_dim": H,
        "out_dim": O,
        "out_dim_padded": OP,
        "mm_dtype": mm_dtype,
        # Embedding tables pre-cast so the per-call gather yields mm_dtype.
        "src_emb": params["src_emb"].astype(mm_dtype),
        "trg_emb": params["trg_emb"].astype(mm_dtype),
        "lin_w": params["lin_w"].T.astype(mm_dtype),             # (H, H)
        "lin_b": params["lin_b"].reshape(1, H).astype(f32),
        # Zero-pad the 21-wide head to a full 128-lane tile.
        "out_w": jnp.zeros((H, OP), mm_dtype)
                    .at[:, :O].set(params["out_w"].T.astype(mm_dtype)),
        "out_b": jnp.zeros((1, OP), f32)
                    .at[0, :O].set(params["out_b"].astype(f32)),
    }
    for l in range(num_layers):
        b_ih = params[f"b_ih_{l}"].astype(f32)
        b_hh = params[f"b_hh_{l}"].astype(f32)
        # Fold the r/z halves of b_hh into b_ih; only the n-gate hidden bias
        # stays separate (it is multiplied by r inside the cell).
        b_ih_folded = b_ih.at[:2 * H].add(b_hh[:2 * H])
        prepped[f"w_ih_{l}"] = params[f"w_ih_{l}"].T.astype(mm_dtype)   # (Din, 3H)
        prepped[f"w_hh_{l}"] = params[f"w_hh_{l}"].T.astype(mm_dtype)   # (H, 3H)
        prepped[f"b_ih_{l}"] = b_ih_folded.reshape(1, 3 * H)
        prepped[f"b_hn_{l}"] = b_hh[2 * H:].reshape(1, H)
    return jax.tree_util.tree_map(
        lambda v: jax.device_put(v) if isinstance(v, jnp.ndarray) else v, prepped)


# ----------------------------------------------------------------------------
# Forward wrapper (hot path: gathers + concat + one pallas_call)
# ----------------------------------------------------------------------------
def leakynet_forward(src, previous_output, rnn_state, prepped):
    f32 = jnp.float32
    mm_dtype = prepped["mm_dtype"]
    num_layers = prepped["num_layers"]
    H = prepped["rnn_hid_dim"]
    O = prepped["out_dim"]
    OP = prepped["out_dim_padded"]

    src_emb = jnp.take(prepped["src_emb"], src, axis=0)              # (L, B, Es)
    trg_emb = jnp.take(prepped["trg_emb"], previous_output, axis=0)  # (L, B, Et)
    x = jnp.concatenate([src_emb, trg_emb], axis=2)                  # mm_dtype
    # embedding_dropout / rnn_dropout: identity in eval mode.

    L, B, Din0 = x.shape
    # Lane/sublane alignment assumptions (otherwise masked ops / layout falls back).
    assert B % 8 == 0, f"batch ({B}) must be a multiple of 8 (sublane tile)"
    assert H % 128 == 0, f"rnn_hid_dim ({H}) must be a multiple of 128 (lane tile)"
    assert Din0 % 128 == 0, f"src+trg embed dim ({Din0}) must be a multiple of 128"

    x2d = x.reshape(L * B, Din0)
    kin = [x2d, rnn_state.astype(f32)]
    for l in range(num_layers):
        kin += [prepped[f"w_ih_{l}"], prepped[f"w_hh_{l}"],
                prepped[f"b_ih_{l}"], prepped[f"b_hn_{l}"]]
    kin += [prepped["lin_w"], prepped["lin_b"], prepped["out_w"], prepped["out_b"]]

    vmem = pl.BlockSpec(memory_space=pltpu.MemorySpace.VMEM)
    # Single grid-less launch: total footprint is ~1 MiB, far under VMEM on
    # every generation (incl. v7x's 64 MiB).
    # TODO(synk): on v7x with B >= 16, add a leading grid axis splitting B in
    # half with dimension_semantics=("parallel",) so the second TensorCore
    # runs an independent recurrence; at B=8 a 4-row half underfills the
    # sublane tile and the serial chain length is unchanged.
    fn = pl.pallas_call(
        make_leakynet_kernel(L, B, H, OP, num_layers, mm_dtype),
        out_shape=(jax.ShapeDtypeStruct((L * B, OP), f32),        # lane-dense
                   jax.ShapeDtypeStruct((num_layers, B, H), f32)),
        in_specs=[vmem] * len(kin),
        out_specs=(vmem, vmem),
        scratch_shapes=[pltpu.VMEM((L * B, 3 * H), f32),          # xg slab (layer 0)
                        pltpu.VMEM((L * B, H), f32)],             # final-layer hseq
    )
    logits_p, h_final = fn(*kin)
    logits = logits_p[:, :O].reshape(L, B, O)
    return logits, h_final


# ----------------------------------------------------------------------------
# Pure-JAX reference (same math as torch.nn.GRU / Linear / LeakyReLU)
# ----------------------------------------------------------------------------
def leakynet_reference(src, previous_output, rnn_state, params):
    hp = lax.Precision.HIGHEST
    H = params["rnn_hid_dim"]
    num_layers = params["num_layers"]
    src_emb = jnp.take(params["src_emb"], src, axis=0)
    trg_emb = jnp.take(params["trg_emb"], previous_output, axis=0)
    inp = jnp.concatenate([src_emb, trg_emb], axis=2).astype(jnp.float32)
    L = inp.shape[0]

    h_layers = []
    for l in range(num_layers):
        w_ih, w_hh = params[f"w_ih_{l}"], params[f"w_hh_{l}"]
        b_ih, b_hh = params[f"b_ih_{l}"], params[f"b_hh_{l}"]
        h = rnn_state[l]
        outs = []
        for t in range(L):
            gi = jnp.dot(inp[t], w_ih.T, precision=hp) + b_ih
            gh = jnp.dot(h, w_hh.T, precision=hp) + b_hh
            r = jax.nn.sigmoid(gi[:, 0:H] + gh[:, 0:H])
            z = jax.nn.sigmoid(gi[:, H:2 * H] + gh[:, H:2 * H])
            n = jnp.tanh(gi[:, 2 * H:3 * H] + r * gh[:, 2 * H:3 * H])
            h = (1.0 - z) * n + z * h
            outs.append(h)
        inp = jnp.stack(outs, axis=0)
        h_layers.append(h)

    pre = jnp.dot(inp, params["lin_w"].T, precision=hp) + params["lin_b"]
    leaky = jnp.where(pre >= 0.0, pre, NEG_SLOPE * pre)
    logits = jnp.dot(leaky, params["out_w"].T, precision=hp) + params["out_b"]
    return logits, jnp.stack(h_layers, axis=0)


# ----------------------------------------------------------------------------
if __name__ == "__main__":
    # Small, module-consistent config.
    L, B = 8, 8                    # (seq_len, batch) — time-major like nn.GRU
    SRC_VOCAB, TRG_VOCAB = 23, 19
    SRC_EMBED, TRG_EMBED = 64, 64
    H, NUM_LAYERS = 128, 2
    O = TRG_VOCAB + 2              # nn.Linear(rnn_hid_dim, trg_vocab_len + 2)

    key = jax.random.PRNGKey(0)
    keys = iter(jax.random.split(key, 64))

    def uni(shape, fan_in):
        bound = 1.0 / jnp.sqrt(jnp.float32(fan_in))
        return jax.random.uniform(next(keys), shape, jnp.float32, -bound, bound)

    params = {
        "num_layers": NUM_LAYERS,
        "rnn_hid_dim": H,
        "src_emb": jax.random.normal(next(keys), (SRC_VOCAB, SRC_EMBED), jnp.float32),
        "trg_emb": jax.random.normal(next(keys), (TRG_VOCAB, TRG_EMBED), jnp.float32),
        "lin_w": uni((H, H), H),
        "lin_b": uni((H,), H),
        "out_w": uni((O, H), H),
        "out_b": uni((O,), H),
    }
    for l in range(NUM_LAYERS):
        din = (SRC_EMBED + TRG_EMBED) if l == 0 else H
        params[f"w_ih_{l}"] = uni((3 * H, din), H)
        params[f"w_hh_{l}"] = uni((3 * H, H), H)
        params[f"b_ih_{l}"] = uni((3 * H,), H)
        params[f"b_hh_{l}"] = uni((3 * H,), H)

    src = jax.random.randint(next(keys), (L, B), 0, SRC_VOCAB, jnp.int32)
    previous_output = jax.random.randint(next(keys), (L, B), 0, TRG_VOCAB, jnp.int32)
    rnn_state = jax.random.normal(next(keys), (NUM_LAYERS, B, H), jnp.float32)

    ref_logits, ref_h = leakynet_reference(src, previous_output, rnn_state, params)

    # ---- f32 matmul operands: tight check vs the PyTorch-style reference
    # (Mosaic default MXU precision, not bitwise HIGHEST; 2e-3 covers it).
    prepped_f32 = prepare_leakynet_params(params, mm_dtype=jnp.float32)
    fwd_f32 = jax.jit(lambda s, p, h: leakynet_forward(s, p, h, prepped_f32))
    logits, h_final = fwd_f32(src, previous_output, rnn_state)
    jax.block_until_ready((logits, h_final))
    assert logits.shape == (L, B, O) and h_final.shape == (NUM_LAYERS, B, H)
    assert jnp.allclose(logits, ref_logits, rtol=2e-3, atol=2e-3), "f32 logits mismatch"
    assert jnp.allclose(h_final, ref_h, rtol=2e-3, atol=2e-3), "f32 state mismatch"

    # ---- DEFAULT path: bf16 matmul operands, f32 MXU accumulation.
    # Gate math / biases / blends stay f32; validate with a bf16 tolerance
    # (hidden-state error compounds over L*num_layers steps; fine at L=8).
    prepped_bf16 = prepare_leakynet_params(params)          # bf16 by default
    fwd_bf16 = jax.jit(lambda s, p, h: leakynet_forward(s, p, h, prepped_bf16))
    logits_bf, h_bf = fwd_bf16(src, previous_output, rnn_state)
    jax.block_until_ready((logits_bf, h_bf))
    assert logits_bf.shape == (L, B, O) and h_bf.shape == (NUM_LAYERS, B, H)
    assert jnp.allclose(logits_bf, ref_logits, rtol=3e-2, atol=3e-2), "bf16 logits mismatch"
    assert jnp.allclose(h_bf, ref_h, rtol=3e-2, atol=3e-2), "bf16 state mismatch"

    print("KERNEL_OK")
</pallas_src>

<mosaic_0001>
module attributes {stable_mosaic.version = 11 : i64} {
  func.func @kernel(%arg0: memref<64x128xf32, #tpu.memory_space<vmem>>, %arg1: memref<2x8x128xf32, #tpu.memory_space<vmem>>, %arg2: memref<128x384xf32, #tpu.memory_space<vmem>>, %arg3: memref<128x384xf32, #tpu.memory_space<vmem>>, %arg4: memref<1x384xf32, #tpu.memory_space<vmem>>, %arg5: memref<1x128xf32, #tpu.memory_space<vmem>>, %arg6: memref<128x384xf32, #tpu.memory_space<vmem>>, %arg7: memref<128x384xf32, #tpu.memory_space<vmem>>, %arg8: memref<1x384xf32, #tpu.memory_space<vmem>>, %arg9: memref<1x128xf32, #tpu.memory_space<vmem>>, %arg10: memref<128x128xf32, #tpu.memory_space<vmem>>, %arg11: memref<1x128xf32, #tpu.memory_space<vmem>>, %arg12: memref<128x128xf32, #tpu.memory_space<vmem>>, %arg13: memref<1x128xf32, #tpu.memory_space<vmem>>, %arg14: memref<64x128xf32, #tpu.memory_space<vmem>>, %arg15: memref<2x8x128xf32, #tpu.memory_space<vmem>>, %arg16: memref<64x384xf32, #tpu.memory_space<vmem>>, %arg17: memref<64x128xf32, #tpu.memory_space<vmem>>) attributes {dimension_semantics = [], scalar_prefetch = 0 : i64, scratch_operands = 2 : i64, tpu.core_type = #tpu.core_type<tc>} {
    %c0 = arith.constant 0 : index
    %c0_0 = arith.constant 0 : index
    %0 = vector.load %arg0[%c0, %c0_0] : memref<64x128xf32, #tpu.memory_space<vmem>>, vector<64x128xf32>
    %c0_1 = arith.constant 0 : index
    %c0_2 = arith.constant 0 : index
    %1 = vector.load %arg2[%c0_1, %c0_2] : memref<128x384xf32, #tpu.memory_space<vmem>>, vector<128x384xf32>
    %cst = arith.constant dense<0.000000e+00> : vector<64x384xf32>
    %2 = tpu.matmul %0, %1, %cst {dimension_numbers = #tpu.dot_dimension_numbers<[1], [0], [0], [1], [0, 0, 1, 1], [], []>} : vector<64x128xf32>, vector<128x384xf32>, vector<64x384xf32> -> vector<64x384xf32>
    %c0_3 = arith.constant 0 : index
    %c0_4 = arith.constant 0 : index
    %3 = vector.load %arg4[%c0_3, %c0_4] : memref<1x384xf32, #tpu.memory_space<vmem>>, vector<1x384xf32>
    %4 = vector.broadcast %3 : vector<1x384xf32> to vector<64x384xf32>
    %5 = arith.addf %2, %4 : vector<64x384xf32>
    %c0_5 = arith.constant 0 : index
    %c0_6 = arith.constant 0 : index
    %6 = vector.load %arg16[%c0_5, %c0_6] : memref<64x384xf32, #tpu.memory_space<vmem>>, vector<64x384xf32>
    tpu.vector_store %arg16[%c0_5, %c0_6], %5 {strides = array<i32>} : memref<64x384xf32, #tpu.memory_space<vmem>>, vector<64x384xf32>,
    %c0_7 = arith.constant 0 : index
    %c0_8 = arith.constant 0 : index
    %7 = vector.load %arg3[%c0_7, %c0_8] : memref<128x384xf32, #tpu.memory_space<vmem>>, vector<128x384xf32>
    %c0_9 = arith.constant 0 : index
    %c0_10 = arith.constant 0 : index
    %8 = vector.load %arg5[%c0_9, %c0_10] : memref<1x128xf32, #tpu.memory_space<vmem>>, vector<1x128xf32>
    %9 = vector.shape_cast %8 : vector<1x128xf32> to vector<1x128xf32>
    %10 = vector.broadcast %9 : vector<1x128xf32> to vector<8x128xf32>
    %c0_11 = arith.constant 0 : index
    %c0_12 = arith.constant 0 : index
    %c0_13 = arith.constant 0 : index
    %11 = vector.load %arg1[%c0_11, %c0_12, %c0_13] : memref<2x8x128xf32, #tpu.memory_space<vmem>>, vector<1x8x128xf32>
    %12 = vector.shape_cast %11 : vector<1x8x128xf32> to vector<8x128xf32>
    %c0_14 = arith.constant 0 : index
    %c0_15 = arith.constant 0 : index
    %13 = vector.load %arg7[%c0_14, %c0_15] : memref<128x384xf32, #tpu.memory_space<vmem>>, vector<128x384xf32>
    %c0_16 = arith.constant 0 : index
    %c0_17 = arith.constant 0 : index
    %14 = vector.load %arg6[%c0_16, %c0_17] : memref<128x384xf32, #tpu.memory_space<vmem>>, vector<128x384xf32>
    %c0_18 = arith.constant 0 : index
    %c0_19 = arith.constant 0 : index
    %15 = vector.load %arg8[%c0_18, %c0_19] : memref<1x384xf32, #tpu.memory_space<vmem>>, vector<1x384xf32>
    %16 = vector.shape_cast %15 : vector<1x384xf32> to vector<1x384xf32>
    %17 = vector.broadcast %16 : vector<1x384xf32> to vector<8x384xf32>
    %c0_20 = arith.constant 0 : index
    %c0_21 = arith.constant 0 : index
    %18 = vector.load %arg9[%c0_20, %c0_21] : memref<1x128xf32, #tpu.memory_space<vmem>>, vector<1x128xf32>
    %19 = vector.shape_cast %18 : vector<1x128xf32> to vector<1x128xf32>
    %20 = vector.broadcast %19 : vector<1x128xf32> to vector<8x128xf32>
    %c1 = arith.constant 1 : index
    %c0_22 = arith.constant 0 : index
    %c0_23 = arith.constant 0 : index
    %21 = vector.load %arg1[%c1, %c0_22, %c0_23] : memref<2x8x128xf32, #tpu.memory_space<vmem>>, vector<1x8x128xf32>
    %22 = vector.shape_cast %21 : vector<1x8x128xf32> to vector<8x128xf32>
    %c0_i32 = arith.constant 0 : i32
    %c8_i32 = arith.constant 8 : i32
    %23 = arith.muli %c0_i32, %c8_i32 : i32
    %24 = tpu.assume_multiple %23, 8 : i32
    %25 = arith.index_cast %24 : i32 to index
    %c0_24 = arith.constant 0 : index
    %26 = vector.load %arg16[%25, %c0_24] : memref<64x384xf32, #tpu.memory_space<vmem>>, vector<8x384xf32>
    %cst_25 = arith.constant dense<0.000000e+00> : vector<8x384xf32>
    %27 = tpu.matmul %12, %7, %cst_25 {dimension_numbers = #tpu.dot_dimension_numbers<[1], [0], [0], [1], [0, 0, 1, 1], [], []>} : vector<8x128xf32>, vector<128x384xf32>, vector<8x384xf32> -> vector<8x384xf32>
    %28 = vector.extract_strided_slice %26 {offsets = [0, 0], sizes = [8, 128], strides = [1, 1]} : vector<8x384xf32> to vector<8x128xf32>
    %29 = vector.extract_strided_slice %27 {offsets = [0, 0], sizes = [8, 128], strides = [1, 1]} : vector<8x384xf32> to vector<8x128xf32>
    %30 = arith.addf %28, %29 : vector<8x128xf32>
    %31 = arith.negf %30 : vector<8x128xf32>
    %32 = math.exp %31 : vector<8x128xf32>
    %cst_26 = arith.constant 1.000000e+00 : f32
    %33 = vector.broadcast %cst_26 : f32 to vector<8x128xf32>
    %34 = arith.addf %33, %32 : vector<8x128xf32>
    %35 = arith.divf %33, %34 : vector<8x128xf32>
    %36 = vector.extract_strided_slice %26 {offsets = [0, 128], sizes = [8, 128], strides = [1, 1]} : vector<8x384xf32> to vector<8x128xf32>
    %37 = vector.extract_strided_slice %27 {offsets = [0, 128], sizes = [8, 128], strides = [1, 1]} : vector<8x384xf32> to vector<8x128xf32>
    %38 = arith.addf %36, %37 : vector<8x128xf32>
    %39 = arith.negf %38 : vector<8x128xf32>
    %40 = math.exp %39 : vector<8x128xf32>
    %cst_27 = arith.constant 1.000000e+00 : f32
    %41 = vector.broadcast %cst_27 : f32 to vector<8x128xf32>
    %42 = arith.addf %41, %40 : vector<8x128xf32>
    %43 = arith.divf %41, %42 : vector<8x128xf32>
    %44 = vector.extract_strided_slice %26 {offsets = [0, 256], sizes = [8, 128], strides = [1, 1]} : vector<8x384xf32> to vector<8x128xf32>
    %45 = vector.extract_strided_slice %27 {offsets = [0, 256], sizes = [8, 128], strides = [1, 1]} : vector<8x384xf32> to vector<8x128xf32>
    %46 = arith.addf %45, %10 : vector<8x128xf32>
    %47 = arith.mulf %35, %46 : vector<8x128xf32>
    %48 = arith.addf %44, %47 : vector<8x128xf32>
    %49 = math.tanh %48 : vector<8x128xf32>
    %cst_28 = arith.constant 1.000000e+00 : f32
    %50 = vector.broadcast %cst_28 : f32 to vector<8x128xf32>
    %51 = arith.subf %50, %43 : vector<8x128xf32>
    %52 = arith.mulf %51, %49 : vector<8x128xf32>
    %53 = arith.mulf %43, %12 : vector<8x128xf32>
    %54 = arith.addf %52, %53 : vector<8x128xf32>
    %cst_29 = arith.constant dense<0.000000e+00> : vector<8x384xf32>
    %55 = tpu.matmul %54, %14, %cst_29 {dimension_numbers = #tpu.dot_dimension_numbers<[1], [0], [0], [1], [0, 0, 1, 1], [], []>} : vector<8x128xf32>, vector<128x384xf32>, vector<8x384xf32> -> vector<8x384xf32>
    %56 = arith.addf %55, %17 : vector<8x384xf32>
    %cst_30 = arith.constant dense<0.000000e+00> : vector<8x384xf32>
    %57 = tpu.matmul %22, %13, %cst_30 {dimension_numbers = #tpu.dot_dimension_numbers<[1], [0], [0], [1], [0, 0, 1, 1], [], []>} : vector<8x128xf32>, vector<128x384xf32>, vector<8x384xf32> -> vector<8x384xf32>
    %58 = vector.extract_strided_slice %56 {offsets = [0, 0], sizes = [8, 128], strides = [1, 1]} : vector<8x384xf32> to vector<8x128xf32>
    %59 = vector.extract_strided_slice %57 {offsets = [0, 0], sizes = [8, 128], strides = [1, 1]} : vector<8x384xf32> to vector<8x128xf32>
    %60 = arith.addf %58, %59 : vector<8x128xf32>
    %61 = arith.negf %60 : vector<8x128xf32>
    %62 = math.exp %61 : vector<8x128xf32>
    %cst_31 = arith.constant 1.000000e+00 : f32
    %63 = vector.broadcast %cst_31 : f32 to vector<8x128xf32>
    %64 = arith.addf %63, %62 : vector<8x128xf32>
    %65 = arith.divf %63, %64 : vector<8x128xf32>
    %66 = vector.extract_strided_slice %56 {offsets = [0, 128], sizes = [8, 128], strides = [1, 1]} : vector<8x384xf32> to vector<8x128xf32>
    %67 = vector.extract_strided_slice %57 {offsets = [0, 128], sizes = [8, 128], strides = [1, 1]} : vector<8x384xf32> to vector<8x128xf32>
    %68 = arith.addf %66, %67 : vector<8x128xf32>
    %69 = arith.negf %68 : vector<8x128xf32>
    %70 = math.exp %69 : vector<8x128xf32>
    %cst_32 = arith.constant 1.000000e+00 : f32
    %71 = vector.broadcast %cst_32 : f32 to vector<8x128xf32>
    %72 = arith.addf %71, %70 : vector<8x128xf32>
    %73 = arith.divf %71, %72 : vector<8x128xf32>
    %74 = vector.extract_strided_slice %56 {offsets = [0, 256], sizes = [8, 128], strides = [1, 1]} : vector<8x384xf32> to vector<8x128xf32>
    %75 = vector.extract_strided_slice %57 {offsets = [0, 256], sizes = [8, 128], strides = [1, 1]} : vector<8x384xf32> to vector<8x128xf32>
    %76 = arith.addf %75, %20 : vector<8x128xf32>
    %77 = arith.mulf %65, %76 : vector<8x128xf32>
    %78 = arith.addf %74, %77 : vector<8x128xf32>
    %79 = math.tanh %78 : vector<8x128xf32>
    %cst_33 = arith.constant 1.000000e+00 : f32
    %80 = vector.broadcast %cst_33 : f32 to vector<8x128xf32>
    %81 = arith.subf %80, %73 : vector<8x128xf32>
    %82 = arith.mulf %81, %79 : vector<8x128xf32>
    %83 = arith.mulf %73, %22 : vector<8x128xf32>
    %84 = arith.addf %82, %83 : vector<8x128xf32>
    %85 = arith.index_cast %24 : i32 to index
    %c0_34 = arith.constant 0 : index
    %86 = vector.load %arg17[%85, %c0_34] : memref<64x128xf32, #tpu.memory_space<vmem>>, vector<8x128xf32>
    tpu.vector_store %arg17[%85, %c0_34], %84 {strides = array<i32>} : memref<64x128xf32, #tpu.memory_space<vmem>>, vector<8x128xf32>,
    %c1_i32 = arith.constant 1 : i32
    %c8_i32_35 = arith.constant 8 : i32
    %87 = arith.muli %c1_i32, %c8_i32_35 : i32
    %88 = tpu.assume_multiple %87, 8 : i32
    %89 = arith.index_cast %88 : i32 to index
    %c0_36 = arith.constant 0 : index
    %90 = vector.load %arg16[%89, %c0_36] : memref<64x384xf32, #tpu.memory_space<vmem>>, vector<8x384xf32>
    %cst_37 = arith.constant dense<0.000000e+00> : vector<8x384xf32>
    %91 = tpu.matmul %54, %7, %cst_37 {dimension_numbers = #tpu.dot_dimension_numbers<[1], [0], [0], [1], [0, 0, 1, 1], [], []>} : vector<8x128xf32>, vector<128x384xf32>, vector<8x384xf32> -> vector<8x384xf32>
    %92 = vector.extract_strided_slice %90 {offsets = [0, 0], sizes = [8, 128], strides = [1, 1]} : vector<8x384xf32> to vector<8x128xf32>
    %93 = vector.extract_strided_slice %91 {offsets = [0, 0], sizes = [8, 128], strides = [1, 1]} : vector<8x384xf32> to vector<8x128xf32>
    %94 = arith.addf %92, %93 : vector<8x128xf32>
    %95 = arith.negf %94 : vector<8x128xf32>
    %96 = math.exp %95 : vector<8x128xf32>
    %cst_38 = arith.constant 1.000000e+00 : f32
    %97 = vector.broadcast %cst_38 : f32 to vector<8x128xf32>
    %98 = arith.addf %97, %96 : vector<8x128xf32>
    %99 = arith.divf %97, %98 : vector<8x128xf32>
    %100 = vector.extract_strided_slice %90 {offsets = [0, 128], sizes = [8, 128], strides = [1, 1]} : vector<8x384xf32> to vector<8x128xf32>
    %101 = vector.extract_strided_slice %91 {offsets = [0, 128], sizes = [8, 128], strides = [1, 1]} : vector<8x384xf32> to vector<8x128xf32>
    %102 = arith.addf %100, %101 : vector<8x128xf32>
    %103 = arith.negf %102 : vector<8x128xf32>
    %104 = math.exp %103 : vector<8x128xf32>
    %cst_39 = arith.constant 1.000000e+00 : f32
    %105 = vector.broadcast %cst_39 : f32 to vector<8x128xf32>
    %106 = arith.addf %105, %104 : vector<8x128xf32>
    %107 = arith.divf %105, %106 : vector<8x128xf32>
    %108 = vector.extract_strided_slice %90 {offsets = [0, 256], sizes = [8, 128], strides = [1, 1]} : vector<8x384xf32> to vector<8x128xf32>
    %109 = vector.extract_strided_slice %91 {offsets = [0, 256], sizes = [8, 128], strides = [1, 1]} : vector<8x384xf32> to vector<8x128xf32>
    %110 = arith.addf %109, %10 : vector<8x128xf32>
    %111 = arith.mulf %99, %110 : vector<8x128xf32>
    %112 = arith.addf %108, %111 : vector<8x128xf32>
    %113 = math.tanh %112 : vector<8x128xf32>
    %cst_40 = arith.constant 1.000000e+00 : f32
    %114 = vector.broadcast %cst_40 : f32 to vector<8x128xf32>
    %115 = arith.subf %114, %107 : vector<8x128xf32>
    %116 = arith.mulf %115, %113 : vector<8x128xf32>
    %117 = arith.mulf %107, %54 : vector<8x128xf32>
    %118 = arith.addf %116, %117 : vector<8x128xf32>
    %cst_41 = arith.constant dense<0.000000e+00> : vector<8x384xf32>
    %119 = tpu.matmul %118, %14, %cst_41 {dimension_numbers = #tpu.dot_dimension_numbers<[1], [0], [0], [1], [0, 0, 1, 1], [], []>} : vector<8x128xf32>, vector<128x384xf32>, vector<8x384xf32> -> vector<8x384xf32>
    %120 = arith.addf %119, %17 : vector<8x384xf32>
    %cst_42 = arith.constant dense<0.000000e+00> : vector<8x384xf32>
    %121 = tpu.matmul %84, %13, %cst_42 {dimension_numbers = #tpu.dot_dimension_numbers<[1], [0], [0], [1], [0, 0, 1, 1], [], []>} : vector<8x128xf32>, vector<128x384xf32>, vector<8x384xf32> -> vector<8x384xf32>
    %122 = vector.extract_strided_slice %120 {offsets = [0, 0], sizes = [8, 128], strides = [1, 1]} : vector<8x384xf32> to vector<8x128xf32>
    %123 = vector.extract_strided_slice %121 {offsets = [0, 0], sizes = [8, 128], strides = [1, 1]} : vector<8x384xf32> to vector<8x128xf32>
    %124 = arith.addf %122, %123 : vector<8x128xf32>
    %125 = arith.negf %124 : vector<8x128xf32>
    %126 = math.exp %125 : vector<8x128xf32>
    %cst_43 = arith.constant 1.000000e+00 : f32
    %127 = vector.broadcast %cst_43 : f32 to vector<8x128xf32>
    %128 = arith.addf %127, %126 : vector<8x128xf32>
    %129 = arith.divf %127, %128 : vector<8x128xf32>
    %130 = vector.extract_strided_slice %120 {offsets = [0, 128], sizes = [8, 128], strides = [1, 1]} : vector<8x384xf32> to vector<8x128xf32>
    %131 = vector.extract_strided_slice %121 {offsets = [0, 128], sizes = [8, 128], strides = [1, 1]} : vector<8x384xf32> to vector<8x128xf32>
    %132 = arith.addf %130, %131 : vector<8x128xf32>
    %133 = arith.negf %132 : vector<8x128xf32>
    %134 = math.exp %133 : vector<8x128xf32>
    %cst_44 = arith.constant 1.000000e+00 : f32
    %135 = vector.broadcast %cst_44 : f32 to vector<8x128xf32>
    %136 = arith.addf %135, %134 : vector<8x128xf32>
    %137 = arith.divf %135, %136 : vector<8x128xf32>
    %138 = vector.extract_strided_slice %120 {offsets = [0, 256], sizes = [8, 128], strides = [1, 1]} : vector<8x384xf32> to vector<8x128xf32>
    %139 = vector.extract_strided_slice %121 {offsets = [0, 256], sizes = [8, 128], strides = [1, 1]} : vector<8x384xf32> to vector<8x128xf32>
    %140 = arith.addf %139, %20 : vector<8x128xf32>
    %141 = arith.mulf %129, %140 : vector<8x128xf32>
    %142 = arith.addf %138, %141 : vector<8x128xf32>
    %143 = math.tanh %142 : vector<8x128xf32>
    %cst_45 = arith.constant 1.000000e+00 : f32
    %144 = vector.broadcast %cst_45 : f32 to vector<8x128xf32>
    %145 = arith.subf %144, %137 : vector<8x128xf32>
    %146 = arith.mulf %145, %143 : vector<8x128xf32>
    %147 = arith.mulf %137, %84 : vector<8x128xf32>
    %148 = arith.addf %146, %147 : vector<8x128xf32>
    %149 = arith.index_cast %88 : i32 to index
    %c0_46 = arith.constant 0 : index
    %150 = vector.load %arg17[%149, %c0_46] : memref<64x128xf32, #tpu.memory_space<vmem>>, vector<8x128xf32>
    tpu.vector_store %arg17[%149, %c0_46], %148 {strides = array<i32>} : memref<64x128xf32, #tpu.memory_space<vmem>>, vector<8x128xf32>,
    %c2_i32 = arith.constant 2 : i32
    %c8_i32_47 = arith.constant 8 : i32
    %151 = arith.muli %c2_i32, %c8_i32_47 : i32
    %152 = tpu.assume_multiple %151, 8 : i32
    %153 = arith.index_cast %152 : i32 to index
    %c0_48 = arith.constant 0 : index
    %154 = vector.load %arg16[%153, %c0_48] : memref<64x384xf32, #tpu.memory_space<vmem>>, vector<8x384xf32>
    %cst_49 = arith.constant dense<0.000000e+00> : vector<8x384xf32>
    %155 = tpu.matmul %118, %7, %cst_49 {dimension_numbers = #tpu.dot_dimension_numbers<[1], [0], [0], [1], [0, 0, 1, 1], [], []>} : vector<8x128xf32>, vector<128x384xf32>, vector<8x384xf32> -> vector<8x384xf32>
    %156 = vector.extract_strided_slice %154 {offsets = [0, 0], sizes = [8, 128], strides = [1, 1]} : vector<8x384xf32> to vector<8x128xf32>
    %157 = vector.extract_strided_slice %155 {offsets = [0, 0], sizes = [8, 128], strides = [1, 1]} : vector<8x384xf32> to vector<8x128xf32>
    %158 = arith.addf %156, %157 : vector<8x128xf32>
    %159 = arith.negf %158 : vector<8x128xf32>
    %160 = math.exp %159 : vector<8x128xf32>
    %cst_50 = arith.constant 1.000000e+00 : f32
    %161 = vector.broadcast %cst_50 : f32 to vector<8x128xf32>
    %162 = arith.addf %161, %160 : vector<8x128xf32>
    %163 = arith.divf %161, %162 : vector<8x128xf32>
    %164 = vector.extract_strided_slice %154 {offsets = [0, 128], sizes = [8, 128], strides = [1, 1]} : vector<8x384xf32> to vector<8x128xf32>
    %165 = vector.extract_strided_slice %155 {offsets = [0, 128], sizes = [8, 128], strides = [1, 1]} : vector<8x384xf32> to vector<8x128xf32>
    %166 = arith.addf %164, %165 : vector<8x128xf32>
    %167 = arith.negf %166 : vector<8x128xf32>
    %168 = math.exp %167 : vector<8x128xf32>
    %cst_51 = arith.constant 1.000000e+00 : f32
    %169 = vector.broadcast %cst_51 : f32 to vector<8x128xf32>
    %170 = arith.addf %169, %168 : vector<8x128xf32>
    %171 = arith.divf %169, %170 : vector<8x128xf32>
    %172 = vector.extract_strided_slice %154 {offsets = [0, 256], sizes = [8, 128], strides = [1, 1]} : vector<8x384xf32> to vector<8x128xf32>
    %173 = vector.extract_strided_slice %155 {offsets = [0, 256], sizes = [8, 128], strides = [1, 1]} : vector<8x384xf32> to vector<8x128xf32>
    %174 = arith.addf %173, %10 : vector<8x128xf32>
    %175 = arith.mulf %163, %174 : vector<8x128xf32>
    %176 = arith.addf %172, %175 : vector<8x128xf32>
    %177 = math.tanh %176 : vector<8x128xf32>
    %cst_52 = arith.constant 1.000000e+00 : f32
    %178 = vector.broadcast %cst_52 : f32 to vector<8x128xf32>
    %179 = arith.subf %178, %171 : vector<8x128xf32>
    %180 = arith.mulf %179, %177 : vector<8x128xf32>
    %181 = arith.mulf %171, %118 : vector<8x128xf32>
    %182 = arith.addf %180, %181 : vector<8x128xf32>
    %cst_53 = arith.constant dense<0.000000e+00> : vector<8x384xf32>
    %183 = tpu.matmul %182, %14, %cst_53 {dimension_numbers = #tpu.dot_dimension_numbers<[1], [0], [0], [1], [0, 0, 1, 1], [], []>} : vector<8x128xf32>, vector<128x384xf32>, vector<8x384xf32> -> vector<8x384xf32>
    %184 = arith.addf %183, %17 : vector<8x384xf32>
    %cst_54 = arith.constant dense<0.000000e+00> : vector<8x384xf32>
    %185 = tpu.matmul %148, %13, %cst_54 {dimension_numbers = #tpu.dot_dimension_numbers<[1], [0], [0], [1], [0, 0, 1, 1], [], []>} : vector<8x128xf32>, vector<128x384xf32>, vector<8x384xf32> -> vector<8x384xf32>
    %186 = vector.extract_strided_slice %184 {offsets = [0, 0], sizes = [8, 128], strides = [1, 1]} : vector<8x384xf32> to vector<8x128xf32>
    %187 = vector.extract_strided_slice %185 {offsets = [0, 0], sizes = [8, 128], strides = [1, 1]} : vector<8x384xf32> to vector<8x128xf32>
    %188 = arith.addf %186, %187 : vector<8x128xf32>
    %189 = arith.negf %188 : vector<8x128xf32>
    %190 = math.exp %189 : vector<8x128xf32>
    %cst_55 = arith.constant 1.000000e+00 : f32
    %191 = vector.broadcast %cst_55 : f32 to vector<8x128xf32>
    %192 = arith.addf %191, %190 : vector<8x128xf32>
    %193 = arith.divf %191, %192 : vector<8x128xf32>
    %194 = vector.extract_strided_slice %184 {offsets = [0, 128], sizes = [8, 128], strides = [1, 1]} : vector<8x384xf32> to vector<8x128xf32>
    %195 = vector.extract_strided_slice %185 {offsets = [0, 128], sizes = [8, 128], strides = [1, 1]} : vector<8x384xf32> to vector<8x128xf32>
    %196 = arith.addf %194, %195 : vector<8x128xf32>
    %197 = arith.negf %196 : vector<8x128xf32>
    %198 = math.exp %197 : vector<8x128xf32>
    %cst_56 = arith.constant 1.000000e+00 : f32
    %199 = vector.broadcast %cst_56 : f32 to vector<8x128xf32>
    %200 = arith.addf %199, %198 : vector<8x128xf32>
    %201 = arith.divf %199, %200 : vector<8x128xf32>
    %202 = vector.extract_strided_slice %184 {offsets = [0, 256], sizes = [8, 128], strides = [1, 1]} : vector<8x384xf32> to vector<8x128xf32>
    %203 = vector.extract_strided_slice %185 {offsets = [0, 256], sizes = [8, 128], strides = [1, 1]} : vector<8x384xf32> to vector<8x128xf32>
    %204 = arith.addf %203, %20 : vector<8x128xf32>
    %205 = arith.mulf %193, %204 : vector<8x128xf32>
    %206 = arith.addf %202, %205 : vector<8x128xf32>
    %207 = math.tanh %206 : vector<8x128xf32>
    %cst_57 = arith.constant 1.000000e+00 : f32
    %208 = vector.broadcast %cst_57 : f32 to vector<8x128xf32>
    %209 = arith.subf %208, %201 : vector<8x128xf32>
    %210 = arith.mulf %209, %207 : vector<8x128xf32>
    %211 = arith.mulf %201, %148 : vector<8x128xf32>
    %212 = arith.addf %210, %211 : vector<8x128xf32>
    %213 = arith.index_cast %152 : i32 to index
    %c0_58 = arith.constant 0 : index
    %214 = vector.load %arg17[%213, %c0_58] : memref<64x128xf32, #tpu.memory_space<vmem>>, vector<8x128xf32>
    tpu.vector_store %arg17[%213, %c0_58], %212 {strides = array<i32>} : memref<64x128xf32, #tpu.memory_space<vmem>>, vector<8x128xf32>,
    %c3_i32 = arith.constant 3 : i32
    %c8_i32_59 = arith.constant 8 : i32
    %215 = arith.muli %c3_i32, %c8_i32_59 : i32
    %216 = tpu.assume_multiple %215, 8 : i32
    %217 = arith.index_cast %216 : i32 to index
    %c0_60 = arith.constant 0 : index
    %218 = vector.load %arg16[%217, %c0_60] : memref<64x384xf32, #tpu.memory_space<vmem>>, vector<8x384xf32>
    %cst_61 = arith.constant dense<0.000000e+00> : vector<8x384xf32>
    %219 = tpu.matmul %182, %7, %cst_61 {dimension_numbers = #tpu.dot_dimension_numbers<[1], [0], [0], [1], [0, 0, 1, 1], [], []>} : vector<8x128xf32>, vector<128x384xf32>, vector<8x384xf32> -> vector<8x384xf32>
    %220 = vector.extract_strided_slice %218 {offsets = [0, 0], sizes = [8, 128], strides = [1, 1]} : vector<8x384xf32> to vector<8x128xf32>
    %221 = vector.extract_strided_slice %219 {offsets = [0, 0], sizes = [8, 128], strides = [1, 1]} : vector<8x384xf32> to vector<8x128xf32>
    %222 = arith.addf %220, %221 : vector<8x128xf32>
    %223 = arith.negf %222 : vector<8x128xf32>
    %224 = math.exp %223 : vector<8x128xf32>
    %cst_62 = arith.constant 1.000000e+00 : f32
    %225 = vector.broadcast %cst_62 : f32 to vector<8x128xf32>
    %226 = arith.addf %225, %224 : vector<8x128xf32>
    %227 = arith.divf %225, %226 : vector<8x128xf32>
    %228 = vector.extract_strided_slice %218 {offsets = [0, 128], sizes = [8, 128], strides = [1, 1]} : vector<8x384xf32> to vector<8x128xf32>
    %229 = vector.extract_strided_slice %219 {offsets = [0, 128], sizes = [8, 128], strides = [1, 1]} : vector<8x384xf32> to vector<8x128xf32>
    %230 = arith.addf %228, %229 : vector<8x128xf32>
    %231 = arith.negf %230 : vector<8x128xf32>
    %232 = math.exp %231 : vector<8x128xf32>
    %cst_63 = arith.constant 1.000000e+00 : f32
    %233 = vector.broadcast %cst_63 : f32 to vector<8x128xf32>
    %234 = arith.addf %233, %232 : vector<8x128xf32>
    %235 = arith.divf %233, %234 : vector<8x128xf32>
    %236 = vector.extract_strided_slice %218 {offsets = [0, 256], sizes = [8, 128], strides = [1, 1]} : vector<8x384xf32> to vector<8x128xf32>
    %237 = vector.extract_strided_slice %219 {offsets = [0, 256], sizes = [8, 128], strides = [1, 1]} : vector<8x384xf32> to vector<8x128xf32>
    %238 = arith.addf %237, %10 : vector<8x128xf32>
    %239 = arith.mulf %227, %238 : vector<8x128xf32>
    %240 = arith.addf %236, %239 : vector<8x128xf32>
    %241 = math.tanh %240 : vector<8x128xf32>
    %cst_64 = arith.constant 1.000000e+00 : f32
    %242 = vector.broadcast %cst_64 : f32 to vector<8x128xf32>
    %243 = arith.subf %242, %235 : vector<8x128xf32>
    %244 = arith.mulf %243, %241 : vector<8x128xf32>
    %245 = arith.mulf %235, %182 : vector<8x128xf32>
    %246 = arith.addf %244, %245 : vector<8x128xf32>
    %cst_65 = arith.constant dense<0.000000e+00> : vector<8x384xf32>
    %247 = tpu.matmul %246, %14, %cst_65 {dimension_numbers = #tpu.dot_dimension_numbers<[1], [0], [0], [1], [0, 0, 1, 1], [], []>} : vector<8x128xf32>, vector<128x384xf32>, vector<8x384xf32> -> vector<8x384xf32>
    %248 = arith.addf %247, %17 : vector<8x384xf32>
    %cst_66 = arith.constant dense<0.000000e+00> : vector<8x384xf32>
    %249 = tpu.matmul %212, %13, %cst_66 {dimension_numbers = #tpu.dot_dimension_numbers<[1], [0], [0], [1], [0, 0, 1, 1], [], []>} : vector<8x128xf32>, vector<128x384xf32>, vector<8x384xf32> -> vector<8x384xf32>
    %250 = vector.extract_strided_slice %248 {offsets = [0, 0], sizes = [8, 128], strides = [1, 1]} : vector<8x384xf32> to vector<8x128xf32>
    %251 = vector.extract_strided_slice %249 {offsets = [0, 0], sizes = [8, 128], strides = [1, 1]} : vector<8x384xf32> to vector<8x128xf32>
    %252 = arith.addf %250, %251 : vector<8x128xf32>
    %253 = arith.negf %252 : vector<8x128xf32>
    %254 = math.exp %253 : vector<8x128xf32>
    %cst_67 = arith.constant 1.000000e+00 : f32
    %255 = vector.broadcast %cst_67 : f32 to vector<8x128xf32>
    %256 = arith.addf %255, %254 : vector<8x128xf32>
    %257 = arith.divf %255, %256 : vector<8x128xf32>
    %258 = vector.extract_strided_slice %248 {offsets = [0, 128], sizes = [8, 128], strides = [1, 1]} : vector<8x384xf32> to vector<8x128xf32>
    %259 = vector.extract_strided_slice %249 {offsets = [0, 128], sizes = [8, 128], strides = [1, 1]} : vector<8x384xf32> to vector<8x128xf32>
    %260 = arith.addf %258, %259 : vector<8x128xf32>
    %261 = arith.negf %260 : vector<8x128xf32>
    %262 = math.exp %261 : vector<8x128xf32>
    %cst_68 = arith.constant 1.000000e+00 : f32
    %263 = vector.broadcast %cst_68 : f32 to vector<8x128xf32>
    %264 = arith.addf %263, %262 : vector<8x128xf32>
    %265 = arith.divf %263, %264 : vector<8x128xf32>
    %266 = vector.extract_strided_slice %248 {offsets = [0, 256], sizes = [8, 128], strides = [1, 1]} : vector<8x384xf32> to vector<8x128xf32>
    %267 = vector.extract_strided_slice %249 {offsets = [0, 256], sizes = [8, 128], strides = [1, 1]} : vector<8x384xf32> to vector<8x128xf32>
    %268 = arith.addf %267, %20 : vector<8x128xf32>
    %269 = arith.mulf %257, %268 : vector<8x128xf32>
    %270 = arith.addf %266, %269 : vector<8x128xf32>
    %271 = math.tanh %270 : vector<8x128xf32>
    %cst_69 = arith.constant 1.000000e+00 : f32
    %272 = vector.broadcast %cst_69 : f32 to vector<8x128xf32>
    %273 = arith.subf %272, %265 : vector<8x128xf32>
    %274 = arith.mulf %273, %271 : vector<8x128xf32>
    %275 = arith.mulf %265, %212 : vector<8x128xf32>
    %276 = arith.addf %274, %275 : vector<8x128xf32>
    %277 = arith.index_cast %216 : i32 to index
    %c0_70 = arith.constant 0 : index
    %278 = vector.load %arg17[%277, %c0_70] : memref<64x128xf32, #tpu.memory_space<vmem>>, vector<8x128xf32>
    tpu.vector_store %arg17[%277, %c0_70], %276 {strides = array<i32>} : memref<64x128xf32, #tpu.memory_space<vmem>>, vector<8x128xf32>,
    %c4_i32 = arith.constant 4 : i32
    %c8_i32_71 = arith.constant 8 : i32
    %279 = arith.muli %c4_i32, %c8_i32_71 : i32
    %280 = tpu.assume_multiple %279, 8 : i32
    %281 = arith.index_cast %280 : i32 to index
    %c0_72 = arith.constant 0 : index
    %282 = vector.load %arg16[%281, %c0_72] : memref<64x384xf32, #tpu.memory_space<vmem>>, vector<8x384xf32>
    %cst_73 = arith.constant dense<0.000000e+00> : vector<8x384xf32>
    %283 = tpu.matmul %246, %7, %cst_73 {dimension_numbers = #tpu.dot_dimension_numbers<[1], [0], [0], [1], [0, 0, 1, 1], [], []>} : vector<8x128xf32>, vector<128x384xf32>, vector<8x384xf32> -> vector<8x384xf32>
    %284 = vector.extract_strided_slice %282 {offsets = [0, 0], sizes = [8, 128], strides = [1, 1]} : vector<8x384xf32> to vector<8x128xf32>
    %285 = vector.extract_strided_slice %283 {offsets = [0, 0], sizes = [8, 128], strides = [1, 1]} : vector<8x384xf32> to vector<8x128xf32>
    %286 = arith.addf %284, %285 : vector<8x128xf32>
    %287 = arith.negf %286 : vector<8x128xf32>
    %288 = math.exp %287 : vector<8x128xf32>
    %cst_74 = arith.constant 1.000000e+00 : f32
    %289 = vector.broadcast %cst_74 : f32 to vector<8x128xf32>
    %290 = arith.addf %289, %288 : vector<8x128xf32>
    %291 = arith.divf %289, %290 : vector<8x128xf32>
    %292 = vector.extract_strided_slice %282 {offsets = [0, 128], sizes = [8, 128], strides = [1, 1]} : vector<8x384xf32> to vector<8x128xf32>
    %293 = vector.extract_strided_slice %283 {offsets = [0, 128], sizes = [8, 128], strides = [1, 1]} : vector<8x384xf32> to vector<8x128xf32>
    %294 = arith.addf %292, %293 : vector<8x128xf32>
    %295 = arith.negf %294 : vector<8x128xf32>
    %296 = math.exp %295 : vector<8x128xf32>
    %cst_75 = arith.constant 1.000000e+00 : f32
    %297 = vector.broadcast %cst_75 : f32 to vector<8x128xf32>
    %298 = arith.addf %297, %296 : vector<8x128xf32>
    %299 = arith.divf %297, %298 : vector<8x128xf32>
    %300 = vector.extract_strided_slice %282 {offsets = [0, 256], sizes = [8, 128], strides = [1, 1]} : vector<8x384xf32> to vector<8x128xf32>
    %301 = vector.extract_strided_slice %283 {offsets = [0, 256], sizes = [8, 128], strides = [1, 1]} : vector<8x384xf32> to vector<8x128xf32>
    %302 = arith.addf %301, %10 : vector<8x128xf32>
    %303 = arith.mulf %291, %302 : vector<8x128xf32>
    %304 = arith.addf %300, %303 : vector<8x128xf32>
    %305 = math.tanh %304 : vector<8x128xf32>
    %cst_76 = arith.constant 1.000000e+00 : f32
    %306 = vector.broadcast %cst_76 : f32 to vector<8x128xf32>
    %307 = arith.subf %306, %299 : vector<8x128xf32>
    %308 = arith.mulf %307, %305 : vector<8x128xf32>
    %309 = arith.mulf %299, %246 : vector<8x128xf32>
    %310 = arith.addf %308, %309 : vector<8x128xf32>
    %cst_77 = arith.constant dense<0.000000e+00> : vector<8x384xf32>
    %311 = tpu.matmul %310, %14, %cst_77 {dimension_numbers = #tpu.dot_dimension_numbers<[1], [0], [0], [1], [0, 0, 1, 1], [], []>} : vector<8x128xf32>, vector<128x384xf32>, vector<8x384xf32> -> vector<8x384xf32>
    %312 = arith.addf %311, %17 : vector<8x384xf32>
    %cst_78 = arith.constant dense<0.000000e+00> : vector<8x384xf32>
    %313 = tpu.matmul %276, %13, %cst_78 {dimension_numbers = #tpu.dot_dimension_numbers<[1], [0], [0], [1], [0, 0, 1, 1], [], []>} : vector<8x128xf32>, vector<128x384xf32>, vector<8x384xf32> -> vector<8x384xf32>
    %314 = vector.extract_strided_slice %312 {offsets = [0, 0], sizes = [8, 128], strides = [1, 1]} : vector<8x384xf32> to vector<8x128xf32>
    %315 = vector.extract_strided_slice %313 {offsets = [0, 0], sizes = [8, 128], strides = [1, 1]} : vector<8x384xf32> to vector<8x128xf32>
    %316 = arith.addf %314, %315 : vector<8x128xf32>
    %317 = arith.negf %316 : vector<8x128xf32>
    %318 = math.exp %317 : vector<8x128xf32>
    %cst_79 = arith.constant 1.000000e+00 : f32
    %319 = vector.broadcast %cst_79 : f32 to vector<8x128xf32>
    %320 = arith.addf %319, %318 : vector<8x128xf32>
    %321 = arith.divf %319, %320 : vector<8x128xf32>
    %322 = vector.extract_strided_slice %312 {offsets = [0, 128], sizes = [8, 128], strides = [1, 1]} : vector<8x384xf32> to vector<8x128xf32>
    %323 = vector.extract_strided_slice %313 {offsets = [0, 128], sizes = [8, 128], strides = [1, 1]} : vector<8x384xf32> to vector<8x128xf32>
    %324 = arith.addf %322, %323 : vector<8x128xf32>
    %325 = arith.negf %324 : vector<8x128xf32>
    %326 = math.exp %325 : vector<8x128xf32>
    %cst_80 = arith.constant 1.000000e+00 : f32
    %327 = vector.broadcast %cst_80 : f32 to vector<8x128xf32>
    %328 = arith.addf %327, %326 : vector<8x128xf32>
    %329 = arith.divf %327, %328 : vector<8x128xf32>
    %330 = vector.extract_strided_slice %312 {offsets = [0, 256], sizes = [8, 128], strides = [1, 1]} : vector<8x384xf32> to vector<8x128xf32>
    %331 = vector.extract_strided_slice %313 {offsets = [0, 256], sizes = [8, 128], strides = [1, 1]} : vector<8x384xf32> to vector<8x128xf32>
    %332 = arith.addf %331, %20 : vector<8x128xf32>
    %333 = arith.mulf %321, %332 : vector<8x128xf32>
    %334 = arith.addf %330, %333 : vector<8x128xf32>
    %335 = math.tanh %334 : vector<8x128xf32>
    %cst_81 = arith.constant 1.000000e+00 : f32
    %336 = vector.broadcast %cst_81 : f32 to vector<8x128xf32>
    %337 = arith.subf %336, %329 : vector<8x128xf32>
    %338 = arith.mulf %337, %335 : vector<8x128xf32>
    %339 = arith.mulf %329, %276 : vector<8x128xf32>
    %340 = arith.addf %338, %339 : vector<8x128xf32>
    %341 = arith.index_cast %280 : i32 to index
    %c0_82 = arith.constant 0 : index
    %342 = vector.load %arg17[%341, %c0_82] : memref<64x128xf32, #tpu.memory_space<vmem>>, vector<8x128xf32>
    tpu.vector_store %arg17[%341, %c0_82], %340 {strides = array<i32>} : memref<64x128xf32, #tpu.memory_space<vmem>>, vector<8x128xf32>,
    %c5_i32 = arith.constant 5 : i32
    %c8_i32_83 = arith.constant 8 : i32
    %343 = arith.muli %c5_i32, %c8_i32_83 : i32
    %344 = tpu.assume_multiple %343, 8 : i32
    %345 = arith.index_cast %344 : i32 to index
    %c0_84 = arith.constant 0 : index
    %346 = vector.load %arg16[%345, %c0_84] : memref<64x384xf32, #tpu.memory_space<vmem>>, vector<8x384xf32>
    %cst_85 = arith.constant dense<0.000000e+00> : vector<8x384xf32>
    %347 = tpu.matmul %310, %7, %cst_85 {dimension_numbers = #tpu.dot_dimension_numbers<[1], [0], [0], [1], [0, 0, 1, 1], [], []>} : vector<8x128xf32>, vector<128x384xf32>, vector<8x384xf32> -> vector<8x384xf32>
    %348 = vector.extract_strided_slice %346 {offsets = [0, 0], sizes = [8, 128], strides = [1, 1]} : vector<8x384xf32> to vector<8x128xf32>
    %349 = vector.extract_strided_slice %347 {offsets = [0, 0], sizes = [8, 128], strides = [1, 1]} : vector<8x384xf32> to vector<8x128xf32>
    %350 = arith.addf %348, %349 : vector<8x128xf32>
    %351 = arith.negf %350 : vector<8x128xf32>
    %352 = math.exp %351 : vector<8x128xf32>
    %cst_86 = arith.constant 1.000000e+00 : f32
    %353 = vector.broadcast %cst_86 : f32 to vector<8x128xf32>
    %354 = arith.addf %353, %352 : vector<8x128xf32>
    %355 = arith.divf %353, %354 : vector<8x128xf32>
    %356 = vector.extract_strided_slice %346 {offsets = [0, 128], sizes = [8, 128], strides = [1, 1]} : vector<8x384xf32> to vector<8x128xf32>
    %357 = vector.extract_strided_slice %347 {offsets = [0, 128], sizes = [8, 128], strides = [1, 1]} : vector<8x384xf32> to vector<8x128xf32>
    %358 = arith.addf %356, %357 : vector<8x128xf32>
    %359 = arith.negf %358 : vector<8x128xf32>
    %360 = math.exp %359 : vector<8x128xf32>
    %cst_87 = arith.constant 1.000000e+00 : f32
    %361 = vector.broadcast %cst_87 : f32 to vector<8x128xf32>
    %362 = arith.addf %361, %360 : vector<8x128xf32>
    %363 = arith.divf %361, %362 : vector<8x128xf32>
    %364 = vector.extract_strided_slice %346 {offsets = [0, 256], sizes = [8, 128], strides = [1, 1]} : vector<8x384xf32> to vector<8x128xf32>
    %365 = vector.extract_strided_slice %347 {offsets = [0, 256], sizes = [8, 128], strides = [1, 1]} : vector<8x384xf32> to vector<8x128xf32>
    %366 = arith.addf %365, %10 : vector<8x128xf32>
    %367 = arith.mulf %355, %366 : vector<8x128xf32>
    %368 = arith.addf %364, %367 : vector<8x128xf32>
    %369 = math.tanh %368 : vector<8x128xf32>
    %cst_88 = arith.constant 1.000000e+00 : f32
    %370 = vector.broadcast %cst_88 : f32 to vector<8x128xf32>
    %371 = arith.subf %370, %363 : vector<8x128xf32>
    %372 = arith.mulf %371, %369 : vector<8x128xf32>
    %373 = arith.mulf %363, %310 : vector<8x128xf32>
    %374 = arith.addf %372, %373 : vector<8x128xf32>
    %cst_89 = arith.constant dense<0.000000e+00> : vector<8x384xf32>
    %375 = tpu.matmul %374, %14, %cst_89 {dimension_numbers = #tpu.dot_dimension_numbers<[1], [0], [0], [1], [0, 0, 1, 1], [], []>} : vector<8x128xf32>, vector<128x384xf32>, vector<8x384xf32> -> vector<8x384xf32>
    %376 = arith.addf %375, %17 : vector<8x384xf32>
    %cst_90 = arith.constant dense<0.000000e+00> : vector<8x384xf32>
    %377 = tpu.matmul %340, %13, %cst_90 {dimension_numbers = #tpu.dot_dimension_numbers<[1], [0], [0], [1], [0, 0, 1, 1], [], []>} : vector<8x128xf32>, vector<128x384xf32>, vector<8x384xf32> -> vector<8x384xf32>
    %378 = vector.extract_strided_slice %376 {offsets = [0, 0], sizes = [8, 128], strides = [1, 1]} : vector<8x384xf32> to vector<8x128xf32>
    %379 = vector.extract_strided_slice %377 {offsets = [0, 0], sizes = [8, 128], strides = [1, 1]} : vector<8x384xf32> to vector<8x128xf32>
    %380 = arith.addf %378, %379 : vector<8x128xf32>
    %381 = arith.negf %380 : vector<8x128xf32>
    %382 = math.exp %381 : vector<8x128xf32>
    %cst_91 = arith.constant 1.000000e+00 : f32
    %383 = vector.broadcast %cst_91 : f32 to vector<8x128xf32>
    %384 = arith.addf %383, %382 : vector<8x128xf32>
    %385 = arith.divf %383, %384 : vector<8x128xf32>
    %386 = vector.extract_strided_slice %376 {offsets = [0, 128], sizes = [8, 128], strides = [1, 1]} : vector<8x384xf32> to vector<8x128xf32>
    %387 = vector.extract_strided_slice %377 {offsets = [0, 128], sizes = [8, 128], strides = [1, 1]} : vector<8x384xf32> to vector<8x128xf32>
    %388 = arith.addf %386, %387 : vector<8x128xf32>
    %389 = arith.negf %388 : vector<8x128xf32>
    %390 = math.exp %389 : vector<8x128xf32>
    %cst_92 = arith.constant 1.000000e+00 : f32
    %391 = vector.broadcast %cst_92 : f32 to vector<8x128xf32>
    %392 = arith.addf %391, %390 : vector<8x128xf32>
    %393 = arith.divf %391, %392 : vector<8x128xf32>
    %394 = vector.extract_strided_slice %376 {offsets = [0, 256], sizes = [8, 128], strides = [1, 1]} : vector<8x384xf32> to vector<8x128xf32>
    %395 = vector.extract_strided_slice %377 {offsets = [0, 256], sizes = [8, 128], strides = [1, 1]} : vector<8x384xf32> to vector<8x128xf32>
    %396 = arith.addf %395, %20 : vector<8x128xf32>
    %397 = arith.mulf %385, %396 : vector<8x128xf32>
    %398 = arith.addf %394, %397 : vector<8x128xf32>
    %399 = math.tanh %398 : vector<8x128xf32>
    %cst_93 = arith.constant 1.000000e+00 : f32
    %400 = vector.broadcast %cst_93 : f32 to vector<8x128xf32>
    %401 = arith.subf %400, %393 : vector<8x128xf32>
    %402 = arith.mulf %401, %399 : vector<8x128xf32>
    %403 = arith.mulf %393, %340 : vector<8x128xf32>
    %404 = arith.addf %402, %403 : vector<8x128xf32>
    %405 = arith.index_cast %344 : i32 to index
    %c0_94 = arith.constant 0 : index
    %406 = vector.load %arg17[%405, %c0_94] : memref<64x128xf32, #tpu.memory_space<vmem>>, vector<8x128xf32>
    tpu.vector_store %arg17[%405, %c0_94], %404 {strides = array<i32>} : memref<64x128xf32, #tpu.memory_space<vmem>>, vector<8x128xf32>,
    %c6_i32 = arith.constant 6 : i32
    %c8_i32_95 = arith.constant 8 : i32
    %407 = arith.muli %c6_i32, %c8_i32_95 : i32
    %408 = tpu.assume_multiple %407, 8 : i32
    %409 = arith.index_cast %408 : i32 to index
    %c0_96 = arith.constant 0 : index
    %410 = vector.load %arg16[%409, %c0_96] : memref<64x384xf32, #tpu.memory_space<vmem>>, vector<8x384xf32>
    %cst_97 = arith.constant dense<0.000000e+00> : vector<8x384xf32>
    %411 = tpu.matmul %374, %7, %cst_97 {dimension_numbers = #tpu.dot_dimension_numbers<[1], [0], [0], [1], [0, 0, 1, 1], [], []>} : vector<8x128xf32>, vector<128x384xf32>, vector<8x384xf32> -> vector<8x384xf32>
    %412 = vector.extract_strided_slice %410 {offsets = [0, 0], sizes = [8, 128], strides = [1, 1]} : vector<8x384xf32> to vector<8x128xf32>
    %413 = vector.extract_strided_slice %411 {offsets = [0, 0], sizes = [8, 128], strides = [1, 1]} : vector<8x384xf32> to vector<8x128xf32>
    %414 = arith.addf %412, %413 : vector<8x128xf32>
    %415 = arith.negf %414 : vector<8x128xf32>
    %416 = math.exp %415 : vector<8x128xf32>
    %cst_98 = arith.constant 1.000000e+00 : f32
    %417 = vector.broadcast %cst_98 : f32 to vector<8x128xf32>
    %418 = arith.addf %417, %416 : vector<8x128xf32>
    %419 = arith.divf %417, %418 : vector<8x128xf32>
    %420 = vector.extract_strided_slice %410 {offsets = [0, 128], sizes = [8, 128], strides = [1, 1]} : vector<8x384xf32> to vector<8x128xf32>
    %421 = vector.extract_strided_slice %411 {offsets = [0, 128], sizes = [8, 128], strides = [1, 1]} : vector<8x384xf32> to vector<8x128xf32>
    %422 = arith.addf %420, %421 : vector<8x128xf32>
    %423 = arith.negf %422 : vector<8x128xf32>
    %424 = math.exp %423 : vector<8x128xf32>
    %cst_99 = arith.constant 1.000000e+00 : f32
    %425 = vector.broadcast %cst_99 : f32 to vector<8x128xf32>
    %426 = arith.addf %425, %424 : vector<8x128xf32>
    %427 = arith.divf %425, %426 : vector<8x128xf32>
    %428 = vector.extract_strided_slice %410 {offsets = [0, 256], sizes = [8, 128], strides = [1, 1]} : vector<8x384xf32> to vector<8x128xf32>
    %429 = vector.extract_strided_slice %411 {offsets = [0, 256], sizes = [8, 128], strides = [1, 1]} : vector<8x384xf32> to vector<8x128xf32>
    %430 = arith.addf %429, %10 : vector<8x128xf32>
    %431 = arith.mulf %419, %430 : vector<8x128xf32>
    %432 = arith.addf %428, %431 : vector<8x128xf32>
    %433 = math.tanh %432 : vector<8x128xf32>
    %cst_100 = arith.constant 1.000000e+00 : f32
    %434 = vector.broadcast %cst_100 : f32 to vector<8x128xf32>
    %435 = arith.subf %434, %427 : vector<8x128xf32>
    %436 = arith.mulf %435, %433 : vector<8x128xf32>
    %437 = arith.mulf %427, %374 : vector<8x128xf32>
    %438 = arith.addf %436, %437 : vector<8x128xf32>
    %cst_101 = arith.constant dense<0.000000e+00> : vector<8x384xf32>
    %439 = tpu.matmul %438, %14, %cst_101 {dimension_numbers = #tpu.dot_dimension_numbers<[1], [0], [0], [1], [0, 0, 1, 1], [], []>} : vector<8x128xf32>, vector<128x384xf32>, vector<8x384xf32> -> vector<8x384xf32>
    %440 = arith.addf %439, %17 : vector<8x384xf32>
    %cst_102 = arith.constant dense<0.000000e+00> : vector<8x384xf32>
    %441 = tpu.matmul %404, %13, %cst_102 {dimension_numbers = #tpu.dot_dimension_numbers<[1], [0], [0], [1], [0, 0, 1, 1], [], []>} : vector<8x128xf32>, vector<128x384xf32>, vector<8x384xf32> -> vector<8x384xf32>
    %442 = vector.extract_strided_slice %440 {offsets = [0, 0], sizes = [8, 128], strides = [1, 1]} : vector<8x384xf32> to vector<8x128xf32>
    %443 = vector.extract_strided_slice %441 {offsets = [0, 0], sizes = [8, 128], strides = [1, 1]} : vector<8x384xf32> to vector<8x128xf32>
    %444 = arith.addf %442, %443 : vector<8x128xf32>
    %445 = arith.negf %444 : vector<8x128xf32>
    %446 = math.exp %445 : vector<8x128xf32>
    %cst_103 = arith.constant 1.000000e+00 : f32
    %447 = vector.broadcast %cst_103 : f32 to vector<8x128xf32>
    %448 = arith.addf %447, %446 : vector<8x128xf32>
    %449 = arith.divf %447, %448 : vector<8x128xf32>
    %450 = vector.extract_strided_slice %440 {offsets = [0, 128], sizes = [8, 128], strides = [1, 1]} : vector<8x384xf32> to vector<8x128xf32>
    %451 = vector.extract_strided_slice %441 {offsets = [0, 128], sizes = [8, 128], strides = [1, 1]} : vector<8x384xf32> to vector<8x128xf32>
    %452 = arith.addf %450, %451 : vector<8x128xf32>
    %453 = arith.negf %452 : vector<8x128xf32>
    %454 = math.exp %453 : vector<8x128xf32>
    %cst_104 = arith.constant 1.000000e+00 : f32
    %455 = vector.broadcast %cst_104 : f32 to vector<8x128xf32>
    %456 = arith.addf %455, %454 : vector<8x128xf32>
    %457 = arith.divf %455, %456 : vector<8x128xf32>
    %458 = vector.extract_strided_slice %440 {offsets = [0, 256], sizes = [8, 128], strides = [1, 1]} : vector<8x384xf32> to vector<8x128xf32>
    %459 = vector.extract_strided_slice %441 {offsets = [0, 256], sizes = [8, 128], strides = [1, 1]} : vector<8x384xf32> to vector<8x128xf32>
    %460 = arith.addf %459, %20 : vector<8x128xf32>
    %461 = arith.mulf %449, %460 : vector<8x128xf32>
    %462 = arith.addf %458, %461 : vector<8x128xf32>
    %463 = math.tanh %462 : vector<8x128xf32>
    %cst_105 = arith.constant 1.000000e+00 : f32
    %464 = vector.broadcast %cst_105 : f32 to vector<8x128xf32>
    %465 = arith.subf %464, %457 : vector<8x128xf32>
    %466 = arith.mulf %465, %463 : vector<8x128xf32>
    %467 = arith.mulf %457, %404 : vector<8x128xf32>
    %468 = arith.addf %466, %467 : vector<8x128xf32>
    %469 = arith.index_cast %408 : i32 to index
    %c0_106 = arith.constant 0 : index
    %470 = vector.load %arg17[%469, %c0_106] : memref<64x128xf32, #tpu.memory_space<vmem>>, vector<8x128xf32>
    tpu.vector_store %arg17[%469, %c0_106], %468 {strides = array<i32>} : memref<64x128xf32, #tpu.memory_space<vmem>>, vector<8x128xf32>,
    %c7_i32 = arith.constant 7 : i32
    %c8_i32_107 = arith.constant 8 : i32
    %471 = arith.muli %c7_i32, %c8_i32_107 : i32
    %472 = tpu.assume_multiple %471, 8 : i32
    %473 = arith.index_cast %472 : i32 to index
    %c0_108 = arith.constant 0 : index
    %474 = vector.load %arg16[%473, %c0_108] : memref<64x384xf32, #tpu.memory_space<vmem>>, vector<8x384xf32>
    %cst_109 = arith.constant dense<0.000000e+00> : vector<8x384xf32>
    %475 = tpu.matmul %438, %7, %cst_109 {dimension_numbers = #tpu.dot_dimension_numbers<[1], [0], [0], [1], [0, 0, 1, 1], [], []>} : vector<8x128xf32>, vector<128x384xf32>, vector<8x384xf32> -> vector<8x384xf32>
    %476 = vector.extract_strided_slice %474 {offsets = [0, 0], sizes = [8, 128], strides = [1, 1]} : vector<8x384xf32> to vector<8x128xf32>
    %477 = vector.extract_strided_slice %475 {offsets = [0, 0], sizes = [8, 128], strides = [1, 1]} : vector<8x384xf32> to vector<8x128xf32>
    %478 = arith.addf %476, %477 : vector<8x128xf32>
    %479 = arith.negf %478 : vector<8x128xf32>
    %480 = math.exp %479 : vector<8x128xf32>
    %cst_110 = arith.constant 1.000000e+00 : f32
    %481 = vector.broadcast %cst_110 : f32 to vector<8x128xf32>
    %482 = arith.addf %481, %480 : vector<8x128xf32>
    %483 = arith.divf %481, %482 : vector<8x128xf32>
    %484 = vector.extract_strided_slice %474 {offsets = [0, 128], sizes = [8, 128], strides = [1, 1]} : vector<8x384xf32> to vector<8x128xf32>
    %485 = vector.extract_strided_slice %475 {offsets = [0, 128], sizes = [8, 128], strides = [1, 1]} : vector<8x384xf32> to vector<8x128xf32>
    %486 = arith.addf %484, %485 : vector<8x128xf32>
    %487 = arith.negf %486 : vector<8x128xf32>
    %488 = math.exp %487 : vector<8x128xf32>
    %cst_111 = arith.constant 1.000000e+00 : f32
    %489 = vector.broadcast %cst_111 : f32 to vector<8x128xf32>
    %490 = arith.addf %489, %488 : vector<8x128xf32>
    %491 = arith.divf %489, %490 : vector<8x128xf32>
    %492 = vector.extract_strided_slice %474 {offsets = [0, 256], sizes = [8, 128], strides = [1, 1]} : vector<8x384xf32> to vector<8x128xf32>
    %493 = vector.extract_strided_slice %475 {offsets = [0, 256], sizes = [8, 128], strides = [1, 1]} : vector<8x384xf32> to vector<8x128xf32>
    %494 = arith.addf %493, %10 : vector<8x128xf32>
    %495 = arith.mulf %483, %494 : vector<8x128xf32>
    %496 = arith.addf %492, %495 : vector<8x128xf32>
    %497 = math.tanh %496 : vector<8x128xf32>
    %cst_112 = arith.constant 1.000000e+00 : f32
    %498 = vector.broadcast %cst_112 : f32 to vector<8x128xf32>
    %499 = arith.subf %498, %491 : vector<8x128xf32>
    %500 = arith.mulf %499, %497 : vector<8x128xf32>
    %501 = arith.mulf %491, %438 : vector<8x128xf32>
    %502 = arith.addf %500, %501 : vector<8x128xf32>
    %cst_113 = arith.constant dense<0.000000e+00> : vector<8x384xf32>
    %503 = tpu.matmul %502, %14, %cst_113 {dimension_numbers = #tpu.dot_dimension_numbers<[1], [0], [0], [1], [0, 0, 1, 1], [], []>} : vector<8x128xf32>, vector<128x384xf32>, vector<8x384xf32> -> vector<8x384xf32>
    %504 = arith.addf %503, %17 : vector<8x384xf32>
    %cst_114 = arith.constant dense<0.000000e+00> : vector<8x384xf32>
    %505 = tpu.matmul %468, %13, %cst_114 {dimension_numbers = #tpu.dot_dimension_numbers<[1], [0], [0], [1], [0, 0, 1, 1], [], []>} : vector<8x128xf32>, vector<128x384xf32>, vector<8x384xf32> -> vector<8x384xf32>
    %506 = vector.extract_strided_slice %504 {offsets = [0, 0], sizes = [8, 128], strides = [1, 1]} : vector<8x384xf32> to vector<8x128xf32>
    %507 = vector.extract_strided_slice %505 {offsets = [0, 0], sizes = [8, 128], strides = [1, 1]} : vector<8x384xf32> to vector<8x128xf32>
    %508 = arith.addf %506, %507 : vector<8x128xf32>
    %509 = arith.negf %508 : vector<8x128xf32>
    %510 = math.exp %509 : vector<8x128xf32>
    %cst_115 = arith.constant 1.000000e+00 : f32
    %511 = vector.broadcast %cst_115 : f32 to vector<8x128xf32>
    %512 = arith.addf %511, %510 : vector<8x128xf32>
    %513 = arith.divf %511, %512 : vector<8x128xf32>
    %514 = vector.extract_strided_slice %504 {offsets = [0, 128], sizes = [8, 128], strides = [1, 1]} : vector<8x384xf32> to vector<8x128xf32>
    %515 = vector.extract_strided_slice %505 {offsets = [0, 128], sizes = [8, 128], strides = [1, 1]} : vector<8x384xf32> to vector<8x128xf32>
    %516 = arith.addf %514, %515 : vector<8x128xf32>
    %517 = arith.negf %516 : vector<8x128xf32>
    %518 = math.exp %517 : vector<8x128xf32>
    %cst_116 = arith.constant 1.000000e+00 : f32
    %519 = vector.broadcast %cst_116 : f32 to vector<8x128xf32>
    %520 = arith.addf %519, %518 : vector<8x128xf32>
    %521 = arith.divf %519, %520 : vector<8x128xf32>
    %522 = vector.extract_strided_slice %504 {offsets = [0, 256], sizes = [8, 128], strides = [1, 1]} : vector<8x384xf32> to vector<8x128xf32>
    %523 = vector.extract_strided_slice %505 {offsets = [0, 256], sizes = [8, 128], strides = [1, 1]} : vector<8x384xf32> to vector<8x128xf32>
    %524 = arith.addf %523, %20 : vector<8x128xf32>
    %525 = arith.mulf %513, %524 : vector<8x128xf32>
    %526 = arith.addf %522, %525 : vector<8x128xf32>
    %527 = math.tanh %526 : vector<8x128xf32>
    %cst_117 = arith.constant 1.000000e+00 : f32
    %528 = vector.broadcast %cst_117 : f32 to vector<8x128xf32>
    %529 = arith.subf %528, %521 : vector<8x128xf32>
    %530 = arith.mulf %529, %527 : vector<8x128xf32>
    %531 = arith.mulf %521, %468 : vector<8x128xf32>
    %532 = arith.addf %530, %531 : vector<8x128xf32>
    %533 = arith.index_cast %472 : i32 to index
    %c0_118 = arith.constant 0 : index
    %534 = vector.load %arg17[%533, %c0_118] : memref<64x128xf32, #tpu.memory_space<vmem>>, vector<8x128xf32>
    tpu.vector_store %arg17[%533, %c0_118], %532 {strides = array<i32>} : memref<64x128xf32, #tpu.memory_space<vmem>>, vector<8x128xf32>,
    %c8_i32_119 = arith.constant 8 : i32
    %c0_120 = arith.constant 0 : index
    %c0_121 = arith.constant 0 : index
    %c0_122 = arith.constant 0 : index
    %535 = vector.load %arg15[%c0_120, %c0_121, %c0_122] : memref<2x8x128xf32, #tpu.memory_space<vmem>>, vector<1x8x128xf32>
    %536 = vector.shape_cast %535 : vector<1x8x128xf32> to vector<8x128xf32>
    %537 = vector.shape_cast %502 : vector<8x128xf32> to vector<1x8x128xf32>
    tpu.vector_store %arg15[%c0_120, %c0_121, %c0_122], %537 {strides = array<i32>} : memref<2x8x128xf32, #tpu.memory_space<vmem>>, vector<1x8x128xf32>,
    %c1_123 = arith.constant 1 : index
    %c0_124 = arith.constant 0 : index
    %c0_125 = arith.constant 0 : index
    %538 = vector.load %arg15[%c1_123, %c0_124, %c0_125] : memref<2x8x128xf32, #tpu.memory_space<vmem>>, vector<1x8x128xf32>
    %539 = vector.shape_cast %538 : vector<1x8x128xf32> to vector<8x128xf32>
    %540 = vector.shape_cast %532 : vector<8x128xf32> to vector<1x8x128xf32>
    tpu.vector_store %arg15[%c1_123, %c0_124, %c0_125], %540 {strides = array<i32>} : memref<2x8x128xf32, #tpu.memory_space<vmem>>, vector<1x8x128xf32>,
    %c0_126 = arith.constant 0 : index
    %c0_127 = arith.constant 0 : index
    %541 = vector.load %arg17[%c0_126, %c0_127] : memref<64x128xf32, #tpu.memory_space<vmem>>, vector<64x128xf32>
    %c0_128 = arith.constant 0 : index
    %c0_129 = arith.constant 0 : index
    %542 = vector.load %arg10[%c0_128, %c0_129] : memref<128x128xf32, #tpu.memory_space<vmem>>, vector<128x128xf32>
    %cst_130 = arith.constant dense<0.000000e+00> : vector<64x128xf32>
    %543 = tpu.matmul %541, %542, %cst_130 {dimension_numbers = #tpu.dot_dimension_numbers<[1], [0], [0], [1], [0, 0, 1, 1], [], []>} : vector<64x128xf32>, vector<128x128xf32>, vector<64x128xf32> -> vector<64x128xf32>
    %c0_131 = arith.constant 0 : index
    %c0_132 = arith.constant 0 : index
    %544 = vector.load %arg11[%c0_131, %c0_132] : memref<1x128xf32, #tpu.memory_space<vmem>>, vector<1x128xf32>
    %545 = vector.broadcast %544 : vector<1x128xf32> to vector<64x128xf32>
    %546 = arith.addf %543, %545 : vector<64x128xf32>
    %cst_133 = arith.constant 0.000000e+00 : f32
    %547 = vector.broadcast %cst_133 : f32 to vector<64x128xf32>
    %548 = arith.cmpf oge, %546, %547 : vector<64x128xf32>
    %cst_134 = arith.constant 0.00999999977 : f32
    %549 = vector.broadcast %cst_134 : f32 to vector<64x128xf32>
    %550 = arith.mulf %549, %546 : vector<64x128xf32>
    %551 = arith.select %548, %546, %550 : vector<64x128xi1>, vector<64x128xf32>
    %c0_135 = arith.constant 0 : index
    %c0_136 = arith.constant 0 : index
    %552 = vector.load %arg12[%c0_135, %c0_136] : memref<128x128xf32, #tpu.memory_space<vmem>>, vector<128x128xf32>
    %cst_137 = arith.constant dense<0.000000e+00> : vector<64x128xf32>
    %553 = tpu.matmul %551, %552, %cst_137 {dimension_numbers = #tpu.dot_dimension_numbers<[1], [0], [0], [1], [0, 0, 1, 1], [], []>} : vector<64x128xf32>, vector<128x128xf32>, vector<64x128xf32> -> vector<64x128xf32>
    %c0_138 = arith.constant 0 : index
    %c0_139 = arith.constant 0 : index
    %554 = vector.load %arg13[%c0_138, %c0_139] : memref<1x128xf32, #tpu.memory_space<vmem>>, vector<1x128xf32>
    %555 = vector.broadcast %554 : vector<1x128xf32> to vector<64x128xf32>
    %556 = arith.addf %553, %555 : vector<64x128xf32>
    %c0_140 = arith.constant 0 : index
    %c0_141 = arith.constant 0 : index
    %557 = vector.load %arg14[%c0_140, %c0_141] : memref<64x128xf32, #tpu.memory_space<vmem>>, vector<64x128xf32>
    tpu.vector_store %arg14[%c0_140, %c0_141], %556 {strides = array<i32>} : memref<64x128xf32, #tpu.memory_space<vmem>>, vector<64x128xf32>,
    return
  }
}

</mosaic_0001>

<bundles_post_ra>
// kernel: _lambda_.1
= control target key start
LH: loop header
LB: loop body
LE: loop exit
PB: predicated region body
PF: predicated region fallthrough
CT: control target
= control target key end

     0   :  { %21 = vsyncpa [#allocation5], 0  ;;  %s11975_s0 = inlined_call_operand.vmem [shape: f32[64,128], index: 0, kind: input, shape index: {}]   ;;  %s11976_s1 = inlined_call_operand.vmem [shape: f32[2,8,128], index: 1, kind: input, shape index: {}]   ;;  %s11977_s2 = inlined_call_operand.vmem [shape: f32[128,384], index: 2, kind: input, shape index: {}]   ;;  %s11978_s3 = inlined_call_operand.vmem [shape: f32[128,384], index: 3, kind: input, shape index: {}]   ;;  %s11979_s4 = inlined_call_operand.vmem [shape: f32[1,384], index: 4, kind: input, shape index: {}]   ;;  %s11980_s5 = inlined_call_operand.vmem [shape: f32[1,128], index: 5, kind: input, shape index: {}]   ;;  %s11981_s6 = inlined_call_operand.vmem [shape: f32[128,384], index: 6, kind: input, shape index: {}]   ;;  %s11982_s7 = inlined_call_operand.vmem [shape: f32[128,384], index: 7, kind: input, shape index: {}]   ;;  %s11983_s8 = inlined_call_operand.vmem [shape: f32[1,384], index: 8, kind: input, shape index: {}]   ;;  %s11984_s9 = inlined_call_operand.vmem [shape: f32[1,128], index: 9, kind: input, shape index: {}]   ;;  %s11985_s10 = inlined_call_operand.hbm [shape: f32[128,128], index: 10, kind: input, shape index: {}]   ;;  %s11986_s11 = inlined_call_operand.vmem [shape: f32[1,128], index: 11, kind: input, shape index: {}]   ;;  %s11987_s12 = inlined_call_operand.hbm [shape: f32[128,128], index: 12, kind: input, shape index: {}]   ;;  %s11988_s13 = inlined_call_operand.vmem [shape: f32[1,128], index: 13, kind: input, shape index: {}]   ;;  %s11989_s14 = inlined_call_operand.vmem [shape: f32[64,128], index: 14, kind: output, shape index: {0}]   ;;  %s11990_s15 = inlined_call_operand.hbm [shape: f32[2,8,128], index: 15, kind: output, shape index: {1}]  }
   0x1   :  { %22 = vsyncpa [#allocation8], 0 }
   0x2   :  { %23 = vsyncpa [#allocation6], 0  ;;  %s6858_s18 = smov [#allocation4]  }
   0x3   :  { %s49_s19 = sshll.u32 %s6858_s18, 4  ;;  %s50_s19 = int_to_ptr.vmem [resolvable:$true] %s49_s19 }
   0x4   :  { %s6800_s20 = scalar_lea.vmem %s50_s19, 2048  ;;  %p6805_p1 = scmp.lt.s32.totalorder %s50_s19, %s50_s19 }
   0x5   :  { %p6801_p0 = scmp.ne.s32.totalorder %s50_s19, %s6800_s20  ;;  %p6806_p2 = scmp.lt.s32.totalorder %s6800_s20, %s6800_s20 }
   0x7   :  { %p6807_p3 = por %p6806_p2, %p6805_p1 }
   0x9   :  { %p6808_p4 = pnand %p6807_p3, %p6801_p0 }
   0xb   :  { %6811 = shalt.err (!%p6808_p4)
}
   0xc   :  { %s6859_s21 = smov 128   ;;  %s6860_s22 = smov 8  }
   0xd   :  { %55 = dma.hbm_to_vmem [thread:$0]  %s11985_s10, 2048, %s50_s19, [#allocation5], %s6859_s21, %s6859_s21, %s6860_s22  }
   0xe   :  { %s6861_s25 = smov [#allocation7]  }
   0xf   :  { %s63_s26 = sshll.u32 %s6861_s25, 4  ;;  %s64_s26 = int_to_ptr.vmem [resolvable:$true] %s63_s26 }
  0x10   :  { %s6820_s27 = scalar_lea.vmem %s64_s26, 2048  ;;  %p6825_p6 = scmp.lt.s32.totalorder %s64_s26, %s64_s26 }
  0x11   :  { %p6821_p5 = scmp.ne.s32.totalorder %s64_s26, %s6820_s27  ;;  %p6826_p7 = scmp.lt.s32.totalorder %s6820_s27, %s6820_s27 }
  0x13   :  { %p6827_p8 = por %p6826_p7, %p6825_p6 }
  0x15   :  { %p6828_p9 = pnand %p6827_p8, %p6821_p5 }
  0x17   :  { %6831 = shalt.err (!%p6828_p9)
}
  0x18   :  { %69 = dma.hbm_to_vmem [thread:$0]  %s11987_s12, 2048, %s64_s26, [#allocation8], %s6859_s21, %s6859_s21, %s6860_s22  }
  0x19   :  { %6852 = dma.done.wait [#allocation5], 2048  }
  0x1a   :  { %6853 = vsyncadd [#allocation5], 4294965248 }
  0x1b   :  { %6854 = dma.done.wait [#allocation8], 2048  }
  0x1c   :  { %6855 = vsyncadd [#allocation8], 4294965248  ;;  %v12002_v0 = vmov 0.0   ;;  %v132_v1 = vld [vmem:[%s11977_s2 + $0x170] sm:$0xff]  ;;  %v131_v2 = vld [vmem:[%s11977_s2 + $0x168] sm:$0xff]  ;;  %vm6863_vm0 = vmmov 0  }
  0x1d   :  { %215 = vmatprep.mubr.f32.mxu0 %v12002_v0  ;;  %v129_v3 = vld [vmem:[%s11977_s2 + $0x158] sm:$0xff]  ;;  %151 = vmatprep.subr.mxu0 %v132_v1  ;;  %v128_v4 = vld [vmem:[%s11977_s2 + $0x150] sm:$0xff]  ;;  %v126_v5 = vld [vmem:[%s11977_s2 + $0x140] sm:$0xff] }
  0x1e   :  { %152 = vmatpush1.msra.mxu0 %v131_v2  ;;  %v125_v6 = vld [vmem:[%s11977_s2 + $0x138] sm:$0xff]  ;;  %v123_v7 = vld [vmem:[%s11977_s2 + $0x128] sm:$0xff]  ;;  %v122_v8 = vld [vmem:[%s11977_s2 + $0x120] sm:$0xff] }
  0x1f   :  { %153 = vmatprep.subr.mxu0 %v129_v3  ;;  %v120_v9 = vld [vmem:[%s11977_s2 + $0x110] sm:$0xff]  ;;  %v119_v10 = vld [vmem:[%s11977_s2 + $0x108] sm:$0xff]  ;;  %v117_v11 = vld [vmem:[%s11977_s2 + $0xf8] sm:$0xff] }
  0x20   :  { %154 = vmatpush1.msra.mxu0 %v128_v4  ;;  %v116_v12 = vld [vmem:[%s11977_s2 + $0xf0] sm:$0xff]  ;;  %v114_v13 = vld [vmem:[%s11977_s2 + $0xe0] sm:$0xff]  ;;  %v133_v14 = vld [vmem:[%s11977_s2 + $0x178] sm:$0xff] }
  0x21   :  { %155 = vmatprep.subr.mxu0 %v126_v5  ;;  %v113_v15 = vld [vmem:[%s11977_s2 + $0xd8] sm:$0xff]  ;;  %5215 = vmatprep.subr.mxu1 %v133_v14  ;;  %v130_v16 = vld [vmem:[%s11977_s2 + $0x160] sm:$0xff]  ;;  %v111_v17 = vld [vmem:[%s11977_s2 + $0xc8] sm:$0xff] }
  0x22   :  { %156 = vmatpush1.msra.mxu0 %v125_v6  ;;  %5216 = vmatpush3.msra.mxu1 %v133_v14  ;;  %v127_v18 = vld [vmem:[%s11977_s2 + $0x148] sm:$0xff]  ;;  %v110_v19 = vld [vmem:[%s11977_s2 + $0xc0] sm:$0xff]  ;;  %v108_v20 = vld [vmem:[%s11977_s2 + $0xb0] sm:$0xff] }
  0x23   :  { %157 = vmatprep.subr.mxu0 %v123_v7  ;;  %5217 = vmatprep.subr.mxu1 %v130_v16  ;;  %v124_v21 = vld [vmem:[%s11977_s2 + $0x130] sm:$0xff]  ;;  %v107_v22 = vld [vmem:[%s11977_s2 + $0xa8] sm:$0xff]  ;;  %v105_v23 = vld [vmem:[%s11977_s2 + $0x98] sm:$0xff] }
  0x24   :  { %158 = vmatpush1.msra.mxu0 %v122_v8  ;;  %5218 = vmatpush3.msra.mxu1 %v130_v16  ;;  %v121_v24 = vld [vmem:[%s11977_s2 + $0x118] sm:$0xff]  ;;  %v104_v25 = vld [vmem:[%s11977_s2 + $0x90] sm:$0xff]  ;;  %v102_v26 = vld [vmem:[%s11977_s2 + $0x80] sm:$0xff] }
  0x25   :  { %159 = vmatprep.subr.mxu0 %v120_v9  ;;  %5219 = vmatprep.subr.mxu1 %v127_v18  ;;  %v118_v27 = vld [vmem:[%s11977_s2 + $0x100] sm:$0xff]  ;;  %v101_v28 = vld [vmem:[%s11977_s2 + $0x78] sm:$0xff]  ;;  %v99_v29 = vld [vmem:[%s11977_s2 + $0x68] sm:$0xff] }
  0x26   :  { %160 = vmatpush1.msra.mxu0 %v119_v10  ;;  %5220 = vmatpush3.msra.mxu1 %v127_v18  ;;  %v115_v30 = vld [vmem:[%s11977_s2 + $0xe8] sm:$0xff]  ;;  %v98_v31 = vld [vmem:[%s11977_s2 + $0x60] sm:$0xff]  ;;  %v96_v32 = vld [vmem:[%s11977_s2 + $0x50] sm:$0xff] }
  0x27   :  { %161 = vmatprep.subr.mxu0 %v117_v11  ;;  %5221 = vmatprep.subr.mxu1 %v124_v21  ;;  %v112_v33 = vld [vmem:[%s11977_s2 + $0xd0] sm:$0xff]  ;;  %v95_v34 = vld [vmem:[%s11977_s2 + $0x48] sm:$0xff]  ;;  %v93_v35 = vld [vmem:[%s11977_s2 + $0x38] sm:$0xff] }
  0x28   :  { %162 = vmatpush1.msra.mxu0 %v116_v12  ;;  %5222 = vmatpush3.msra.mxu1 %v124_v21  ;;  %v109_v36 = vld [vmem:[%s11977_s2 + $0xb8] sm:$0xff]  ;;  %v92_v37 = vld [vmem:[%s11977_s2 + $0x30] sm:$0xff]  ;;  %v90_v38 = vld [vmem:[%s11977_s2 + $0x20] sm:$0xff] }
  0x29   :  { %163 = vmatprep.subr.mxu0 %v114_v13  ;;  %5223 = vmatprep.subr.mxu1 %v121_v24  ;;  %v106_v39 = vld [vmem:[%s11977_s2 + $0xa0] sm:$0xff]  ;;  %v89_v40 = vld [vmem:[%s11977_s2 + $0x18] sm:$0xff]  ;;  %v87_v41 = vld [vmem:[%s11977_s2 + $0x8] sm:$0xff] }
  0x2a   :  { %164 = vmatpush1.msra.mxu0 %v113_v15  ;;  %5224 = vmatpush3.msra.mxu1 %v121_v24  ;;  %v103_v42 = vld [vmem:[%s11977_s2 + $0x88] sm:$0xff]  ;;  %v86_v43 = vld [vmem:[%s11977_s2] sm:$0xff]  ;;  %v7095_v45 = vld [vmem:[%s11978_s3 + $0x170] sm:$0xff] }
  0x2b   :  { %165 = vmatprep.subr.mxu0 %v111_v17  ;;  %5225 = vmatprep.subr.mxu1 %v118_v27  ;;  %v7090_v44 = vld [vmem:[%s11975_s0] sm:$0xff]  ;;  %v7100_v46 = vld [vmem:[%s11978_s3 + $0x168] sm:$0xff]  ;;  %v7105_v47 = vld [vmem:[%s11978_s3 + $0x158] sm:$0xff] }
  0x2c   :  { %166 = vmatpush1.msra.mxu0 %v110_v19  ;;  %5226 = vmatpush3.msra.mxu1 %v118_v27  ;;  %v100_v48 = vld [vmem:[%s11977_s2 + $0x70] sm:$0xff]  ;;  %v7122_v50 = vld [vmem:[%s11975_s0 + $0x8] sm:$0xff]  ;;  %v7127_v51 = vld [vmem:[%s11978_s3 + $0x140] sm:$0xff] }
  0x2d   :  { %167 = vmatprep.subr.mxu0 %v108_v20  ;;  %5227 = vmatprep.subr.mxu1 %v115_v30  ;;  %v7115_v49 = vld [vmem:[%s11978_s3 + $0x150] sm:$0xff]  ;;  %v7133_v52 = vld [vmem:[%s11978_s3 + $0x138] sm:$0xff]  ;;  %v7139_v53 = vld [vmem:[%s11978_s3 + $0x128] sm:$0xff] }
  0x2e   :  { %168 = vmatpush1.msra.mxu0 %v107_v22  ;;  %5228 = vmatpush3.msra.mxu1 %v115_v30  ;;  %v97_v54 = vld [vmem:[%s11977_s2 + $0x58] sm:$0xff]  ;;  %v7149_v55 = vld [vmem:[%s11978_s3 + $0x120] sm:$0xff]  ;;  %v7156_v56 = vld [vmem:[%s11975_s0 + $0x10] sm:$0xff] }
  0x2f   :  { %169 = vmatprep.subr.mxu0 %v105_v23  ;;  %5229 = vmatprep.subr.mxu1 %v112_v33  ;;  %v7161_v57 = vld [vmem:[%s11978_s3 + $0x110] sm:$0xff]  ;;  %v7167_v58 = vld [vmem:[%s11978_s3 + $0x108] sm:$0xff]  ;;  %v7173_v59 = vld [vmem:[%s11978_s3 + $0xf8] sm:$0xff] }
  0x30   :  { %170 = vmatpush1.msra.mxu0 %v104_v25  ;;  %5230 = vmatpush3.msra.mxu1 %v112_v33  ;;  %v94_v60 = vld [vmem:[%s11977_s2 + $0x40] sm:$0xff]  ;;  %v7183_v61 = vld [vmem:[%s11978_s3 + $0xf0] sm:$0xff]  ;;  %v7190_v62 = vld [vmem:[%s11975_s0 + $0x18] sm:$0xff] }
  0x31   :  { %171 = vmatprep.subr.mxu0 %v102_v26  ;;  %5231 = vmatprep.subr.mxu1 %v109_v36  ;;  %v7195_v63 = vld [vmem:[%s11978_s3 + $0xe0] sm:$0xff]  ;;  %v7201_v1 = vld [vmem:[%s11978_s3 + $0xd8] sm:$0xff]  ;;  %v7207_v2 = vld [vmem:[%s11978_s3 + $0xc8] sm:$0xff] }
  0x32   :  { %172 = vmatpush1.msra.mxu0 %v101_v28  ;;  %5232 = vmatpush3.msra.mxu1 %v109_v36  ;;  %v91_v3 = vld [vmem:[%s11977_s2 + $0x28] sm:$0xff]  ;;  %v7217_v4 = vld [vmem:[%s11978_s3 + $0xc0] sm:$0xff]  ;;  %v7229_v6 = vld [vmem:[%s11978_s3 + $0xb0] sm:$0xff] }
  0x33   :  { %173 = vmatprep.subr.mxu0 %v99_v29  ;;  %5233 = vmatprep.subr.mxu1 %v106_v39  ;;  %v7224_v5 = vld [vmem:[%s11975_s0 + $0x20] sm:$0xff]  ;;  %v7235_v7 = vld [vmem:[%s11978_s3 + $0xa8] sm:$0xff]  ;;  %v7241_v8 = vld [vmem:[%s11978_s3 + $0x98] sm:$0xff] }
  0x34   :  { %174 = vmatpush1.msra.mxu0 %v98_v31  ;;  %5234 = vmatpush3.msra.mxu1 %v106_v39  ;;  %v88_v9 = vld [vmem:[%s11977_s2 + $0x10] sm:$0xff]  ;;  %v83_v11 = vld [vmem:[%s11975_s0 + $0x28] sm:$0xff]  ;;  %v7261_v12 = vld [vmem:[%s11978_s3 + $0x80] sm:$0xff] }
  0x35   :  { %175 = vmatprep.subr.mxu0 %v96_v32  ;;  %5235 = vmatprep.subr.mxu1 %v103_v42  ;;  %v7251_v10 = vld [vmem:[%s11978_s3 + $0x90] sm:$0xff]  ;;  %v7267_v13 = vld [vmem:[%s11978_s3 + $0x78] sm:$0xff]  ;;  %v7273_v14 = vld [vmem:[%s11978_s3 + $0x68] sm:$0xff] }
  0x36   :  { %176 = vmatpush1.msra.mxu0 %v95_v34  ;;  %5236 = vmatpush3.msra.mxu1 %v103_v42  ;;  %v7279_v15 = vld [vmem:[%s11978_s3 + $0x60] sm:$0xff]  ;;  %v84_v16 = vld [vmem:[%s11975_s0 + $0x30] sm:$0xff]  ;;  %v7295_v18 = vld [vmem:[%s11978_s3 + $0x48] sm:$0xff] }
  0x37   :  { %177 = vmatprep.subr.mxu0 %v93_v35  ;;  %5237 = vmatprep.subr.mxu1 %v100_v48  ;;  %v7289_v17 = vld [vmem:[%s11978_s3 + $0x50] sm:$0xff]  ;;  %v7302_v19 = vld [vmem:[%s11978_s3 + $0x38] sm:$0xff]  ;;  %v7324_v23 = vld [vmem:[%s11978_s3 + $0x20] sm:$0xff] }
  0x38   :  { %178 = vmatpush1.msra.mxu0 %v92_v37  ;;  %5238 = vmatpush3.msra.mxu1 %v100_v48  ;;  %v7309_v20 = vld [vmem:[%s11978_s3 + $0x30] sm:$0xff]  ;;  %v7314_v21 = vld [vmem:[%s11978_s3 + $0x178] sm:$0xff]  ;;  %12359 = vst [vmem:[#allocation14_spill] sm:$0xff] %v7324_v23  ;;  %v7337_v25 = vld [vmem:[%s11978_s3 + $0x8] sm:$0xff] }
  0x39   :  { %179 = vmatprep.subr.mxu0 %v90_v38  ;;  %5239 = vmatprep.subr.mxu1 %v97_v54  ;;  %12358 = vst [vmem:[#allocation13_spill] sm:$0xff] %v7309_v20  ;;  %v85_v22 = vld [vmem:[%s11975_s0 + $0x38] sm:$0xff]  ;;  %12361 = vst [vmem:[#allocation16_spill] sm:$0xff] %v7337_v25  ;;  %v7344_v26 = vld [vmem:[%s11978_s3] sm:$0xff] }
  0x3a   :  { %180 = vmatpush1.msra.mxu0 %v89_v40  ;;  %5240 = vmatpush3.msra.mxu1 %v97_v54  ;;  %v7330_v24 = vld [vmem:[%s11978_s3 + $0x18] sm:$0xff]  ;;  %12362 = vst [vmem:[#allocation17_spill] sm:$0xff] %v7344_v26  ;;  %v7349_v27 = vld [vmem:[%s11978_s3 + $0x160] sm:$0xff]  ;;  %v7363_v29 = vld [vmem:[%s11978_s3 + $0x148] sm:$0xff] }
  0x3b   :  { %181 = vmatprep.subr.mxu0 %v87_v41  ;;  %5241 = vmatprep.subr.mxu1 %v94_v60  ;;  %12360 = vst [vmem:[#allocation15_spill] sm:$0xff] %v7330_v24  ;;  %v7356_v28 = vld [vmem:[%s11976_s1] sm:$0xff]  ;;  %v7372_v30 = vld [vmem:[%s11978_s3 + $0x130] sm:$0xff]  ;;  %v7380_v31 = vld [vmem:[%s11978_s3 + $0x118] sm:$0xff] }
  0x3c   :  { %182 = vmatpush1.msra.mxu0 %v86_v43  ;;  %5242 = vmatpush3.msra.mxu1 %v94_v60  ;;  %v7389_v32 = vld [vmem:[%s11978_s3 + $0x100] sm:$0xff]  ;;  %v7397_v33 = vld [vmem:[%s11978_s3 + $0xe8] sm:$0xff]  ;;  %v7404_v34 = vld [vmem:[%s11978_s3 + $0xd0] sm:$0xff] }
  0x3d   :  { %216 = vmatmul.mubr.f32.vlgmr.msra.gmra.mxu0 %v7090_v44  ;;  %577 = vmatprep.subr.mxu0 %v7095_v45  ;;  %v7411_v35 = vld [vmem:[%s11978_s3 + $0xb8] sm:$0xff]  ;;  %v7420_v36 = vld [vmem:[%s11978_s3 + $0xa0] sm:$0xff]  ;;  %v7427_v37 = vld [vmem:[%s11978_s3 + $0x88] sm:$0xff] }
  0x3e   :  { %578 = vmatpush1.msra.mxu0 %v7100_v46  ;;  %221 = vmatprep.mubr.f32.mxu0 %v12002_v0  ;;  %v7434_v38 = vld [vmem:[%s11978_s3 + $0x70] sm:$0xff]  ;;  %v7441_v39 = vld [vmem:[%s11978_s3 + $0x58] sm:$0xff]  ;;  %v7448_v40 = vld [vmem:[%s11978_s3 + $0x40] sm:$0xff] }
  0x3f   :  { %579 = vmatprep.subr.mxu0 %v7105_v47  ;;  %5243 = vmatprep.subr.mxu1 %v91_v3  ;;  %12363 = vst [vmem:[#allocation18_spill] sm:$0xff] %v7448_v40  ;;  %v7455_v41 = vld [vmem:[%s11978_s3 + $0x28] sm:$0xff]  ;;  %v7462_v42 = vld [vmem:[%s11978_s3 + $0x10] sm:$0xff]  ;;  %v7484_v48 = vld [vmem:[%s11981_s6 + $0x178] sm:$0xff] }
  0x40   :  { %580 = vmatpush1.msra.mxu0 %v7115_v49  ;;  %5244 = vmatpush3.msra.mxu1 %v91_v3  ;;  %12364 = vst [vmem:[#allocation19_spill] sm:$0xff] %v7455_v41  ;;  %12365 = vst [vmem:[#allocation20_spill] sm:$0xff] %v7462_v42  ;;  %v7474_v43 = vld [vmem:[%s11981_s6 + $0x170] sm:$0xff]  ;;  %v7508_v60 = vld [vmem:[%s11981_s6 + $0x140] sm:$0xff] }
  0x41   :  { %222 = vmatmul.mubr.f32.gmra.mxu0 %v7122_v50  ;;  %581 = vmatprep.subr.mxu0 %v7127_v51  ;;  %12366 = vst [vmem:[#allocation21_spill] sm:$0xff] %v7474_v43  ;;  %12368 = vst [vmem:[#allocation23_spill] sm:$0xff] %v7484_v48  ;;  %v7496_v54 = vld [vmem:[%s11981_s6 + $0x150] sm:$0xff]  ;;  %v7520_v3 = vld [vmem:[%s11981_s6 + $0x138] sm:$0xff] }
  0x42   :  { %582 = vmatpush1.msra.mxu0 %v7133_v52  ;;  %227 = vmatprep.mubr.f32.mxu0 %v12002_v0  ;;  %12370 = vst [vmem:[#allocation25_spill] sm:$0xff] %v7496_v54  ;;  %12372 = vst [vmem:[#allocation27_spill] sm:$0xff] %v7508_v60 }
  0x43   :  { %583 = vmatprep.subr.mxu0 %v7139_v53  ;;  %5245 = vmatprep.subr.mxu1 %v88_v9  ;;  %12374 = vst [vmem:[#allocation29_spill] sm:$0xff] %v7520_v3 }
  0x44   :  { %584 = vmatpush1.msra.mxu0 %v7149_v55  ;;  %5246 = vmatpush3.msra.mxu1 %v88_v9  ;;  %v7537_v9 = vld [vmem:[%s11981_s6 + $0x120] sm:$0xff] }
  0x45   :  { %228 = vmatmul.mubr.f32.gmra.mxu0 %v7156_v56  ;;  %585 = vmatprep.subr.mxu0 %v7161_v57  ;;  %12376 = vst [vmem:[#allocation31_spill] sm:$0xff] %v7537_v9 }
  0x46   :  { %586 = vmatpush1.msra.mxu0 %v7167_v58  ;;  %233 = vmatprep.mubr.f32.mxu0 %v12002_v0 }
  0x47   :  { %587 = vmatprep.subr.mxu0 %v7173_v59  ;;  %5247 = vmatprep.mubr.f32.mxu1 %v7090_v44  ;;  %v7479_v44 = vld [vmem:[%s11981_s6 + $0x168] sm:$0xff] }
  0x48   :  { %588 = vmatpush1.msra.mxu0 %v7183_v61  ;;  %5259 = vmatprep.subr.mxu1 %v12002_v0  ;;  %12367 = vst [vmem:[#allocation22_spill] sm:$0xff] %v7479_v44 }
  0x49   :  { %234 = vmatmul.mubr.f32.gmra.mxu0 %v7190_v62  ;;  %589 = vmatprep.subr.mxu0 %v7195_v63 }
  0x4a   :  { %590 = vmatpush1.msra.mxu0 %v7201_v1  ;;  %239 = vmatprep.mubr.f32.mxu0 %v12002_v0 }
  0x4b   :  { %591 = vmatprep.subr.mxu0 %v7207_v2  ;;  %5248 = vmatmul.mubr.f32.vlgmr.msra.gmra.mxu1 %v7122_v50  ;;  %v7491_v50 = vld [vmem:[%s11981_s6 + $0x158] sm:$0xff] }
  0x4c   :  { %592 = vmatpush1.msra.mxu0 %v7217_v4  ;;  %5260 = vmatpush3.msra.mxu1 %v7314_v21  ;;  %12369 = vst [vmem:[#allocation24_spill] sm:$0xff] %v7491_v50 }
  0x4d   :  { %240 = vmatmul.mubr.f32.gmra.mxu0 %v7224_v5  ;;  %593 = vmatprep.subr.mxu0 %v7229_v6 }
  0x4e   :  { %594 = vmatpush1.msra.mxu0 %v7235_v7  ;;  %245 = vmatprep.mubr.f32.mxu0 %v12002_v0 }
  0x4f   :  { %595 = vmatprep.subr.mxu0 %v7241_v8  ;;  %5261 = vmatprep.subr.mxu1 %v12002_v0 }
  0x50   :  { %596 = vmatpush1.msra.mxu0 %v7251_v10  ;;  %5262 = vmatpush3.msra.mxu1 %v7349_v27 }
  0x51   :  { %246 = vmatmul.mubr.f32.gmra.mxu0 %v83_v11  ;;  %597 = vmatprep.subr.mxu0 %v7261_v12 }
  0x52   :  { %598 = vmatpush1.msra.mxu0 %v7267_v13  ;;  %251 = vmatprep.mubr.f32.mxu0 %v12002_v0 }
  0x53   :  { %599 = vmatprep.subr.mxu0 %v7273_v14  ;;  %5263 = vmatprep.subr.mxu1 %v12002_v0 }
  0x54   :  { %600 = vmatpush1.msra.mxu0 %v7279_v15  ;;  %5264 = vmatpush3.msra.mxu1 %v7363_v29 }
  0x55   :  { %252 = vmatmul.mubr.f32.gmra.mxu0 %v84_v16  ;;  %601 = vmatprep.subr.mxu0 %v7289_v17 }
  0x56   :  { %602 = vmatpush1.msra.mxu0 %v7295_v18  ;;  %257 = vmatprep.mubr.f32.mxu0 %v12002_v0 }
  0x57   :  { %603 = vmatprep.subr.mxu0 %v7302_v19  ;;  %5250 = vmatprep.mubr.f32.mxu1 %v7156_v56  ;;  %v7501_v56 = vld [vmem:[%s11981_s6 + $0x160] sm:$0xff] }
  0x58   :  { %604 = vmatpush1.msra.mxu0 %v7309_v20  ;;  %5265 = vmatprep.subr.mxu1 %v12002_v0  ;;  %12371 = vst [vmem:[#allocation26_spill] sm:$0xff] %v7501_v56 }
  0x59   :  { %258 = vmatmul.mubr.f32.gmra.mxu0 %v85_v22  ;;  %605 = vmatprep.subr.mxu0 %v7324_v23 }
  0x5a   :  { %606 = vmatpush1.msra.mxu0 %v7330_v24  ;;  %641 = vmatprep.mubr.f32.mxu0 %v12002_v0 }
  0x5b   :  { %607 = vmatprep.subr.mxu0 %v7337_v25  ;;  %5251 = vmatmul.mubr.f32.gmra.mxu1 %v7190_v62  ;;  %v7513_v62 = vld [vmem:[%s11981_s6 + $0x148] sm:$0xff] }
  0x5c   :  { %608 = vmatpush1.msra.mxu0 %v7344_v26  ;;  %5266 = vmatpush3.msra.mxu1 %v7372_v30  ;;  %12373 = vst [vmem:[#allocation28_spill] sm:$0xff] %v7513_v62 }
  0x5d   :  { %642 = vmatmul.mubr.f32.vlgmr.msra.gmra.mxu0 %v7356_v28  ;;  %5253 = vmatprep.mubr.f32.mxu1 %v7224_v5  ;;  %v7527_v5 = vld [vmem:[%s11981_s6 + $0x128] sm:$0xff] }
  0x5e   :  { %5267 = vmatprep.subr.mxu1 %v12002_v0  ;;  %804 = vmatprep.mubr.f32.mxu0 %v12002_v0  ;;  %12375 = vst [vmem:[#allocation30_spill] sm:$0xff] %v7527_v5 }
  0x5f   :  { %5268 = vmatpush3.msra.mxu1 %v7380_v31  ;;  %740 = vmatprep.subr.mxu0 %v7474_v43 }
  0x60   :  { %5269 = vmatprep.subr.mxu1 %v12002_v0  ;;  %5254 = vmatmul.mubr.f32.gmra.mxu1 %v83_v11  ;;  %v7542_v11 = vld [vmem:[%s11981_s6 + $0x130] sm:$0xff] }
  0x61   :  { %5270 = vmatpush3.msra.mxu1 %v7389_v32  ;;  %5256 = vmatprep.mubr.f32.mxu1 %v84_v16  ;;  %12377 = vst [vmem:[#allocation32_spill] sm:$0xff] %v7542_v11  ;;  %v7549_v16 = vld [vmem:[%s11981_s6 + $0x110] sm:$0xff] }
  0x62   :  { %5271 = vmatprep.subr.mxu1 %v12002_v0  ;;  %741 = vmatpush1.msra.mxu0 %v7479_v44  ;;  %12378 = vst [vmem:[#allocation33_spill] sm:$0xff] %v7549_v16 }
  0x63   :  { %5272 = vmatpush3.msra.mxu1 %v7397_v33  ;;  %742 = vmatprep.subr.mxu0 %v7491_v50 }
  0x64   :  { %5273 = vmatprep.subr.mxu1 %v12002_v0  ;;  %5257 = vmatmul.mubr.f32.gmra.mxu1 %v85_v22  ;;  %v7556_v22 = vld [vmem:[%s11981_s6 + $0x108] sm:$0xff] }
  0x65   :  { %5274 = vmatpush3.msra.mxu1 %v7404_v34  ;;  %5291 = vmatprep.mubr.msk.f32.mxu1 %vm6863_vm0, %v12002_v0  ;;  %12379 = vst [vmem:[#allocation34_spill] sm:$0xff] %v7556_v22 }
  0x66   :  { %5275 = vmatprep.subr.mxu1 %v12002_v0  ;;  %743 = vmatpush1.msra.mxu0 %v7496_v54 }
  0x67   :  { %5276 = vmatpush3.msra.mxu1 %v7411_v35  ;;  %744 = vmatprep.subr.mxu0 %v7508_v60  ;;  %v134_v60 = vld [vmem:[%s11979_s4] sm:$0x7]  ;;  %s6864_s4 = smov [#allocation9]  }
  0x68   :  { %5277 = vmatprep.subr.mxu1 %v12002_v0  ;;  %745 = vmatpush1.msra.mxu0 %v7520_v3  ;;  %v7666_v3 = vld [vmem:[%s11981_s6 + $0x78] sm:$0xff]  ;;  %s4676_s20 = sshll.u32 %s6864_s4, 4  ;;  %s4677_s20 = int_to_ptr.vmem [resolvable:$true] %s4676_s20 }
  0x69   :  { %5278 = vmatpush3.msra.mxu1 %v7420_v36  ;;  %746 = vmatprep.subr.mxu0 %v7527_v5  ;;  %v7647_v5 = vld [vmem:[%s11981_s6 + $0x90] sm:$0xff]  ;;  %12398 = vst [vmem:[#allocation52_spill] sm:$0xff] %v7666_v3  ;;  %s6832_s23 = scalar_lea.vmem %s4677_s20, 256  ;;  %p6837_p11 = scmp.lt.s32.totalorder %s4677_s20, %s4677_s20 }
  0x6a   :  { %5279 = vmatprep.subr.mxu1 %v12002_v0  ;;  %747 = vmatpush1.msra.mxu0 %v7537_v9  ;;  %v7561_v9 = vld [vmem:[%s11981_s6 + $0x118] sm:$0xff]  ;;  %12395 = vst [vmem:[#allocation49_spill] sm:$0xff] %v7647_v5  ;;  %p6833_p10 = scmp.ne.s32.totalorder %s4677_s20, %s6832_s23  ;;  %p6838_p12 = scmp.lt.s32.totalorder %s6832_s23, %s6832_s23 }
  0x6b   :  { %5280 = vmatpush3.msra.mxu1 %v7427_v37  ;;  %748 = vmatprep.subr.mxu0 %v7549_v16  ;;  %12380 = vst [vmem:[#allocation35_spill] sm:$0xff] %v7561_v9  ;;  %v7568_v16 = vld [vmem:[%s11981_s6 + $0xf8] sm:$0xff] }
  0x6c   :  { %5281 = vmatprep.subr.mxu1 %v12002_v0  ;;  %749 = vmatpush1.msra.mxu0 %v7556_v22  ;;  %12381 = vst [vmem:[#allocation36_spill] sm:$0xff] %v7568_v16  ;;  %v7580_v22 = vld [vmem:[%s11981_s6 + $0x100] sm:$0xff]  ;;  %p6839_p13 = por %p6838_p12, %p6837_p11 }
  0x6d   :  { %5282 = vmatpush3.msra.mxu1 %v7434_v38  ;;  %750 = vmatprep.subr.mxu0 %v7568_v16  ;;  %12383 = vst [vmem:[#allocation38_spill] sm:$0xff] %v7580_v22  ;;  %v7587_v16 = vld [vmem:[%s11981_s6 + $0xe0] sm:$0xff] }
  0x6e   :  { %5283 = vmatprep.subr.mxu1 %v12002_v0  ;;  %12384 = vst [vmem:[#allocation39_spill] sm:$0xff] %v7587_v16  ;;  %p6840_p0 = pnand %p6839_p13, %p6833_p10 }
  0x6f   :  { %5284 = vmatpush3.msra.mxu1 %v7441_v39 }
  0x70   :  { %5285 = vmatprep.subr.mxu1 %v12002_v0 }
  0x71   :  { %5286 = vmatpush3.msra.mxu1 %v7448_v40 }
  0x72   :  { %5287 = vmatprep.subr.mxu1 %v12002_v0 }
  0x73   :  { %5288 = vmatpush3.msra.mxu1 %v7455_v41 }
  0x74   :  { %5289 = vmatprep.subr.mxu1 %v12002_v0 }
  0x75   :  { %5290 = vmatpush3.msra.mxu1 %v7462_v42 }
  0x76   :  { %5292 = vmatmul.mubr.f32.vlgmr.msra.gmra.mxu1 %v7356_v28  ;;  %5294 = vmatprep.subr.mxu1 %v12002_v0 }
  0x77   :  { %5326 = vmatprep.mubr.msk.f32.mxu1 %vm6863_vm0, %v12002_v0  ;;  %5295 = vmatpush3.msra.mxu1 %v7484_v48 }
  0x78   :  { %5296 = vmatprep.subr.mxu1 %v12002_v0 }
  0x79   :  { %5297 = vmatpush3.msra.mxu1 %v7501_v56 }
  0x7a   :  { %5298 = vmatprep.subr.mxu1 %v12002_v0 }
  0x7b   :  { %5299 = vmatpush3.msra.mxu1 %v7513_v62  ;;  %v7652_v62 = vld [vmem:[%s11981_s6 + $0xa0] sm:$0xff] }
  0x7c   :  { %5300 = vmatprep.subr.mxu1 %v12002_v0  ;;  %12396 = vst [vmem:[#allocation50_spill] sm:$0xff] %v7652_v62 }
  0x7d   :  { %5301 = vmatpush3.msra.mxu1 %v7542_v11  ;;  %v7575_v11 = vld [vmem:[%s11981_s6 + $0xf0] sm:$0xff] }
  0x7e   :  { %5302 = vmatprep.subr.mxu1 %v12002_v0  ;;  %12382 = vst [vmem:[#allocation37_spill] sm:$0xff] %v7575_v11  ;;  %751 = vmatpush1.msra.mxu0 %v7575_v11  ;;  %v7599_v11 = vld [vmem:[%s11981_s6 + $0xe8] sm:$0xff] }
  0x7f   :  { %5303 = vmatpush3.msra.mxu1 %v7561_v9  ;;  %752 = vmatprep.subr.mxu0 %v7587_v16  ;;  %v7594_v9 = vld [vmem:[%s11981_s6 + $0xd8] sm:$0xff]  ;;  %12386 = vst [vmem:[#allocation41_spill] sm:$0xff] %v7599_v11  ;;  %v7606_v16 = vld [vmem:[%s11981_s6 + $0xc8] sm:$0xff] }
  0x80   :  { %5304 = vmatprep.subr.mxu1 %v12002_v0  ;;  %12385 = vst [vmem:[#allocation40_spill] sm:$0xff] %v7594_v9  ;;  %753 = vmatpush1.msra.mxu0 %v7594_v9  ;;  %12387 = vst [vmem:[#allocation42_spill] sm:$0xff] %v7606_v16  ;;  %v7618_v9 = vld [vmem:[%s11981_s6 + $0xd0] sm:$0xff] }
  0x81   :  { %5305 = vmatpush3.msra.mxu1 %v7580_v22  ;;  %754 = vmatprep.subr.mxu0 %v7606_v16  ;;  %v7613_v22 = vld [vmem:[%s11981_s6 + $0xc0] sm:$0xff]  ;;  %12389 = vst [vmem:[#allocation44_spill] sm:$0xff] %v7618_v9  ;;  %v7625_v16 = vld [vmem:[%s11981_s6 + $0xb0] sm:$0xff] }
  0x82   :  { %5306 = vmatprep.subr.mxu1 %v12002_v0  ;;  %12388 = vst [vmem:[#allocation43_spill] sm:$0xff] %v7613_v22  ;;  %755 = vmatpush1.msra.mxu0 %v7613_v22  ;;  %12390 = vst [vmem:[#allocation45_spill] sm:$0xff] %v7625_v16  ;;  %v12393_v22 = vmov 0.0  }
  0x83   :  { %5307 = vmatpush3.msra.mxu1 %v7599_v11  ;;  %v7635_v11 = vld [vmem:[%s11981_s6 + $0xb8] sm:$0xff]  ;;  %756 = vmatprep.subr.mxu0 %v7625_v16  ;;  %v7659_v16 = vld [vmem:[%s11981_s6 + $0x80] sm:$0xff] }
  0x84   :  { %5308 = vmatprep.subr.mxu1 %v12002_v0  ;;  %v7630_v0 = vld [vmem:[%s11981_s6 + $0xa8] sm:$0xff]  ;;  %12392 = vst [vmem:[#allocation47_spill] sm:$0xff] %v7635_v11  ;;  %12397 = vst [vmem:[#allocation51_spill] sm:$0xff] %v7659_v16 }
  0x85   :  { %5309 = vmatpush3.msra.mxu1 %v7618_v9  ;;  %12391 = vst [vmem:[#allocation46_spill] sm:$0xff] %v7630_v0  ;;  %v7642_v9 = vld [vmem:[%s11981_s6 + $0x98] sm:$0xff]  ;;  %757 = vmatpush1.msra.mxu0 %v7630_v0  ;;  %v7671_v0 = vld [vmem:[%s11981_s6 + $0x88] sm:$0xff] }
  0x86   :  { %5310 = vmatprep.subr.mxu1 %v12393_v22  ;;  %12394 = vst [vmem:[#allocation48_spill] sm:$0xff] %v7642_v9  ;;  %758 = vmatprep.subr.mxu0 %v7642_v9  ;;  %12399 = vst [vmem:[#allocation53_spill] sm:$0xff] %v7671_v0  ;;  %v7678_v9 = vld [vmem:[%s11981_s6 + $0x68] sm:$0xff] }
  0x87   :  { %5311 = vmatpush3.msra.mxu1 %v7635_v11  ;;  %759 = vmatpush1.msra.mxu0 %v7647_v5  ;;  %12400 = vst [vmem:[#allocation54_spill] sm:$0xff] %v7678_v9  ;;  %v7685_v11 = vld [vmem:[%s11981_s6 + $0x60] sm:$0xff]  ;;  %v7690_v5 = vld [vmem:[%s11981_s6 + $0x70] sm:$0xff] }
  0x88   :  { %5312 = vmatprep.subr.mxu1 %v12393_v22  ;;  %760 = vmatprep.subr.mxu0 %v7659_v16  ;;  %12401 = vst [vmem:[#allocation55_spill] sm:$0xff] %v7685_v11  ;;  %12402 = vst [vmem:[#allocation56_spill] sm:$0xff] %v7690_v5  ;;  %v7697_v16 = vld [vmem:[%s11981_s6 + $0x50] sm:$0xff] }
  0x89   :  { %5313 = vmatpush3.msra.mxu1 %v7652_v62  ;;  %761 = vmatpush1.msra.mxu0 %v7666_v3  ;;  %12403 = vst [vmem:[#allocation57_spill] sm:$0xff] %v7697_v16  ;;  %v7704_v62 = vld [vmem:[%s11981_s6 + $0x48] sm:$0xff]  ;;  %v7709_v3 = vld [vmem:[%s11981_s6 + $0x58] sm:$0xff] }
  0x8a   :  { %5314 = vmatprep.subr.mxu1 %v12393_v22  ;;  %762 = vmatprep.subr.mxu0 %v7678_v9  ;;  %12404 = vst [vmem:[#allocation58_spill] sm:$0xff] %v7704_v62  ;;  %12405 = vst [vmem:[#allocation59_spill] sm:$0xff] %v7709_v3  ;;  %v7716_v9 = vld [vmem:[%s11981_s6 + $0x38] sm:$0xff] }
  0x8b   :  { %5315 = vmatpush3.msra.mxu1 %v7671_v0  ;;  %763 = vmatpush1.msra.mxu0 %v7685_v11  ;;  %12406 = vst [vmem:[#allocation60_spill] sm:$0xff] %v7716_v9  ;;  %v7723_v0 = vld [vmem:[%s11981_s6 + $0x30] sm:$0xff]  ;;  %v7728_v11 = vld [vmem:[%s11981_s6 + $0x40] sm:$0xff] }
  0x8c   :  { %5316 = vmatprep.subr.mxu1 %v12393_v22  ;;  %764 = vmatprep.subr.mxu0 %v7697_v16  ;;  %12407 = vst [vmem:[#allocation61_spill] sm:$0xff] %v7723_v0  ;;  %12408 = vst [vmem:[#allocation62_spill] sm:$0xff] %v7728_v11  ;;  %v7735_v16 = vld [vmem:[%s11981_s6 + $0x20] sm:$0xff] }
  0x8d   :  { %5317 = vmatpush3.msra.mxu1 %v7690_v5  ;;  %765 = vmatpush1.msra.mxu0 %v7704_v62  ;;  %12409 = vst [vmem:[#allocation63_spill] sm:$0xff] %v7735_v16  ;;  %v7742_v5 = vld [vmem:[%s11981_s6 + $0x18] sm:$0xff]  ;;  %v7747_v62 = vld [vmem:[%s11981_s6 + $0x28] sm:$0xff] }
  0x8e   :  { %5318 = vmatprep.subr.mxu1 %v12393_v22  ;;  %766 = vmatprep.subr.mxu0 %v7716_v9  ;;  %12410 = vst [vmem:[#allocation64_spill] sm:$0xff] %v7742_v5  ;;  %12411 = vst [vmem:[#allocation65_spill] sm:$0xff] %v7747_v62  ;;  %v7754_v9 = vld [vmem:[%s11981_s6 + $0x8] sm:$0xff] }
  0x8f   :  { %5319 = vmatpush3.msra.mxu1 %v7709_v3  ;;  %767 = vmatpush1.msra.mxu0 %v7723_v0  ;;  %12412 = vst [vmem:[#allocation66_spill] sm:$0xff] %v7754_v9  ;;  %v7761_v3 = vld [vmem:[%s11981_s6] sm:$0xff]  ;;  %v7766_v0 = vld [vmem:[%s11981_s6 + $0x10] sm:$0xff] }
  0x90   :  { %5320 = vmatprep.subr.mxu1 %v12393_v22  ;;  %768 = vmatprep.subr.mxu0 %v7735_v16  ;;  %12413 = vst [vmem:[#allocation67_spill] sm:$0xff] %v7761_v3  ;;  %12414 = vst [vmem:[#allocation68_spill] sm:$0xff] %v7766_v0  ;;  %v7773_v16 = vld [vmem:[%s11982_s7 + $0x170] sm:$0xff] }
  0x91   :  { %5321 = vmatpush3.msra.mxu1 %v7728_v11  ;;  %769 = vmatpush1.msra.mxu0 %v7742_v5  ;;  %12415 = vst [vmem:[#allocation69_spill] sm:$0xff] %v7773_v16  ;;  %v136_v5 = vlaneseq }
  0x92   :  { %5322 = vmatprep.subr.mxu1 %v12393_v22  ;;  %770 = vmatprep.subr.mxu0 %v7754_v9 }
  0x93   :  { %5323 = vmatpush3.msra.mxu1 %v7747_v62  ;;  %771 = vmatpush1.msra.mxu0 %v7761_v3  ;;  %v7781_v11 = vshrl.u32 %v136_v5, 7 }
  0x94   :  { %5324 = vmatprep.subr.mxu1 %v12393_v22  ;;  %881 = vmatprep.subr.mxu0 %v7773_v16 }
  0x95   :  { %5325 = vmatpush3.msra.mxu1 %v7766_v0  ;;  %12416 = vst [vmem:[#allocation70_spill] sm:$0xff] %v7781_v11  ;;  %v12047_v62 = vsub.s32 0, %v7781_v11  ;;  %v12050_v56 = vsub.s32 1, %v7781_v11 }
  0x96   :  { %5329 = vmatprep.subr.mxu1 %v12393_v22 }
  0x97   :  { %v139_v0 = vrot.slane %v134_v60, %v12047_v62  ;;  %v143_v16 = vrot.slane %v134_v60, %v12050_v56 }
  0xfd   :  { %v217_v9 = vpop.f32.mrf.mxu0 }
  0xff   :  { %v219_v54 = vpop.f32.mrf.mxu0 }
 0x101   :  { %v223_v3 = vpop.f32.mrf.mxu0 }
 0x102   :  { %v7792_v50 = vadd.f32 %v223_v3, %v139_v0 }
 0x103   :  { %v225_v5 = vpop.f32.mrf.mxu0 }
 0x104   :  { %12417 = vst [vmem:[#allocation71_spill] sm:$0xff] %v7792_v50  ;;  %v7794_v48 = vadd.f32 %v225_v5, %v143_v16  ;;  %v12053_v5 = vsub.s32 2, %v7781_v11 }
 0x105   :  { %v229_v44 = vpop.f32.mrf.mxu0 }
 0x106   :  { %12418 = vst [vmem:[#allocation72_spill] sm:$0xff] %v7794_v48  ;;  %v7796_v43 = vadd.f32 %v229_v44, %v139_v0 }
 0x107   :  { %v231_v42 = vpop.f32.mrf.mxu0 }
 0x108   :  { %12419 = vst [vmem:[#allocation73_spill] sm:$0xff] %v7796_v43  ;;  %v7798_v26 = vadd.f32 %v231_v42, %v143_v16 }
 0x109   :  { %v235_v25 = vpop.f32.mrf.mxu0 }
 0x10a   :  { %12420 = vst [vmem:[#allocation74_spill] sm:$0xff] %v7798_v26  ;;  %v7800_v41 = vadd.f32 %v235_v25, %v139_v0  ;;  %v147_v25 = vrot.slane %v134_v60, %v12053_v5 }
 0x10b   :  { %v237_v24 = vpop.f32.mrf.mxu0 }
 0x10c   :  { %12421 = vst [vmem:[#allocation75_spill] sm:$0xff] %v7800_v41  ;;  %v7802_v62 = vadd.f32 %v237_v24, %v143_v16 }
 0x10d   :  { %v241_v23 = vpop.f32.mrf.mxu0 }
 0x10e   :  { %12422 = vst [vmem:[#allocation76_spill] sm:$0xff] %v7802_v62  ;;  %v7804_v40 = vadd.f32 %v241_v23, %v139_v0  ;;  %v5249_v23 = vpop.f32.mrf.mxu1 }
 0x10f   :  { %v243_v3 = vpop.f32.mrf.mxu0 }
 0x110   :  { %12423 = vst [vmem:[#allocation77_spill] sm:$0xff] %v7804_v40  ;;  %v7806_v56 = vadd.f32 %v243_v3, %v143_v16  ;;  %v7819_v3 = vadd.f32 %v5249_v23, %v147_v25 }
 0x111   :  { %v247_v48 = vpop.f32.mrf.mxu0 }
 0x112   :  { %12424 = vst [vmem:[#allocation78_spill] sm:$0xff] %v7806_v56  ;;  %v7809_v44 = vadd.f32 %v247_v48, %v139_v0 }
 0x113   :  { %v249_v43 = vpop.f32.mrf.mxu0 }
 0x114   :  { %12425 = vst [vmem:[#allocation79_spill] sm:$0xff] %v7809_v44  ;;  %v7811_v42 = vadd.f32 %v249_v43, %v143_v16  ;;  %v218_v44 = vadd.f32 %v217_v9, %v139_v0 }
 0x115   :  { %v253_v41 = vpop.f32.mrf.mxu0 }
 0x116   :  { %12426 = vst [vmem:[#allocation80_spill] sm:$0xff] %v7811_v42  ;;  %v7815_v24 = vadd.f32 %v253_v41, %v139_v0  ;;  %v330_v42 = vpop.f32.mrf.mxu1 }
 0x117   :  { %v255_v62 = vpop.f32.mrf.mxu0 }
 0x118   :  { %12427 = vst [vmem:[#allocation81_spill] sm:$0xff] %v7815_v24  ;;  %v7817_v40 = vadd.f32 %v255_v62, %v143_v16  ;;  %v220_v62 = vadd.f32 %v219_v54, %v143_v16 }
 0x119   :  { %v259_v56 = vpop.f32.mrf.mxu0 }
 0x11a   :  { %12428 = vst [vmem:[#allocation82_spill] sm:$0xff] %v7817_v40  ;;  %v7821_v26 = vadd.f32 %v259_v56, %v139_v0 }
 0x11b   :  { %v261_v48 = vpop.f32.mrf.mxu0  ;;  %v5252_v60 = vpop.f32.mrf.mxu1 }
 0x11c   :  { %12429 = vst [vmem:[#allocation83_spill] sm:$0xff] %v7821_v26  ;;  %v7823_v50 = vadd.f32 %v261_v48, %v143_v16  ;;  %v7825_v41 = vadd.f32 %v5252_v60, %v147_v25 }
 0x11d   :  { %v643_v43 = vpop.f32.mrf.mxu0  ;;  %v340_v20 = vpop.f32.mrf.mxu1 }
 0x11e   :  { %12430 = vst [vmem:[#allocation84_spill] sm:$0xff] %v7823_v50  ;;  %v718_v11 = vadd.f32 %v643_v43, %v218_v44  ;;  %12431 = vst [vmem:[#allocation85_spill] sm:$0xff] %v7825_v41  ;;  %v7827_v23 = vadd.f32 %v340_v20, %v147_v25  ;;  %v7961_v41 = vld [vmem:[%s11982_s7 + $0xd8] sm:$0xff] }
 0x11f   :  { %v645_v24 = vpop.f32.mrf.mxu0  ;;  %12442 = vst [vmem:[#allocation96_spill] sm:$0xff] %v7961_v41 }
 0x120   :  { %v4701_v5 = vmul.f32 -1.442695, %v718_v11  ;;  %12432 = vst [vmem:[#allocation86_spill] sm:$0xff] %v7827_v23  ;;  %v5255_v40 = vpop.f32.mrf.mxu1  ;;  %v725_v56 = vadd.f32 %v645_v24, %v220_v62  ;;  %v7966_v23 = vld [vmem:[%s11982_s7 + $0xe8] sm:$0xff] }
 0x121   :  { %v7829_v26 = vadd.f32 %v5255_v40, %v147_v25  ;;  %v7840_v40 = vld [vmem:[%s11980_s5] ss:$0 sm:$0xff]  ;;  %12443 = vst [vmem:[#allocation97_spill] sm:$0xff] %v7966_v23 }
 0x122   :  { %6194 = vpow2.f32 %v4701_v5  ;;  %v350_v0 = vpop.f32.mrf.mxu1  ;;  %v4702_v50 = vmul.f32 -1.442695, %v725_v56 }
 0x123   :  { %12433 = vst [vmem:[#allocation87_spill] sm:$0xff] %v7829_v26  ;;  %v7831_v9 = vadd.f32 %v350_v0, %v147_v25  ;;  %v331_v0 = vadd.f32 %v330_v42, %v147_v25  ;;  %v7854_v42 = vld [vmem:[%s11982_s7 + $0x178] sm:$0xff] }
 0x124   :  { %v5258_v48 = vpop.f32.mrf.mxu1  ;;  %6196 = vpow2.f32 %v4702_v50 }
 0x125   :  { %12434 = vst [vmem:[#allocation88_spill] sm:$0xff] %v7831_v9  ;;  %v7833_v44 = vadd.f32 %v5258_v48, %v147_v25  ;;  %v7954_v9 = vld [vmem:[%s11982_s7 + $0xe0] sm:$0xff] }
 0x126   :  { %v360_v11 = vpop.f32.mrf.mxu1  ;;  %12441 = vst [vmem:[#allocation95_spill] sm:$0xff] %v7954_v9 }
 0x127   :  { %12435 = vst [vmem:[#allocation89_spill] sm:$0xff] %v7833_v44  ;;  %v7835_v43 = vadd.f32 %v360_v11, %v147_v25  ;;  %v7859_v25 = vld [vmem:[%s11982_s7 + $0x158] sm:$0xff] }
 0x129   :  { %12436 = vst [vmem:[#allocation90_spill] sm:$0xff] %v7835_v43 }
 0x12f   :  { %v6195_v60 = vpop.eup %6194 }
 0x130   :  { %v722_v54 = vadd.f32 1.0, %v6195_v60 }
 0x131   :  { %v6197_v20 = vpop.eup %6196 }
 0x132   :  { %6198 = vrcp.f32 %v722_v54  ;;  %v729_v24 = vadd.f32 1.0, %v6197_v20  ;;  %v7849_v20 = vld [vmem:[%s11982_s7 + $0x168] sm:$0xff] }
 0x134   :  { %6200 = vrcp.f32 %v729_v24  ;;  %v7897_v24 = vld [vmem:[%s11982_s7 + $0x128] sm:$0xff] }
 0x136   :  { %v714_v16 = vpop.f32.mrf.mxu1 }
 0x137   :  { %v732_v62 = vadd.f32 %v7840_v40, %v714_v16  ;;  %v7885_v16 = vld [vmem:[%s11982_s7 + $0x138] sm:$0xff] }
 0x138   :  { %v5293_v5 = vpop.f32.mrf.mxu1 }
 0x139   :  { %v7890_v5 = vld [vmem:[%s11982_s7 + $0x148] sm:$0xff] }
 0x13f   :  { %v6199_v56 = vpop.eup %6198 }
 0x140   :  { %v733_v48 = vmul.f32 %v6199_v56, %v732_v62  ;;  %v7904_v62 = vld [vmem:[%s11982_s7 + $0x120] sm:$0xff]  ;;  %v7909_v56 = vld [vmem:[%s11982_s7 + $0x130] sm:$0xff] }
 0x141   :  { %v6201_v50 = vpop.eup %6200 }
 0x142   :  { %v734_v11 = vadd.f32 %v733_v48, %v331_v0  ;;  %v736_v60 = vsub.f32 1.0, %v6201_v50  ;;  %v738_v43 = vmul.f32 %v6201_v50, %v7356_v28  ;;  %v7866_v28 = vld [vmem:[%s11982_s7 + $0x150] sm:$0xff]  ;;  %v7923_v48 = vld [vmem:[%s11982_s7 + $0x108] sm:$0xff]  ;;  %v7935_v50 = vld [vmem:[%s11982_s7 + $0xf8] sm:$0xff] }
 0x143   :  { %v7916_v0 = vld [vmem:[%s11982_s7 + $0x110] sm:$0xff]  ;;  %12438 = vst [vmem:[#allocation92_spill] sm:$0xff] %v7935_v50 }
 0x144   :  { %6202 = vtanh.f32 %v734_v11  ;;  %v7928_v11 = vld [vmem:[%s11982_s7 + $0x118] sm:$0xff] }
 0x145   :  { %12437 = vst [vmem:[#allocation91_spill] sm:$0xff] %v7928_v11 }
 0x151   :  { %v6203_v54 = vpop.eup %6202 }
 0x152   :  { %v737_v44 = vmul.f32 %v6203_v54, %v736_v60  ;;  %v7942_v60 = vld [vmem:[%s11982_s7 + $0xf0] sm:$0xff]  ;;  %v7947_v54 = vld [vmem:[%s11982_s7 + $0x100] sm:$0xff] }
 0x153   :  { %12439 = vst [vmem:[#allocation93_spill] sm:$0xff] %v7942_v60  ;;  %12440 = vst [vmem:[#allocation94_spill] sm:$0xff] %v7947_v54 }
 0x154   :  { %v7844_v26 = vadd.f32 %v738_v43, %v737_v44  ;;  %v7871_v44 = vld [vmem:[%s11982_s7 + $0x160] sm:$0xff] }
 0x155   :  { %v7878_v43 = vld [vmem:[%s11982_s7 + $0x140] sm:$0xff] }
 0x156   :  { %805 = vmatmul.mubr.f32.vlgmr.msra.gmra.mxu0 %v7844_v26  ;;  %5327 = vmatmul.mubr.f32.vlgmr.msra.gmra.mxu1 %v7844_v26 }
 0x157   :  { %882 = vmatpush1.msra.mxu0 %v7849_v20  ;;  %5330 = vmatpush3.msra.mxu1 %v7854_v42 }
 0x158   :  { %883 = vmatprep.subr.mxu0 %v7859_v25  ;;  %5331 = vmatprep.subr.mxu1 %v12393_v22 }
 0x159   :  { %884 = vmatpush1.msra.mxu0 %v7866_v28  ;;  %5332 = vmatpush3.msra.mxu1 %v7871_v44 }
 0x15a   :  { %885 = vmatprep.subr.mxu0 %v7878_v43  ;;  %5333 = vmatprep.subr.mxu1 %v12393_v22 }
 0x15b   :  { %886 = vmatpush1.msra.mxu0 %v7885_v16  ;;  %5334 = vmatpush3.msra.mxu1 %v7890_v5 }
 0x15c   :  { %887 = vmatprep.subr.mxu0 %v7897_v24  ;;  %5335 = vmatprep.subr.mxu1 %v12393_v22 }
 0x15d   :  { %888 = vmatpush1.msra.mxu0 %v7904_v62  ;;  %5336 = vmatpush3.msra.mxu1 %v7909_v56 }
 0x15e   :  { %889 = vmatprep.subr.mxu0 %v7916_v0  ;;  %5337 = vmatprep.subr.mxu1 %v12393_v22 }
 0x15f   :  { %890 = vmatpush1.msra.mxu0 %v7923_v48  ;;  %5338 = vmatpush3.msra.mxu1 %v7928_v11  ;;  %v7980_v11 = vld [vmem:[%s11982_s7 + $0xc0] sm:$0xff] }
 0x160   :  { %891 = vmatprep.subr.mxu0 %v7935_v50  ;;  %5339 = vmatprep.subr.mxu1 %v12393_v22  ;;  %v7973_v50 = vld [vmem:[%s11982_s7 + $0xc8] sm:$0xff]  ;;  %12445 = vst [vmem:[#allocation99_spill] sm:$0xff] %v7980_v11 }
 0x161   :  { %892 = vmatpush1.msra.mxu0 %v7942_v60  ;;  %5340 = vmatpush3.msra.mxu1 %v7947_v54  ;;  %12444 = vst [vmem:[#allocation98_spill] sm:$0xff] %v7973_v50  ;;  %v7985_v60 = vld [vmem:[%s11982_s7 + $0xd0] sm:$0xff]  ;;  %v7999_v54 = vld [vmem:[%s11982_s7 + $0xa8] sm:$0xff] }
 0x162   :  { %893 = vmatprep.subr.mxu0 %v7954_v9  ;;  %5341 = vmatprep.subr.mxu1 %v12393_v22  ;;  %12446 = vst [vmem:[#allocation100_spill] sm:$0xff] %v7985_v60  ;;  %v7992_v9 = vld [vmem:[%s11982_s7 + $0xb0] sm:$0xff]  ;;  %12448 = vst [vmem:[#allocation102_spill] sm:$0xff] %v7999_v54 }
 0x163   :  { %894 = vmatpush1.msra.mxu0 %v7961_v41  ;;  %5342 = vmatpush3.msra.mxu1 %v7966_v23  ;;  %12447 = vst [vmem:[#allocation101_spill] sm:$0xff] %v7992_v9  ;;  %v8004_v41 = vld [vmem:[%s11982_s7 + $0xb8] sm:$0xff]  ;;  %v8018_v23 = vld [vmem:[%s11982_s7 + $0x90] sm:$0xff] }
 0x164   :  { %895 = vmatprep.subr.mxu0 %v7973_v50  ;;  %5343 = vmatprep.subr.mxu1 %v12393_v22  ;;  %12449 = vst [vmem:[#allocation103_spill] sm:$0xff] %v8004_v41  ;;  %v8011_v50 = vld [vmem:[%s11982_s7 + $0x98] sm:$0xff]  ;;  %12451 = vst [vmem:[#allocation105_spill] sm:$0xff] %v8018_v23 }
 0x165   :  { %896 = vmatpush1.msra.mxu0 %v7980_v11  ;;  %5344 = vmatpush3.msra.mxu1 %v7985_v60  ;;  %12450 = vst [vmem:[#allocation104_spill] sm:$0xff] %v8011_v50  ;;  %v8023_v11 = vld [vmem:[%s11982_s7 + $0xa0] sm:$0xff]  ;;  %v8037_v60 = vld [vmem:[%s11982_s7 + $0x78] sm:$0xff] }
 0x166   :  { %897 = vmatprep.subr.mxu0 %v7992_v9  ;;  %5345 = vmatprep.subr.mxu1 %v12393_v22  ;;  %12452 = vst [vmem:[#allocation106_spill] sm:$0xff] %v8023_v11  ;;  %v8030_v9 = vld [vmem:[%s11982_s7 + $0x80] sm:$0xff]  ;;  %12454 = vst [vmem:[#allocation108_spill] sm:$0xff] %v8037_v60 }
 0x167   :  { %898 = vmatpush1.msra.mxu0 %v7999_v54  ;;  %5346 = vmatpush3.msra.mxu1 %v8004_v41  ;;  %12453 = vst [vmem:[#allocation107_spill] sm:$0xff] %v8030_v9  ;;  %v8042_v54 = vld [vmem:[%s11982_s7 + $0x88] sm:$0xff]  ;;  %v8056_v41 = vld [vmem:[%s11982_s7 + $0x60] sm:$0xff] }
 0x168   :  { %899 = vmatprep.subr.mxu0 %v8011_v50  ;;  %5347 = vmatprep.subr.mxu1 %v12393_v22  ;;  %12455 = vst [vmem:[#allocation109_spill] sm:$0xff] %v8042_v54  ;;  %v8049_v50 = vld [vmem:[%s11982_s7 + $0x68] sm:$0xff]  ;;  %12457 = vst [vmem:[#allocation111_spill] sm:$0xff] %v8056_v41 }
 0x169   :  { %900 = vmatpush1.msra.mxu0 %v8018_v23  ;;  %5348 = vmatpush3.msra.mxu1 %v8023_v11  ;;  %12456 = vst [vmem:[#allocation110_spill] sm:$0xff] %v8049_v50  ;;  %v8061_v23 = vld [vmem:[%s11982_s7 + $0x70] sm:$0xff]  ;;  %v8075_v11 = vld [vmem:[%s11982_s7 + $0x48] sm:$0xff] }
 0x16a   :  { %901 = vmatprep.subr.mxu0 %v8030_v9  ;;  %5349 = vmatprep.subr.mxu1 %v12393_v22  ;;  %12458 = vst [vmem:[#allocation112_spill] sm:$0xff] %v8061_v23  ;;  %v8068_v9 = vld [vmem:[%s11982_s7 + $0x50] sm:$0xff]  ;;  %12460 = vst [vmem:[#allocation114_spill] sm:$0xff] %v8075_v11 }
 0x16b   :  { %902 = vmatpush1.msra.mxu0 %v8037_v60  ;;  %5350 = vmatpush3.msra.mxu1 %v8042_v54  ;;  %12459 = vst [vmem:[#allocation113_spill] sm:$0xff] %v8068_v9  ;;  %v8080_v60 = vld [vmem:[%s11982_s7 + $0x58] sm:$0xff]  ;;  %v8094_v54 = vld [vmem:[%s11982_s7 + $0x30] sm:$0xff] }
 0x16c   :  { %903 = vmatprep.subr.mxu0 %v8049_v50  ;;  %5351 = vmatprep.subr.mxu1 %v12393_v22  ;;  %12461 = vst [vmem:[#allocation115_spill] sm:$0xff] %v8080_v60  ;;  %v8087_v50 = vld [vmem:[%s11982_s7 + $0x38] sm:$0xff] }
 0x16d   :  { %904 = vmatpush1.msra.mxu0 %v8056_v41  ;;  %5352 = vmatpush3.msra.mxu1 %v8061_v23  ;;  %12462 = vst [vmem:[#allocation116_spill] sm:$0xff] %v8087_v50  ;;  %v8099_v41 = vld [vmem:[%s11982_s7 + $0x40] sm:$0xff]  ;;  %v8113_v23 = vld [vmem:[%s11982_s7 + $0x18] sm:$0xff] }
 0x16e   :  { %905 = vmatprep.subr.mxu0 %v8068_v9  ;;  %5353 = vmatprep.subr.mxu1 %v12393_v22  ;;  %12463 = vst [vmem:[#allocation117_spill] sm:$0xff] %v8099_v41  ;;  %v8106_v9 = vld [vmem:[%s11982_s7 + $0x20] sm:$0xff] }
 0x16f   :  { %906 = vmatpush1.msra.mxu0 %v8075_v11  ;;  %5354 = vmatpush3.msra.mxu1 %v8080_v60  ;;  %12464 = vst [vmem:[#allocation118_spill] sm:$0xff] %v8106_v9  ;;  %v8118_v11 = vld [vmem:[%s11982_s7 + $0x28] sm:$0xff]  ;;  %v8132_v60 = vld [vmem:[%s11982_s7] sm:$0xff] }
 0x170   :  { %907 = vmatprep.subr.mxu0 %v8087_v50  ;;  %5355 = vmatprep.subr.mxu1 %v12393_v22  ;;  %v8125_v50 = vld [vmem:[%s11982_s7 + $0x8] sm:$0xff] }
 0x171   :  { %908 = vmatpush1.msra.mxu0 %v8094_v54  ;;  %5356 = vmatpush3.msra.mxu1 %v8099_v41  ;;  %v8139_v41 = vld [vmem:[%s11982_s7 + $0x10] sm:$0xff] }
 0x172   :  { %909 = vmatprep.subr.mxu0 %v8106_v9  ;;  %5357 = vmatprep.subr.mxu1 %v12393_v22  ;;  %v8144_v9 = vld [vmem:[%s11976_s1 + $0x8] sm:$0xff] }
 0x173   :  { %910 = vmatpush1.msra.mxu0 %v8113_v23  ;;  %5358 = vmatpush3.msra.mxu1 %v8118_v11 }
 0x174   :  { %911 = vmatprep.subr.mxu0 %v8125_v50  ;;  %5359 = vmatprep.subr.mxu1 %v12393_v22 }
 0x175   :  { %912 = vmatpush1.msra.mxu0 %v8132_v60  ;;  %945 = vmatprep.mubr.f32.mxu0 %v12393_v22 }
 0x176   :  { %5360 = vmatpush3.msra.mxu1 %v8139_v41  ;;  %946 = vmatmul.mubr.f32.vlgmr.msra.gmra.mxu0 %v8144_v9 }
 0x177   :  { %5361 = vmatprep.mubr.msk.f32.mxu1 %vm6863_vm0, %v12393_v22  ;;  %1051 = vmatprep.subr.mxu0 %v7095_v45  ;;  %v12465_v45 = vld [vmem:[#allocation13_spill] sm:$0xff] }
 0x178   :  { %5364 = vmatprep.subr.mxu1 %v12393_v22  ;;  %5362 = vmatmul.mubr.f32.vlgmr.msra.gmra.mxu1 %v8144_v9 }
 0x179   :  { %1052 = vmatpush1.msra.mxu0 %v7100_v46  ;;  %5365 = vmatpush3.msra.mxu1 %v7314_v21  ;;  %v12466_v46 = vld [vmem:[#allocation18_spill] sm:$0xff]  ;;  %v12492_v21 = vld [vmem:[#allocation40_spill] sm:$0xff] }
 0x17a   :  { %1053 = vmatprep.subr.mxu0 %v7105_v47  ;;  %5366 = vmatprep.subr.mxu1 %v12393_v22  ;;  %v12467_v47 = vld [vmem:[#allocation14_spill] sm:$0xff] }
 0x17b   :  { %1054 = vmatpush1.msra.mxu0 %v7115_v49  ;;  %5367 = vmatpush3.msra.mxu1 %v7349_v27  ;;  %v12468_v49 = vld [vmem:[#allocation15_spill] sm:$0xff]  ;;  %v12493_v27 = vld [vmem:[#allocation41_spill] sm:$0xff] }
 0x17c   :  { %1055 = vmatprep.subr.mxu0 %v7127_v51  ;;  %5368 = vmatprep.subr.mxu1 %v12393_v22  ;;  %v12469_v51 = vld [vmem:[#allocation19_spill] sm:$0xff] }
 0x17d   :  { %1056 = vmatpush1.msra.mxu0 %v7133_v52  ;;  %5369 = vmatpush3.msra.mxu1 %v7363_v29  ;;  %v12470_v52 = vld [vmem:[#allocation16_spill] sm:$0xff]  ;;  %v12494_v29 = vld [vmem:[#allocation42_spill] sm:$0xff] }
 0x17e   :  { %1057 = vmatprep.subr.mxu0 %v7139_v53  ;;  %5370 = vmatprep.subr.mxu1 %v12393_v22  ;;  %v12471_v53 = vld [vmem:[#allocation17_spill] sm:$0xff] }
 0x17f   :  { %1058 = vmatpush1.msra.mxu0 %v7149_v55  ;;  %5371 = vmatpush3.msra.mxu1 %v7372_v30  ;;  %v12472_v55 = vld [vmem:[#allocation20_spill] sm:$0xff]  ;;  %v12495_v30 = vld [vmem:[#allocation43_spill] sm:$0xff] }
 0x180   :  { %1059 = vmatprep.subr.mxu0 %v7161_v57  ;;  %5372 = vmatprep.subr.mxu1 %v12393_v22  ;;  %v12473_v57 = vld [vmem:[#allocation21_spill] sm:$0xff] }
 0x181   :  { %1060 = vmatpush1.msra.mxu0 %v7167_v58  ;;  %5373 = vmatpush3.msra.mxu1 %v7380_v31  ;;  %v12474_v58 = vld [vmem:[#allocation22_spill] sm:$0xff]  ;;  %v12496_v31 = vld [vmem:[#allocation44_spill] sm:$0xff] }
 0x182   :  { %1061 = vmatprep.subr.mxu0 %v7173_v59  ;;  %5374 = vmatprep.subr.mxu1 %v12393_v22  ;;  %v12475_v59 = vld [vmem:[#allocation23_spill] sm:$0xff] }
 0x183   :  { %1062 = vmatpush1.msra.mxu0 %v7183_v61  ;;  %5375 = vmatpush3.msra.mxu1 %v7389_v32  ;;  %v12476_v61 = vld [vmem:[#allocation24_spill] sm:$0xff]  ;;  %v12497_v32 = vld [vmem:[#allocation45_spill] sm:$0xff] }
 0x184   :  { %1063 = vmatprep.subr.mxu0 %v7195_v63  ;;  %5376 = vmatprep.subr.mxu1 %v12393_v22  ;;  %v12477_v63 = vld [vmem:[#allocation25_spill] sm:$0xff] }
 0x185   :  { %1064 = vmatpush1.msra.mxu0 %v7201_v1  ;;  %5377 = vmatpush3.msra.mxu1 %v7397_v33  ;;  %v12478_v1 = vld [vmem:[#allocation26_spill] sm:$0xff] }
 0x186   :  { %1065 = vmatprep.subr.mxu0 %v7207_v2  ;;  %5378 = vmatprep.subr.mxu1 %v12393_v22  ;;  %v12479_v2 = vld [vmem:[#allocation27_spill] sm:$0xff]  ;;  %v12498_v33 = vld [vmem:[#allocation46_spill] sm:$0xff] }
 0x187   :  { %1066 = vmatpush1.msra.mxu0 %v7217_v4  ;;  %5379 = vmatpush3.msra.mxu1 %v7404_v34  ;;  %v12480_v4 = vld [vmem:[#allocation29_spill] sm:$0xff]  ;;  %v12499_v34 = vld [vmem:[#allocation47_spill] sm:$0xff] }
 0x188   :  { %1067 = vmatprep.subr.mxu0 %v7229_v6  ;;  %5380 = vmatprep.subr.mxu1 %v12393_v22  ;;  %v12481_v6 = vld [vmem:[#allocation28_spill] sm:$0xff] }
 0x189   :  { %1068 = vmatpush1.msra.mxu0 %v7235_v7  ;;  %5381 = vmatpush3.msra.mxu1 %v7411_v35  ;;  %v12482_v7 = vld [vmem:[#allocation30_spill] sm:$0xff]  ;;  %v12500_v35 = vld [vmem:[#allocation48_spill] sm:$0xff] }
 0x18a   :  { %1069 = vmatprep.subr.mxu0 %v7241_v8  ;;  %5382 = vmatprep.subr.mxu1 %v12393_v22  ;;  %v12483_v8 = vld [vmem:[#allocation31_spill] sm:$0xff] }
 0x18b   :  { %1070 = vmatpush1.msra.mxu0 %v7251_v10  ;;  %5383 = vmatpush3.msra.mxu1 %v7420_v36  ;;  %v12484_v10 = vld [vmem:[#allocation32_spill] sm:$0xff]  ;;  %v12501_v36 = vld [vmem:[#allocation49_spill] sm:$0xff] }
 0x18c   :  { %1071 = vmatprep.subr.mxu0 %v7261_v12  ;;  %5384 = vmatprep.subr.mxu1 %v12393_v22  ;;  %v12485_v12 = vld [vmem:[#allocation33_spill] sm:$0xff] }
 0x18d   :  { %1072 = vmatpush1.msra.mxu0 %v7267_v13  ;;  %5385 = vmatpush3.msra.mxu1 %v7427_v37  ;;  %v12486_v13 = vld [vmem:[#allocation34_spill] sm:$0xff] }
 0x18e   :  { %1073 = vmatprep.subr.mxu0 %v7273_v14  ;;  %5386 = vmatprep.subr.mxu1 %v12393_v22  ;;  %v12487_v14 = vld [vmem:[#allocation35_spill] sm:$0xff]  ;;  %v12502_v37 = vld [vmem:[#allocation50_spill] sm:$0xff] }
 0x18f   :  { %1074 = vmatpush1.msra.mxu0 %v7279_v15  ;;  %5387 = vmatpush3.msra.mxu1 %v7434_v38  ;;  %v12488_v15 = vld [vmem:[#allocation36_spill] sm:$0xff]  ;;  %v12503_v38 = vld [vmem:[#allocation51_spill] sm:$0xff] }
 0x190   :  { %1075 = vmatprep.subr.mxu0 %v7289_v17  ;;  %5388 = vmatprep.subr.mxu1 %v12393_v22  ;;  %v12489_v17 = vld [vmem:[#allocation37_spill] sm:$0xff] }
 0x191   :  { %1076 = vmatpush1.msra.mxu0 %v7295_v18  ;;  %5389 = vmatpush3.msra.mxu1 %v7441_v39  ;;  %v12490_v18 = vld [vmem:[#allocation38_spill] sm:$0xff]  ;;  %v12504_v39 = vld [vmem:[#allocation52_spill] sm:$0xff] }
 0x192   :  { %1077 = vmatprep.subr.mxu0 %v7302_v19  ;;  %5390 = vmatprep.subr.mxu1 %v12393_v22  ;;  %v12491_v19 = vld [vmem:[#allocation39_spill] sm:$0xff] }
 0x193   :  { %1078 = vmatpush1.msra.mxu0 %v12465_v45  ;;  %5391 = vmatpush3.msra.mxu1 %v12466_v46  ;;  %v12505_v45 = vld [vmem:[#allocation53_spill] sm:$0xff]  ;;  %v12506_v46 = vld [vmem:[#allocation54_spill] sm:$0xff] }
 0x194   :  { %1079 = vmatprep.subr.mxu0 %v12467_v47  ;;  %5392 = vmatprep.subr.mxu1 %v12393_v22  ;;  %v12507_v47 = vld [vmem:[#allocation55_spill] sm:$0xff] }
 0x195   :  { %1080 = vmatpush1.msra.mxu0 %v12468_v49  ;;  %5393 = vmatpush3.msra.mxu1 %v12469_v51  ;;  %v12508_v49 = vld [vmem:[#allocation56_spill] sm:$0xff]  ;;  %v12509_v51 = vld [vmem:[#allocation57_spill] sm:$0xff] }
 0x196   :  { %1081 = vmatprep.subr.mxu0 %v12470_v52  ;;  %5394 = vmatprep.subr.mxu1 %v12393_v22  ;;  %v12510_v52 = vld [vmem:[#allocation58_spill] sm:$0xff] }
 0x197   :  { %1082 = vmatpush1.msra.mxu0 %v12471_v53  ;;  %1115 = vmatprep.mubr.f32.mxu0 %v12393_v22  ;;  %v12511_v53 = vld [vmem:[#allocation59_spill] sm:$0xff] }
 0x198   :  { %5395 = vmatpush3.msra.mxu1 %v12472_v55  ;;  %5396 = vmatprep.mubr.msk.f32.mxu1 %vm6863_vm0, %v12393_v22  ;;  %v12512_v55 = vld [vmem:[#allocation60_spill] sm:$0xff] }
 0x199   :  { %1116 = vmatmul.mubr.f32.vlgmr.msra.gmra.mxu0 %v7844_v26  ;;  %5397 = vmatmul.mubr.f32.vlgmr.msra.gmra.mxu1 %v7844_v26 }
 0x19a   :  { %1214 = vmatprep.subr.mxu0 %v12473_v57  ;;  %5399 = vmatprep.subr.mxu1 %v12393_v22  ;;  %v12513_v57 = vld [vmem:[#allocation61_spill] sm:$0xff] }
 0x19b   :  { %1215 = vmatpush1.msra.mxu0 %v12474_v58  ;;  %5400 = vmatpush3.msra.mxu1 %v12475_v59  ;;  %v12514_v58 = vld [vmem:[#allocation62_spill] sm:$0xff]  ;;  %v12515_v59 = vld [vmem:[#allocation63_spill] sm:$0xff] }
 0x19c   :  { %1216 = vmatprep.subr.mxu0 %v12476_v61  ;;  %5401 = vmatprep.subr.mxu1 %v12393_v22  ;;  %v12516_v61 = vld [vmem:[#allocation64_spill] sm:$0xff] }
 0x19d   :  { %1217 = vmatpush1.msra.mxu0 %v12477_v63  ;;  %5402 = vmatpush3.msra.mxu1 %v12478_v1  ;;  %v12517_v63 = vld [vmem:[#allocation65_spill] sm:$0xff]  ;;  %v12518_v1 = vld [vmem:[#allocation66_spill] sm:$0xff] }
 0x19e   :  { %1218 = vmatprep.subr.mxu0 %v12479_v2  ;;  %5403 = vmatprep.subr.mxu1 %v12393_v22  ;;  %v12519_v2 = vld [vmem:[#allocation67_spill] sm:$0xff] }
 0x19f   :  { %1219 = vmatpush1.msra.mxu0 %v12480_v4  ;;  %5404 = vmatpush3.msra.mxu1 %v12481_v6  ;;  %v12520_v4 = vld [vmem:[#allocation68_spill] sm:$0xff]  ;;  %v12521_v6 = vld [vmem:[#allocation69_spill] sm:$0xff] }
 0x1a0   :  { %1220 = vmatprep.subr.mxu0 %v12482_v7  ;;  %5405 = vmatprep.subr.mxu1 %v12393_v22 }
 0x1a1   :  { %1221 = vmatpush1.msra.mxu0 %v12483_v8  ;;  %5406 = vmatpush3.msra.mxu1 %v12484_v10  ;;  %v545_v10 = vld [vmem:[%s11983_s8] sm:$0x7] }
 0x1a2   :  { %1222 = vmatprep.subr.mxu0 %v12485_v12  ;;  %5407 = vmatprep.subr.mxu1 %v12393_v22 }
 0x1a3   :  { %1223 = vmatpush1.msra.mxu0 %v12486_v13  ;;  %5408 = vmatpush3.msra.mxu1 %v12487_v14  ;;  %v12522_v13 = vld [vmem:[#allocation70_spill] sm:$0xff] }
 0x1a4   :  { %1224 = vmatprep.subr.mxu0 %v12488_v15  ;;  %5409 = vmatprep.subr.mxu1 %v12393_v22  ;;  %v12523_v14 = vsub.s32 0, %v12522_v13 }
 0x1a5   :  { %1225 = vmatpush1.msra.mxu0 %v12489_v17  ;;  %5410 = vmatpush3.msra.mxu1 %v12490_v18 }
 0x1a6   :  { %1226 = vmatprep.subr.mxu0 %v12491_v19  ;;  %5411 = vmatprep.subr.mxu1 %v12393_v22  ;;  %v8298_v15 = vrot.slane %v545_v10, %v12523_v14 }
 0x1a7   :  { %1227 = vmatpush1.msra.mxu0 %v12492_v21  ;;  %5412 = vmatpush3.msra.mxu1 %v12493_v27 }
 0x1a8   :  { %1228 = vmatprep.subr.mxu0 %v12494_v29  ;;  %5413 = vmatprep.subr.mxu1 %v12393_v22  ;;  %12524 = vst [vmem:[#allocation13_spill] sm:$0xff] %v8298_v15 }
 0x1a9   :  { %1229 = vmatpush1.msra.mxu0 %v12495_v30  ;;  %5414 = vmatpush3.msra.mxu1 %v12496_v31 }
 0x1aa   :  { %1230 = vmatprep.subr.mxu0 %v12497_v32  ;;  %5415 = vmatprep.subr.mxu1 %v12393_v22 }
 0x1ab   :  { %1231 = vmatpush1.msra.mxu0 %v12498_v33  ;;  %5416 = vmatpush3.msra.mxu1 %v12499_v34  ;;  %v8304_v33 = vld [vmem:[%s11984_s9] ss:$0 sm:$0xff]  ;;  %v12525_v34 = vsub.s32 2, %v12522_v13 }
 0x1ac   :  { %1232 = vmatprep.subr.mxu0 %v12500_v35  ;;  %5417 = vmatprep.subr.mxu1 %v12393_v22 }
 0x1ad   :  { %1233 = vmatpush1.msra.mxu0 %v12501_v36  ;;  %5418 = vmatpush3.msra.mxu1 %v12502_v37  ;;  %v8308_v35 = vrot.slane %v545_v10, %v12525_v34  ;;  %v12544_v34 = vld [vmem:[#allocation106_spill] sm:$0xff] }
 0x1ae   :  { %1234 = vmatprep.subr.mxu0 %v12503_v38  ;;  %5419 = vmatprep.subr.mxu1 %v12393_v22 }
 0x1af   :  { %1235 = vmatpush1.msra.mxu0 %v12504_v39  ;;  %5420 = vmatpush3.msra.mxu1 %v12505_v45 }
 0x1b0   :  { %1236 = vmatprep.subr.mxu0 %v12506_v46  ;;  %5421 = vmatprep.subr.mxu1 %v12393_v22 }
 0x1b1   :  { %1237 = vmatpush1.msra.mxu0 %v12507_v47  ;;  %5422 = vmatpush3.msra.mxu1 %v12508_v49  ;;  %v12526_v49 = vld [vmem:[#allocation71_spill] sm:$0xff] }
 0x1b2   :  { %1238 = vmatprep.subr.mxu0 %v12509_v51  ;;  %5423 = vmatprep.subr.mxu1 %v12393_v22 }
 0x1b3   :  { %1239 = vmatpush1.msra.mxu0 %v12510_v52  ;;  %5424 = vmatpush3.msra.mxu1 %v12511_v53 }
 0x1b4   :  { %1240 = vmatprep.subr.mxu0 %v12512_v55  ;;  %5425 = vmatprep.subr.mxu1 %v12393_v22 }
 0x1b5   :  { %1241 = vmatpush1.msra.mxu0 %v12513_v57  ;;  %5426 = vmatpush3.msra.mxu1 %v12514_v58  ;;  %v12527_v58 = vld [vmem:[#allocation72_spill] sm:$0xff] }
 0x1b6   :  { %1242 = vmatprep.subr.mxu0 %v12515_v59  ;;  %5427 = vmatprep.subr.mxu1 %v12393_v22 }
 0x1b7   :  { %1243 = vmatpush1.msra.mxu0 %v12516_v61  ;;  %5428 = vmatpush3.msra.mxu1 %v12517_v63 }
 0x1b8   :  { %1244 = vmatprep.subr.mxu0 %v12518_v1  ;;  %5429 = vmatprep.subr.mxu1 %v12393_v22 }
 0x1b9   :  { %1245 = vmatpush1.msra.mxu0 %v12519_v2  ;;  %5430 = vmatpush3.msra.mxu1 %v12520_v4 }
 0x1ba   :  { %1278 = vmatprep.mubr.f32.mxu0 %v12393_v22  ;;  %5431 = vmatprep.mubr.msk.f32.mxu1 %vm6863_vm0, %v12393_v22 }
 0x1bb   :  { %1355 = vmatprep.subr.mxu0 %v12521_v6  ;;  %5434 = vmatprep.subr.mxu1 %v12393_v22  ;;  %v12528_v6 = vsub.s32 1, %v12522_v13 }
 0x216   :  { %v877_v7 = vpop.f32.mrf.mxu1  ;;  %v806_v12 = vpop.f32.mrf.mxu0 }
 0x217   :  { %v807_v18 = vadd.f32 %v806_v12, %v8298_v15  ;;  %v878_v39 = vadd.f32 %v877_v7, %v8308_v35  ;;  %v8316_v7 = vrot.slane %v545_v10, %v12528_v6  ;;  %v8456_v6 = vld [vmem:[%s11978_s3 + $0x128] sm:$0xff] }
 0x218   :  { %v5328_v8 = vpop.f32.mrf.mxu1  ;;  %v808_v17 = vpop.f32.mrf.mxu0 }
 0x236   :  { %v947_v19 = vpop.f32.mrf.mxu0 }
 0x237   :  { %v1022_v21 = vadd.f32 %v947_v19, %v807_v18  ;;  %v809_v18 = vadd.f32 %v808_v17, %v8316_v7  ;;  %v12543_v17 = vld [vmem:[#allocation105_spill] sm:$0xff] }
 0x238   :  { %v1018_v27 = vpop.f32.mrf.mxu1  ;;  %v949_v37 = vpop.f32.mrf.mxu0 }
 0x239   :  { %v4703_v29 = vmul.f32 -1.442695, %v1022_v21  ;;  %v1036_v36 = vadd.f32 %v8304_v33, %v1018_v27  ;;  %v1029_v21 = vadd.f32 %v949_v37, %v809_v18  ;;  %v12546_v37 = vld [vmem:[#allocation108_spill] sm:$0xff] }
 0x23a   :  { %v5363_v30 = vpop.f32.mrf.mxu1  ;;  %v8482_v18 = vld [vmem:[%s11978_s3 + $0x108] sm:$0xff] }
 0x23b   :  { %6204 = vpow2.f32 %v4703_v29  ;;  %v4704_v27 = vmul.f32 -1.442695, %v1029_v21  ;;  %v8494_v21 = vld [vmem:[%s11978_s3 + $0xf8] sm:$0xff] }
 0x248   :  { %v6205_v31 = vpop.eup %6204 }
 0x249   :  { %v1026_v32 = vadd.f32 1.0, %v6205_v31 }
 0x24b   :  { %6206 = vrcp.f32 %v1026_v32 }
 0x258   :  { %v6207_v38 = vpop.eup %6206 }
 0x259   :  { %v1037_v45 = vmul.f32 %v6207_v38, %v1036_v36  ;;  %v1117_v46 = vpop.f32.mrf.mxu0  ;;  %v1188_v47 = vpop.f32.mrf.mxu1  ;;  %v12545_v36 = vld [vmem:[#allocation107_spill] sm:$0xff]  ;;  %v12547_v38 = vld [vmem:[#allocation109_spill] sm:$0xff] }
 0x25a   :  { %v1192_v51 = vadd.f32 %v1117_v46, %v12526_v49  ;;  %v1206_v8 = vadd.f32 %v7840_v40, %v1188_v47  ;;  %v12529_v40 = vld [vmem:[#allocation91_spill] sm:$0xff]  ;;  %v12550_v47 = vld [vmem:[#allocation112_spill] sm:$0xff] }
 0x25b   :  { %v1038_v52 = vadd.f32 %v1037_v45, %v878_v39  ;;  %v5398_v53 = vpop.f32.mrf.mxu1  ;;  %v1119_v57 = vpop.f32.mrf.mxu0  ;;  %v12548_v45 = vld [vmem:[#allocation110_spill] sm:$0xff]  ;;  %v12549_v46 = vld [vmem:[#allocation111_spill] sm:$0xff] }
 0x25c   :  { %v4705_v55 = vmul.f32 -1.442695, %v1192_v51  ;;  %v1199_v59 = vadd.f32 %v1119_v57, %v12527_v58  ;;  %v12551_v51 = vld [vmem:[#allocation113_spill] sm:$0xff]  ;;  %v12553_v53 = vld [vmem:[#allocation115_spill] sm:$0xff]  ;;  %v12554_v57 = vld [vmem:[#allocation116_spill] sm:$0xff] }
 0x25d   :  { %v12555_v58 = vld [vmem:[#allocation117_spill] sm:$0xff] }
 0x25e   :  { %6208 = vpow2.f32 %v4705_v55  ;;  %v4706_v61 = vmul.f32 -1.442695, %v1199_v59 }
 0x260   :  { %6210 = vpow2.f32 %v4706_v61  ;;  %v12556_v61 = vld [vmem:[#allocation118_spill] sm:$0xff] }
 0x26b   :  { %v6209_v63 = vpop.eup %6208 }
 0x26c   :  { %v1196_v1 = vadd.f32 1.0, %v6209_v63 }
 0x26d   :  { %v6211_v2 = vpop.eup %6210 }
 0x26e   :  { %6212 = vrcp.f32 %v1196_v1  ;;  %v1203_v4 = vadd.f32 1.0, %v6211_v2  ;;  %v8437_v1 = vld [vmem:[%s11978_s3 + $0x140] sm:$0xff]  ;;  %v8444_v2 = vld [vmem:[%s11978_s3 + $0x138] sm:$0xff] }
 0x270   :  { %6214 = vrcp.f32 %v1203_v4  ;;  %v8450_v4 = vld [vmem:[%s11978_s3 + $0x148] sm:$0xff] }
 0x27b   :  { %v6213_v12 = vpop.eup %6212 }
 0x27c   :  { %v1207_v14 = vmul.f32 %v6213_v12, %v1206_v8  ;;  %v8463_v8 = vld [vmem:[%s11978_s3 + $0x120] sm:$0xff]  ;;  %v8469_v12 = vld [vmem:[%s11978_s3 + $0x130] sm:$0xff] }
 0x27d   :  { %v6215_v29 = vpop.eup %6214 }
 0x27e   :  { %v1208_v19 = vadd.f32 %v1207_v14, %v7819_v3  ;;  %v1210_v30 = vsub.f32 1.0, %v6215_v29  ;;  %v1212_v10 = vmul.f32 %v6215_v29, %v7844_v26  ;;  %v8475_v14 = vld [vmem:[%s11978_s3 + $0x110] sm:$0xff]  ;;  %v8507_v29 = vld [vmem:[%s11978_s3 + $0x100] sm:$0xff] }
 0x280   :  { %6216 = vtanh.f32 %v1208_v19  ;;  %v8488_v19 = vld [vmem:[%s11978_s3 + $0x118] sm:$0xff] }
 0x281   :  { %6218 = vpow2.f32 %v4704_v27  ;;  %v8501_v27 = vld [vmem:[%s11978_s3 + $0xf0] sm:$0xff] }
 0x28d   :  { %v6217_v31 = vpop.eup %6216 }
 0x28e   :  { %v1211_v32 = vmul.f32 %v6217_v31, %v1210_v30  ;;  %v6219_v3 = vpop.eup %6218  ;;  %v8513_v30 = vld [vmem:[%s11978_s3 + $0xe0] sm:$0xff]  ;;  %v8520_v31 = vld [vmem:[%s11978_s3 + $0xd8] sm:$0xff] }
 0x28f   :  { %v1033_v26 = vadd.f32 1.0, %v6219_v3  ;;  %v8539_v3 = vld [vmem:[%s11978_s3 + $0xc0] sm:$0xff] }
 0x290   :  { %v8322_v13 = vadd.f32 %v1212_v10, %v1211_v32  ;;  %v8526_v32 = vld [vmem:[%s11978_s3 + $0xe8] sm:$0xff] }
 0x291   :  { %6220 = vrcp.f32 %v1033_v26  ;;  %v8532_v10 = vld [vmem:[%s11978_s3 + $0xc8] sm:$0xff]  ;;  %v8545_v26 = vld [vmem:[%s11978_s3 + $0xd0] sm:$0xff] }
 0x292   :  { %1279 = vmatmul.mubr.f32.vlgmr.msra.gmra.mxu0 %v8322_v13  ;;  %5432 = vmatmul.mubr.f32.vlgmr.msra.gmra.mxu1 %v8322_v13  ;;  %6222 = vtanh.f32 %v1038_v52  ;;  %v12552_v52 = vld [vmem:[#allocation114_spill] sm:$0xff] }
 0x293   :  { %1356 = vmatpush1.msra.mxu0 %v7849_v20  ;;  %5435 = vmatpush3.msra.mxu1 %v7854_v42  ;;  %v12530_v20 = vld [vmem:[#allocation92_spill] sm:$0xff]  ;;  %v12531_v42 = vld [vmem:[#allocation93_spill] sm:$0xff] }
 0x294   :  { %1357 = vmatprep.subr.mxu0 %v7859_v25  ;;  %5436 = vmatprep.subr.mxu1 %v12393_v22  ;;  %v12532_v25 = vld [vmem:[#allocation94_spill] sm:$0xff] }
 0x295   :  { %1358 = vmatpush1.msra.mxu0 %v7866_v28  ;;  %5437 = vmatpush3.msra.mxu1 %v7871_v44  ;;  %v12533_v28 = vld [vmem:[#allocation95_spill] sm:$0xff]  ;;  %v12534_v44 = vld [vmem:[#allocation96_spill] sm:$0xff] }
 0x296   :  { %1359 = vmatprep.subr.mxu0 %v7878_v43  ;;  %5438 = vmatprep.subr.mxu1 %v12393_v22  ;;  %v12535_v43 = vld [vmem:[#allocation97_spill] sm:$0xff] }
 0x297   :  { %1360 = vmatpush1.msra.mxu0 %v7885_v16  ;;  %5439 = vmatpush3.msra.mxu1 %v7890_v5  ;;  %v12536_v16 = vld [vmem:[#allocation98_spill] sm:$0xff]  ;;  %v12537_v5 = vld [vmem:[#allocation99_spill] sm:$0xff] }
 0x298   :  { %1361 = vmatprep.subr.mxu0 %v7897_v24  ;;  %5440 = vmatprep.subr.mxu1 %v12393_v22  ;;  %v12538_v24 = vld [vmem:[#allocation100_spill] sm:$0xff] }
 0x299   :  { %1362 = vmatpush1.msra.mxu0 %v7904_v62  ;;  %5441 = vmatpush3.msra.mxu1 %v7909_v56  ;;  %v12539_v62 = vld [vmem:[#allocation101_spill] sm:$0xff]  ;;  %v12540_v56 = vld [vmem:[#allocation102_spill] sm:$0xff] }
 0x29a   :  { %1363 = vmatprep.subr.mxu0 %v7916_v0  ;;  %5442 = vmatprep.subr.mxu1 %v12393_v22  ;;  %v12541_v0 = vld [vmem:[#allocation103_spill] sm:$0xff] }
 0x29b   :  { %1364 = vmatpush1.msra.mxu0 %v7923_v48  ;;  %5443 = vmatpush3.msra.mxu1 %v12529_v40  ;;  %v12542_v48 = vld [vmem:[#allocation104_spill] sm:$0xff]  ;;  %v8551_v40 = vld [vmem:[%s11978_s3 + $0xb0] sm:$0xff] }
 0x29c   :  { %1365 = vmatprep.subr.mxu0 %v12530_v20  ;;  %5444 = vmatprep.subr.mxu1 %v12393_v22  ;;  %v8558_v20 = vld [vmem:[%s11978_s3 + $0xa8] sm:$0xff] }
 0x29d   :  { %1366 = vmatpush1.msra.mxu0 %v12531_v42  ;;  %5445 = vmatpush3.msra.mxu1 %v12532_v25  ;;  %v8564_v42 = vld [vmem:[%s11978_s3 + $0xb8] sm:$0xff] }
 0x29e   :  { %1367 = vmatprep.subr.mxu0 %v12533_v28  ;;  %5446 = vmatprep.subr.mxu1 %v12393_v22  ;;  %v6221_v39 = vpop.eup %6220  ;;  %v8570_v25 = vld [vmem:[%s11978_s3 + $0x98] sm:$0xff]  ;;  %v8577_v28 = vld [vmem:[%s11978_s3 + $0x90] sm:$0xff] }
 0x29f   :  { %1368 = vmatpush1.msra.mxu0 %v12534_v44  ;;  %5447 = vmatpush3.msra.mxu1 %v12535_v43  ;;  %v6223_v49 = vpop.eup %6222  ;;  %v1040_v55 = vsub.f32 1.0, %v6221_v39  ;;  %v1042_v63 = vmul.f32 %v6221_v39, %v8144_v9  ;;  %v8412_v9 = vld [vmem:[%s11978_s3 + $0x178] sm:$0xff]  ;;  %v8583_v44 = vld [vmem:[%s11978_s3 + $0xa0] sm:$0xff] }
 0x2a0   :  { %1369 = vmatprep.subr.mxu0 %v12536_v16  ;;  %5448 = vmatprep.subr.mxu1 %v12393_v22  ;;  %v8589_v43 = vld [vmem:[%s11978_s3 + $0x80] sm:$0xff]  ;;  %v8596_v16 = vld [vmem:[%s11978_s3 + $0x78] sm:$0xff] }
 0x2a1   :  { %1370 = vmatpush1.msra.mxu0 %v12537_v5  ;;  %5449 = vmatpush3.msra.mxu1 %v12538_v24  ;;  %v1041_v59 = vmul.f32 %v6223_v49, %v1040_v55  ;;  %v8602_v5 = vld [vmem:[%s11978_s3 + $0x88] sm:$0xff]  ;;  %v8672_v39 = vld [vmem:[%s11978_s3 + $0x18] sm:$0xff]  ;;  %v8698_v49 = vld [vmem:[%s11978_s3 + $0x10] sm:$0xff] }
 0x2a2   :  { %1371 = vmatprep.subr.mxu0 %v12539_v62  ;;  %5450 = vmatprep.subr.mxu1 %v12393_v22  ;;  %v8608_v24 = vld [vmem:[%s11978_s3 + $0x68] sm:$0xff]  ;;  %v8615_v62 = vld [vmem:[%s11978_s3 + $0x60] sm:$0xff]  ;;  %12564 = vst [vmem:[#allocation21_spill] sm:$0xff] %v8672_v39  ;;  %12568 = vst [vmem:[#allocation25_spill] sm:$0xff] %v8698_v49 }
 0x2a3   :  { %1372 = vmatpush1.msra.mxu0 %v12540_v56  ;;  %5451 = vmatpush3.msra.mxu1 %v12541_v0  ;;  %v8621_v56 = vld [vmem:[%s11978_s3 + $0x70] sm:$0xff]  ;;  %v8727_v55 = vld [vmem:[%s11981_s6 + $0x158] sm:$0xff] }
 0x2a4   :  { %1373 = vmatprep.subr.mxu0 %v12542_v48  ;;  %5452 = vmatprep.subr.mxu1 %v12393_v22  ;;  %v8627_v0 = vld [vmem:[%s11978_s3 + $0x50] sm:$0xff]  ;;  %v8634_v48 = vld [vmem:[%s11978_s3 + $0x48] sm:$0xff]  ;;  %12572 = vst [vmem:[#allocation28_spill] sm:$0xff] %v8727_v55 }
 0x2a5   :  { %1374 = vmatpush1.msra.mxu0 %v12543_v17  ;;  %5453 = vmatpush3.msra.mxu1 %v12544_v34  ;;  %12558 = vst [vmem:[#allocation14_spill] sm:$0xff] %v8634_v48  ;;  %v8640_v17 = vld [vmem:[%s11978_s3 + $0x58] sm:$0xff] }
 0x2a6   :  { %1375 = vmatprep.subr.mxu0 %v12545_v36  ;;  %5454 = vmatprep.subr.mxu1 %v12393_v22  ;;  %12559 = vst [vmem:[#allocation15_spill] sm:$0xff] %v8640_v17  ;;  %v8646_v34 = vld [vmem:[%s11978_s3 + $0x38] sm:$0xff]  ;;  %v8653_v36 = vld [vmem:[%s11978_s3 + $0x30] sm:$0xff] }
 0x2a7   :  { %1376 = vmatpush1.msra.mxu0 %v12546_v37  ;;  %5455 = vmatpush3.msra.mxu1 %v12547_v38  ;;  %12560 = vst [vmem:[#allocation19_spill] sm:$0xff] %v8646_v34  ;;  %12561 = vst [vmem:[#allocation16_spill] sm:$0xff] %v8653_v36  ;;  %v8659_v37 = vld [vmem:[%s11978_s3 + $0x40] sm:$0xff] }
 0x2a8   :  { %1377 = vmatprep.subr.mxu0 %v12548_v45  ;;  %5456 = vmatprep.subr.mxu1 %v12393_v22  ;;  %12562 = vst [vmem:[#allocation17_spill] sm:$0xff] %v8659_v37  ;;  %v8665_v38 = vld [vmem:[%s11978_s3 + $0x20] sm:$0xff]  ;;  %v8678_v45 = vld [vmem:[%s11978_s3 + $0x28] sm:$0xff] }
 0x2a9   :  { %1378 = vmatpush1.msra.mxu0 %v12549_v46  ;;  %5457 = vmatpush3.msra.mxu1 %v12550_v47  ;;  %12563 = vst [vmem:[#allocation20_spill] sm:$0xff] %v8665_v38  ;;  %12565 = vst [vmem:[#allocation22_spill] sm:$0xff] %v8678_v45  ;;  %v8684_v46 = vld [vmem:[%s11978_s3 + $0x8] sm:$0xff]  ;;  %v8691_v47 = vld [vmem:[%s11978_s3] sm:$0xff] }
 0x2aa   :  { %1379 = vmatprep.subr.mxu0 %v12551_v51  ;;  %5458 = vmatprep.subr.mxu1 %v12393_v22  ;;  %12566 = vst [vmem:[#allocation23_spill] sm:$0xff] %v8684_v46  ;;  %12567 = vst [vmem:[#allocation24_spill] sm:$0xff] %v8691_v47  ;;  %v8708_v51 = vld [vmem:[%s11981_s6 + $0x170] sm:$0xff] }
 0x2ab   :  { %1380 = vmatpush1.msra.mxu0 %v12552_v52  ;;  %5459 = vmatpush3.msra.mxu1 %v12553_v53  ;;  %12569 = vst [vmem:[#allocation26_spill] sm:$0xff] %v8708_v51  ;;  %v8715_v52 = vld [vmem:[%s11981_s6 + $0x168] sm:$0xff]  ;;  %v8721_v53 = vld [vmem:[%s11981_s6 + $0x178] sm:$0xff] }
 0x2ac   :  { %1381 = vmatprep.subr.mxu0 %v12554_v57  ;;  %5460 = vmatprep.subr.mxu1 %v12393_v22  ;;  %12570 = vst [vmem:[#allocation27_spill] sm:$0xff] %v8715_v52  ;;  %12571 = vst [vmem:[#allocation29_spill] sm:$0xff] %v8721_v53  ;;  %v8734_v57 = vld [vmem:[%s11981_s6 + $0x150] sm:$0xff] }
 0x2ad   :  { %1382 = vmatpush1.msra.mxu0 %v8094_v54  ;;  %5461 = vmatpush3.msra.mxu1 %v12555_v58  ;;  %v8389_v54 = vadd.f32 %v1042_v63, %v1041_v59  ;;  %12573 = vst [vmem:[#allocation30_spill] sm:$0xff] %v8734_v57  ;;  %v8740_v58 = vld [vmem:[%s11981_s6 + $0x160] sm:$0xff]  ;;  %v8759_v63 = vld [vmem:[%s11981_s6 + $0x148] sm:$0xff] }
 0x2ae   :  { %1383 = vmatprep.subr.mxu0 %v12556_v61  ;;  %5462 = vmatprep.subr.mxu1 %v12393_v22  ;;  %12574 = vst [vmem:[#allocation31_spill] sm:$0xff] %v8740_v58  ;;  %v8746_v59 = vld [vmem:[%s11981_s6 + $0x140] sm:$0xff]  ;;  %v8753_v61 = vld [vmem:[%s11981_s6 + $0x138] sm:$0xff]  ;;  %12577 = vst [vmem:[#allocation34_spill] sm:$0xff] %v8759_v63 }
 0x2af   :  { %1384 = vmatpush1.msra.mxu0 %v8113_v23  ;;  %5463 = vmatpush3.msra.mxu1 %v8118_v11  ;;  %12557 = vst [vmem:[#allocation18_spill] sm:$0xff] %v8389_v54  ;;  %v8399_v23 = vld [vmem:[%s11978_s3 + $0x170] sm:$0xff]  ;;  %v8418_v11 = vld [vmem:[%s11978_s3 + $0x158] sm:$0xff]  ;;  %12575 = vst [vmem:[#allocation32_spill] sm:$0xff] %v8746_v59 }
 0x2b0   :  { %1385 = vmatprep.subr.mxu0 %v8125_v50  ;;  %5464 = vmatprep.subr.mxu1 %v12393_v22  ;;  %v8425_v50 = vld [vmem:[%s11978_s3 + $0x150] sm:$0xff]  ;;  %12576 = vst [vmem:[#allocation33_spill] sm:$0xff] %v8753_v61 }
 0x2b1   :  { %1386 = vmatpush1.msra.mxu0 %v8132_v60  ;;  %1419 = vmatprep.mubr.f32.mxu0 %v12393_v22  ;;  %v8431_v60 = vld [vmem:[%s11978_s3 + $0x160] sm:$0xff] }
 0x2b2   :  { %5465 = vmatpush3.msra.mxu1 %v8139_v41  ;;  %5466 = vmatprep.mubr.msk.f32.mxu1 %vm6863_vm0, %v12393_v22  ;;  %v8406_v41 = vld [vmem:[%s11978_s3 + $0x168] sm:$0xff] }
 0x2b3   :  { %1420 = vmatmul.mubr.f32.vlgmr.msra.gmra.mxu0 %v8389_v54  ;;  %5467 = vmatmul.mubr.f32.vlgmr.msra.gmra.mxu1 %v8389_v54 }
 0x2b4   :  { %1526 = vmatprep.subr.mxu0 %v8399_v23  ;;  %5469 = vmatprep.subr.mxu1 %v12393_v22 }
 0x2b5   :  { %1527 = vmatpush1.msra.mxu0 %v8406_v41  ;;  %5470 = vmatpush3.msra.mxu1 %v8412_v9 }
 0x2b6   :  { %1528 = vmatprep.subr.mxu0 %v8418_v11  ;;  %5471 = vmatprep.subr.mxu1 %v12393_v22 }
 0x2b7   :  { %1529 = vmatpush1.msra.mxu0 %v8425_v50  ;;  %5472 = vmatpush3.msra.mxu1 %v8431_v60 }
 0x2b8   :  { %1530 = vmatprep.subr.mxu0 %v8437_v1  ;;  %5473 = vmatprep.subr.mxu1 %v12393_v22 }
 0x2b9   :  { %1531 = vmatpush1.msra.mxu0 %v8444_v2  ;;  %5474 = vmatpush3.msra.mxu1 %v8450_v4 }
 0x2ba   :  { %1532 = vmatprep.subr.mxu0 %v8456_v6  ;;  %5475 = vmatprep.subr.mxu1 %v12393_v22 }
 0x2bb   :  { %1533 = vmatpush1.msra.mxu0 %v8463_v8  ;;  %5476 = vmatpush3.msra.mxu1 %v8469_v12 }
 0x2bc   :  { %1534 = vmatprep.subr.mxu0 %v8475_v14  ;;  %5477 = vmatprep.subr.mxu1 %v12393_v22 }
 0x2bd   :  { %1535 = vmatpush1.msra.mxu0 %v8482_v18  ;;  %5478 = vmatpush3.msra.mxu1 %v8488_v19 }
 0x2be   :  { %1536 = vmatprep.subr.mxu0 %v8494_v21  ;;  %5479 = vmatprep.subr.mxu1 %v12393_v22 }
 0x2bf   :  { %1537 = vmatpush1.msra.mxu0 %v8501_v27  ;;  %5480 = vmatpush3.msra.mxu1 %v8507_v29 }
 0x2c0   :  { %1538 = vmatprep.subr.mxu0 %v8513_v30  ;;  %5481 = vmatprep.subr.mxu1 %v12393_v22 }
 0x2c1   :  { %1539 = vmatpush1.msra.mxu0 %v8520_v31  ;;  %5482 = vmatpush3.msra.mxu1 %v8526_v32 }
 0x2c2   :  { %1540 = vmatprep.subr.mxu0 %v8532_v10  ;;  %5483 = vmatprep.subr.mxu1 %v12393_v22 }
 0x2c3   :  { %1541 = vmatpush1.msra.mxu0 %v8539_v3  ;;  %5484 = vmatpush3.msra.mxu1 %v8545_v26 }
 0x2c4   :  { %1542 = vmatprep.subr.mxu0 %v8551_v40  ;;  %5485 = vmatprep.subr.mxu1 %v12393_v22 }
 0x2c5   :  { %1543 = vmatpush1.msra.mxu0 %v8558_v20  ;;  %5486 = vmatpush3.msra.mxu1 %v8564_v42 }
 0x2c6   :  { %1544 = vmatprep.subr.mxu0 %v8570_v25  ;;  %5487 = vmatprep.subr.mxu1 %v12393_v22 }
 0x2c7   :  { %1545 = vmatpush1.msra.mxu0 %v8577_v28  ;;  %5488 = vmatpush3.msra.mxu1 %v8583_v44 }
 0x2c8   :  { %1546 = vmatprep.subr.mxu0 %v8589_v43  ;;  %5489 = vmatprep.subr.mxu1 %v12393_v22 }
 0x2c9   :  { %1547 = vmatpush1.msra.mxu0 %v8596_v16  ;;  %5490 = vmatpush3.msra.mxu1 %v8602_v5 }
 0x2ca   :  { %1548 = vmatprep.subr.mxu0 %v8608_v24  ;;  %5491 = vmatprep.subr.mxu1 %v12393_v22 }
 0x2cb   :  { %1549 = vmatpush1.msra.mxu0 %v8615_v62  ;;  %5492 = vmatpush3.msra.mxu1 %v8621_v56 }
 0x2cc   :  { %1550 = vmatprep.subr.mxu0 %v8627_v0  ;;  %5493 = vmatprep.subr.mxu1 %v12393_v22 }
 0x2cd   :  { %1551 = vmatpush1.msra.mxu0 %v8634_v48  ;;  %5494 = vmatpush3.msra.mxu1 %v8640_v17  ;;  %v12618_v17 = vld [vmem:[#allocation73_spill] sm:$0xff] }
 0x2ce   :  { %1552 = vmatprep.subr.mxu0 %v8646_v34  ;;  %5495 = vmatprep.subr.mxu1 %v12393_v22 }
 0x2cf   :  { %1553 = vmatpush1.msra.mxu0 %v8653_v36  ;;  %5496 = vmatpush3.msra.mxu1 %v8659_v37 }
 0x2d0   :  { %1554 = vmatprep.subr.mxu0 %v8665_v38  ;;  %5497 = vmatprep.subr.mxu1 %v12393_v22 }
 0x2d1   :  { %1555 = vmatpush1.msra.mxu0 %v8672_v39  ;;  %5498 = vmatpush3.msra.mxu1 %v8678_v45 }
 0x2d2   :  { %1556 = vmatprep.subr.mxu0 %v8684_v46  ;;  %5499 = vmatprep.subr.mxu1 %v12393_v22 }
 0x2d3   :  { %1557 = vmatpush1.msra.mxu0 %v8691_v47  ;;  %1590 = vmatprep.mubr.f32.mxu0 %v12393_v22 }
 0x2d4   :  { %5500 = vmatpush3.msra.mxu1 %v8698_v49  ;;  %5501 = vmatprep.mubr.msk.f32.mxu1 %vm6863_vm0, %v12393_v22 }
 0x2d5   :  { %1591 = vmatmul.mubr.f32.vlgmr.msra.gmra.mxu0 %v8322_v13  ;;  %5502 = vmatmul.mubr.f32.vlgmr.msra.gmra.mxu1 %v8322_v13 }
 0x2d6   :  { %1689 = vmatprep.subr.mxu0 %v8708_v51  ;;  %5504 = vmatprep.subr.mxu1 %v12393_v22 }
 0x2d7   :  { %1690 = vmatpush1.msra.mxu0 %v8715_v52  ;;  %5505 = vmatpush3.msra.mxu1 %v8721_v53 }
 0x2d8   :  { %1691 = vmatprep.subr.mxu0 %v8727_v55  ;;  %5506 = vmatprep.subr.mxu1 %v12393_v22 }
 0x2d9   :  { %1692 = vmatpush1.msra.mxu0 %v8734_v57  ;;  %5507 = vmatpush3.msra.mxu1 %v8740_v58 }
 0x2da   :  { %1693 = vmatprep.subr.mxu0 %v8746_v59  ;;  %5508 = vmatprep.subr.mxu1 %v12393_v22  ;;  %v8765_v59 = vld [vmem:[%s11981_s6 + $0x128] sm:$0xff] }
 0x2db   :  { %1694 = vmatpush1.msra.mxu0 %v8753_v61  ;;  %5509 = vmatpush3.msra.mxu1 %v8759_v63  ;;  %12578 = vst [vmem:[#allocation35_spill] sm:$0xff] %v8765_v59  ;;  %v8772_v61 = vld [vmem:[%s11981_s6 + $0x120] sm:$0xff]  ;;  %v8778_v63 = vld [vmem:[%s11981_s6 + $0x130] sm:$0xff] }
 0x2dc   :  { %1695 = vmatprep.subr.mxu0 %v8765_v59  ;;  %5510 = vmatprep.subr.mxu1 %v12393_v22  ;;  %12579 = vst [vmem:[#allocation36_spill] sm:$0xff] %v8772_v61  ;;  %12580 = vst [vmem:[#allocation37_spill] sm:$0xff] %v8778_v63  ;;  %v8784_v59 = vld [vmem:[%s11981_s6 + $0x110] sm:$0xff] }
 0x2dd   :  { %1696 = vmatpush1.msra.mxu0 %v8772_v61  ;;  %5511 = vmatpush3.msra.mxu1 %v8778_v63  ;;  %12581 = vst [vmem:[#allocation38_spill] sm:$0xff] %v8784_v59  ;;  %v8791_v61 = vld [vmem:[%s11981_s6 + $0x108] sm:$0xff]  ;;  %v8797_v63 = vld [vmem:[%s11981_s6 + $0x118] sm:$0xff] }
 0x2de   :  { %1697 = vmatprep.subr.mxu0 %v8784_v59  ;;  %5512 = vmatprep.subr.mxu1 %v12393_v22  ;;  %12582 = vst [vmem:[#allocation39_spill] sm:$0xff] %v8791_v61  ;;  %12583 = vst [vmem:[#allocation40_spill] sm:$0xff] %v8797_v63  ;;  %v8803_v59 = vld [vmem:[%s11981_s6 + $0xf8] sm:$0xff] }
 0x2df   :  { %1698 = vmatpush1.msra.mxu0 %v8791_v61  ;;  %5513 = vmatpush3.msra.mxu1 %v8797_v63  ;;  %12584 = vst [vmem:[#allocation41_spill] sm:$0xff] %v8803_v59  ;;  %v8810_v61 = vld [vmem:[%s11981_s6 + $0xf0] sm:$0xff]  ;;  %v8816_v63 = vld [vmem:[%s11981_s6 + $0x100] sm:$0xff] }
 0x2e0   :  { %1699 = vmatprep.subr.mxu0 %v8803_v59  ;;  %5514 = vmatprep.subr.mxu1 %v12393_v22  ;;  %12585 = vst [vmem:[#allocation42_spill] sm:$0xff] %v8810_v61  ;;  %12586 = vst [vmem:[#allocation43_spill] sm:$0xff] %v8816_v63  ;;  %v8822_v59 = vld [vmem:[%s11981_s6 + $0xe0] sm:$0xff] }
 0x2e1   :  { %1700 = vmatpush1.msra.mxu0 %v8810_v61  ;;  %5515 = vmatpush3.msra.mxu1 %v8816_v63  ;;  %12587 = vst [vmem:[#allocation44_spill] sm:$0xff] %v8822_v59  ;;  %v8829_v61 = vld [vmem:[%s11981_s6 + $0xd8] sm:$0xff]  ;;  %v8835_v63 = vld [vmem:[%s11981_s6 + $0xe8] sm:$0xff] }
 0x2e2   :  { %1701 = vmatprep.subr.mxu0 %v8822_v59  ;;  %5516 = vmatprep.subr.mxu1 %v12393_v22  ;;  %12588 = vst [vmem:[#allocation45_spill] sm:$0xff] %v8829_v61  ;;  %12589 = vst [vmem:[#allocation46_spill] sm:$0xff] %v8835_v63  ;;  %v8841_v59 = vld [vmem:[%s11981_s6 + $0xc8] sm:$0xff] }
 0x2e3   :  { %1702 = vmatpush1.msra.mxu0 %v8829_v61  ;;  %5517 = vmatpush3.msra.mxu1 %v8835_v63  ;;  %12590 = vst [vmem:[#allocation47_spill] sm:$0xff] %v8841_v59  ;;  %v8848_v61 = vld [vmem:[%s11981_s6 + $0xc0] sm:$0xff]  ;;  %v8854_v63 = vld [vmem:[%s11981_s6 + $0xd0] sm:$0xff] }
 0x2e4   :  { %1703 = vmatprep.subr.mxu0 %v8841_v59  ;;  %5518 = vmatprep.subr.mxu1 %v12393_v22  ;;  %12591 = vst [vmem:[#allocation48_spill] sm:$0xff] %v8848_v61  ;;  %12592 = vst [vmem:[#allocation49_spill] sm:$0xff] %v8854_v63  ;;  %v8860_v59 = vld [vmem:[%s11981_s6 + $0xb0] sm:$0xff] }
 0x2e5   :  { %1704 = vmatpush1.msra.mxu0 %v8848_v61  ;;  %5519 = vmatpush3.msra.mxu1 %v8854_v63  ;;  %12593 = vst [vmem:[#allocation50_spill] sm:$0xff] %v8860_v59  ;;  %v8867_v61 = vld [vmem:[%s11981_s6 + $0xa8] sm:$0xff]  ;;  %v8873_v63 = vld [vmem:[%s11981_s6 + $0xb8] sm:$0xff] }
 0x2e6   :  { %1705 = vmatprep.subr.mxu0 %v8860_v59  ;;  %5520 = vmatprep.subr.mxu1 %v12393_v22  ;;  %12594 = vst [vmem:[#allocation51_spill] sm:$0xff] %v8867_v61  ;;  %12595 = vst [vmem:[#allocation52_spill] sm:$0xff] %v8873_v63  ;;  %v8879_v59 = vld [vmem:[%s11981_s6 + $0x98] sm:$0xff] }
 0x2e7   :  { %1706 = vmatpush1.msra.mxu0 %v8867_v61  ;;  %5521 = vmatpush3.msra.mxu1 %v8873_v63  ;;  %12596 = vst [vmem:[#allocation53_spill] sm:$0xff] %v8879_v59  ;;  %v8886_v61 = vld [vmem:[%s11981_s6 + $0x90] sm:$0xff]  ;;  %v8892_v63 = vld [vmem:[%s11981_s6 + $0xa0] sm:$0xff] }
 0x2e8   :  { %1707 = vmatprep.subr.mxu0 %v8879_v59  ;;  %5522 = vmatprep.subr.mxu1 %v12393_v22  ;;  %12597 = vst [vmem:[#allocation54_spill] sm:$0xff] %v8886_v61  ;;  %12598 = vst [vmem:[#allocation55_spill] sm:$0xff] %v8892_v63  ;;  %v8898_v59 = vld [vmem:[%s11981_s6 + $0x80] sm:$0xff] }
 0x2e9   :  { %1708 = vmatpush1.msra.mxu0 %v8886_v61  ;;  %5523 = vmatpush3.msra.mxu1 %v8892_v63  ;;  %12599 = vst [vmem:[#allocation56_spill] sm:$0xff] %v8898_v59  ;;  %v8905_v61 = vld [vmem:[%s11981_s6 + $0x78] sm:$0xff]  ;;  %v8911_v63 = vld [vmem:[%s11981_s6 + $0x88] sm:$0xff] }
 0x2ea   :  { %1709 = vmatprep.subr.mxu0 %v8898_v59  ;;  %5524 = vmatprep.subr.mxu1 %v12393_v22  ;;  %12600 = vst [vmem:[#allocation57_spill] sm:$0xff] %v8905_v61  ;;  %12601 = vst [vmem:[#allocation58_spill] sm:$0xff] %v8911_v63  ;;  %v8917_v59 = vld [vmem:[%s11981_s6 + $0x68] sm:$0xff] }
 0x2eb   :  { %1710 = vmatpush1.msra.mxu0 %v8905_v61  ;;  %5525 = vmatpush3.msra.mxu1 %v8911_v63  ;;  %12602 = vst [vmem:[#allocation59_spill] sm:$0xff] %v8917_v59  ;;  %v8924_v61 = vld [vmem:[%s11981_s6 + $0x60] sm:$0xff]  ;;  %v8930_v63 = vld [vmem:[%s11981_s6 + $0x70] sm:$0xff] }
 0x2ec   :  { %1711 = vmatprep.subr.mxu0 %v8917_v59  ;;  %5526 = vmatprep.subr.mxu1 %v12393_v22  ;;  %12603 = vst [vmem:[#allocation60_spill] sm:$0xff] %v8924_v61  ;;  %12604 = vst [vmem:[#allocation61_spill] sm:$0xff] %v8930_v63  ;;  %v8936_v59 = vld [vmem:[%s11981_s6 + $0x50] sm:$0xff] }
 0x2ed   :  { %1712 = vmatpush1.msra.mxu0 %v8924_v61  ;;  %5527 = vmatpush3.msra.mxu1 %v8930_v63  ;;  %12605 = vst [vmem:[#allocation62_spill] sm:$0xff] %v8936_v59  ;;  %v8943_v61 = vld [vmem:[%s11981_s6 + $0x48] sm:$0xff]  ;;  %v8949_v63 = vld [vmem:[%s11981_s6 + $0x58] sm:$0xff] }
 0x2ee   :  { %1713 = vmatprep.subr.mxu0 %v8936_v59  ;;  %5528 = vmatprep.subr.mxu1 %v12393_v22  ;;  %12606 = vst [vmem:[#allocation63_spill] sm:$0xff] %v8943_v61  ;;  %12607 = vst [vmem:[#allocation64_spill] sm:$0xff] %v8949_v63  ;;  %v8955_v59 = vld [vmem:[%s11981_s6 + $0x38] sm:$0xff] }
 0x2ef   :  { %1714 = vmatpush1.msra.mxu0 %v8943_v61  ;;  %5529 = vmatpush3.msra.mxu1 %v8949_v63  ;;  %12608 = vst [vmem:[#allocation65_spill] sm:$0xff] %v8955_v59  ;;  %v8962_v61 = vld [vmem:[%s11981_s6 + $0x30] sm:$0xff]  ;;  %v8968_v63 = vld [vmem:[%s11981_s6 + $0x40] sm:$0xff] }
 0x2f0   :  { %1715 = vmatprep.subr.mxu0 %v8955_v59  ;;  %5530 = vmatprep.subr.mxu1 %v12393_v22  ;;  %12609 = vst [vmem:[#allocation66_spill] sm:$0xff] %v8962_v61  ;;  %12610 = vst [vmem:[#allocation67_spill] sm:$0xff] %v8968_v63  ;;  %v8974_v59 = vld [vmem:[%s11981_s6 + $0x20] sm:$0xff] }
 0x2f1   :  { %1716 = vmatpush1.msra.mxu0 %v8962_v61  ;;  %5531 = vmatpush3.msra.mxu1 %v8968_v63  ;;  %12611 = vst [vmem:[#allocation68_spill] sm:$0xff] %v8974_v59  ;;  %v8981_v61 = vld [vmem:[%s11981_s6 + $0x18] sm:$0xff]  ;;  %v8987_v63 = vld [vmem:[%s11981_s6 + $0x28] sm:$0xff] }
 0x2f2   :  { %1717 = vmatprep.subr.mxu0 %v8974_v59  ;;  %5532 = vmatprep.subr.mxu1 %v12393_v22  ;;  %12612 = vst [vmem:[#allocation69_spill] sm:$0xff] %v8981_v61  ;;  %12613 = vst [vmem:[#allocation70_spill] sm:$0xff] %v8987_v63  ;;  %v8993_v59 = vld [vmem:[%s11981_s6 + $0x8] sm:$0xff] }
 0x2f3   :  { %1718 = vmatpush1.msra.mxu0 %v8981_v61  ;;  %5533 = vmatpush3.msra.mxu1 %v8987_v63  ;;  %12614 = vst [vmem:[#allocation71_spill] sm:$0xff] %v8993_v59  ;;  %v9000_v61 = vld [vmem:[%s11981_s6] sm:$0xff]  ;;  %v9006_v63 = vld [vmem:[%s11981_s6 + $0x10] sm:$0xff] }
 0x2f4   :  { %1719 = vmatprep.subr.mxu0 %v8993_v59  ;;  %5534 = vmatprep.subr.mxu1 %v12393_v22  ;;  %12615 = vst [vmem:[#allocation72_spill] sm:$0xff] %v9000_v61  ;;  %12616 = vst [vmem:[#allocation91_spill] sm:$0xff] %v9006_v63  ;;  %v9015_v59 = vld [vmem:[%s11982_s7 + $0x170] sm:$0xff] }
 0x2f5   :  { %1720 = vmatpush1.msra.mxu0 %v9000_v61  ;;  %5535 = vmatpush3.msra.mxu1 %v9006_v63  ;;  %12617 = vst [vmem:[#allocation92_spill] sm:$0xff] %v9015_v59 }
 0x2f6   :  { %1753 = vmatprep.mubr.f32.mxu0 %v12393_v22  ;;  %5536 = vmatprep.mubr.msk.f32.mxu1 %vm6863_vm0, %v12393_v22 }
 0x2f7   :  { %1830 = vmatprep.subr.mxu0 %v9015_v59  ;;  %5539 = vmatprep.subr.mxu1 %v12393_v22 }
 0x352   :  { %v1351_v61 = vpop.f32.mrf.mxu1  ;;  %v1280_v57 = vpop.f32.mrf.mxu0 }
 0x353   :  { %v1281_v63 = vadd.f32 %v1280_v57, %v8298_v15 }
 0x354   :  { %v5433_v58 = vpop.f32.mrf.mxu1  ;;  %v1282_v55 = vpop.f32.mrf.mxu0 }
 0x355   :  { %v1352_v58 = vadd.f32 %v1351_v61, %v8308_v35 }
 0x373   :  { %v1421_v53 = vpop.f32.mrf.mxu0  ;;  %v1492_v52 = vpop.f32.mrf.mxu1 }
 0x374   :  { %v1496_v51 = vadd.f32 %v1421_v53, %v1281_v63  ;;  %v1510_v59 = vadd.f32 %v8304_v33, %v1492_v52 }
 0x375   :  { %v5468_v49 = vpop.f32.mrf.mxu1  ;;  %v1423_v39 = vpop.f32.mrf.mxu0 }
 0x376   :  { %v4707_v47 = vmul.f32 -1.442695, %v1496_v51 }
 0x378   :  { %6224 = vpow2.f32 %v4707_v47  ;;  %v12619_v47 = vld [vmem:[#allocation74_spill] sm:$0xff] }
 0x385   :  { %v6225_v46 = vpop.eup %6224 }
 0x386   :  { %v1500_v45 = vadd.f32 1.0, %v6225_v46 }
 0x388   :  { %6226 = vrcp.f32 %v1500_v45 }
 0x395   :  { %v6227_v38 = vpop.eup %6226  ;;  %v1592_v37 = vpop.f32.mrf.mxu0 }
 0x396   :  { %v1663_v36 = vpop.f32.mrf.mxu1  ;;  %v1511_v34 = vmul.f32 %v6227_v38, %v1510_v59  ;;  %v1667_v57 = vadd.f32 %v1592_v37, %v12618_v17  ;;  %v9029_v38 = vld [vmem:[%s11980_s5] ss:$0 sm:$0xff]  ;;  %v1283_v37 = vadd.f32 %v1282_v55, %v8316_v7  ;;  %v12620_v59 = vld [vmem:[#allocation86_spill] sm:$0xff] }
 0x397   :  { %v1594_v51 = vpop.f32.mrf.mxu0  ;;  %v9054_v55 = vld [vmem:[%s11982_s7 + $0x158] sm:$0xff] }
 0x398   :  { %v5503_v15 = vpop.f32.mrf.mxu1  ;;  %v9023_v48 = vadd.f32 %v1511_v34, %v1352_v58  ;;  %v4709_v49 = vmul.f32 -1.442695, %v1667_v57  ;;  %v1674_v46 = vadd.f32 %v1594_v51, %v12619_v47  ;;  %v1503_v58 = vadd.f32 %v1423_v39, %v1283_v37  ;;  %v9048_v39 = vld [vmem:[%s11982_s7 + $0x178] sm:$0xff]  ;;  %v9092_v37 = vld [vmem:[%s11982_s7 + $0x128] sm:$0xff] }
 0x399   :  { %v1681_v15 = vadd.f32 %v9029_v38, %v1663_v36  ;;  %v9042_v36 = vld [vmem:[%s11982_s7 + $0x168] sm:$0xff] }
 0x39a   :  { %6228 = vpow2.f32 %v4709_v49  ;;  %v4710_v45 = vmul.f32 -1.442695, %v1674_v46  ;;  %v4708_v57 = vmul.f32 -1.442695, %v1503_v58  ;;  %v9111_v58 = vld [vmem:[%s11982_s7 + $0x110] sm:$0xff] }
 0x39c   :  { %6230 = vpow2.f32 %v4710_v45 }
 0x3a7   :  { %v6229_v53 = vpop.eup %6228 }
 0x3a8   :  { %v1671_v33 = vadd.f32 1.0, %v6229_v53 }
 0x3a9   :  { %v6231_v52 = vpop.eup %6230 }
 0x3aa   :  { %6232 = vrcp.f32 %v1671_v33  ;;  %v1678_v63 = vadd.f32 1.0, %v6231_v52  ;;  %v9061_v33 = vld [vmem:[%s11982_s7 + $0x150] sm:$0xff]  ;;  %v9067_v52 = vld [vmem:[%s11982_s7 + $0x160] sm:$0xff] }
 0x3ac   :  { %6234 = vrcp.f32 %v1678_v63  ;;  %v9073_v63 = vld [vmem:[%s11982_s7 + $0x140] sm:$0xff] }
 0x3b7   :  { %v6233_v17 = vpop.eup %6232 }
 0x3b8   :  { %v1682_v34 = vmul.f32 %v6233_v17, %v1681_v15  ;;  %v9080_v17 = vld [vmem:[%s11982_s7 + $0x138] sm:$0xff] }
 0x3b9   :  { %v6235_v49 = vpop.eup %6234 }
 0x3ba   :  { %v1683_v61 = vadd.f32 %v1682_v34, %v12620_v59  ;;  %v1685_v51 = vsub.f32 1.0, %v6235_v49  ;;  %v1687_v45 = vmul.f32 %v6235_v49, %v8322_v13  ;;  %v9086_v34 = vld [vmem:[%s11982_s7 + $0x148] sm:$0xff]  ;;  %v9099_v59 = vld [vmem:[%s11982_s7 + $0x120] sm:$0xff]  ;;  %v9124_v49 = vld [vmem:[%s11982_s7 + $0x118] sm:$0xff] }
 0x3bc   :  { %6236 = vtanh.f32 %v1683_v61  ;;  %v9105_v61 = vld [vmem:[%s11982_s7 + $0x130] sm:$0xff] }
 0x3bd   :  { %6238 = vpow2.f32 %v4708_v57  ;;  %v9118_v57 = vld [vmem:[%s11982_s7 + $0x108] sm:$0xff] }
 0x3c9   :  { %v6237_v47 = vpop.eup %6236 }
 0x3ca   :  { %v1686_v46 = vmul.f32 %v6237_v47, %v1685_v51  ;;  %v6239_v13 = vpop.eup %6238  ;;  %v9130_v51 = vld [vmem:[%s11982_s7 + $0xf8] sm:$0xff]  ;;  %v9138_v47 = vld [vmem:[%s11982_s7 + $0xf0] sm:$0xff] }
 0x3cb   :  { %v1507_v15 = vadd.f32 1.0, %v6239_v13  ;;  %12621 = vst [vmem:[#allocation93_spill] sm:$0xff] %v9130_v51  ;;  %12622 = vst [vmem:[#allocation94_spill] sm:$0xff] %v9138_v47  ;;  %v9163_v13 = vld [vmem:[%s11982_s7 + $0xe8] sm:$0xff] }
 0x3cc   :  { %v9035_v53 = vadd.f32 %v1687_v45, %v1686_v46  ;;  %v9144_v46 = vld [vmem:[%s11982_s7 + $0x100] sm:$0xff]  ;;  %12626 = vst [vmem:[#allocation98_spill] sm:$0xff] %v9163_v13 }
 0x3cd   :  { %6240 = vrcp.f32 %v1507_v15  ;;  %12623 = vst [vmem:[#allocation95_spill] sm:$0xff] %v9144_v46  ;;  %v9150_v45 = vld [vmem:[%s11982_s7 + $0xe0] sm:$0xff]  ;;  %v9169_v15 = vld [vmem:[%s11982_s7 + $0xc8] sm:$0xff] }
 0x3ce   :  { %1754 = vmatmul.mubr.f32.vlgmr.msra.gmra.mxu0 %v9035_v53  ;;  %5537 = vmatmul.mubr.f32.vlgmr.msra.gmra.mxu1 %v9035_v53  ;;  %6242 = vtanh.f32 %v9023_v48  ;;  %12624 = vst [vmem:[#allocation96_spill] sm:$0xff] %v9150_v45  ;;  %v9157_v48 = vld [vmem:[%s11982_s7 + $0xd8] sm:$0xff]  ;;  %12627 = vst [vmem:[#allocation99_spill] sm:$0xff] %v9169_v15 }
 0x3cf   :  { %1831 = vmatpush1.msra.mxu0 %v9042_v36  ;;  %5540 = vmatpush3.msra.mxu1 %v9048_v39  ;;  %12625 = vst [vmem:[#allocation97_spill] sm:$0xff] %v9157_v48 }
 0x3d0   :  { %1832 = vmatprep.subr.mxu0 %v9054_v55  ;;  %5541 = vmatprep.subr.mxu1 %v12393_v22 }
 0x3d1   :  { %1833 = vmatpush1.msra.mxu0 %v9061_v33  ;;  %5542 = vmatpush3.msra.mxu1 %v9067_v52 }
 0x3d2   :  { %1834 = vmatprep.subr.mxu0 %v9073_v63  ;;  %5543 = vmatprep.subr.mxu1 %v12393_v22 }
 0x3d3   :  { %1835 = vmatpush1.msra.mxu0 %v9080_v17  ;;  %5544 = vmatpush3.msra.mxu1 %v9086_v34 }
 0x3d4   :  { %1836 = vmatprep.subr.mxu0 %v9092_v37  ;;  %5545 = vmatprep.subr.mxu1 %v12393_v22 }
 0x3d5   :  { %1837 = vmatpush1.msra.mxu0 %v9099_v59  ;;  %5546 = vmatpush3.msra.mxu1 %v9105_v61 }
 0x3d6   :  { %1838 = vmatprep.subr.mxu0 %v9111_v58  ;;  %5547 = vmatprep.subr.mxu1 %v12393_v22 }
 0x3d7   :  { %1839 = vmatpush1.msra.mxu0 %v9118_v57  ;;  %5548 = vmatpush3.msra.mxu1 %v9124_v49 }
 0x3d8   :  { %1840 = vmatprep.subr.mxu0 %v9130_v51  ;;  %5549 = vmatprep.subr.mxu1 %v12393_v22 }
 0x3d9   :  { %1841 = vmatpush1.msra.mxu0 %v9138_v47  ;;  %5550 = vmatpush3.msra.mxu1 %v9144_v46 }
 0x3da   :  { %1842 = vmatprep.subr.mxu0 %v9150_v45  ;;  %5551 = vmatprep.subr.mxu1 %v12393_v22  ;;  %v6241_v45 = vpop.eup %6240 }
 0x3db   :  { %1843 = vmatpush1.msra.mxu0 %v9157_v48  ;;  %5552 = vmatpush3.msra.mxu1 %v9163_v13  ;;  %v9176_v48 = vld [vmem:[%s11982_s7 + $0xc0] sm:$0xff]  ;;  %v9182_v13 = vld [vmem:[%s11982_s7 + $0xd0] sm:$0xff]  ;;  %v6243_v46 = vpop.eup %6242  ;;  %v1514_v47 = vsub.f32 1.0, %v6241_v45 }
 0x3dc   :  { %1844 = vmatprep.subr.mxu0 %v9169_v15  ;;  %5553 = vmatprep.subr.mxu1 %v12393_v22  ;;  %12628 = vst [vmem:[#allocation100_spill] sm:$0xff] %v9176_v48  ;;  %12629 = vst [vmem:[#allocation101_spill] sm:$0xff] %v9182_v13  ;;  %v9188_v15 = vld [vmem:[%s11982_s7 + $0xb0] sm:$0xff] }
 0x3dd   :  { %1845 = vmatpush1.msra.mxu0 %v9176_v48  ;;  %5554 = vmatpush3.msra.mxu1 %v9182_v13  ;;  %12630 = vst [vmem:[#allocation102_spill] sm:$0xff] %v9188_v15  ;;  %v9195_v48 = vld [vmem:[%s11982_s7 + $0xa8] sm:$0xff]  ;;  %v9201_v13 = vld [vmem:[%s11982_s7 + $0xb8] sm:$0xff]  ;;  %v1515_v51 = vmul.f32 %v6243_v46, %v1514_v47  ;;  %v1516_v46 = vmul.f32 %v6241_v45, %v8389_v54  ;;  %v9338_v45 = vld [vmem:[%s11982_s7 + $0x10] sm:$0xff] }
 0x3de   :  { %1846 = vmatprep.subr.mxu0 %v9188_v15  ;;  %5555 = vmatprep.subr.mxu1 %v12393_v22  ;;  %12631 = vst [vmem:[#allocation103_spill] sm:$0xff] %v9195_v48  ;;  %12632 = vst [vmem:[#allocation104_spill] sm:$0xff] %v9201_v13  ;;  %v9207_v15 = vld [vmem:[%s11982_s7 + $0x98] sm:$0xff]  ;;  %v9315_v47 = vld [vmem:[%s11982_s7 + $0x28] sm:$0xff] }
 0x3df   :  { %1847 = vmatpush1.msra.mxu0 %v9195_v48  ;;  %5556 = vmatpush3.msra.mxu1 %v9201_v13  ;;  %12633 = vst [vmem:[#allocation105_spill] sm:$0xff] %v9207_v15  ;;  %v9214_v48 = vld [vmem:[%s11982_s7 + $0x90] sm:$0xff]  ;;  %v9220_v13 = vld [vmem:[%s11982_s7 + $0xa0] sm:$0xff]  ;;  %12649 = vst [vmem:[#allocation86_spill] sm:$0xff] %v9315_v47 }
 0x3e0   :  { %1848 = vmatprep.subr.mxu0 %v9207_v15  ;;  %5557 = vmatprep.subr.mxu1 %v12393_v22  ;;  %12634 = vst [vmem:[#allocation106_spill] sm:$0xff] %v9214_v48  ;;  %12635 = vst [vmem:[#allocation107_spill] sm:$0xff] %v9220_v13  ;;  %v9226_v15 = vld [vmem:[%s11982_s7 + $0x80] sm:$0xff]  ;;  %v9934_v54 = vld [vmem:[%s11981_s6 + $0x148] sm:$0xff] }
 0x3e1   :  { %1849 = vmatpush1.msra.mxu0 %v9214_v48  ;;  %5558 = vmatpush3.msra.mxu1 %v9220_v13  ;;  %12636 = vst [vmem:[#allocation108_spill] sm:$0xff] %v9226_v15  ;;  %v9233_v48 = vld [vmem:[%s11982_s7 + $0x78] sm:$0xff]  ;;  %v9239_v13 = vld [vmem:[%s11982_s7 + $0x88] sm:$0xff] }
 0x3e2   :  { %1850 = vmatprep.subr.mxu0 %v9226_v15  ;;  %5559 = vmatprep.subr.mxu1 %v12393_v22  ;;  %12637 = vst [vmem:[#allocation109_spill] sm:$0xff] %v9233_v48  ;;  %12638 = vst [vmem:[#allocation110_spill] sm:$0xff] %v9239_v13  ;;  %v9245_v15 = vld [vmem:[%s11982_s7 + $0x68] sm:$0xff] }
 0x3e3   :  { %1851 = vmatpush1.msra.mxu0 %v9233_v48  ;;  %5560 = vmatpush3.msra.mxu1 %v9239_v13  ;;  %12639 = vst [vmem:[#allocation111_spill] sm:$0xff] %v9245_v15  ;;  %v9252_v48 = vld [vmem:[%s11982_s7 + $0x60] sm:$0xff]  ;;  %v9258_v13 = vld [vmem:[%s11982_s7 + $0x70] sm:$0xff] }
 0x3e4   :  { %1852 = vmatprep.subr.mxu0 %v9245_v15  ;;  %5561 = vmatprep.subr.mxu1 %v12393_v22  ;;  %12640 = vst [vmem:[#allocation112_spill] sm:$0xff] %v9252_v48  ;;  %12641 = vst [vmem:[#allocation113_spill] sm:$0xff] %v9258_v13  ;;  %v9264_v15 = vld [vmem:[%s11982_s7 + $0x50] sm:$0xff] }
 0x3e5   :  { %1853 = vmatpush1.msra.mxu0 %v9252_v48  ;;  %5562 = vmatpush3.msra.mxu1 %v9258_v13  ;;  %12642 = vst [vmem:[#allocation114_spill] sm:$0xff] %v9264_v15  ;;  %v9271_v48 = vld [vmem:[%s11982_s7 + $0x48] sm:$0xff]  ;;  %v9277_v13 = vld [vmem:[%s11982_s7 + $0x58] sm:$0xff] }
 0x3e6   :  { %1854 = vmatprep.subr.mxu0 %v9264_v15  ;;  %5563 = vmatprep.subr.mxu1 %v12393_v22  ;;  %12643 = vst [vmem:[#allocation115_spill] sm:$0xff] %v9271_v48  ;;  %12644 = vst [vmem:[#allocation116_spill] sm:$0xff] %v9277_v13  ;;  %v9283_v15 = vld [vmem:[%s11982_s7 + $0x38] sm:$0xff] }
 0x3e7   :  { %1855 = vmatpush1.msra.mxu0 %v9271_v48  ;;  %5564 = vmatpush3.msra.mxu1 %v9277_v13  ;;  %12645 = vst [vmem:[#allocation117_spill] sm:$0xff] %v9283_v15  ;;  %v9290_v48 = vld [vmem:[%s11982_s7 + $0x30] sm:$0xff]  ;;  %v9296_v13 = vld [vmem:[%s11982_s7 + $0x40] sm:$0xff] }
 0x3e8   :  { %1856 = vmatprep.subr.mxu0 %v9283_v15  ;;  %5565 = vmatprep.subr.mxu1 %v12393_v22  ;;  %12646 = vst [vmem:[#allocation118_spill] sm:$0xff] %v9290_v48  ;;  %v9302_v15 = vld [vmem:[%s11982_s7 + $0x20] sm:$0xff] }
 0x3e9   :  { %1857 = vmatpush1.msra.mxu0 %v9290_v48  ;;  %5566 = vmatpush3.msra.mxu1 %v9296_v13  ;;  %12647 = vst [vmem:[#allocation73_spill] sm:$0xff] %v9302_v15  ;;  %v9309_v48 = vld [vmem:[%s11982_s7 + $0x18] sm:$0xff] }
 0x3ea   :  { %1858 = vmatprep.subr.mxu0 %v9302_v15  ;;  %5567 = vmatprep.subr.mxu1 %v12393_v22  ;;  %12648 = vst [vmem:[#allocation74_spill] sm:$0xff] %v9309_v48  ;;  %v9322_v15 = vld [vmem:[%s11982_s7 + $0x8] sm:$0xff] }
 0x3eb   :  { %1859 = vmatpush1.msra.mxu0 %v9309_v48  ;;  %5568 = vmatpush3.msra.mxu1 %v9315_v47  ;;  %v9329_v48 = vld [vmem:[%s11982_s7] sm:$0xff]  ;;  %v9333_v47 = vadd.f32 %v1516_v46, %v1515_v51  ;;  %v12688_v51 = vld [vmem:[#allocation52_spill] sm:$0xff]  ;;  %v12689_v46 = vld [vmem:[#allocation53_spill] sm:$0xff] }
 0x3ec   :  { %1860 = vmatprep.subr.mxu0 %v9322_v15  ;;  %5569 = vmatprep.subr.mxu1 %v12393_v22 }
 0x3ed   :  { %1861 = vmatpush1.msra.mxu0 %v9329_v48  ;;  %1894 = vmatprep.mubr.f32.mxu0 %v12393_v22  ;;  %12650 = vst [vmem:[#allocation119_spill] sm:$0xff] %v9333_v47 }
 0x3ee   :  { %5570 = vmatpush3.msra.mxu1 %v9338_v45  ;;  %5571 = vmatprep.mubr.msk.f32.mxu1 %vm6863_vm0, %v12393_v22 }
 0x3ef   :  { %1895 = vmatmul.mubr.f32.vlgmr.msra.gmra.mxu0 %v9333_v47  ;;  %5572 = vmatmul.mubr.f32.vlgmr.msra.gmra.mxu1 %v9333_v47 }
 0x3f0   :  { %2001 = vmatprep.subr.mxu0 %v8399_v23  ;;  %5574 = vmatprep.subr.mxu1 %v12393_v22  ;;  %v12651_v23 = vld [vmem:[#allocation14_spill] sm:$0xff] }
 0x3f1   :  { %2002 = vmatpush1.msra.mxu0 %v8406_v41  ;;  %5575 = vmatpush3.msra.mxu1 %v8412_v9  ;;  %v12652_v41 = vld [vmem:[#allocation15_spill] sm:$0xff] }
 0x3f2   :  { %2003 = vmatprep.subr.mxu0 %v8418_v11  ;;  %5576 = vmatprep.subr.mxu1 %v12393_v22  ;;  %v12653_v9 = vld [vmem:[#allocation19_spill] sm:$0xff]  ;;  %v12654_v11 = vld [vmem:[#allocation16_spill] sm:$0xff] }
 0x3f3   :  { %2004 = vmatpush1.msra.mxu0 %v8425_v50  ;;  %5577 = vmatpush3.msra.mxu1 %v8431_v60  ;;  %v12655_v50 = vld [vmem:[#allocation17_spill] sm:$0xff]  ;;  %v12656_v60 = vld [vmem:[#allocation20_spill] sm:$0xff] }
 0x3f4   :  { %2005 = vmatprep.subr.mxu0 %v8437_v1  ;;  %5578 = vmatprep.subr.mxu1 %v12393_v22  ;;  %v12657_v1 = vld [vmem:[#allocation21_spill] sm:$0xff] }
 0x3f5   :  { %2006 = vmatpush1.msra.mxu0 %v8444_v2  ;;  %5579 = vmatpush3.msra.mxu1 %v8450_v4  ;;  %v12658_v2 = vld [vmem:[#allocation22_spill] sm:$0xff]  ;;  %v12659_v4 = vld [vmem:[#allocation23_spill] sm:$0xff] }
 0x3f6   :  { %2007 = vmatprep.subr.mxu0 %v8456_v6  ;;  %5580 = vmatprep.subr.mxu1 %v12393_v22  ;;  %v12660_v6 = vld [vmem:[#allocation24_spill] sm:$0xff] }
 0x3f7   :  { %2008 = vmatpush1.msra.mxu0 %v8463_v8  ;;  %5581 = vmatpush3.msra.mxu1 %v8469_v12  ;;  %v12661_v8 = vld [vmem:[#allocation25_spill] sm:$0xff]  ;;  %v12662_v12 = vld [vmem:[#allocation26_spill] sm:$0xff] }
 0x3f8   :  { %2009 = vmatprep.subr.mxu0 %v8475_v14  ;;  %5582 = vmatprep.subr.mxu1 %v12393_v22  ;;  %v12663_v14 = vld [vmem:[#allocation27_spill] sm:$0xff] }
 0x3f9   :  { %2010 = vmatpush1.msra.mxu0 %v8482_v18  ;;  %5583 = vmatpush3.msra.mxu1 %v8488_v19  ;;  %v12664_v18 = vld [vmem:[#allocation29_spill] sm:$0xff]  ;;  %v12665_v19 = vld [vmem:[#allocation28_spill] sm:$0xff] }
 0x3fa   :  { %2011 = vmatprep.subr.mxu0 %v8494_v21  ;;  %5584 = vmatprep.subr.mxu1 %v12393_v22  ;;  %v12666_v21 = vld [vmem:[#allocation30_spill] sm:$0xff] }
 0x3fb   :  { %2012 = vmatpush1.msra.mxu0 %v8501_v27  ;;  %5585 = vmatpush3.msra.mxu1 %v8507_v29  ;;  %v12667_v27 = vld [vmem:[#allocation31_spill] sm:$0xff]  ;;  %v12668_v29 = vld [vmem:[#allocation32_spill] sm:$0xff] }
 0x3fc   :  { %2013 = vmatprep.subr.mxu0 %v8513_v30  ;;  %5586 = vmatprep.subr.mxu1 %v12393_v22  ;;  %v12669_v30 = vld [vmem:[#allocation33_spill] sm:$0xff] }
 0x3fd   :  { %2014 = vmatpush1.msra.mxu0 %v8520_v31  ;;  %5587 = vmatpush3.msra.mxu1 %v8526_v32  ;;  %v12670_v31 = vld [vmem:[#allocation34_spill] sm:$0xff]  ;;  %v12671_v32 = vld [vmem:[#allocation35_spill] sm:$0xff] }
 0x3fe   :  { %2015 = vmatprep.subr.mxu0 %v8532_v10  ;;  %5588 = vmatprep.subr.mxu1 %v12393_v22  ;;  %v12672_v10 = vld [vmem:[#allocation36_spill] sm:$0xff]  ;;  %12764 = vst [vmem:[#allocation35_spill] sm:$0xff] %v9934_v54 }
 0x3ff   :  { %2016 = vmatpush1.msra.mxu0 %v8539_v3  ;;  %5589 = vmatpush3.msra.mxu1 %v8545_v26  ;;  %v12673_v3 = vld [vmem:[#allocation37_spill] sm:$0xff]  ;;  %v12674_v26 = vld [vmem:[#allocation38_spill] sm:$0xff] }
 0x400   :  { %2017 = vmatprep.subr.mxu0 %v8551_v40  ;;  %5590 = vmatprep.subr.mxu1 %v12393_v22  ;;  %v12675_v40 = vld [vmem:[#allocation39_spill] sm:$0xff] }
 0x401   :  { %2018 = vmatpush1.msra.mxu0 %v8558_v20  ;;  %5591 = vmatpush3.msra.mxu1 %v8564_v42  ;;  %v12676_v20 = vld [vmem:[#allocation40_spill] sm:$0xff]  ;;  %v12677_v42 = vld [vmem:[#allocation41_spill] sm:$0xff] }
 0x402   :  { %2019 = vmatprep.subr.mxu0 %v8570_v25  ;;  %5592 = vmatprep.subr.mxu1 %v12393_v22  ;;  %v12678_v25 = vld [vmem:[#allocation42_spill] sm:$0xff] }
 0x403   :  { %2020 = vmatpush1.msra.mxu0 %v8577_v28  ;;  %5593 = vmatpush3.msra.mxu1 %v8583_v44  ;;  %v12679_v28 = vld [vmem:[#allocation43_spill] sm:$0xff]  ;;  %v12680_v44 = vld [vmem:[#allocation44_spill] sm:$0xff] }
 0x404   :  { %2021 = vmatprep.subr.mxu0 %v8589_v43  ;;  %5594 = vmatprep.subr.mxu1 %v12393_v22  ;;  %v12681_v43 = vld [vmem:[#allocation45_spill] sm:$0xff] }
 0x405   :  { %2022 = vmatpush1.msra.mxu0 %v8596_v16  ;;  %5595 = vmatpush3.msra.mxu1 %v8602_v5  ;;  %v12682_v16 = vld [vmem:[#allocation46_spill] sm:$0xff]  ;;  %v12683_v5 = vld [vmem:[#allocation47_spill] sm:$0xff] }
 0x406   :  { %2023 = vmatprep.subr.mxu0 %v8608_v24  ;;  %5596 = vmatprep.subr.mxu1 %v12393_v22  ;;  %v12684_v24 = vld [vmem:[#allocation48_spill] sm:$0xff] }
 0x407   :  { %2024 = vmatpush1.msra.mxu0 %v8615_v62  ;;  %5597 = vmatpush3.msra.mxu1 %v8621_v56  ;;  %v12685_v62 = vld [vmem:[#allocation49_spill] sm:$0xff]  ;;  %v12686_v56 = vld [vmem:[#allocation50_spill] sm:$0xff] }
 0x408   :  { %2025 = vmatprep.subr.mxu0 %v8627_v0  ;;  %5598 = vmatprep.subr.mxu1 %v12393_v22  ;;  %v12687_v0 = vld [vmem:[#allocation51_spill] sm:$0xff] }
 0x409   :  { %2026 = vmatpush1.msra.mxu0 %v12651_v23  ;;  %5599 = vmatpush3.msra.mxu1 %v12652_v41  ;;  %v12690_v23 = vld [vmem:[#allocation54_spill] sm:$0xff]  ;;  %v12691_v41 = vld [vmem:[#allocation55_spill] sm:$0xff] }
 0x40a   :  { %2027 = vmatprep.subr.mxu0 %v12653_v9  ;;  %5600 = vmatprep.subr.mxu1 %v12393_v22  ;;  %v12692_v9 = vld [vmem:[#allocation56_spill] sm:$0xff] }
 0x40b   :  { %2028 = vmatpush1.msra.mxu0 %v12654_v11  ;;  %5601 = vmatpush3.msra.mxu1 %v12655_v50  ;;  %v12693_v11 = vld [vmem:[#allocation57_spill] sm:$0xff]  ;;  %v12694_v50 = vld [vmem:[#allocation58_spill] sm:$0xff] }
 0x40c   :  { %2029 = vmatprep.subr.mxu0 %v12656_v60  ;;  %5602 = vmatprep.subr.mxu1 %v12393_v22  ;;  %v12695_v60 = vld [vmem:[#allocation59_spill] sm:$0xff] }
 0x40d   :  { %2030 = vmatpush1.msra.mxu0 %v12657_v1  ;;  %5603 = vmatpush3.msra.mxu1 %v12658_v2  ;;  %v12696_v1 = vld [vmem:[#allocation60_spill] sm:$0xff]  ;;  %v12697_v2 = vld [vmem:[#allocation61_spill] sm:$0xff] }
 0x40e   :  { %2031 = vmatprep.subr.mxu0 %v12659_v4  ;;  %5604 = vmatprep.subr.mxu1 %v12393_v22  ;;  %v12698_v4 = vld [vmem:[#allocation62_spill] sm:$0xff] }
 0x40f   :  { %2032 = vmatpush1.msra.mxu0 %v12660_v6  ;;  %2065 = vmatprep.mubr.f32.mxu0 %v12393_v22  ;;  %v12699_v6 = vld [vmem:[#allocation63_spill] sm:$0xff] }
 0x410   :  { %5605 = vmatpush3.msra.mxu1 %v12661_v8  ;;  %5606 = vmatprep.mubr.msk.f32.mxu1 %vm6863_vm0, %v12393_v22  ;;  %v12700_v8 = vld [vmem:[#allocation64_spill] sm:$0xff] }
 0x411   :  { %2066 = vmatmul.mubr.f32.vlgmr.msra.gmra.mxu0 %v9035_v53  ;;  %5607 = vmatmul.mubr.f32.vlgmr.msra.gmra.mxu1 %v9035_v53 }
 0x412   :  { %2164 = vmatprep.subr.mxu0 %v12662_v12  ;;  %5609 = vmatprep.subr.mxu1 %v12393_v22  ;;  %v12701_v12 = vld [vmem:[#allocation65_spill] sm:$0xff] }
 0x413   :  { %2165 = vmatpush1.msra.mxu0 %v12663_v14  ;;  %5610 = vmatpush3.msra.mxu1 %v12664_v18  ;;  %v12702_v14 = vld [vmem:[#allocation66_spill] sm:$0xff]  ;;  %v12703_v18 = vld [vmem:[#allocation67_spill] sm:$0xff] }
 0x414   :  { %2166 = vmatprep.subr.mxu0 %v12665_v19  ;;  %5611 = vmatprep.subr.mxu1 %v12393_v22  ;;  %v12704_v19 = vld [vmem:[#allocation68_spill] sm:$0xff] }
 0x415   :  { %2167 = vmatpush1.msra.mxu0 %v12666_v21  ;;  %5612 = vmatpush3.msra.mxu1 %v12667_v27  ;;  %v12705_v21 = vld [vmem:[#allocation69_spill] sm:$0xff]  ;;  %v12706_v27 = vld [vmem:[#allocation70_spill] sm:$0xff] }
 0x416   :  { %2168 = vmatprep.subr.mxu0 %v12668_v29  ;;  %5613 = vmatprep.subr.mxu1 %v12393_v22  ;;  %v12707_v29 = vld [vmem:[#allocation71_spill] sm:$0xff] }
 0x417   :  { %2169 = vmatpush1.msra.mxu0 %v12669_v30  ;;  %5614 = vmatpush3.msra.mxu1 %v12670_v31  ;;  %v12708_v30 = vld [vmem:[#allocation72_spill] sm:$0xff]  ;;  %v12709_v31 = vld [vmem:[#allocation91_spill] sm:$0xff] }
 0x418   :  { %2170 = vmatprep.subr.mxu0 %v12671_v32  ;;  %5615 = vmatprep.subr.mxu1 %v12393_v22  ;;  %v12710_v32 = vld [vmem:[#allocation92_spill] sm:$0xff] }
 0x419   :  { %2171 = vmatpush1.msra.mxu0 %v12672_v10  ;;  %5616 = vmatpush3.msra.mxu1 %v12673_v3 }
 0x41a   :  { %2172 = vmatprep.subr.mxu0 %v12674_v26  ;;  %5617 = vmatprep.subr.mxu1 %v12393_v22 }
 0x41b   :  { %2173 = vmatpush1.msra.mxu0 %v12675_v40  ;;  %5618 = vmatpush3.msra.mxu1 %v12676_v20  ;;  %v12711_v20 = vld [vmem:[#allocation13_spill] sm:$0xff] }
 0x41c   :  { %2174 = vmatprep.subr.mxu0 %v12677_v42  ;;  %5619 = vmatprep.subr.mxu1 %v12393_v22 }
 0x41d   :  { %2175 = vmatpush1.msra.mxu0 %v12678_v25  ;;  %5620 = vmatpush3.msra.mxu1 %v12679_v28 }
 0x41e   :  { %2176 = vmatprep.subr.mxu0 %v12680_v44  ;;  %5621 = vmatprep.subr.mxu1 %v12393_v22 }
 0x41f   :  { %2177 = vmatpush1.msra.mxu0 %v12681_v43  ;;  %5622 = vmatpush3.msra.mxu1 %v12682_v16 }
 0x420   :  { %2178 = vmatprep.subr.mxu0 %v12683_v5  ;;  %5623 = vmatprep.subr.mxu1 %v12393_v22 }
 0x421   :  { %2179 = vmatpush1.msra.mxu0 %v12684_v24  ;;  %5624 = vmatpush3.msra.mxu1 %v12685_v62 }
 0x422   :  { %2180 = vmatprep.subr.mxu0 %v12686_v56  ;;  %5625 = vmatprep.subr.mxu1 %v12393_v22  ;;  %v9487_v56 = vld [vmem:[%s11984_s9] ss:$0 sm:$0xff] }
 0x423   :  { %2181 = vmatpush1.msra.mxu0 %v12687_v0  ;;  %5626 = vmatpush3.msra.mxu1 %v12688_v51 }
 0x424   :  { %2182 = vmatprep.subr.mxu0 %v12689_v46  ;;  %5627 = vmatprep.subr.mxu1 %v12393_v22 }
 0x425   :  { %2183 = vmatpush1.msra.mxu0 %v12690_v23  ;;  %5628 = vmatpush3.msra.mxu1 %v12691_v41 }
 0x426   :  { %2184 = vmatprep.subr.mxu0 %v12692_v9  ;;  %5629 = vmatprep.subr.mxu1 %v12393_v22 }
 0x427   :  { %2185 = vmatpush1.msra.mxu0 %v12693_v11  ;;  %5630 = vmatpush3.msra.mxu1 %v12694_v50  ;;  %v12712_v11 = vld [vmem:[#allocation75_spill] sm:$0xff] }
 0x428   :  { %2186 = vmatprep.subr.mxu0 %v12695_v60  ;;  %5631 = vmatprep.subr.mxu1 %v12393_v22 }
 0x429   :  { %2187 = vmatpush1.msra.mxu0 %v12696_v1  ;;  %5632 = vmatpush3.msra.mxu1 %v12697_v2 }
 0x42a   :  { %2188 = vmatprep.subr.mxu0 %v12698_v4  ;;  %5633 = vmatprep.subr.mxu1 %v12393_v22 }
 0x42b   :  { %2189 = vmatpush1.msra.mxu0 %v12699_v6  ;;  %5634 = vmatpush3.msra.mxu1 %v12700_v8  ;;  %v12713_v6 = vld [vmem:[#allocation76_spill] sm:$0xff] }
 0x42c   :  { %2190 = vmatprep.subr.mxu0 %v12701_v12  ;;  %5635 = vmatprep.subr.mxu1 %v12393_v22 }
 0x42d   :  { %2191 = vmatpush1.msra.mxu0 %v12702_v14  ;;  %5636 = vmatpush3.msra.mxu1 %v12703_v18 }
 0x42e   :  { %2192 = vmatprep.subr.mxu0 %v12704_v19  ;;  %5637 = vmatprep.subr.mxu1 %v12393_v22 }
 0x42f   :  { %2193 = vmatpush1.msra.mxu0 %v12705_v21  ;;  %5638 = vmatpush3.msra.mxu1 %v12706_v27 }
 0x430   :  { %2194 = vmatprep.subr.mxu0 %v12707_v29  ;;  %5639 = vmatprep.subr.mxu1 %v12393_v22 }
 0x431   :  { %2195 = vmatpush1.msra.mxu0 %v12708_v30  ;;  %5640 = vmatpush3.msra.mxu1 %v12709_v31 }
 0x432   :  { %2228 = vmatprep.mubr.f32.mxu0 %v12393_v22  ;;  %5641 = vmatprep.mubr.msk.f32.mxu1 %vm6863_vm0, %v12393_v22 }
 0x433   :  { %2305 = vmatprep.subr.mxu0 %v12710_v32  ;;  %5644 = vmatprep.subr.mxu1 %v12393_v22  ;;  %v12714_v32 = vld [vmem:[#allocation85_spill] sm:$0xff] }
 0x48e   :  { %v1826_v10 = vpop.f32.mrf.mxu1  ;;  %v1755_v26 = vpop.f32.mrf.mxu0 }
 0x48f   :  { %v1756_v42 = vadd.f32 %v1755_v26, %v12711_v20  ;;  %v1827_v41 = vadd.f32 %v1826_v10, %v8308_v35 }
 0x490   :  { %v5538_v3 = vpop.f32.mrf.mxu1  ;;  %v1757_v40 = vpop.f32.mrf.mxu0 }
 0x491   :  { %v1758_v31 = vadd.f32 %v1757_v40, %v8316_v7  ;;  %v12729_v40 = vld [vmem:[#allocation107_spill] sm:$0xff] }
 0x4af   :  { %v1896_v25 = vpop.f32.mrf.mxu0  ;;  %v1967_v28 = vpop.f32.mrf.mxu1 }
 0x4b0   :  { %v1971_v44 = vadd.f32 %v1896_v25, %v1756_v42  ;;  %v1985_v0 = vadd.f32 %v9487_v56, %v1967_v28 }
 0x4b1   :  { %v5573_v43 = vpop.f32.mrf.mxu1  ;;  %v1898_v62 = vpop.f32.mrf.mxu0 }
 0x4b2   :  { %v4711_v16 = vmul.f32 -1.442695, %v1971_v44  ;;  %v1978_v3 = vadd.f32 %v1898_v62, %v1758_v31  ;;  %v12732_v62 = vld [vmem:[#allocation110_spill] sm:$0xff]  ;;  %v9631_v31 = vld [vmem:[%s11978_s3 + $0x128] sm:$0xff] }
 0x4b4   :  { %6244 = vpow2.f32 %v4711_v16  ;;  %v4712_v26 = vmul.f32 -1.442695, %v1978_v3  ;;  %v9650_v3 = vld [vmem:[%s11978_s3 + $0x110] sm:$0xff] }
 0x4c1   :  { %v6245_v5 = vpop.eup %6244 }
 0x4c2   :  { %v1975_v24 = vadd.f32 1.0, %v6245_v5  ;;  %v12730_v5 = vld [vmem:[#allocation108_spill] sm:$0xff] }
 0x4c4   :  { %6246 = vrcp.f32 %v1975_v24  ;;  %v12731_v24 = vld [vmem:[#allocation109_spill] sm:$0xff] }
 0x4d1   :  { %v6247_v51 = vpop.eup %6246  ;;  %v2067_v46 = vpop.f32.mrf.mxu0 }
 0x4d2   :  { %v2138_v23 = vpop.f32.mrf.mxu1  ;;  %v1986_v9 = vmul.f32 %v6247_v51, %v1985_v0  ;;  %v2142_v50 = vadd.f32 %v2067_v46, %v12712_v11  ;;  %v12733_v51 = vld [vmem:[#allocation111_spill] sm:$0xff]  ;;  %v12734_v46 = vld [vmem:[#allocation112_spill] sm:$0xff] }
 0x4d3   :  { %v2069_v4 = vpop.f32.mrf.mxu0  ;;  %v2156_v27 = vadd.f32 %v9029_v38, %v2138_v23  ;;  %v12735_v23 = vld [vmem:[#allocation113_spill] sm:$0xff]  ;;  %v12737_v11 = vld [vmem:[#allocation115_spill] sm:$0xff] }
 0x4d4   :  { %v5608_v60 = vpop.f32.mrf.mxu1  ;;  %v1987_v1 = vadd.f32 %v1986_v9, %v1827_v41  ;;  %v4713_v2 = vmul.f32 -1.442695, %v2142_v50  ;;  %v2149_v8 = vadd.f32 %v2069_v4, %v12713_v6  ;;  %v12736_v9 = vld [vmem:[#allocation114_spill] sm:$0xff]  ;;  %v12738_v50 = vld [vmem:[#allocation116_spill] sm:$0xff]  ;;  %v12741_v6 = vld [vmem:[#allocation73_spill] sm:$0xff] }
 0x4d6   :  { %6248 = vpow2.f32 %v4713_v2  ;;  %v4714_v12 = vmul.f32 -1.442695, %v2149_v8  ;;  %v12740_v2 = vld [vmem:[#allocation118_spill] sm:$0xff] }
 0x4d7   :  { %v12742_v8 = vld [vmem:[#allocation74_spill] sm:$0xff] }
 0x4d8   :  { %6250 = vpow2.f32 %v4714_v12  ;;  %v12743_v12 = vld [vmem:[#allocation86_spill] sm:$0xff] }
 0x4e3   :  { %v6249_v14 = vpop.eup %6248 }
 0x4e4   :  { %v2146_v18 = vadd.f32 1.0, %v6249_v14 }
 0x4e5   :  { %v6251_v19 = vpop.eup %6250 }
 0x4e6   :  { %6252 = vrcp.f32 %v2146_v18  ;;  %v2153_v21 = vadd.f32 1.0, %v6251_v19  ;;  %v9593_v18 = vld [vmem:[%s11978_s3 + $0x158] sm:$0xff]  ;;  %v9600_v19 = vld [vmem:[%s11978_s3 + $0x150] sm:$0xff] }
 0x4e8   :  { %6254 = vrcp.f32 %v2153_v21  ;;  %v9606_v21 = vld [vmem:[%s11978_s3 + $0x160] sm:$0xff] }
 0x4f3   :  { %v6253_v29 = vpop.eup %6252 }
 0x4f4   :  { %v2157_v30 = vmul.f32 %v6253_v29, %v2156_v27  ;;  %v9612_v27 = vld [vmem:[%s11978_s3 + $0x140] sm:$0xff]  ;;  %v9619_v29 = vld [vmem:[%s11978_s3 + $0x138] sm:$0xff] }
 0x4f5   :  { %v6255_v42 = vpop.eup %6254 }
 0x4f6   :  { %v2158_v10 = vadd.f32 %v2157_v30, %v12714_v32  ;;  %v2160_v25 = vsub.f32 1.0, %v6255_v42  ;;  %v2162_v43 = vmul.f32 %v6255_v42, %v9035_v53  ;;  %v9625_v30 = vld [vmem:[%s11978_s3 + $0x148] sm:$0xff]  ;;  %v9638_v32 = vld [vmem:[%s11978_s3 + $0x120] sm:$0xff]  ;;  %v9663_v42 = vld [vmem:[%s11978_s3 + $0x118] sm:$0xff] }
 0x4f8   :  { %6256 = vtanh.f32 %v2158_v10  ;;  %v9644_v10 = vld [vmem:[%s11978_s3 + $0x130] sm:$0xff] }
 0x4f9   :  { %6258 = vpow2.f32 %v4712_v26  ;;  %v9657_v26 = vld [vmem:[%s11978_s3 + $0x108] sm:$0xff] }
 0x505   :  { %v6257_v28 = vpop.eup %6256 }
 0x506   :  { %v2161_v44 = vmul.f32 %v6257_v28, %v2160_v25  ;;  %v6259_v38 = vpop.eup %6258  ;;  %v9669_v25 = vld [vmem:[%s11978_s3 + $0xf8] sm:$0xff]  ;;  %v9676_v28 = vld [vmem:[%s11978_s3 + $0xf0] sm:$0xff] }
 0x507   :  { %v1982_v53 = vadd.f32 1.0, %v6259_v38  ;;  %v9695_v38 = vld [vmem:[%s11978_s3 + $0xd8] sm:$0xff] }
 0x508   :  { %v9497_v16 = vadd.f32 %v2162_v43, %v2161_v44  ;;  %v9682_v44 = vld [vmem:[%s11978_s3 + $0x100] sm:$0xff] }
 0x509   :  { %6260 = vrcp.f32 %v1982_v53  ;;  %v9688_v43 = vld [vmem:[%s11978_s3 + $0xe0] sm:$0xff]  ;;  %v9701_v53 = vld [vmem:[%s11978_s3 + $0xe8] sm:$0xff] }
 0x50a   :  { %2229 = vmatmul.mubr.f32.vlgmr.msra.gmra.mxu0 %v9497_v16  ;;  %5642 = vmatmul.mubr.f32.vlgmr.msra.gmra.mxu1 %v9497_v16  ;;  %6262 = vtanh.f32 %v1987_v1  ;;  %v12739_v1 = vld [vmem:[#allocation117_spill] sm:$0xff] }
 0x50b   :  { %2306 = vmatpush1.msra.mxu0 %v9042_v36  ;;  %5645 = vmatpush3.msra.mxu1 %v9048_v39  ;;  %v12715_v36 = vld [vmem:[#allocation93_spill] sm:$0xff]  ;;  %v12716_v39 = vld [vmem:[#allocation94_spill] sm:$0xff] }
 0x50c   :  { %2307 = vmatprep.subr.mxu0 %v9054_v55  ;;  %5646 = vmatprep.subr.mxu1 %v12393_v22  ;;  %v12717_v55 = vld [vmem:[#allocation95_spill] sm:$0xff] }
 0x50d   :  { %2308 = vmatpush1.msra.mxu0 %v9061_v33  ;;  %5647 = vmatpush3.msra.mxu1 %v9067_v52  ;;  %v12718_v33 = vld [vmem:[#allocation96_spill] sm:$0xff]  ;;  %v12719_v52 = vld [vmem:[#allocation97_spill] sm:$0xff] }
 0x50e   :  { %2309 = vmatprep.subr.mxu0 %v9073_v63  ;;  %5648 = vmatprep.subr.mxu1 %v12393_v22  ;;  %v12720_v63 = vld [vmem:[#allocation98_spill] sm:$0xff] }
 0x50f   :  { %2310 = vmatpush1.msra.mxu0 %v9080_v17  ;;  %5649 = vmatpush3.msra.mxu1 %v9086_v34  ;;  %v12721_v17 = vld [vmem:[#allocation99_spill] sm:$0xff]  ;;  %v12722_v34 = vld [vmem:[#allocation100_spill] sm:$0xff] }
 0x510   :  { %2311 = vmatprep.subr.mxu0 %v9092_v37  ;;  %5650 = vmatprep.subr.mxu1 %v12393_v22  ;;  %v12723_v37 = vld [vmem:[#allocation101_spill] sm:$0xff] }
 0x511   :  { %2312 = vmatpush1.msra.mxu0 %v9099_v59  ;;  %5651 = vmatpush3.msra.mxu1 %v9105_v61  ;;  %v12724_v59 = vld [vmem:[#allocation102_spill] sm:$0xff]  ;;  %v12725_v61 = vld [vmem:[#allocation103_spill] sm:$0xff] }
 0x512   :  { %2313 = vmatprep.subr.mxu0 %v9111_v58  ;;  %5652 = vmatprep.subr.mxu1 %v12393_v22  ;;  %v12726_v58 = vld [vmem:[#allocation104_spill] sm:$0xff] }
 0x513   :  { %2314 = vmatpush1.msra.mxu0 %v9118_v57  ;;  %5653 = vmatpush3.msra.mxu1 %v9124_v49  ;;  %v12727_v57 = vld [vmem:[#allocation105_spill] sm:$0xff]  ;;  %v12728_v49 = vld [vmem:[#allocation106_spill] sm:$0xff] }
 0x514   :  { %2315 = vmatprep.subr.mxu0 %v12715_v36  ;;  %5654 = vmatprep.subr.mxu1 %v12393_v22  ;;  %v9707_v36 = vld [vmem:[%s11978_s3 + $0xc8] sm:$0xff] }
 0x515   :  { %2316 = vmatpush1.msra.mxu0 %v12716_v39  ;;  %5655 = vmatpush3.msra.mxu1 %v12717_v55  ;;  %v9714_v39 = vld [vmem:[%s11978_s3 + $0xc0] sm:$0xff]  ;;  %v9720_v55 = vld [vmem:[%s11978_s3 + $0xd0] sm:$0xff] }
 0x516   :  { %2317 = vmatprep.subr.mxu0 %v12718_v33  ;;  %5656 = vmatprep.subr.mxu1 %v12393_v22  ;;  %v6261_v0 = vpop.eup %6260  ;;  %v9726_v33 = vld [vmem:[%s11978_s3 + $0xb0] sm:$0xff] }
 0x517   :  { %2318 = vmatpush1.msra.mxu0 %v12719_v52  ;;  %5657 = vmatpush3.msra.mxu1 %v12720_v63  ;;  %v6263_v41 = vpop.eup %6262  ;;  %v1989_v60 = vsub.f32 1.0, %v6261_v0  ;;  %v1991_v14 = vmul.f32 %v6261_v0, %v9333_v47  ;;  %v9733_v52 = vld [vmem:[%s11978_s3 + $0xa8] sm:$0xff]  ;;  %v9739_v63 = vld [vmem:[%s11978_s3 + $0xb8] sm:$0xff] }
 0x518   :  { %2319 = vmatprep.subr.mxu0 %v12721_v17  ;;  %5658 = vmatprep.subr.mxu1 %v12393_v22  ;;  %v9745_v17 = vld [vmem:[%s11978_s3 + $0x98] sm:$0xff] }
 0x519   :  { %2320 = vmatpush1.msra.mxu0 %v12722_v34  ;;  %5659 = vmatpush3.msra.mxu1 %v12723_v37  ;;  %v1990_v4 = vmul.f32 %v6263_v41, %v1989_v60  ;;  %v9752_v34 = vld [vmem:[%s11978_s3 + $0x90] sm:$0xff]  ;;  %v9758_v37 = vld [vmem:[%s11978_s3 + $0xa0] sm:$0xff]  ;;  %v9821_v0 = vld [vmem:[%s11978_s3 + $0x38] sm:$0xff] }
 0x51a   :  { %2321 = vmatprep.subr.mxu0 %v12724_v59  ;;  %5660 = vmatprep.subr.mxu1 %v12393_v22  ;;  %v9764_v59 = vld [vmem:[%s11978_s3 + $0x80] sm:$0xff]  ;;  %12747 = vst [vmem:[#allocation16_spill] sm:$0xff] %v9821_v0  ;;  %v9847_v41 = vld [vmem:[%s11978_s3 + $0x18] sm:$0xff]  ;;  %v9873_v60 = vld [vmem:[%s11978_s3 + $0x10] sm:$0xff] }
 0x51b   :  { %2322 = vmatpush1.msra.mxu0 %v12725_v61  ;;  %5661 = vmatpush3.msra.mxu1 %v12726_v58  ;;  %v9771_v61 = vld [vmem:[%s11978_s3 + $0x78] sm:$0xff]  ;;  %v9777_v58 = vld [vmem:[%s11978_s3 + $0x88] sm:$0xff]  ;;  %12751 = vst [vmem:[#allocation22_spill] sm:$0xff] %v9847_v41  ;;  %12755 = vst [vmem:[#allocation26_spill] sm:$0xff] %v9873_v60 }
 0x51c   :  { %2323 = vmatprep.subr.mxu0 %v12727_v57  ;;  %5662 = vmatprep.subr.mxu1 %v12393_v22  ;;  %v9783_v57 = vld [vmem:[%s11978_s3 + $0x68] sm:$0xff]  ;;  %v9928_v47 = vld [vmem:[%s11981_s6 + $0x138] sm:$0xff] }
 0x51d   :  { %2324 = vmatpush1.msra.mxu0 %v12728_v49  ;;  %5663 = vmatpush3.msra.mxu1 %v12729_v40  ;;  %v9790_v49 = vld [vmem:[%s11978_s3 + $0x60] sm:$0xff]  ;;  %v9796_v40 = vld [vmem:[%s11978_s3 + $0x70] sm:$0xff]  ;;  %12763 = vst [vmem:[#allocation34_spill] sm:$0xff] %v9928_v47 }
 0x51e   :  { %2325 = vmatprep.subr.mxu0 %v12730_v5  ;;  %5664 = vmatprep.subr.mxu1 %v12393_v22  ;;  %v9802_v5 = vld [vmem:[%s11978_s3 + $0x50] sm:$0xff] }
 0x51f   :  { %2326 = vmatpush1.msra.mxu0 %v12731_v24  ;;  %5665 = vmatpush3.msra.mxu1 %v12732_v62  ;;  %v9809_v24 = vld [vmem:[%s11978_s3 + $0x48] sm:$0xff]  ;;  %v9815_v62 = vld [vmem:[%s11978_s3 + $0x58] sm:$0xff] }
 0x520   :  { %2327 = vmatprep.subr.mxu0 %v12733_v51  ;;  %5666 = vmatprep.subr.mxu1 %v12393_v22  ;;  %12745 = vst [vmem:[#allocation15_spill] sm:$0xff] %v9809_v24  ;;  %12746 = vst [vmem:[#allocation19_spill] sm:$0xff] %v9815_v62  ;;  %v9828_v51 = vld [vmem:[%s11978_s3 + $0x30] sm:$0xff] }
 0x521   :  { %2328 = vmatpush1.msra.mxu0 %v12734_v46  ;;  %5667 = vmatpush3.msra.mxu1 %v12735_v23  ;;  %12748 = vst [vmem:[#allocation17_spill] sm:$0xff] %v9828_v51  ;;  %v9834_v46 = vld [vmem:[%s11978_s3 + $0x40] sm:$0xff] }
 0x522   :  { %2329 = vmatprep.subr.mxu0 %v12736_v9  ;;  %5668 = vmatprep.subr.mxu1 %v12393_v22  ;;  %12749 = vst [vmem:[#allocation20_spill] sm:$0xff] %v9834_v46  ;;  %v9840_v23 = vld [vmem:[%s11978_s3 + $0x20] sm:$0xff]  ;;  %v9853_v9 = vld [vmem:[%s11978_s3 + $0x28] sm:$0xff] }
 0x523   :  { %2330 = vmatpush1.msra.mxu0 %v12737_v11  ;;  %5669 = vmatpush3.msra.mxu1 %v12738_v50  ;;  %12750 = vst [vmem:[#allocation21_spill] sm:$0xff] %v9840_v23  ;;  %12752 = vst [vmem:[#allocation23_spill] sm:$0xff] %v9853_v9  ;;  %v9859_v11 = vld [vmem:[%s11978_s3 + $0x8] sm:$0xff]  ;;  %v9866_v50 = vld [vmem:[%s11978_s3] sm:$0xff] }
 0x524   :  { %2331 = vmatprep.subr.mxu0 %v12739_v1  ;;  %5670 = vmatprep.subr.mxu1 %v12393_v22  ;;  %12753 = vst [vmem:[#allocation24_spill] sm:$0xff] %v9859_v11  ;;  %12754 = vst [vmem:[#allocation25_spill] sm:$0xff] %v9866_v50  ;;  %v9883_v1 = vld [vmem:[%s11981_s6 + $0x170] sm:$0xff] }
 0x525   :  { %2332 = vmatpush1.msra.mxu0 %v12740_v2  ;;  %5671 = vmatpush3.msra.mxu1 %v9296_v13  ;;  %v9564_v13 = vadd.f32 %v1991_v14, %v1990_v4  ;;  %12756 = vst [vmem:[#allocation27_spill] sm:$0xff] %v9883_v1  ;;  %v9890_v2 = vld [vmem:[%s11981_s6 + $0x168] sm:$0xff]  ;;  %v9896_v4 = vld [vmem:[%s11981_s6 + $0x178] sm:$0xff]  ;;  %v9921_v14 = vld [vmem:[%s11981_s6 + $0x140] sm:$0xff] }
 0x526   :  { %2333 = vmatprep.subr.mxu0 %v12741_v6  ;;  %5672 = vmatprep.subr.mxu1 %v12393_v22  ;;  %12757 = vst [vmem:[#allocation29_spill] sm:$0xff] %v9890_v2  ;;  %12758 = vst [vmem:[#allocation28_spill] sm:$0xff] %v9896_v4  ;;  %v9902_v6 = vld [vmem:[%s11981_s6 + $0x158] sm:$0xff] }
 0x527   :  { %2334 = vmatpush1.msra.mxu0 %v12742_v8  ;;  %5673 = vmatpush3.msra.mxu1 %v12743_v12  ;;  %12744 = vst [vmem:[#allocation14_spill] sm:$0xff] %v9564_v13  ;;  %12759 = vst [vmem:[#allocation30_spill] sm:$0xff] %v9902_v6  ;;  %v9909_v8 = vld [vmem:[%s11981_s6 + $0x150] sm:$0xff]  ;;  %v9915_v12 = vld [vmem:[%s11981_s6 + $0x160] sm:$0xff] }
 0x528   :  { %2335 = vmatprep.subr.mxu0 %v9322_v15  ;;  %5674 = vmatprep.subr.mxu1 %v12393_v22  ;;  %v9574_v15 = vld [vmem:[%s11978_s3 + $0x170] sm:$0xff]  ;;  %12760 = vst [vmem:[#allocation31_spill] sm:$0xff] %v9909_v8  ;;  %12761 = vst [vmem:[#allocation32_spill] sm:$0xff] %v9915_v12 }
 0x529   :  { %2336 = vmatpush1.msra.mxu0 %v9329_v48  ;;  %2369 = vmatprep.mubr.f32.mxu0 %v12393_v22  ;;  %v9581_v48 = vld [vmem:[%s11978_s3 + $0x168] sm:$0xff]  ;;  %12762 = vst [vmem:[#allocation33_spill] sm:$0xff] %v9921_v14 }
 0x52a   :  { %5675 = vmatpush3.msra.mxu1 %v9338_v45  ;;  %5676 = vmatprep.mubr.msk.f32.mxu1 %vm6863_vm0, %v12393_v22  ;;  %v9587_v45 = vld [vmem:[%s11978_s3 + $0x178] sm:$0xff] }
 0x52b   :  { %2370 = vmatmul.mubr.f32.vlgmr.msra.gmra.mxu0 %v9564_v13  ;;  %5677 = vmatmul.mubr.f32.vlgmr.msra.gmra.mxu1 %v9564_v13 }
 0x52c   :  { %2476 = vmatprep.subr.mxu0 %v9574_v15  ;;  %5679 = vmatprep.subr.mxu1 %v12393_v22 }
 0x52d   :  { %2477 = vmatpush1.msra.mxu0 %v9581_v48  ;;  %5680 = vmatpush3.msra.mxu1 %v9587_v45 }
 0x52e   :  { %2478 = vmatprep.subr.mxu0 %v9593_v18  ;;  %5681 = vmatprep.subr.mxu1 %v12393_v22 }
 0x52f   :  { %2479 = vmatpush1.msra.mxu0 %v9600_v19  ;;  %5682 = vmatpush3.msra.mxu1 %v9606_v21 }
 0x530   :  { %2480 = vmatprep.subr.mxu0 %v9612_v27  ;;  %5683 = vmatprep.subr.mxu1 %v12393_v22 }
 0x531   :  { %2481 = vmatpush1.msra.mxu0 %v9619_v29  ;;  %5684 = vmatpush3.msra.mxu1 %v9625_v30 }
 0x532   :  { %2482 = vmatprep.subr.mxu0 %v9631_v31  ;;  %5685 = vmatprep.subr.mxu1 %v12393_v22 }
 0x533   :  { %2483 = vmatpush1.msra.mxu0 %v9638_v32  ;;  %5686 = vmatpush3.msra.mxu1 %v9644_v10 }
 0x534   :  { %2484 = vmatprep.subr.mxu0 %v9650_v3  ;;  %5687 = vmatprep.subr.mxu1 %v12393_v22 }
 0x535   :  { %2485 = vmatpush1.msra.mxu0 %v9657_v26  ;;  %5688 = vmatpush3.msra.mxu1 %v9663_v42 }
 0x536   :  { %2486 = vmatprep.subr.mxu0 %v9669_v25  ;;  %5689 = vmatprep.subr.mxu1 %v12393_v22 }
 0x537   :  { %2487 = vmatpush1.msra.mxu0 %v9676_v28  ;;  %5690 = vmatpush3.msra.mxu1 %v9682_v44 }
 0x538   :  { %2488 = vmatprep.subr.mxu0 %v9688_v43  ;;  %5691 = vmatprep.subr.mxu1 %v12393_v22 }
 0x539   :  { %2489 = vmatpush1.msra.mxu0 %v9695_v38  ;;  %5692 = vmatpush3.msra.mxu1 %v9701_v53 }
 0x53a   :  { %2490 = vmatprep.subr.mxu0 %v9707_v36  ;;  %5693 = vmatprep.subr.mxu1 %v12393_v22 }
 0x53b   :  { %2491 = vmatpush1.msra.mxu0 %v9714_v39  ;;  %5694 = vmatpush3.msra.mxu1 %v9720_v55 }
 0x53c   :  { %2492 = vmatprep.subr.mxu0 %v9726_v33  ;;  %5695 = vmatprep.subr.mxu1 %v12393_v22 }
 0x53d   :  { %2493 = vmatpush1.msra.mxu0 %v9733_v52  ;;  %5696 = vmatpush3.msra.mxu1 %v9739_v63 }
 0x53e   :  { %2494 = vmatprep.subr.mxu0 %v9745_v17  ;;  %5697 = vmatprep.subr.mxu1 %v12393_v22 }
 0x53f   :  { %2495 = vmatpush1.msra.mxu0 %v9752_v34  ;;  %5698 = vmatpush3.msra.mxu1 %v9758_v37 }
 0x540   :  { %2496 = vmatprep.subr.mxu0 %v9764_v59  ;;  %5699 = vmatprep.subr.mxu1 %v12393_v22 }
 0x541   :  { %2497 = vmatpush1.msra.mxu0 %v9771_v61  ;;  %5700 = vmatpush3.msra.mxu1 %v9777_v58 }
 0x542   :  { %2498 = vmatprep.subr.mxu0 %v9783_v57  ;;  %5701 = vmatprep.subr.mxu1 %v12393_v22 }
 0x543   :  { %2499 = vmatpush1.msra.mxu0 %v9790_v49  ;;  %5702 = vmatpush3.msra.mxu1 %v9796_v40 }
 0x544   :  { %2500 = vmatprep.subr.mxu0 %v9802_v5  ;;  %5703 = vmatprep.subr.mxu1 %v12393_v22 }
 0x545   :  { %2501 = vmatpush1.msra.mxu0 %v9809_v24  ;;  %5704 = vmatpush3.msra.mxu1 %v9815_v62  ;;  %v12805_v62 = vld [vmem:[#allocation77_spill] sm:$0xff] }
 0x546   :  { %2502 = vmatprep.subr.mxu0 %v9821_v0  ;;  %5705 = vmatprep.subr.mxu1 %v12393_v22 }
 0x547   :  { %2503 = vmatpush1.msra.mxu0 %v9828_v51  ;;  %5706 = vmatpush3.msra.mxu1 %v9834_v46 }
 0x548   :  { %2504 = vmatprep.subr.mxu0 %v9840_v23  ;;  %5707 = vmatprep.subr.mxu1 %v12393_v22 }
 0x549   :  { %2505 = vmatpush1.msra.mxu0 %v9847_v41  ;;  %5708 = vmatpush3.msra.mxu1 %v9853_v9 }
 0x54a   :  { %2506 = vmatprep.subr.mxu0 %v9859_v11  ;;  %5709 = vmatprep.subr.mxu1 %v12393_v22 }
 0x54b   :  { %2507 = vmatpush1.msra.mxu0 %v9866_v50  ;;  %2540 = vmatprep.mubr.f32.mxu0 %v12393_v22 }
 0x54c   :  { %5710 = vmatpush3.msra.mxu1 %v9873_v60  ;;  %5711 = vmatprep.mubr.msk.f32.mxu1 %vm6863_vm0, %v12393_v22 }
 0x54d   :  { %2541 = vmatmul.mubr.f32.vlgmr.msra.gmra.mxu0 %v9497_v16  ;;  %5712 = vmatmul.mubr.f32.vlgmr.msra.gmra.mxu1 %v9497_v16 }
 0x54e   :  { %2639 = vmatprep.subr.mxu0 %v9883_v1  ;;  %5714 = vmatprep.subr.mxu1 %v12393_v22 }
 0x54f   :  { %2640 = vmatpush1.msra.mxu0 %v9890_v2  ;;  %5715 = vmatpush3.msra.mxu1 %v9896_v4 }
 0x550   :  { %2641 = vmatprep.subr.mxu0 %v9902_v6  ;;  %5716 = vmatprep.subr.mxu1 %v12393_v22 }
 0x551   :  { %2642 = vmatpush1.msra.mxu0 %v9909_v8  ;;  %5717 = vmatpush3.msra.mxu1 %v9915_v12 }
 0x552   :  { %2643 = vmatprep.subr.mxu0 %v9921_v14  ;;  %5718 = vmatprep.subr.mxu1 %v12393_v22  ;;  %v9940_v14 = vld [vmem:[%s11981_s6 + $0x128] sm:$0xff] }
 0x553   :  { %2644 = vmatpush1.msra.mxu0 %v9928_v47  ;;  %5719 = vmatpush3.msra.mxu1 %v9934_v54  ;;  %12765 = vst [vmem:[#allocation36_spill] sm:$0xff] %v9940_v14  ;;  %v9947_v47 = vld [vmem:[%s11981_s6 + $0x120] sm:$0xff]  ;;  %v9953_v54 = vld [vmem:[%s11981_s6 + $0x130] sm:$0xff] }
 0x554   :  { %2645 = vmatprep.subr.mxu0 %v9940_v14  ;;  %5720 = vmatprep.subr.mxu1 %v12393_v22  ;;  %12766 = vst [vmem:[#allocation37_spill] sm:$0xff] %v9947_v47  ;;  %12767 = vst [vmem:[#allocation38_spill] sm:$0xff] %v9953_v54  ;;  %v9959_v14 = vld [vmem:[%s11981_s6 + $0x110] sm:$0xff] }
 0x555   :  { %2646 = vmatpush1.msra.mxu0 %v9947_v47  ;;  %5721 = vmatpush3.msra.mxu1 %v9953_v54  ;;  %12768 = vst [vmem:[#allocation39_spill] sm:$0xff] %v9959_v14  ;;  %v9966_v47 = vld [vmem:[%s11981_s6 + $0x108] sm:$0xff]  ;;  %v9972_v54 = vld [vmem:[%s11981_s6 + $0x118] sm:$0xff] }
 0x556   :  { %2647 = vmatprep.subr.mxu0 %v9959_v14  ;;  %5722 = vmatprep.subr.mxu1 %v12393_v22  ;;  %12769 = vst [vmem:[#allocation40_spill] sm:$0xff] %v9966_v47  ;;  %12770 = vst [vmem:[#allocation41_spill] sm:$0xff] %v9972_v54  ;;  %v9978_v14 = vld [vmem:[%s11981_s6 + $0xf8] sm:$0xff] }
 0x557   :  { %2648 = vmatpush1.msra.mxu0 %v9966_v47  ;;  %5723 = vmatpush3.msra.mxu1 %v9972_v54  ;;  %12771 = vst [vmem:[#allocation42_spill] sm:$0xff] %v9978_v14  ;;  %v9985_v47 = vld [vmem:[%s11981_s6 + $0xf0] sm:$0xff]  ;;  %v9991_v54 = vld [vmem:[%s11981_s6 + $0x100] sm:$0xff] }
 0x558   :  { %2649 = vmatprep.subr.mxu0 %v9978_v14  ;;  %5724 = vmatprep.subr.mxu1 %v12393_v22  ;;  %12772 = vst [vmem:[#allocation43_spill] sm:$0xff] %v9985_v47  ;;  %12773 = vst [vmem:[#allocation44_spill] sm:$0xff] %v9991_v54  ;;  %v9997_v14 = vld [vmem:[%s11981_s6 + $0xe0] sm:$0xff] }
 0x559   :  { %2650 = vmatpush1.msra.mxu0 %v9985_v47  ;;  %5725 = vmatpush3.msra.mxu1 %v9991_v54  ;;  %12774 = vst [vmem:[#allocation45_spill] sm:$0xff] %v9997_v14  ;;  %v10004_v47 = vld [vmem:[%s11981_s6 + $0xd8] sm:$0xff]  ;;  %v10010_v54 = vld [vmem:[%s11981_s6 + $0xe8] sm:$0xff] }
 0x55a   :  { %2651 = vmatprep.subr.mxu0 %v9997_v14  ;;  %5726 = vmatprep.subr.mxu1 %v12393_v22  ;;  %12775 = vst [vmem:[#allocation46_spill] sm:$0xff] %v10004_v47  ;;  %12776 = vst [vmem:[#allocation47_spill] sm:$0xff] %v10010_v54  ;;  %v10016_v14 = vld [vmem:[%s11981_s6 + $0xc8] sm:$0xff] }
 0x55b   :  { %2652 = vmatpush1.msra.mxu0 %v10004_v47  ;;  %5727 = vmatpush3.msra.mxu1 %v10010_v54  ;;  %12777 = vst [vmem:[#allocation48_spill] sm:$0xff] %v10016_v14  ;;  %v10023_v47 = vld [vmem:[%s11981_s6 + $0xc0] sm:$0xff]  ;;  %v10029_v54 = vld [vmem:[%s11981_s6 + $0xd0] sm:$0xff] }
 0x55c   :  { %2653 = vmatprep.subr.mxu0 %v10016_v14  ;;  %5728 = vmatprep.subr.mxu1 %v12393_v22  ;;  %12778 = vst [vmem:[#allocation49_spill] sm:$0xff] %v10023_v47  ;;  %12779 = vst [vmem:[#allocation50_spill] sm:$0xff] %v10029_v54  ;;  %v10035_v14 = vld [vmem:[%s11981_s6 + $0xb0] sm:$0xff] }
 0x55d   :  { %2654 = vmatpush1.msra.mxu0 %v10023_v47  ;;  %5729 = vmatpush3.msra.mxu1 %v10029_v54  ;;  %12780 = vst [vmem:[#allocation51_spill] sm:$0xff] %v10035_v14  ;;  %v10042_v47 = vld [vmem:[%s11981_s6 + $0xa8] sm:$0xff]  ;;  %v10048_v54 = vld [vmem:[%s11981_s6 + $0xb8] sm:$0xff] }
 0x55e   :  { %2655 = vmatprep.subr.mxu0 %v10035_v14  ;;  %5730 = vmatprep.subr.mxu1 %v12393_v22  ;;  %12781 = vst [vmem:[#allocation52_spill] sm:$0xff] %v10042_v47  ;;  %12782 = vst [vmem:[#allocation53_spill] sm:$0xff] %v10048_v54  ;;  %v10054_v14 = vld [vmem:[%s11981_s6 + $0x98] sm:$0xff] }
 0x55f   :  { %2656 = vmatpush1.msra.mxu0 %v10042_v47  ;;  %5731 = vmatpush3.msra.mxu1 %v10048_v54  ;;  %12783 = vst [vmem:[#allocation54_spill] sm:$0xff] %v10054_v14  ;;  %v10061_v47 = vld [vmem:[%s11981_s6 + $0x90] sm:$0xff]  ;;  %v10067_v54 = vld [vmem:[%s11981_s6 + $0xa0] sm:$0xff] }
 0x560   :  { %2657 = vmatprep.subr.mxu0 %v10054_v14  ;;  %5732 = vmatprep.subr.mxu1 %v12393_v22  ;;  %12784 = vst [vmem:[#allocation55_spill] sm:$0xff] %v10061_v47  ;;  %12785 = vst [vmem:[#allocation56_spill] sm:$0xff] %v10067_v54  ;;  %v10073_v14 = vld [vmem:[%s11981_s6 + $0x80] sm:$0xff] }
 0x561   :  { %2658 = vmatpush1.msra.mxu0 %v10061_v47  ;;  %5733 = vmatpush3.msra.mxu1 %v10067_v54  ;;  %12786 = vst [vmem:[#allocation57_spill] sm:$0xff] %v10073_v14  ;;  %v10080_v47 = vld [vmem:[%s11981_s6 + $0x78] sm:$0xff]  ;;  %v10086_v54 = vld [vmem:[%s11981_s6 + $0x88] sm:$0xff] }
 0x562   :  { %2659 = vmatprep.subr.mxu0 %v10073_v14  ;;  %5734 = vmatprep.subr.mxu1 %v12393_v22  ;;  %12787 = vst [vmem:[#allocation58_spill] sm:$0xff] %v10080_v47  ;;  %12788 = vst [vmem:[#allocation59_spill] sm:$0xff] %v10086_v54  ;;  %v10092_v14 = vld [vmem:[%s11981_s6 + $0x68] sm:$0xff] }
 0x563   :  { %2660 = vmatpush1.msra.mxu0 %v10080_v47  ;;  %5735 = vmatpush3.msra.mxu1 %v10086_v54  ;;  %12789 = vst [vmem:[#allocation60_spill] sm:$0xff] %v10092_v14  ;;  %v10099_v47 = vld [vmem:[%s11981_s6 + $0x60] sm:$0xff]  ;;  %v10105_v54 = vld [vmem:[%s11981_s6 + $0x70] sm:$0xff] }
 0x564   :  { %2661 = vmatprep.subr.mxu0 %v10092_v14  ;;  %5736 = vmatprep.subr.mxu1 %v12393_v22  ;;  %12790 = vst [vmem:[#allocation61_spill] sm:$0xff] %v10099_v47  ;;  %12791 = vst [vmem:[#allocation62_spill] sm:$0xff] %v10105_v54  ;;  %v10111_v14 = vld [vmem:[%s11981_s6 + $0x50] sm:$0xff] }
 0x565   :  { %2662 = vmatpush1.msra.mxu0 %v10099_v47  ;;  %5737 = vmatpush3.msra.mxu1 %v10105_v54  ;;  %12792 = vst [vmem:[#allocation63_spill] sm:$0xff] %v10111_v14  ;;  %v10118_v47 = vld [vmem:[%s11981_s6 + $0x48] sm:$0xff]  ;;  %v10124_v54 = vld [vmem:[%s11981_s6 + $0x58] sm:$0xff] }
 0x566   :  { %2663 = vmatprep.subr.mxu0 %v10111_v14  ;;  %5738 = vmatprep.subr.mxu1 %v12393_v22  ;;  %12793 = vst [vmem:[#allocation64_spill] sm:$0xff] %v10118_v47  ;;  %12794 = vst [vmem:[#allocation65_spill] sm:$0xff] %v10124_v54  ;;  %v10130_v14 = vld [vmem:[%s11981_s6 + $0x38] sm:$0xff] }
 0x567   :  { %2664 = vmatpush1.msra.mxu0 %v10118_v47  ;;  %5739 = vmatpush3.msra.mxu1 %v10124_v54  ;;  %12795 = vst [vmem:[#allocation66_spill] sm:$0xff] %v10130_v14  ;;  %v10137_v47 = vld [vmem:[%s11981_s6 + $0x30] sm:$0xff]  ;;  %v10143_v54 = vld [vmem:[%s11981_s6 + $0x40] sm:$0xff] }
 0x568   :  { %2665 = vmatprep.subr.mxu0 %v10130_v14  ;;  %5740 = vmatprep.subr.mxu1 %v12393_v22  ;;  %12796 = vst [vmem:[#allocation67_spill] sm:$0xff] %v10137_v47  ;;  %12797 = vst [vmem:[#allocation68_spill] sm:$0xff] %v10143_v54  ;;  %v10149_v14 = vld [vmem:[%s11981_s6 + $0x20] sm:$0xff] }
 0x569   :  { %2666 = vmatpush1.msra.mxu0 %v10137_v47  ;;  %5741 = vmatpush3.msra.mxu1 %v10143_v54  ;;  %12798 = vst [vmem:[#allocation69_spill] sm:$0xff] %v10149_v14  ;;  %v10156_v47 = vld [vmem:[%s11981_s6 + $0x18] sm:$0xff]  ;;  %v10162_v54 = vld [vmem:[%s11981_s6 + $0x28] sm:$0xff] }
 0x56a   :  { %2667 = vmatprep.subr.mxu0 %v10149_v14  ;;  %5742 = vmatprep.subr.mxu1 %v12393_v22  ;;  %12799 = vst [vmem:[#allocation70_spill] sm:$0xff] %v10156_v47  ;;  %12800 = vst [vmem:[#allocation71_spill] sm:$0xff] %v10162_v54  ;;  %v10168_v14 = vld [vmem:[%s11981_s6 + $0x8] sm:$0xff] }
 0x56b   :  { %2668 = vmatpush1.msra.mxu0 %v10156_v47  ;;  %5743 = vmatpush3.msra.mxu1 %v10162_v54  ;;  %12801 = vst [vmem:[#allocation72_spill] sm:$0xff] %v10168_v14  ;;  %v10175_v47 = vld [vmem:[%s11981_s6] sm:$0xff]  ;;  %v10181_v54 = vld [vmem:[%s11981_s6 + $0x10] sm:$0xff] }
 0x56c   :  { %2669 = vmatprep.subr.mxu0 %v10168_v14  ;;  %5744 = vmatprep.subr.mxu1 %v12393_v22  ;;  %12802 = vst [vmem:[#allocation91_spill] sm:$0xff] %v10175_v47  ;;  %12803 = vst [vmem:[#allocation92_spill] sm:$0xff] %v10181_v54  ;;  %v10190_v14 = vld [vmem:[%s11982_s7 + $0x170] sm:$0xff] }
 0x56d   :  { %2670 = vmatpush1.msra.mxu0 %v10175_v47  ;;  %5745 = vmatpush3.msra.mxu1 %v10181_v54  ;;  %12804 = vst [vmem:[#allocation75_spill] sm:$0xff] %v10190_v14 }
 0x56e   :  { %2703 = vmatprep.mubr.f32.mxu0 %v12393_v22  ;;  %5746 = vmatprep.mubr.msk.f32.mxu1 %vm6863_vm0, %v12393_v22 }
 0x56f   :  { %2780 = vmatprep.subr.mxu0 %v10190_v14  ;;  %5749 = vmatprep.subr.mxu1 %v12393_v22 }
 0x5ca   :  { %v2301_v47 = vpop.f32.mrf.mxu1  ;;  %v2230_v8 = vpop.f32.mrf.mxu0 }
 0x5cb   :  { %v2231_v54 = vadd.f32 %v2230_v8, %v12711_v20 }
 0x5cc   :  { %v5643_v12 = vpop.f32.mrf.mxu1  ;;  %v2232_v6 = vpop.f32.mrf.mxu0 }
 0x5cd   :  { %v2302_v12 = vadd.f32 %v2301_v47, %v8308_v35  ;;  %v10204_v47 = vld [vmem:[%s11980_s5] ss:$0 sm:$0xff] }
 0x5eb   :  { %v2371_v4 = vpop.f32.mrf.mxu0  ;;  %v2442_v2 = vpop.f32.mrf.mxu1 }
 0x5ec   :  { %v2446_v1 = vadd.f32 %v2371_v4, %v2231_v54  ;;  %v2460_v14 = vadd.f32 %v9487_v56, %v2442_v2 }
 0x5ed   :  { %v5678_v60 = vpop.f32.mrf.mxu1  ;;  %v2373_v41 = vpop.f32.mrf.mxu0 }
 0x5ee   :  { %v4715_v50 = vmul.f32 -1.442695, %v2446_v1 }
 0x5f0   :  { %6264 = vpow2.f32 %v4715_v50  ;;  %v12806_v50 = vld [vmem:[#allocation78_spill] sm:$0xff] }
 0x5fd   :  { %v6265_v11 = vpop.eup %6264 }
 0x5fe   :  { %v2450_v9 = vadd.f32 1.0, %v6265_v11 }
 0x600   :  { %6266 = vrcp.f32 %v2450_v9 }
 0x60d   :  { %v6267_v23 = vpop.eup %6266  ;;  %v2542_v46 = vpop.f32.mrf.mxu0 }
 0x60e   :  { %v2613_v51 = vpop.f32.mrf.mxu1  ;;  %v2461_v0 = vmul.f32 %v6267_v23, %v2460_v14  ;;  %v2617_v8 = vadd.f32 %v2542_v46, %v12805_v62  ;;  %v2233_v46 = vadd.f32 %v2232_v6, %v8316_v7  ;;  %v12807_v23 = vld [vmem:[#allocation88_spill] sm:$0xff]  ;;  %v10229_v6 = vld [vmem:[%s11982_s7 + $0x158] sm:$0xff] }
 0x60f   :  { %v2544_v60 = vpop.f32.mrf.mxu0 }
 0x610   :  { %v5713_v20 = vpop.f32.mrf.mxu1  ;;  %v10198_v24 = vadd.f32 %v2461_v0, %v2302_v12  ;;  %v4717_v54 = vmul.f32 -1.442695, %v2617_v8  ;;  %v2624_v11 = vadd.f32 %v2544_v60, %v12806_v50  ;;  %v2453_v12 = vadd.f32 %v2373_v41, %v2233_v46  ;;  %v10223_v41 = vld [vmem:[%s11982_s7 + $0x178] sm:$0xff]  ;;  %v10267_v46 = vld [vmem:[%s11982_s7 + $0x128] sm:$0xff] }
 0x611   :  { %v2631_v20 = vadd.f32 %v10204_v47, %v2613_v51  ;;  %v10217_v51 = vld [vmem:[%s11982_s7 + $0x168] sm:$0xff] }
 0x612   :  { %6268 = vpow2.f32 %v4717_v54  ;;  %v4718_v9 = vmul.f32 -1.442695, %v2624_v11  ;;  %v4716_v8 = vmul.f32 -1.442695, %v2453_v12  ;;  %v10286_v12 = vld [vmem:[%s11982_s7 + $0x110] sm:$0xff] }
 0x614   :  { %6270 = vpow2.f32 %v4718_v9 }
 0x61f   :  { %v6269_v1 = vpop.eup %6268 }
 0x620   :  { %v2621_v56 = vadd.f32 1.0, %v6269_v1 }
 0x621   :  { %v6271_v2 = vpop.eup %6270 }
 0x622   :  { %6272 = vrcp.f32 %v2621_v56  ;;  %v2628_v4 = vadd.f32 1.0, %v6271_v2  ;;  %v10236_v56 = vld [vmem:[%s11982_s7 + $0x150] sm:$0xff]  ;;  %v10242_v2 = vld [vmem:[%s11982_s7 + $0x160] sm:$0xff] }
 0x624   :  { %6274 = vrcp.f32 %v2628_v4  ;;  %v10248_v4 = vld [vmem:[%s11982_s7 + $0x140] sm:$0xff] }
 0x62f   :  { %v6273_v62 = vpop.eup %6272 }
 0x630   :  { %v2632_v0 = vmul.f32 %v6273_v62, %v2631_v20  ;;  %v10255_v62 = vld [vmem:[%s11982_s7 + $0x138] sm:$0xff] }
 0x631   :  { %v6275_v54 = vpop.eup %6274 }
 0x632   :  { %v2633_v14 = vadd.f32 %v2632_v0, %v12807_v23  ;;  %v2635_v60 = vsub.f32 1.0, %v6275_v54  ;;  %v2637_v9 = vmul.f32 %v6275_v54, %v9497_v16  ;;  %v10261_v0 = vld [vmem:[%s11982_s7 + $0x148] sm:$0xff]  ;;  %v10274_v23 = vld [vmem:[%s11982_s7 + $0x120] sm:$0xff]  ;;  %v10299_v54 = vld [vmem:[%s11982_s7 + $0x118] sm:$0xff] }
 0x634   :  { %6276 = vtanh.f32 %v2633_v14  ;;  %v10280_v14 = vld [vmem:[%s11982_s7 + $0x130] sm:$0xff] }
 0x635   :  { %6278 = vpow2.f32 %v4716_v8  ;;  %v10293_v8 = vld [vmem:[%s11982_s7 + $0x108] sm:$0xff] }
 0x641   :  { %v6277_v50 = vpop.eup %6276 }
 0x642   :  { %v2636_v11 = vmul.f32 %v6277_v50, %v2635_v60  ;;  %v6279_v16 = vpop.eup %6278  ;;  %v10305_v60 = vld [vmem:[%s11982_s7 + $0xf8] sm:$0xff]  ;;  %v10313_v50 = vld [vmem:[%s11982_s7 + $0xf0] sm:$0xff] }
 0x643   :  { %v2457_v20 = vadd.f32 1.0, %v6279_v16  ;;  %12808 = vst [vmem:[#allocation76_spill] sm:$0xff] %v10305_v60  ;;  %12809 = vst [vmem:[#allocation85_spill] sm:$0xff] %v10313_v50  ;;  %v10338_v16 = vld [vmem:[%s11982_s7 + $0xe8] sm:$0xff] }
 0x644   :  { %v10210_v1 = vadd.f32 %v2637_v9, %v2636_v11  ;;  %v10319_v11 = vld [vmem:[%s11982_s7 + $0x100] sm:$0xff]  ;;  %12813 = vst [vmem:[#allocation96_spill] sm:$0xff] %v10338_v16 }
 0x645   :  { %6280 = vrcp.f32 %v2457_v20  ;;  %12810 = vst [vmem:[#allocation93_spill] sm:$0xff] %v10319_v11  ;;  %v10325_v9 = vld [vmem:[%s11982_s7 + $0xe0] sm:$0xff]  ;;  %v10344_v20 = vld [vmem:[%s11982_s7 + $0xc8] sm:$0xff] }
 0x646   :  { %2704 = vmatmul.mubr.f32.vlgmr.msra.gmra.mxu0 %v10210_v1  ;;  %5747 = vmatmul.mubr.f32.vlgmr.msra.gmra.mxu1 %v10210_v1  ;;  %6282 = vtanh.f32 %v10198_v24  ;;  %12811 = vst [vmem:[#allocation94_spill] sm:$0xff] %v10325_v9  ;;  %v10332_v24 = vld [vmem:[%s11982_s7 + $0xd8] sm:$0xff]  ;;  %12814 = vst [vmem:[#allocation97_spill] sm:$0xff] %v10344_v20 }
 0x647   :  { %2781 = vmatpush1.msra.mxu0 %v10217_v51  ;;  %5750 = vmatpush3.msra.mxu1 %v10223_v41  ;;  %12812 = vst [vmem:[#allocation95_spill] sm:$0xff] %v10332_v24 }
 0x648   :  { %2782 = vmatprep.subr.mxu0 %v10229_v6  ;;  %5751 = vmatprep.subr.mxu1 %v12393_v22 }
 0x649   :  { %2783 = vmatpush1.msra.mxu0 %v10236_v56  ;;  %5752 = vmatpush3.msra.mxu1 %v10242_v2 }
 0x64a   :  { %2784 = vmatprep.subr.mxu0 %v10248_v4  ;;  %5753 = vmatprep.subr.mxu1 %v12393_v22 }
 0x64b   :  { %2785 = vmatpush1.msra.mxu0 %v10255_v62  ;;  %5754 = vmatpush3.msra.mxu1 %v10261_v0 }
 0x64c   :  { %2786 = vmatprep.subr.mxu0 %v10267_v46  ;;  %5755 = vmatprep.subr.mxu1 %v12393_v22 }
 0x64d   :  { %2787 = vmatpush1.msra.mxu0 %v10274_v23  ;;  %5756 = vmatpush3.msra.mxu1 %v10280_v14 }
 0x64e   :  { %2788 = vmatprep.subr.mxu0 %v10286_v12  ;;  %5757 = vmatprep.subr.mxu1 %v12393_v22 }
 0x64f   :  { %2789 = vmatpush1.msra.mxu0 %v10293_v8  ;;  %5758 = vmatpush3.msra.mxu1 %v10299_v54 }
 0x650   :  { %2790 = vmatprep.subr.mxu0 %v10305_v60  ;;  %5759 = vmatprep.subr.mxu1 %v12393_v22 }
 0x651   :  { %2791 = vmatpush1.msra.mxu0 %v10313_v50  ;;  %5760 = vmatpush3.msra.mxu1 %v10319_v11 }
 0x652   :  { %2792 = vmatprep.subr.mxu0 %v10325_v9  ;;  %5761 = vmatprep.subr.mxu1 %v12393_v22  ;;  %v6281_v9 = vpop.eup %6280 }
 0x653   :  { %2793 = vmatpush1.msra.mxu0 %v10332_v24  ;;  %5762 = vmatpush3.msra.mxu1 %v10338_v16  ;;  %v10351_v24 = vld [vmem:[%s11982_s7 + $0xc0] sm:$0xff]  ;;  %v10357_v16 = vld [vmem:[%s11982_s7 + $0xd0] sm:$0xff]  ;;  %v6283_v11 = vpop.eup %6282  ;;  %v2464_v50 = vsub.f32 1.0, %v6281_v9 }
 0x654   :  { %2794 = vmatprep.subr.mxu0 %v10344_v20  ;;  %5763 = vmatprep.subr.mxu1 %v12393_v22  ;;  %12815 = vst [vmem:[#allocation98_spill] sm:$0xff] %v10351_v24  ;;  %12816 = vst [vmem:[#allocation99_spill] sm:$0xff] %v10357_v16  ;;  %v10363_v20 = vld [vmem:[%s11982_s7 + $0xb0] sm:$0xff] }
 0x655   :  { %2795 = vmatpush1.msra.mxu0 %v10351_v24  ;;  %5764 = vmatpush3.msra.mxu1 %v10357_v16  ;;  %12817 = vst [vmem:[#allocation100_spill] sm:$0xff] %v10363_v20  ;;  %v10370_v24 = vld [vmem:[%s11982_s7 + $0xa8] sm:$0xff]  ;;  %v10376_v16 = vld [vmem:[%s11982_s7 + $0xb8] sm:$0xff]  ;;  %v2465_v60 = vmul.f32 %v6283_v11, %v2464_v50  ;;  %v2466_v11 = vmul.f32 %v6281_v9, %v9564_v13  ;;  %v10513_v9 = vld [vmem:[%s11982_s7 + $0x10] sm:$0xff] }
 0x656   :  { %2796 = vmatprep.subr.mxu0 %v10363_v20  ;;  %5765 = vmatprep.subr.mxu1 %v12393_v22  ;;  %12818 = vst [vmem:[#allocation101_spill] sm:$0xff] %v10370_v24  ;;  %12819 = vst [vmem:[#allocation102_spill] sm:$0xff] %v10376_v16  ;;  %v10382_v20 = vld [vmem:[%s11982_s7 + $0x98] sm:$0xff]  ;;  %v10490_v50 = vld [vmem:[%s11982_s7 + $0x28] sm:$0xff] }
 0x657   :  { %2797 = vmatpush1.msra.mxu0 %v10370_v24  ;;  %5766 = vmatpush3.msra.mxu1 %v10376_v16  ;;  %12820 = vst [vmem:[#allocation103_spill] sm:$0xff] %v10382_v20  ;;  %v10389_v24 = vld [vmem:[%s11982_s7 + $0x90] sm:$0xff]  ;;  %v10395_v16 = vld [vmem:[%s11982_s7 + $0xa0] sm:$0xff]  ;;  %12836 = vst [vmem:[#allocation73_spill] sm:$0xff] %v10490_v50 }
 0x658   :  { %2798 = vmatprep.subr.mxu0 %v10382_v20  ;;  %5767 = vmatprep.subr.mxu1 %v12393_v22  ;;  %12821 = vst [vmem:[#allocation104_spill] sm:$0xff] %v10389_v24  ;;  %12822 = vst [vmem:[#allocation105_spill] sm:$0xff] %v10395_v16  ;;  %v10401_v20 = vld [vmem:[%s11982_s7 + $0x80] sm:$0xff]  ;;  %v11109_v13 = vld [vmem:[%s11981_s6 + $0x148] sm:$0xff] }
 0x659   :  { %2799 = vmatpush1.msra.mxu0 %v10389_v24  ;;  %5768 = vmatpush3.msra.mxu1 %v10395_v16  ;;  %12823 = vst [vmem:[#allocation106_spill] sm:$0xff] %v10401_v20  ;;  %v10408_v24 = vld [vmem:[%s11982_s7 + $0x78] sm:$0xff]  ;;  %v10414_v16 = vld [vmem:[%s11982_s7 + $0x88] sm:$0xff] }
 0x65a   :  { %2800 = vmatprep.subr.mxu0 %v10401_v20  ;;  %5769 = vmatprep.subr.mxu1 %v12393_v22  ;;  %12824 = vst [vmem:[#allocation107_spill] sm:$0xff] %v10408_v24  ;;  %12825 = vst [vmem:[#allocation108_spill] sm:$0xff] %v10414_v16  ;;  %v10420_v20 = vld [vmem:[%s11982_s7 + $0x68] sm:$0xff] }
 0x65b   :  { %2801 = vmatpush1.msra.mxu0 %v10408_v24  ;;  %5770 = vmatpush3.msra.mxu1 %v10414_v16  ;;  %12826 = vst [vmem:[#allocation109_spill] sm:$0xff] %v10420_v20  ;;  %v10427_v24 = vld [vmem:[%s11982_s7 + $0x60] sm:$0xff]  ;;  %v10433_v16 = vld [vmem:[%s11982_s7 + $0x70] sm:$0xff] }
 0x65c   :  { %2802 = vmatprep.subr.mxu0 %v10420_v20  ;;  %5771 = vmatprep.subr.mxu1 %v12393_v22  ;;  %12827 = vst [vmem:[#allocation110_spill] sm:$0xff] %v10427_v24  ;;  %12828 = vst [vmem:[#allocation111_spill] sm:$0xff] %v10433_v16  ;;  %v10439_v20 = vld [vmem:[%s11982_s7 + $0x50] sm:$0xff] }
 0x65d   :  { %2803 = vmatpush1.msra.mxu0 %v10427_v24  ;;  %5772 = vmatpush3.msra.mxu1 %v10433_v16  ;;  %12829 = vst [vmem:[#allocation112_spill] sm:$0xff] %v10439_v20  ;;  %v10446_v24 = vld [vmem:[%s11982_s7 + $0x48] sm:$0xff]  ;;  %v10452_v16 = vld [vmem:[%s11982_s7 + $0x58] sm:$0xff] }
 0x65e   :  { %2804 = vmatprep.subr.mxu0 %v10439_v20  ;;  %5773 = vmatprep.subr.mxu1 %v12393_v22  ;;  %12830 = vst [vmem:[#allocation113_spill] sm:$0xff] %v10446_v24  ;;  %12831 = vst [vmem:[#allocation114_spill] sm:$0xff] %v10452_v16  ;;  %v10458_v20 = vld [vmem:[%s11982_s7 + $0x38] sm:$0xff] }
 0x65f   :  { %2805 = vmatpush1.msra.mxu0 %v10446_v24  ;;  %5774 = vmatpush3.msra.mxu1 %v10452_v16  ;;  %12832 = vst [vmem:[#allocation115_spill] sm:$0xff] %v10458_v20  ;;  %v10465_v24 = vld [vmem:[%s11982_s7 + $0x30] sm:$0xff]  ;;  %v10471_v16 = vld [vmem:[%s11982_s7 + $0x40] sm:$0xff] }
 0x660   :  { %2806 = vmatprep.subr.mxu0 %v10458_v20  ;;  %5775 = vmatprep.subr.mxu1 %v12393_v22  ;;  %12833 = vst [vmem:[#allocation116_spill] sm:$0xff] %v10465_v24  ;;  %v10477_v20 = vld [vmem:[%s11982_s7 + $0x20] sm:$0xff] }
 0x661   :  { %2807 = vmatpush1.msra.mxu0 %v10465_v24  ;;  %5776 = vmatpush3.msra.mxu1 %v10471_v16  ;;  %12834 = vst [vmem:[#allocation117_spill] sm:$0xff] %v10477_v20  ;;  %v10484_v24 = vld [vmem:[%s11982_s7 + $0x18] sm:$0xff] }
 0x662   :  { %2808 = vmatprep.subr.mxu0 %v10477_v20  ;;  %5777 = vmatprep.subr.mxu1 %v12393_v22  ;;  %12835 = vst [vmem:[#allocation118_spill] sm:$0xff] %v10484_v24  ;;  %v10497_v20 = vld [vmem:[%s11982_s7 + $0x8] sm:$0xff] }
 0x663   :  { %2809 = vmatpush1.msra.mxu0 %v10484_v24  ;;  %5778 = vmatpush3.msra.mxu1 %v10490_v50  ;;  %v10504_v24 = vld [vmem:[%s11982_s7] sm:$0xff]  ;;  %v10508_v50 = vadd.f32 %v2466_v11, %v2465_v60  ;;  %v12875_v60 = vld [vmem:[#allocation53_spill] sm:$0xff]  ;;  %v12876_v11 = vld [vmem:[#allocation54_spill] sm:$0xff] }
 0x664   :  { %2810 = vmatprep.subr.mxu0 %v10497_v20  ;;  %5779 = vmatprep.subr.mxu1 %v12393_v22 }
 0x665   :  { %2811 = vmatpush1.msra.mxu0 %v10504_v24  ;;  %2844 = vmatprep.mubr.f32.mxu0 %v12393_v22  ;;  %12837 = vst [vmem:[#allocation74_spill] sm:$0xff] %v10508_v50 }
 0x666   :  { %5780 = vmatpush3.msra.mxu1 %v10513_v9  ;;  %5781 = vmatprep.mubr.msk.f32.mxu1 %vm6863_vm0, %v12393_v22 }
 0x667   :  { %2845 = vmatmul.mubr.f32.vlgmr.msra.gmra.mxu0 %v10508_v50  ;;  %5782 = vmatmul.mubr.f32.vlgmr.msra.gmra.mxu1 %v10508_v50 }
 0x668   :  { %2951 = vmatprep.subr.mxu0 %v9574_v15  ;;  %5784 = vmatprep.subr.mxu1 %v12393_v22  ;;  %v12838_v15 = vld [vmem:[#allocation15_spill] sm:$0xff] }
 0x669   :  { %2952 = vmatpush1.msra.mxu0 %v9581_v48  ;;  %5785 = vmatpush3.msra.mxu1 %v9587_v45  ;;  %v12839_v48 = vld [vmem:[#allocation19_spill] sm:$0xff]  ;;  %v12840_v45 = vld [vmem:[#allocation16_spill] sm:$0xff] }
 0x66a   :  { %2953 = vmatprep.subr.mxu0 %v9593_v18  ;;  %5786 = vmatprep.subr.mxu1 %v12393_v22  ;;  %v12841_v18 = vld [vmem:[#allocation17_spill] sm:$0xff] }
 0x66b   :  { %2954 = vmatpush1.msra.mxu0 %v9600_v19  ;;  %5787 = vmatpush3.msra.mxu1 %v9606_v21  ;;  %v12842_v19 = vld [vmem:[#allocation20_spill] sm:$0xff]  ;;  %v12843_v21 = vld [vmem:[#allocation21_spill] sm:$0xff] }
 0x66c   :  { %2955 = vmatprep.subr.mxu0 %v9612_v27  ;;  %5788 = vmatprep.subr.mxu1 %v12393_v22  ;;  %v12844_v27 = vld [vmem:[#allocation22_spill] sm:$0xff] }
 0x66d   :  { %2956 = vmatpush1.msra.mxu0 %v9619_v29  ;;  %5789 = vmatpush3.msra.mxu1 %v9625_v30  ;;  %v12845_v29 = vld [vmem:[#allocation23_spill] sm:$0xff]  ;;  %v12846_v30 = vld [vmem:[#allocation24_spill] sm:$0xff] }
 0x66e   :  { %2957 = vmatprep.subr.mxu0 %v9631_v31  ;;  %5790 = vmatprep.subr.mxu1 %v12393_v22  ;;  %v12847_v31 = vld [vmem:[#allocation25_spill] sm:$0xff] }
 0x66f   :  { %2958 = vmatpush1.msra.mxu0 %v9638_v32  ;;  %5791 = vmatpush3.msra.mxu1 %v9644_v10  ;;  %v12848_v32 = vld [vmem:[#allocation26_spill] sm:$0xff]  ;;  %v12849_v10 = vld [vmem:[#allocation27_spill] sm:$0xff] }
 0x670   :  { %2959 = vmatprep.subr.mxu0 %v9650_v3  ;;  %5792 = vmatprep.subr.mxu1 %v12393_v22  ;;  %v12850_v3 = vld [vmem:[#allocation29_spill] sm:$0xff] }
 0x671   :  { %2960 = vmatpush1.msra.mxu0 %v9657_v26  ;;  %5793 = vmatpush3.msra.mxu1 %v9663_v42  ;;  %v12851_v26 = vld [vmem:[#allocation28_spill] sm:$0xff]  ;;  %v12852_v42 = vld [vmem:[#allocation30_spill] sm:$0xff] }
 0x672   :  { %2961 = vmatprep.subr.mxu0 %v9669_v25  ;;  %5794 = vmatprep.subr.mxu1 %v12393_v22  ;;  %v12853_v25 = vld [vmem:[#allocation31_spill] sm:$0xff] }
 0x673   :  { %2962 = vmatpush1.msra.mxu0 %v9676_v28  ;;  %5795 = vmatpush3.msra.mxu1 %v9682_v44  ;;  %v12854_v28 = vld [vmem:[#allocation32_spill] sm:$0xff]  ;;  %v12855_v44 = vld [vmem:[#allocation33_spill] sm:$0xff]  ;;  %12950 = vst [vmem:[#allocation31_spill] sm:$0xff] %v11109_v13 }
 0x674   :  { %2963 = vmatprep.subr.mxu0 %v9688_v43  ;;  %5796 = vmatprep.subr.mxu1 %v12393_v22  ;;  %v12856_v43 = vld [vmem:[#allocation34_spill] sm:$0xff] }
 0x675   :  { %2964 = vmatpush1.msra.mxu0 %v9695_v38  ;;  %5797 = vmatpush3.msra.mxu1 %v9701_v53  ;;  %v12857_v38 = vld [vmem:[#allocation35_spill] sm:$0xff]  ;;  %v12858_v53 = vld [vmem:[#allocation36_spill] sm:$0xff] }
 0x676   :  { %2965 = vmatprep.subr.mxu0 %v9707_v36  ;;  %5798 = vmatprep.subr.mxu1 %v12393_v22  ;;  %v12859_v36 = vld [vmem:[#allocation37_spill] sm:$0xff] }
 0x677   :  { %2966 = vmatpush1.msra.mxu0 %v9714_v39  ;;  %5799 = vmatpush3.msra.mxu1 %v9720_v55  ;;  %v12860_v39 = vld [vmem:[#allocation38_spill] sm:$0xff]  ;;  %v12861_v55 = vld [vmem:[#allocation39_spill] sm:$0xff] }
 0x678   :  { %2967 = vmatprep.subr.mxu0 %v9726_v33  ;;  %5800 = vmatprep.subr.mxu1 %v12393_v22  ;;  %v12862_v33 = vld [vmem:[#allocation40_spill] sm:$0xff] }
 0x679   :  { %2968 = vmatpush1.msra.mxu0 %v9733_v52  ;;  %5801 = vmatpush3.msra.mxu1 %v9739_v63  ;;  %v12863_v52 = vld [vmem:[#allocation41_spill] sm:$0xff]  ;;  %v12864_v63 = vld [vmem:[#allocation42_spill] sm:$0xff] }
 0x67a   :  { %2969 = vmatprep.subr.mxu0 %v9745_v17  ;;  %5802 = vmatprep.subr.mxu1 %v12393_v22  ;;  %v12865_v17 = vld [vmem:[#allocation43_spill] sm:$0xff] }
 0x67b   :  { %2970 = vmatpush1.msra.mxu0 %v9752_v34  ;;  %5803 = vmatpush3.msra.mxu1 %v9758_v37  ;;  %v12866_v34 = vld [vmem:[#allocation44_spill] sm:$0xff]  ;;  %v12867_v37 = vld [vmem:[#allocation45_spill] sm:$0xff] }
 0x67c   :  { %2971 = vmatprep.subr.mxu0 %v9764_v59  ;;  %5804 = vmatprep.subr.mxu1 %v12393_v22  ;;  %v12868_v59 = vld [vmem:[#allocation46_spill] sm:$0xff] }
 0x67d   :  { %2972 = vmatpush1.msra.mxu0 %v9771_v61  ;;  %5805 = vmatpush3.msra.mxu1 %v9777_v58  ;;  %v12869_v61 = vld [vmem:[#allocation47_spill] sm:$0xff]  ;;  %v12870_v58 = vld [vmem:[#allocation48_spill] sm:$0xff] }
 0x67e   :  { %2973 = vmatprep.subr.mxu0 %v9783_v57  ;;  %5806 = vmatprep.subr.mxu1 %v12393_v22  ;;  %v12871_v57 = vld [vmem:[#allocation49_spill] sm:$0xff] }
 0x67f   :  { %2974 = vmatpush1.msra.mxu0 %v9790_v49  ;;  %5807 = vmatpush3.msra.mxu1 %v9796_v40  ;;  %v12872_v49 = vld [vmem:[#allocation50_spill] sm:$0xff]  ;;  %v12873_v40 = vld [vmem:[#allocation51_spill] sm:$0xff] }
 0x680   :  { %2975 = vmatprep.subr.mxu0 %v9802_v5  ;;  %5808 = vmatprep.subr.mxu1 %v12393_v22  ;;  %v12874_v5 = vld [vmem:[#allocation52_spill] sm:$0xff] }
 0x681   :  { %2976 = vmatpush1.msra.mxu0 %v12838_v15  ;;  %5809 = vmatpush3.msra.mxu1 %v12839_v48  ;;  %v12877_v15 = vld [vmem:[#allocation55_spill] sm:$0xff]  ;;  %v12878_v48 = vld [vmem:[#allocation56_spill] sm:$0xff] }
 0x682   :  { %2977 = vmatprep.subr.mxu0 %v12840_v45  ;;  %5810 = vmatprep.subr.mxu1 %v12393_v22  ;;  %v12879_v45 = vld [vmem:[#allocation57_spill] sm:$0xff] }
 0x683   :  { %2978 = vmatpush1.msra.mxu0 %v12841_v18  ;;  %5811 = vmatpush3.msra.mxu1 %v12842_v19  ;;  %v12880_v18 = vld [vmem:[#allocation58_spill] sm:$0xff]  ;;  %v12881_v19 = vld [vmem:[#allocation59_spill] sm:$0xff] }
 0x684   :  { %2979 = vmatprep.subr.mxu0 %v12843_v21  ;;  %5812 = vmatprep.subr.mxu1 %v12393_v22  ;;  %v12882_v21 = vld [vmem:[#allocation60_spill] sm:$0xff] }
 0x685   :  { %2980 = vmatpush1.msra.mxu0 %v12844_v27  ;;  %5813 = vmatpush3.msra.mxu1 %v12845_v29  ;;  %v12883_v27 = vld [vmem:[#allocation61_spill] sm:$0xff]  ;;  %v12884_v29 = vld [vmem:[#allocation62_spill] sm:$0xff] }
 0x686   :  { %2981 = vmatprep.subr.mxu0 %v12846_v30  ;;  %5814 = vmatprep.subr.mxu1 %v12393_v22  ;;  %v12885_v30 = vld [vmem:[#allocation63_spill] sm:$0xff] }
 0x687   :  { %2982 = vmatpush1.msra.mxu0 %v12847_v31  ;;  %3015 = vmatprep.mubr.f32.mxu0 %v12393_v22  ;;  %v12886_v31 = vld [vmem:[#allocation64_spill] sm:$0xff] }
 0x688   :  { %5815 = vmatpush3.msra.mxu1 %v12848_v32  ;;  %5816 = vmatprep.mubr.msk.f32.mxu1 %vm6863_vm0, %v12393_v22  ;;  %v12887_v32 = vld [vmem:[#allocation65_spill] sm:$0xff] }
 0x689   :  { %3016 = vmatmul.mubr.f32.vlgmr.msra.gmra.mxu0 %v10210_v1  ;;  %5817 = vmatmul.mubr.f32.vlgmr.msra.gmra.mxu1 %v10210_v1 }
 0x68a   :  { %3114 = vmatprep.subr.mxu0 %v12849_v10  ;;  %5819 = vmatprep.subr.mxu1 %v12393_v22  ;;  %v12888_v10 = vld [vmem:[#allocation66_spill] sm:$0xff] }
 0x68b   :  { %3115 = vmatpush1.msra.mxu0 %v12850_v3  ;;  %5820 = vmatpush3.msra.mxu1 %v12851_v26  ;;  %v12889_v3 = vld [vmem:[#allocation67_spill] sm:$0xff]  ;;  %v12890_v26 = vld [vmem:[#allocation68_spill] sm:$0xff] }
 0x68c   :  { %3116 = vmatprep.subr.mxu0 %v12852_v42  ;;  %5821 = vmatprep.subr.mxu1 %v12393_v22  ;;  %v12891_v42 = vld [vmem:[#allocation69_spill] sm:$0xff] }
 0x68d   :  { %3117 = vmatpush1.msra.mxu0 %v12853_v25  ;;  %5822 = vmatpush3.msra.mxu1 %v12854_v28  ;;  %v12892_v25 = vld [vmem:[#allocation70_spill] sm:$0xff]  ;;  %v12893_v28 = vld [vmem:[#allocation71_spill] sm:$0xff] }
 0x68e   :  { %3118 = vmatprep.subr.mxu0 %v12855_v44  ;;  %5823 = vmatprep.subr.mxu1 %v12393_v22  ;;  %v12894_v44 = vld [vmem:[#allocation72_spill] sm:$0xff] }
 0x68f   :  { %3119 = vmatpush1.msra.mxu0 %v12856_v43  ;;  %5824 = vmatpush3.msra.mxu1 %v12857_v38  ;;  %v12895_v43 = vld [vmem:[#allocation91_spill] sm:$0xff]  ;;  %v12896_v38 = vld [vmem:[#allocation92_spill] sm:$0xff] }
 0x690   :  { %3120 = vmatprep.subr.mxu0 %v12858_v53  ;;  %5825 = vmatprep.subr.mxu1 %v12393_v22  ;;  %v12897_v53 = vld [vmem:[#allocation75_spill] sm:$0xff] }
 0x691   :  { %3121 = vmatpush1.msra.mxu0 %v12859_v36  ;;  %5826 = vmatpush3.msra.mxu1 %v12860_v39 }
 0x692   :  { %3122 = vmatprep.subr.mxu0 %v12861_v55  ;;  %5827 = vmatprep.subr.mxu1 %v12393_v22 }
 0x693   :  { %3123 = vmatpush1.msra.mxu0 %v12862_v33  ;;  %5828 = vmatpush3.msra.mxu1 %v12863_v52  ;;  %v12898_v52 = vld [vmem:[#allocation13_spill] sm:$0xff] }
 0x694   :  { %3124 = vmatprep.subr.mxu0 %v12864_v63  ;;  %5829 = vmatprep.subr.mxu1 %v12393_v22 }
 0x695   :  { %3125 = vmatpush1.msra.mxu0 %v12865_v17  ;;  %5830 = vmatpush3.msra.mxu1 %v12866_v34 }
 0x696   :  { %3126 = vmatprep.subr.mxu0 %v12867_v37  ;;  %5831 = vmatprep.subr.mxu1 %v12393_v22 }
 0x697   :  { %3127 = vmatpush1.msra.mxu0 %v12868_v59  ;;  %5832 = vmatpush3.msra.mxu1 %v12869_v61 }
 0x698   :  { %3128 = vmatprep.subr.mxu0 %v12870_v58  ;;  %5833 = vmatprep.subr.mxu1 %v12393_v22 }
 0x699   :  { %3129 = vmatpush1.msra.mxu0 %v12871_v57  ;;  %5834 = vmatpush3.msra.mxu1 %v12872_v49 }
 0x69a   :  { %3130 = vmatprep.subr.mxu0 %v12873_v40  ;;  %5835 = vmatprep.subr.mxu1 %v12393_v22  ;;  %v10662_v40 = vld [vmem:[%s11984_s9] ss:$0 sm:$0xff] }
 0x69b   :  { %3131 = vmatpush1.msra.mxu0 %v12874_v5  ;;  %5836 = vmatpush3.msra.mxu1 %v12875_v60 }
 0x69c   :  { %3132 = vmatprep.subr.mxu0 %v12876_v11  ;;  %5837 = vmatprep.subr.mxu1 %v12393_v22 }
 0x69d   :  { %3133 = vmatpush1.msra.mxu0 %v12877_v15  ;;  %5838 = vmatpush3.msra.mxu1 %v12878_v48 }
 0x69e   :  { %3134 = vmatprep.subr.mxu0 %v12879_v45  ;;  %5839 = vmatprep.subr.mxu1 %v12393_v22 }
 0x69f   :  { %3135 = vmatpush1.msra.mxu0 %v12880_v18  ;;  %5840 = vmatpush3.msra.mxu1 %v12881_v19  ;;  %v12899_v18 = vld [vmem:[#allocation79_spill] sm:$0xff] }
 0x6a0   :  { %3136 = vmatprep.subr.mxu0 %v12882_v21  ;;  %5841 = vmatprep.subr.mxu1 %v12393_v22 }
 0x6a1   :  { %3137 = vmatpush1.msra.mxu0 %v12883_v27  ;;  %5842 = vmatpush3.msra.mxu1 %v12884_v29 }
 0x6a2   :  { %3138 = vmatprep.subr.mxu0 %v12885_v30  ;;  %5843 = vmatprep.subr.mxu1 %v12393_v22 }
 0x6a3   :  { %3139 = vmatpush1.msra.mxu0 %v12886_v31  ;;  %5844 = vmatpush3.msra.mxu1 %v12887_v32  ;;  %v12900_v31 = vld [vmem:[#allocation80_spill] sm:$0xff] }
 0x6a4   :  { %3140 = vmatprep.subr.mxu0 %v12888_v10  ;;  %5845 = vmatprep.subr.mxu1 %v12393_v22 }
 0x6a5   :  { %3141 = vmatpush1.msra.mxu0 %v12889_v3  ;;  %5846 = vmatpush3.msra.mxu1 %v12890_v26 }
 0x6a6   :  { %3142 = vmatprep.subr.mxu0 %v12891_v42  ;;  %5847 = vmatprep.subr.mxu1 %v12393_v22 }
 0x6a7   :  { %3143 = vmatpush1.msra.mxu0 %v12892_v25  ;;  %5848 = vmatpush3.msra.mxu1 %v12893_v28 }
 0x6a8   :  { %3144 = vmatprep.subr.mxu0 %v12894_v44  ;;  %5849 = vmatprep.subr.mxu1 %v12393_v22 }
 0x6a9   :  { %3145 = vmatpush1.msra.mxu0 %v12895_v43  ;;  %5850 = vmatpush3.msra.mxu1 %v12896_v38 }
 0x6aa   :  { %3178 = vmatprep.mubr.f32.mxu0 %v12393_v22  ;;  %5851 = vmatprep.mubr.msk.f32.mxu1 %vm6863_vm0, %v12393_v22 }
 0x6ab   :  { %3255 = vmatprep.subr.mxu0 %v12897_v53  ;;  %5854 = vmatprep.subr.mxu1 %v12393_v22  ;;  %v12901_v53 = vld [vmem:[#allocation87_spill] sm:$0xff] }
 0x706   :  { %v2776_v36 = vpop.f32.mrf.mxu1  ;;  %v2705_v55 = vpop.f32.mrf.mxu0 }
 0x707   :  { %v2706_v63 = vadd.f32 %v2705_v55, %v12898_v52  ;;  %v2777_v48 = vadd.f32 %v2776_v36, %v8308_v35 }
 0x708   :  { %v5748_v39 = vpop.f32.mrf.mxu1  ;;  %v2707_v33 = vpop.f32.mrf.mxu0 }
 0x709   :  { %v2708_v38 = vadd.f32 %v2707_v33, %v8316_v7  ;;  %v12916_v33 = vld [vmem:[#allocation105_spill] sm:$0xff] }
 0x727   :  { %v2846_v17 = vpop.f32.mrf.mxu0  ;;  %v2917_v34 = vpop.f32.mrf.mxu1 }
 0x728   :  { %v2921_v37 = vadd.f32 %v2846_v17, %v2706_v63  ;;  %v2935_v5 = vadd.f32 %v10662_v40, %v2917_v34 }
 0x729   :  { %v5783_v59 = vpop.f32.mrf.mxu1  ;;  %v2848_v49 = vpop.f32.mrf.mxu0 }
 0x72a   :  { %v4719_v61 = vmul.f32 -1.442695, %v2921_v37  ;;  %v2928_v39 = vadd.f32 %v2848_v49, %v2708_v38  ;;  %v12919_v49 = vld [vmem:[#allocation108_spill] sm:$0xff] }
 0x72b   :  { %v10806_v38 = vld [vmem:[%s11978_s3 + $0x128] sm:$0xff] }
 0x72c   :  { %6284 = vpow2.f32 %v4719_v61  ;;  %v4720_v55 = vmul.f32 -1.442695, %v2928_v39  ;;  %v10825_v39 = vld [vmem:[%s11978_s3 + $0x110] sm:$0xff] }
 0x739   :  { %v6285_v58 = vpop.eup %6284 }
 0x73a   :  { %v2925_v57 = vadd.f32 1.0, %v6285_v58  ;;  %v12917_v58 = vld [vmem:[#allocation106_spill] sm:$0xff] }
 0x73c   :  { %6286 = vrcp.f32 %v2925_v57  ;;  %v12918_v57 = vld [vmem:[#allocation107_spill] sm:$0xff] }
 0x749   :  { %v6287_v60 = vpop.eup %6286  ;;  %v3017_v11 = vpop.f32.mrf.mxu0 }
 0x74a   :  { %v3088_v15 = vpop.f32.mrf.mxu1  ;;  %v2936_v45 = vmul.f32 %v6287_v60, %v2935_v5  ;;  %v3092_v19 = vadd.f32 %v3017_v11, %v12899_v18  ;;  %v12920_v60 = vld [vmem:[#allocation109_spill] sm:$0xff]  ;;  %v12921_v11 = vld [vmem:[#allocation110_spill] sm:$0xff] }
 0x74b   :  { %v3019_v30 = vpop.f32.mrf.mxu0  ;;  %v3106_v28 = vadd.f32 %v10204_v47, %v3088_v15  ;;  %v12922_v15 = vld [vmem:[#allocation111_spill] sm:$0xff]  ;;  %v12924_v18 = vld [vmem:[#allocation113_spill] sm:$0xff] }
 0x74c   :  { %v5818_v21 = vpop.f32.mrf.mxu1  ;;  %v2937_v27 = vadd.f32 %v2936_v45, %v2777_v48  ;;  %v4721_v29 = vmul.f32 -1.442695, %v3092_v19  ;;  %v3099_v32 = vadd.f32 %v3019_v30, %v12900_v31  ;;  %v12923_v45 = vld [vmem:[#allocation112_spill] sm:$0xff]  ;;  %v12925_v19 = vld [vmem:[#allocation114_spill] sm:$0xff]  ;;  %v12928_v31 = vld [vmem:[#allocation117_spill] sm:$0xff] }
 0x74e   :  { %6288 = vpow2.f32 %v4721_v29  ;;  %v4722_v10 = vmul.f32 -1.442695, %v3099_v32  ;;  %v12927_v29 = vld [vmem:[#allocation116_spill] sm:$0xff]  ;;  %v12929_v32 = vld [vmem:[#allocation118_spill] sm:$0xff] }
 0x750   :  { %6290 = vpow2.f32 %v4722_v10  ;;  %v12930_v10 = vld [vmem:[#allocation73_spill] sm:$0xff] }
 0x75b   :  { %v6289_v3 = vpop.eup %6288 }
 0x75c   :  { %v3096_v26 = vadd.f32 1.0, %v6289_v3 }
 0x75d   :  { %v6291_v42 = vpop.eup %6290 }
 0x75e   :  { %6292 = vrcp.f32 %v3096_v26  ;;  %v3103_v25 = vadd.f32 1.0, %v6291_v42  ;;  %v10768_v26 = vld [vmem:[%s11978_s3 + $0x158] sm:$0xff]  ;;  %v10775_v42 = vld [vmem:[%s11978_s3 + $0x150] sm:$0xff] }
 0x760   :  { %6294 = vrcp.f32 %v3103_v25  ;;  %v10781_v25 = vld [vmem:[%s11978_s3 + $0x160] sm:$0xff] }
 0x76b   :  { %v6293_v44 = vpop.eup %6292 }
 0x76c   :  { %v3107_v43 = vmul.f32 %v6293_v44, %v3106_v28  ;;  %v10787_v28 = vld [vmem:[%s11978_s3 + $0x140] sm:$0xff]  ;;  %v10794_v44 = vld [vmem:[%s11978_s3 + $0x138] sm:$0xff] }
 0x76d   :  { %v6295_v63 = vpop.eup %6294 }
 0x76e   :  { %v3108_v36 = vadd.f32 %v3107_v43, %v12901_v53  ;;  %v3110_v17 = vsub.f32 1.0, %v6295_v63  ;;  %v3112_v59 = vmul.f32 %v6295_v63, %v10210_v1  ;;  %v10800_v43 = vld [vmem:[%s11978_s3 + $0x148] sm:$0xff]  ;;  %v10813_v53 = vld [vmem:[%s11978_s3 + $0x120] sm:$0xff]  ;;  %v10838_v63 = vld [vmem:[%s11978_s3 + $0x118] sm:$0xff] }
 0x770   :  { %6296 = vtanh.f32 %v3108_v36  ;;  %v10819_v36 = vld [vmem:[%s11978_s3 + $0x130] sm:$0xff] }
 0x771   :  { %6298 = vpow2.f32 %v4720_v55  ;;  %v10832_v55 = vld [vmem:[%s11978_s3 + $0x108] sm:$0xff] }
 0x77d   :  { %v6297_v34 = vpop.eup %6296 }
 0x77e   :  { %v3111_v37 = vmul.f32 %v6297_v34, %v3110_v17  ;;  %v6299_v47 = vpop.eup %6298  ;;  %v10844_v17 = vld [vmem:[%s11978_s3 + $0xf8] sm:$0xff]  ;;  %v10851_v34 = vld [vmem:[%s11978_s3 + $0xf0] sm:$0xff] }
 0x77f   :  { %v2932_v1 = vadd.f32 1.0, %v6299_v47  ;;  %v10870_v47 = vld [vmem:[%s11978_s3 + $0xd8] sm:$0xff] }
 0x780   :  { %v10672_v61 = vadd.f32 %v3112_v59, %v3111_v37  ;;  %v10857_v37 = vld [vmem:[%s11978_s3 + $0x100] sm:$0xff] }
 0x781   :  { %6300 = vrcp.f32 %v2932_v1  ;;  %v10863_v59 = vld [vmem:[%s11978_s3 + $0xe0] sm:$0xff]  ;;  %v10876_v1 = vld [vmem:[%s11978_s3 + $0xe8] sm:$0xff] }
 0x782   :  { %3179 = vmatmul.mubr.f32.vlgmr.msra.gmra.mxu0 %v10672_v61  ;;  %5852 = vmatmul.mubr.f32.vlgmr.msra.gmra.mxu1 %v10672_v61  ;;  %6302 = vtanh.f32 %v2937_v27  ;;  %v12926_v27 = vld [vmem:[#allocation115_spill] sm:$0xff] }
 0x783   :  { %3256 = vmatpush1.msra.mxu0 %v10217_v51  ;;  %5855 = vmatpush3.msra.mxu1 %v10223_v41  ;;  %v12902_v51 = vld [vmem:[#allocation76_spill] sm:$0xff]  ;;  %v12903_v41 = vld [vmem:[#allocation85_spill] sm:$0xff] }
 0x784   :  { %3257 = vmatprep.subr.mxu0 %v10229_v6  ;;  %5856 = vmatprep.subr.mxu1 %v12393_v22  ;;  %v12904_v6 = vld [vmem:[#allocation93_spill] sm:$0xff] }
 0x785   :  { %3258 = vmatpush1.msra.mxu0 %v10236_v56  ;;  %5857 = vmatpush3.msra.mxu1 %v10242_v2  ;;  %v12905_v56 = vld [vmem:[#allocation94_spill] sm:$0xff]  ;;  %v12906_v2 = vld [vmem:[#allocation95_spill] sm:$0xff] }
 0x786   :  { %3259 = vmatprep.subr.mxu0 %v10248_v4  ;;  %5858 = vmatprep.subr.mxu1 %v12393_v22  ;;  %v12907_v4 = vld [vmem:[#allocation96_spill] sm:$0xff] }
 0x787   :  { %3260 = vmatpush1.msra.mxu0 %v10255_v62  ;;  %5859 = vmatpush3.msra.mxu1 %v10261_v0  ;;  %v12908_v62 = vld [vmem:[#allocation97_spill] sm:$0xff]  ;;  %v12909_v0 = vld [vmem:[#allocation98_spill] sm:$0xff] }
 0x788   :  { %3261 = vmatprep.subr.mxu0 %v10267_v46  ;;  %5860 = vmatprep.subr.mxu1 %v12393_v22  ;;  %v12910_v46 = vld [vmem:[#allocation99_spill] sm:$0xff] }
 0x789   :  { %3262 = vmatpush1.msra.mxu0 %v10274_v23  ;;  %5861 = vmatpush3.msra.mxu1 %v10280_v14  ;;  %v12911_v23 = vld [vmem:[#allocation100_spill] sm:$0xff]  ;;  %v12912_v14 = vld [vmem:[#allocation101_spill] sm:$0xff] }
 0x78a   :  { %3263 = vmatprep.subr.mxu0 %v10286_v12  ;;  %5862 = vmatprep.subr.mxu1 %v12393_v22  ;;  %v12913_v12 = vld [vmem:[#allocation102_spill] sm:$0xff] }
 0x78b   :  { %3264 = vmatpush1.msra.mxu0 %v10293_v8  ;;  %5863 = vmatpush3.msra.mxu1 %v10299_v54  ;;  %v12914_v8 = vld [vmem:[#allocation103_spill] sm:$0xff]  ;;  %v12915_v54 = vld [vmem:[#allocation104_spill] sm:$0xff] }
 0x78c   :  { %3265 = vmatprep.subr.mxu0 %v12902_v51  ;;  %5864 = vmatprep.subr.mxu1 %v12393_v22  ;;  %v10882_v51 = vld [vmem:[%s11978_s3 + $0xc8] sm:$0xff] }
 0x78d   :  { %3266 = vmatpush1.msra.mxu0 %v12903_v41  ;;  %5865 = vmatpush3.msra.mxu1 %v12904_v6  ;;  %v10889_v41 = vld [vmem:[%s11978_s3 + $0xc0] sm:$0xff]  ;;  %v10895_v6 = vld [vmem:[%s11978_s3 + $0xd0] sm:$0xff] }
 0x78e   :  { %3267 = vmatprep.subr.mxu0 %v12905_v56  ;;  %5866 = vmatprep.subr.mxu1 %v12393_v22  ;;  %v6301_v5 = vpop.eup %6300  ;;  %v10901_v56 = vld [vmem:[%s11978_s3 + $0xb0] sm:$0xff] }
 0x78f   :  { %3268 = vmatpush1.msra.mxu0 %v12906_v2  ;;  %5867 = vmatpush3.msra.mxu1 %v12907_v4  ;;  %v6303_v48 = vpop.eup %6302  ;;  %v2939_v21 = vsub.f32 1.0, %v6301_v5  ;;  %v2941_v3 = vmul.f32 %v6301_v5, %v10508_v50  ;;  %v10908_v2 = vld [vmem:[%s11978_s3 + $0xa8] sm:$0xff]  ;;  %v10914_v4 = vld [vmem:[%s11978_s3 + $0xb8] sm:$0xff] }
 0x790   :  { %3269 = vmatprep.subr.mxu0 %v12908_v62  ;;  %5868 = vmatprep.subr.mxu1 %v12393_v22  ;;  %v10920_v62 = vld [vmem:[%s11978_s3 + $0x98] sm:$0xff] }
 0x791   :  { %3270 = vmatpush1.msra.mxu0 %v12909_v0  ;;  %5869 = vmatpush3.msra.mxu1 %v12910_v46  ;;  %v2940_v30 = vmul.f32 %v6303_v48, %v2939_v21  ;;  %v10927_v0 = vld [vmem:[%s11978_s3 + $0x90] sm:$0xff]  ;;  %v10933_v46 = vld [vmem:[%s11978_s3 + $0xa0] sm:$0xff]  ;;  %v10996_v5 = vld [vmem:[%s11978_s3 + $0x38] sm:$0xff] }
 0x792   :  { %3271 = vmatprep.subr.mxu0 %v12911_v23  ;;  %5870 = vmatprep.subr.mxu1 %v12393_v22  ;;  %v10939_v23 = vld [vmem:[%s11978_s3 + $0x80] sm:$0xff]  ;;  %12933 = vst [vmem:[#allocation78_spill] sm:$0xff] %v10996_v5  ;;  %v11022_v48 = vld [vmem:[%s11978_s3 + $0x18] sm:$0xff]  ;;  %v11048_v21 = vld [vmem:[%s11978_s3 + $0x10] sm:$0xff] }
 0x793   :  { %3272 = vmatpush1.msra.mxu0 %v12912_v14  ;;  %5871 = vmatpush3.msra.mxu1 %v12913_v12  ;;  %v10946_v14 = vld [vmem:[%s11978_s3 + $0x78] sm:$0xff]  ;;  %v10952_v12 = vld [vmem:[%s11978_s3 + $0x88] sm:$0xff]  ;;  %12937 = vst [vmem:[#allocation16_spill] sm:$0xff] %v11022_v48  ;;  %12941 = vst [vmem:[#allocation22_spill] sm:$0xff] %v11048_v21 }
 0x794   :  { %3273 = vmatprep.subr.mxu0 %v12914_v8  ;;  %5872 = vmatprep.subr.mxu1 %v12393_v22  ;;  %v10958_v8 = vld [vmem:[%s11978_s3 + $0x68] sm:$0xff]  ;;  %v11103_v50 = vld [vmem:[%s11981_s6 + $0x138] sm:$0xff] }
 0x795   :  { %3274 = vmatpush1.msra.mxu0 %v12915_v54  ;;  %5873 = vmatpush3.msra.mxu1 %v12916_v33  ;;  %v10965_v54 = vld [vmem:[%s11978_s3 + $0x60] sm:$0xff]  ;;  %v10971_v33 = vld [vmem:[%s11978_s3 + $0x70] sm:$0xff]  ;;  %12949 = vst [vmem:[#allocation30_spill] sm:$0xff] %v11103_v50 }
 0x796   :  { %3275 = vmatprep.subr.mxu0 %v12917_v58  ;;  %5874 = vmatprep.subr.mxu1 %v12393_v22  ;;  %v10977_v58 = vld [vmem:[%s11978_s3 + $0x50] sm:$0xff] }
 0x797   :  { %3276 = vmatpush1.msra.mxu0 %v12918_v57  ;;  %5875 = vmatpush3.msra.mxu1 %v12919_v49  ;;  %v10984_v57 = vld [vmem:[%s11978_s3 + $0x48] sm:$0xff]  ;;  %v10990_v49 = vld [vmem:[%s11978_s3 + $0x58] sm:$0xff] }
 0x798   :  { %3277 = vmatprep.subr.mxu0 %v12920_v60  ;;  %5876 = vmatprep.subr.mxu1 %v12393_v22  ;;  %12931 = vst [vmem:[#allocation86_spill] sm:$0xff] %v10984_v57  ;;  %12932 = vst [vmem:[#allocation77_spill] sm:$0xff] %v10990_v49  ;;  %v11003_v60 = vld [vmem:[%s11978_s3 + $0x30] sm:$0xff] }
 0x799   :  { %3278 = vmatpush1.msra.mxu0 %v12921_v11  ;;  %5877 = vmatpush3.msra.mxu1 %v12922_v15  ;;  %12934 = vst [vmem:[#allocation88_spill] sm:$0xff] %v11003_v60  ;;  %v11009_v11 = vld [vmem:[%s11978_s3 + $0x40] sm:$0xff] }
 0x79a   :  { %3279 = vmatprep.subr.mxu0 %v12923_v45  ;;  %5878 = vmatprep.subr.mxu1 %v12393_v22  ;;  %12935 = vst [vmem:[#allocation15_spill] sm:$0xff] %v11009_v11  ;;  %v11015_v15 = vld [vmem:[%s11978_s3 + $0x20] sm:$0xff]  ;;  %v11028_v45 = vld [vmem:[%s11978_s3 + $0x28] sm:$0xff] }
 0x79b   :  { %3280 = vmatpush1.msra.mxu0 %v12924_v18  ;;  %5879 = vmatpush3.msra.mxu1 %v12925_v19  ;;  %12936 = vst [vmem:[#allocation19_spill] sm:$0xff] %v11015_v15  ;;  %12938 = vst [vmem:[#allocation17_spill] sm:$0xff] %v11028_v45  ;;  %v11034_v18 = vld [vmem:[%s11978_s3 + $0x8] sm:$0xff]  ;;  %v11041_v19 = vld [vmem:[%s11978_s3] sm:$0xff] }
 0x79c   :  { %3281 = vmatprep.subr.mxu0 %v12926_v27  ;;  %5880 = vmatprep.subr.mxu1 %v12393_v22  ;;  %12939 = vst [vmem:[#allocation20_spill] sm:$0xff] %v11034_v18  ;;  %12940 = vst [vmem:[#allocation21_spill] sm:$0xff] %v11041_v19  ;;  %v11058_v27 = vld [vmem:[%s11981_s6 + $0x170] sm:$0xff] }
 0x79d   :  { %3282 = vmatpush1.msra.mxu0 %v12927_v29  ;;  %5881 = vmatpush3.msra.mxu1 %v10471_v16  ;;  %v10739_v16 = vadd.f32 %v2941_v3, %v2940_v30  ;;  %12942 = vst [vmem:[#allocation23_spill] sm:$0xff] %v11058_v27  ;;  %v11065_v29 = vld [vmem:[%s11981_s6 + $0x168] sm:$0xff]  ;;  %v11071_v30 = vld [vmem:[%s11981_s6 + $0x178] sm:$0xff]  ;;  %v11096_v3 = vld [vmem:[%s11981_s6 + $0x140] sm:$0xff] }
 0x79e   :  { %3283 = vmatprep.subr.mxu0 %v12928_v31  ;;  %5882 = vmatprep.subr.mxu1 %v12393_v22  ;;  %12943 = vst [vmem:[#allocation24_spill] sm:$0xff] %v11065_v29  ;;  %12944 = vst [vmem:[#allocation25_spill] sm:$0xff] %v11071_v30  ;;  %v11077_v31 = vld [vmem:[%s11981_s6 + $0x158] sm:$0xff] }
 0x79f   :  { %3284 = vmatpush1.msra.mxu0 %v12929_v32  ;;  %5883 = vmatpush3.msra.mxu1 %v12930_v10  ;;  %12945 = vst [vmem:[#allocation26_spill] sm:$0xff] %v11077_v31  ;;  %v11084_v32 = vld [vmem:[%s11981_s6 + $0x150] sm:$0xff]  ;;  %v11090_v10 = vld [vmem:[%s11981_s6 + $0x160] sm:$0xff]  ;;  %12948 = vst [vmem:[#allocation28_spill] sm:$0xff] %v11096_v3 }
 0x7a0   :  { %3285 = vmatprep.subr.mxu0 %v10497_v20  ;;  %5884 = vmatprep.subr.mxu1 %v12393_v22  ;;  %v10749_v20 = vld [vmem:[%s11978_s3 + $0x170] sm:$0xff]  ;;  %12946 = vst [vmem:[#allocation27_spill] sm:$0xff] %v11084_v32  ;;  %12947 = vst [vmem:[#allocation29_spill] sm:$0xff] %v11090_v10 }
 0x7a1   :  { %3286 = vmatpush1.msra.mxu0 %v10504_v24  ;;  %3319 = vmatprep.mubr.f32.mxu0 %v12393_v22  ;;  %v10756_v24 = vld [vmem:[%s11978_s3 + $0x168] sm:$0xff] }
 0x7a2   :  { %5885 = vmatpush3.msra.mxu1 %v10513_v9  ;;  %5886 = vmatprep.mubr.msk.f32.mxu1 %vm6863_vm0, %v12393_v22  ;;  %v10762_v9 = vld [vmem:[%s11978_s3 + $0x178] sm:$0xff] }
 0x7a3   :  { %3320 = vmatmul.mubr.f32.vlgmr.msra.gmra.mxu0 %v10739_v16  ;;  %5887 = vmatmul.mubr.f32.vlgmr.msra.gmra.mxu1 %v10739_v16 }
 0x7a4   :  { %3426 = vmatprep.subr.mxu0 %v10749_v20  ;;  %5889 = vmatprep.subr.mxu1 %v12393_v22 }
 0x7a5   :  { %3427 = vmatpush1.msra.mxu0 %v10756_v24  ;;  %5890 = vmatpush3.msra.mxu1 %v10762_v9 }
 0x7a6   :  { %3428 = vmatprep.subr.mxu0 %v10768_v26  ;;  %5891 = vmatprep.subr.mxu1 %v12393_v22 }
 0x7a7   :  { %3429 = vmatpush1.msra.mxu0 %v10775_v42  ;;  %5892 = vmatpush3.msra.mxu1 %v10781_v25 }
 0x7a8   :  { %3430 = vmatprep.subr.mxu0 %v10787_v28  ;;  %5893 = vmatprep.subr.mxu1 %v12393_v22 }
 0x7a9   :  { %3431 = vmatpush1.msra.mxu0 %v10794_v44  ;;  %5894 = vmatpush3.msra.mxu1 %v10800_v43 }
 0x7aa   :  { %3432 = vmatprep.subr.mxu0 %v10806_v38  ;;  %5895 = vmatprep.subr.mxu1 %v12393_v22 }
 0x7ab   :  { %3433 = vmatpush1.msra.mxu0 %v10813_v53  ;;  %5896 = vmatpush3.msra.mxu1 %v10819_v36 }
 0x7ac   :  { %3434 = vmatprep.subr.mxu0 %v10825_v39  ;;  %5897 = vmatprep.subr.mxu1 %v12393_v22 }
 0x7ad   :  { %3435 = vmatpush1.msra.mxu0 %v10832_v55  ;;  %5898 = vmatpush3.msra.mxu1 %v10838_v63 }
 0x7ae   :  { %3436 = vmatprep.subr.mxu0 %v10844_v17  ;;  %5899 = vmatprep.subr.mxu1 %v12393_v22 }
 0x7af   :  { %3437 = vmatpush1.msra.mxu0 %v10851_v34  ;;  %5900 = vmatpush3.msra.mxu1 %v10857_v37 }
 0x7b0   :  { %3438 = vmatprep.subr.mxu0 %v10863_v59  ;;  %5901 = vmatprep.subr.mxu1 %v12393_v22 }
 0x7b1   :  { %3439 = vmatpush1.msra.mxu0 %v10870_v47  ;;  %5902 = vmatpush3.msra.mxu1 %v10876_v1 }
 0x7b2   :  { %3440 = vmatprep.subr.mxu0 %v10882_v51  ;;  %5903 = vmatprep.subr.mxu1 %v12393_v22 }
 0x7b3   :  { %3441 = vmatpush1.msra.mxu0 %v10889_v41  ;;  %5904 = vmatpush3.msra.mxu1 %v10895_v6 }
 0x7b4   :  { %3442 = vmatprep.subr.mxu0 %v10901_v56  ;;  %5905 = vmatprep.subr.mxu1 %v12393_v22 }
 0x7b5   :  { %3443 = vmatpush1.msra.mxu0 %v10908_v2  ;;  %5906 = vmatpush3.msra.mxu1 %v10914_v4 }
 0x7b6   :  { %3444 = vmatprep.subr.mxu0 %v10920_v62  ;;  %5907 = vmatprep.subr.mxu1 %v12393_v22 }
 0x7b7   :  { %3445 = vmatpush1.msra.mxu0 %v10927_v0  ;;  %5908 = vmatpush3.msra.mxu1 %v10933_v46 }
 0x7b8   :  { %3446 = vmatprep.subr.mxu0 %v10939_v23  ;;  %5909 = vmatprep.subr.mxu1 %v12393_v22 }
 0x7b9   :  { %3447 = vmatpush1.msra.mxu0 %v10946_v14  ;;  %5910 = vmatpush3.msra.mxu1 %v10952_v12 }
 0x7ba   :  { %3448 = vmatprep.subr.mxu0 %v10958_v8  ;;  %5911 = vmatprep.subr.mxu1 %v12393_v22 }
 0x7bb   :  { %3449 = vmatpush1.msra.mxu0 %v10965_v54  ;;  %5912 = vmatpush3.msra.mxu1 %v10971_v33 }
 0x7bc   :  { %3450 = vmatprep.subr.mxu0 %v10977_v58  ;;  %5913 = vmatprep.subr.mxu1 %v12393_v22 }
 0x7bd   :  { %3451 = vmatpush1.msra.mxu0 %v10984_v57  ;;  %5914 = vmatpush3.msra.mxu1 %v10990_v49  ;;  %v12991_v49 = vld [vmem:[#allocation81_spill] sm:$0xff] }
 0x7be   :  { %3452 = vmatprep.subr.mxu0 %v10996_v5  ;;  %5915 = vmatprep.subr.mxu1 %v12393_v22 }
 0x7bf   :  { %3453 = vmatpush1.msra.mxu0 %v11003_v60  ;;  %5916 = vmatpush3.msra.mxu1 %v11009_v11 }
 0x7c0   :  { %3454 = vmatprep.subr.mxu0 %v11015_v15  ;;  %5917 = vmatprep.subr.mxu1 %v12393_v22 }
 0x7c1   :  { %3455 = vmatpush1.msra.mxu0 %v11022_v48  ;;  %5918 = vmatpush3.msra.mxu1 %v11028_v45 }
 0x7c2   :  { %3456 = vmatprep.subr.mxu0 %v11034_v18  ;;  %5919 = vmatprep.subr.mxu1 %v12393_v22 }
 0x7c3   :  { %3457 = vmatpush1.msra.mxu0 %v11041_v19  ;;  %3490 = vmatprep.mubr.f32.mxu0 %v12393_v22 }
 0x7c4   :  { %5920 = vmatpush3.msra.mxu1 %v11048_v21  ;;  %5921 = vmatprep.mubr.msk.f32.mxu1 %vm6863_vm0, %v12393_v22 }
 0x7c5   :  { %3491 = vmatmul.mubr.f32.vlgmr.msra.gmra.mxu0 %v10672_v61  ;;  %5922 = vmatmul.mubr.f32.vlgmr.msra.gmra.mxu1 %v10672_v61 }
 0x7c6   :  { %3589 = vmatprep.subr.mxu0 %v11058_v27  ;;  %5924 = vmatprep.subr.mxu1 %v12393_v22 }
 0x7c7   :  { %3590 = vmatpush1.msra.mxu0 %v11065_v29  ;;  %5925 = vmatpush3.msra.mxu1 %v11071_v30 }
 0x7c8   :  { %3591 = vmatprep.subr.mxu0 %v11077_v31  ;;  %5926 = vmatprep.subr.mxu1 %v12393_v22 }
 0x7c9   :  { %3592 = vmatpush1.msra.mxu0 %v11084_v32  ;;  %5927 = vmatpush3.msra.mxu1 %v11090_v10 }
 0x7ca   :  { %3593 = vmatprep.subr.mxu0 %v11096_v3  ;;  %5928 = vmatprep.subr.mxu1 %v12393_v22  ;;  %v11115_v3 = vld [vmem:[%s11981_s6 + $0x128] sm:$0xff] }
 0x7cb   :  { %3594 = vmatpush1.msra.mxu0 %v11103_v50  ;;  %5929 = vmatpush3.msra.mxu1 %v11109_v13  ;;  %12951 = vst [vmem:[#allocation32_spill] sm:$0xff] %v11115_v3  ;;  %v11122_v50 = vld [vmem:[%s11981_s6 + $0x120] sm:$0xff]  ;;  %v11128_v13 = vld [vmem:[%s11981_s6 + $0x130] sm:$0xff] }
 0x7cc   :  { %3595 = vmatprep.subr.mxu0 %v11115_v3  ;;  %5930 = vmatprep.subr.mxu1 %v12393_v22  ;;  %12952 = vst [vmem:[#allocation33_spill] sm:$0xff] %v11122_v50  ;;  %12953 = vst [vmem:[#allocation34_spill] sm:$0xff] %v11128_v13  ;;  %v11134_v3 = vld [vmem:[%s11981_s6 + $0x110] sm:$0xff] }
 0x7cd   :  { %3596 = vmatpush1.msra.mxu0 %v11122_v50  ;;  %5931 = vmatpush3.msra.mxu1 %v11128_v13  ;;  %12954 = vst [vmem:[#allocation35_spill] sm:$0xff] %v11134_v3  ;;  %v11141_v50 = vld [vmem:[%s11981_s6 + $0x108] sm:$0xff]  ;;  %v11147_v13 = vld [vmem:[%s11981_s6 + $0x118] sm:$0xff] }
 0x7ce   :  { %3597 = vmatprep.subr.mxu0 %v11134_v3  ;;  %5932 = vmatprep.subr.mxu1 %v12393_v22  ;;  %12955 = vst [vmem:[#allocation36_spill] sm:$0xff] %v11141_v50  ;;  %12956 = vst [vmem:[#allocation37_spill] sm:$0xff] %v11147_v13  ;;  %v11153_v3 = vld [vmem:[%s11981_s6 + $0xf8] sm:$0xff] }
 0x7cf   :  { %3598 = vmatpush1.msra.mxu0 %v11141_v50  ;;  %5933 = vmatpush3.msra.mxu1 %v11147_v13  ;;  %12957 = vst [vmem:[#allocation38_spill] sm:$0xff] %v11153_v3  ;;  %v11160_v50 = vld [vmem:[%s11981_s6 + $0xf0] sm:$0xff]  ;;  %v11166_v13 = vld [vmem:[%s11981_s6 + $0x100] sm:$0xff] }
 0x7d0   :  { %3599 = vmatprep.subr.mxu0 %v11153_v3  ;;  %5934 = vmatprep.subr.mxu1 %v12393_v22  ;;  %12958 = vst [vmem:[#allocation39_spill] sm:$0xff] %v11160_v50  ;;  %12959 = vst [vmem:[#allocation40_spill] sm:$0xff] %v11166_v13  ;;  %v11172_v3 = vld [vmem:[%s11981_s6 + $0xe0] sm:$0xff] }
 0x7d1   :  { %3600 = vmatpush1.msra.mxu0 %v11160_v50  ;;  %5935 = vmatpush3.msra.mxu1 %v11166_v13  ;;  %12960 = vst [vmem:[#allocation41_spill] sm:$0xff] %v11172_v3  ;;  %v11179_v50 = vld [vmem:[%s11981_s6 + $0xd8] sm:$0xff]  ;;  %v11185_v13 = vld [vmem:[%s11981_s6 + $0xe8] sm:$0xff] }
 0x7d2   :  { %3601 = vmatprep.subr.mxu0 %v11172_v3  ;;  %5936 = vmatprep.subr.mxu1 %v12393_v22  ;;  %12961 = vst [vmem:[#allocation42_spill] sm:$0xff] %v11179_v50  ;;  %12962 = vst [vmem:[#allocation43_spill] sm:$0xff] %v11185_v13  ;;  %v11191_v3 = vld [vmem:[%s11981_s6 + $0xc8] sm:$0xff] }
 0x7d3   :  { %3602 = vmatpush1.msra.mxu0 %v11179_v50  ;;  %5937 = vmatpush3.msra.mxu1 %v11185_v13  ;;  %12963 = vst [vmem:[#allocation44_spill] sm:$0xff] %v11191_v3  ;;  %v11198_v50 = vld [vmem:[%s11981_s6 + $0xc0] sm:$0xff]  ;;  %v11204_v13 = vld [vmem:[%s11981_s6 + $0xd0] sm:$0xff] }
 0x7d4   :  { %3603 = vmatprep.subr.mxu0 %v11191_v3  ;;  %5938 = vmatprep.subr.mxu1 %v12393_v22  ;;  %12964 = vst [vmem:[#allocation45_spill] sm:$0xff] %v11198_v50  ;;  %12965 = vst [vmem:[#allocation46_spill] sm:$0xff] %v11204_v13  ;;  %v11210_v3 = vld [vmem:[%s11981_s6 + $0xb0] sm:$0xff] }
 0x7d5   :  { %3604 = vmatpush1.msra.mxu0 %v11198_v50  ;;  %5939 = vmatpush3.msra.mxu1 %v11204_v13  ;;  %12966 = vst [vmem:[#allocation47_spill] sm:$0xff] %v11210_v3  ;;  %v11217_v50 = vld [vmem:[%s11981_s6 + $0xa8] sm:$0xff]  ;;  %v11223_v13 = vld [vmem:[%s11981_s6 + $0xb8] sm:$0xff] }
 0x7d6   :  { %3605 = vmatprep.subr.mxu0 %v11210_v3  ;;  %5940 = vmatprep.subr.mxu1 %v12393_v22  ;;  %12967 = vst [vmem:[#allocation48_spill] sm:$0xff] %v11217_v50  ;;  %12968 = vst [vmem:[#allocation49_spill] sm:$0xff] %v11223_v13  ;;  %v11229_v3 = vld [vmem:[%s11981_s6 + $0x98] sm:$0xff] }
 0x7d7   :  { %3606 = vmatpush1.msra.mxu0 %v11217_v50  ;;  %5941 = vmatpush3.msra.mxu1 %v11223_v13  ;;  %12969 = vst [vmem:[#allocation50_spill] sm:$0xff] %v11229_v3  ;;  %v11236_v50 = vld [vmem:[%s11981_s6 + $0x90] sm:$0xff]  ;;  %v11242_v13 = vld [vmem:[%s11981_s6 + $0xa0] sm:$0xff] }
 0x7d8   :  { %3607 = vmatprep.subr.mxu0 %v11229_v3  ;;  %5942 = vmatprep.subr.mxu1 %v12393_v22  ;;  %12970 = vst [vmem:[#allocation51_spill] sm:$0xff] %v11236_v50  ;;  %12971 = vst [vmem:[#allocation52_spill] sm:$0xff] %v11242_v13  ;;  %v11248_v3 = vld [vmem:[%s11981_s6 + $0x80] sm:$0xff] }
 0x7d9   :  { %3608 = vmatpush1.msra.mxu0 %v11236_v50  ;;  %5943 = vmatpush3.msra.mxu1 %v11242_v13  ;;  %12972 = vst [vmem:[#allocation53_spill] sm:$0xff] %v11248_v3  ;;  %v11255_v50 = vld [vmem:[%s11981_s6 + $0x78] sm:$0xff]  ;;  %v11261_v13 = vld [vmem:[%s11981_s6 + $0x88] sm:$0xff] }
 0x7da   :  { %3609 = vmatprep.subr.mxu0 %v11248_v3  ;;  %5944 = vmatprep.subr.mxu1 %v12393_v22  ;;  %12973 = vst [vmem:[#allocation54_spill] sm:$0xff] %v11255_v50  ;;  %12974 = vst [vmem:[#allocation55_spill] sm:$0xff] %v11261_v13  ;;  %v11267_v3 = vld [vmem:[%s11981_s6 + $0x68] sm:$0xff] }
 0x7db   :  { %3610 = vmatpush1.msra.mxu0 %v11255_v50  ;;  %5945 = vmatpush3.msra.mxu1 %v11261_v13  ;;  %12975 = vst [vmem:[#allocation56_spill] sm:$0xff] %v11267_v3  ;;  %v11274_v50 = vld [vmem:[%s11981_s6 + $0x60] sm:$0xff]  ;;  %v11280_v13 = vld [vmem:[%s11981_s6 + $0x70] sm:$0xff] }
 0x7dc   :  { %3611 = vmatprep.subr.mxu0 %v11267_v3  ;;  %5946 = vmatprep.subr.mxu1 %v12393_v22  ;;  %12976 = vst [vmem:[#allocation57_spill] sm:$0xff] %v11274_v50  ;;  %12977 = vst [vmem:[#allocation58_spill] sm:$0xff] %v11280_v13  ;;  %v11286_v3 = vld [vmem:[%s11981_s6 + $0x50] sm:$0xff] }
 0x7dd   :  { %3612 = vmatpush1.msra.mxu0 %v11274_v50  ;;  %5947 = vmatpush3.msra.mxu1 %v11280_v13  ;;  %12978 = vst [vmem:[#allocation59_spill] sm:$0xff] %v11286_v3  ;;  %v11293_v50 = vld [vmem:[%s11981_s6 + $0x48] sm:$0xff]  ;;  %v11299_v13 = vld [vmem:[%s11981_s6 + $0x58] sm:$0xff] }
 0x7de   :  { %3613 = vmatprep.subr.mxu0 %v11286_v3  ;;  %5948 = vmatprep.subr.mxu1 %v12393_v22  ;;  %12979 = vst [vmem:[#allocation60_spill] sm:$0xff] %v11293_v50  ;;  %12980 = vst [vmem:[#allocation61_spill] sm:$0xff] %v11299_v13  ;;  %v11305_v3 = vld [vmem:[%s11981_s6 + $0x38] sm:$0xff] }
 0x7df   :  { %3614 = vmatpush1.msra.mxu0 %v11293_v50  ;;  %5949 = vmatpush3.msra.mxu1 %v11299_v13  ;;  %12981 = vst [vmem:[#allocation62_spill] sm:$0xff] %v11305_v3  ;;  %v11312_v50 = vld [vmem:[%s11981_s6 + $0x30] sm:$0xff]  ;;  %v11318_v13 = vld [vmem:[%s11981_s6 + $0x40] sm:$0xff] }
 0x7e0   :  { %3615 = vmatprep.subr.mxu0 %v11305_v3  ;;  %5950 = vmatprep.subr.mxu1 %v12393_v22  ;;  %12982 = vst [vmem:[#allocation63_spill] sm:$0xff] %v11312_v50  ;;  %12983 = vst [vmem:[#allocation64_spill] sm:$0xff] %v11318_v13  ;;  %v11324_v3 = vld [vmem:[%s11981_s6 + $0x20] sm:$0xff] }
 0x7e1   :  { %3616 = vmatpush1.msra.mxu0 %v11312_v50  ;;  %5951 = vmatpush3.msra.mxu1 %v11318_v13  ;;  %12984 = vst [vmem:[#allocation65_spill] sm:$0xff] %v11324_v3  ;;  %v11331_v50 = vld [vmem:[%s11981_s6 + $0x18] sm:$0xff]  ;;  %v11337_v13 = vld [vmem:[%s11981_s6 + $0x28] sm:$0xff] }
 0x7e2   :  { %3617 = vmatprep.subr.mxu0 %v11324_v3  ;;  %5952 = vmatprep.subr.mxu1 %v12393_v22  ;;  %12985 = vst [vmem:[#allocation66_spill] sm:$0xff] %v11331_v50  ;;  %12986 = vst [vmem:[#allocation67_spill] sm:$0xff] %v11337_v13  ;;  %v11343_v3 = vld [vmem:[%s11981_s6 + $0x8] sm:$0xff] }
 0x7e3   :  { %3618 = vmatpush1.msra.mxu0 %v11331_v50  ;;  %5953 = vmatpush3.msra.mxu1 %v11337_v13  ;;  %12987 = vst [vmem:[#allocation68_spill] sm:$0xff] %v11343_v3  ;;  %v11350_v50 = vld [vmem:[%s11981_s6] sm:$0xff]  ;;  %v11356_v13 = vld [vmem:[%s11981_s6 + $0x10] sm:$0xff] }
 0x7e4   :  { %3619 = vmatprep.subr.mxu0 %v11343_v3  ;;  %5954 = vmatprep.subr.mxu1 %v12393_v22  ;;  %12988 = vst [vmem:[#allocation69_spill] sm:$0xff] %v11350_v50  ;;  %12989 = vst [vmem:[#allocation70_spill] sm:$0xff] %v11356_v13  ;;  %v11365_v3 = vld [vmem:[%s11982_s7 + $0x170] sm:$0xff] }
 0x7e5   :  { %3620 = vmatpush1.msra.mxu0 %v11350_v50  ;;  %5955 = vmatpush3.msra.mxu1 %v11356_v13  ;;  %12990 = vst [vmem:[#allocation71_spill] sm:$0xff] %v11365_v3 }
 0x7e6   :  { %3653 = vmatprep.mubr.f32.mxu0 %v12393_v22  ;;  %5956 = vmatprep.mubr.msk.f32.mxu1 %vm6863_vm0, %v12393_v22 }
 0x7e7   :  { %3730 = vmatprep.subr.mxu0 %v11365_v3  ;;  %5959 = vmatprep.subr.mxu1 %v12393_v22 }
 0x842   :  { %v3251_v50 = vpop.f32.mrf.mxu1  ;;  %v3180_v32 = vpop.f32.mrf.mxu0 }
 0x843   :  { %v3181_v13 = vadd.f32 %v3180_v32, %v12898_v52 }
 0x844   :  { %v5853_v10 = vpop.f32.mrf.mxu1  ;;  %v3182_v31 = vpop.f32.mrf.mxu0 }
 0x845   :  { %v3252_v10 = vadd.f32 %v3251_v50, %v8308_v35  ;;  %v11379_v50 = vld [vmem:[%s11980_s5] ss:$0 sm:$0xff] }
 0x863   :  { %v3321_v30 = vpop.f32.mrf.mxu0  ;;  %v3392_v29 = vpop.f32.mrf.mxu1 }
 0x864   :  { %v3396_v27 = vadd.f32 %v3321_v30, %v3181_v13  ;;  %v3410_v3 = vadd.f32 %v10662_v40, %v3392_v29 }
 0x865   :  { %v5888_v21 = vpop.f32.mrf.mxu1  ;;  %v3323_v48 = vpop.f32.mrf.mxu0 }
 0x866   :  { %v4723_v19 = vmul.f32 -1.442695, %v3396_v27 }
 0x868   :  { %6304 = vpow2.f32 %v4723_v19  ;;  %v12992_v19 = vld [vmem:[#allocation82_spill] sm:$0xff] }
 0x875   :  { %v6305_v18 = vpop.eup %6304 }
 0x876   :  { %v3400_v45 = vadd.f32 1.0, %v6305_v18 }
 0x878   :  { %6306 = vrcp.f32 %v3400_v45 }
 0x885   :  { %v6307_v15 = vpop.eup %6306  ;;  %v3492_v11 = vpop.f32.mrf.mxu0 }
 0x886   :  { %v3563_v60 = vpop.f32.mrf.mxu1  ;;  %v3411_v5 = vmul.f32 %v6307_v15, %v3410_v3  ;;  %v3567_v32 = vadd.f32 %v3492_v11, %v12991_v49  ;;  %v3183_v11 = vadd.f32 %v3182_v31, %v8316_v7  ;;  %v12993_v15 = vld [vmem:[#allocation90_spill] sm:$0xff] }
 0x887   :  { %v3494_v21 = vpop.f32.mrf.mxu0  ;;  %v11404_v31 = vld [vmem:[%s11982_s7 + $0x158] sm:$0xff] }
 0x888   :  { %v5923_v52 = vpop.f32.mrf.mxu1  ;;  %v11373_v57 = vadd.f32 %v3411_v5, %v3252_v10  ;;  %v4725_v13 = vmul.f32 -1.442695, %v3567_v32  ;;  %v3574_v18 = vadd.f32 %v3494_v21, %v12992_v19  ;;  %v3403_v10 = vadd.f32 %v3323_v48, %v3183_v11  ;;  %v11398_v48 = vld [vmem:[%s11982_s7 + $0x178] sm:$0xff]  ;;  %v11442_v11 = vld [vmem:[%s11982_s7 + $0x128] sm:$0xff] }
 0x889   :  { %v3581_v52 = vadd.f32 %v11379_v50, %v3563_v60  ;;  %v11392_v60 = vld [vmem:[%s11982_s7 + $0x168] sm:$0xff] }
 0x88a   :  { %6308 = vpow2.f32 %v4725_v13  ;;  %v4726_v45 = vmul.f32 -1.442695, %v3574_v18  ;;  %v4724_v32 = vmul.f32 -1.442695, %v3403_v10  ;;  %v11461_v10 = vld [vmem:[%s11982_s7 + $0x110] sm:$0xff] }
 0x88c   :  { %6310 = vpow2.f32 %v4726_v45 }
 0x897   :  { %v6309_v27 = vpop.eup %6308 }
 0x898   :  { %v3571_v40 = vadd.f32 1.0, %v6309_v27 }
 0x899   :  { %v6311_v29 = vpop.eup %6310 }
 0x89a   :  { %6312 = vrcp.f32 %v3571_v40  ;;  %v3578_v30 = vadd.f32 1.0, %v6311_v29  ;;  %v11411_v40 = vld [vmem:[%s11982_s7 + $0x150] sm:$0xff]  ;;  %v11417_v29 = vld [vmem:[%s11982_s7 + $0x160] sm:$0xff] }
 0x89c   :  { %6314 = vrcp.f32 %v3578_v30  ;;  %v11423_v30 = vld [vmem:[%s11982_s7 + $0x140] sm:$0xff] }
 0x8a7   :  { %v6313_v49 = vpop.eup %6312 }
 0x8a8   :  { %v3582_v5 = vmul.f32 %v6313_v49, %v3581_v52  ;;  %v11430_v49 = vld [vmem:[%s11982_s7 + $0x138] sm:$0xff] }
 0x8a9   :  { %v6315_v13 = vpop.eup %6314 }
 0x8aa   :  { %v3583_v3 = vadd.f32 %v3582_v5, %v12993_v15  ;;  %v3585_v21 = vsub.f32 1.0, %v6315_v13  ;;  %v3587_v45 = vmul.f32 %v6315_v13, %v10672_v61  ;;  %v11436_v5 = vld [vmem:[%s11982_s7 + $0x148] sm:$0xff]  ;;  %v11449_v15 = vld [vmem:[%s11982_s7 + $0x120] sm:$0xff]  ;;  %v11474_v13 = vld [vmem:[%s11982_s7 + $0x118] sm:$0xff] }
 0x8ac   :  { %6316 = vtanh.f32 %v3583_v3  ;;  %v11455_v3 = vld [vmem:[%s11982_s7 + $0x130] sm:$0xff] }
 0x8ad   :  { %6318 = vpow2.f32 %v4724_v32  ;;  %v11468_v32 = vld [vmem:[%s11982_s7 + $0x108] sm:$0xff] }
 0x8b9   :  { %v6317_v19 = vpop.eup %6316 }
 0x8ba   :  { %v3586_v18 = vmul.f32 %v6317_v19, %v3585_v21  ;;  %v6319_v61 = vpop.eup %6318  ;;  %v11480_v21 = vld [vmem:[%s11982_s7 + $0xf8] sm:$0xff]  ;;  %v11488_v19 = vld [vmem:[%s11982_s7 + $0xf0] sm:$0xff] }
 0x8bb   :  { %v3407_v52 = vadd.f32 1.0, %v6319_v61  ;;  %12994 = vst [vmem:[#allocation72_spill] sm:$0xff] %v11480_v21  ;;  %12995 = vst [vmem:[#allocation91_spill] sm:$0xff] %v11488_v19  ;;  %v11513_v61 = vld [vmem:[%s11982_s7 + $0xe8] sm:$0xff] }
 0x8bc   :  { %v11385_v27 = vadd.f32 %v3587_v45, %v3586_v18  ;;  %v11494_v18 = vld [vmem:[%s11982_s7 + $0x100] sm:$0xff]  ;;  %12999 = vst [vmem:[#allocation80_spill] sm:$0xff] %v11513_v61 }
 0x8bd   :  { %6320 = vrcp.f32 %v3407_v52  ;;  %12996 = vst [vmem:[#allocation92_spill] sm:$0xff] %v11494_v18  ;;  %v11500_v45 = vld [vmem:[%s11982_s7 + $0xe0] sm:$0xff]  ;;  %v11519_v52 = vld [vmem:[%s11982_s7 + $0xc8] sm:$0xff] }
 0x8be   :  { %3654 = vmatmul.mubr.f32.vlgmr.msra.gmra.mxu0 %v11385_v27  ;;  %5957 = vmatmul.mubr.f32.vlgmr.msra.gmra.mxu1 %v11385_v27  ;;  %6322 = vtanh.f32 %v11373_v57  ;;  %12997 = vst [vmem:[#allocation75_spill] sm:$0xff] %v11500_v45  ;;  %v11507_v57 = vld [vmem:[%s11982_s7 + $0xd8] sm:$0xff]  ;;  %13000 = vst [vmem:[#allocation87_spill] sm:$0xff] %v11519_v52 }
 0x8bf   :  { %3731 = vmatpush1.msra.mxu0 %v11392_v60  ;;  %5960 = vmatpush3.msra.mxu1 %v11398_v48  ;;  %12998 = vst [vmem:[#allocation79_spill] sm:$0xff] %v11507_v57 }
 0x8c0   :  { %3732 = vmatprep.subr.mxu0 %v11404_v31  ;;  %5961 = vmatprep.subr.mxu1 %v12393_v22 }
 0x8c1   :  { %3733 = vmatpush1.msra.mxu0 %v11411_v40  ;;  %5962 = vmatpush3.msra.mxu1 %v11417_v29 }
 0x8c2   :  { %3734 = vmatprep.subr.mxu0 %v11423_v30  ;;  %5963 = vmatprep.subr.mxu1 %v12393_v22 }
 0x8c3   :  { %3735 = vmatpush1.msra.mxu0 %v11430_v49  ;;  %5964 = vmatpush3.msra.mxu1 %v11436_v5 }
 0x8c4   :  { %3736 = vmatprep.subr.mxu0 %v11442_v11  ;;  %5965 = vmatprep.subr.mxu1 %v12393_v22 }
 0x8c5   :  { %3737 = vmatpush1.msra.mxu0 %v11449_v15  ;;  %5966 = vmatpush3.msra.mxu1 %v11455_v3 }
 0x8c6   :  { %3738 = vmatprep.subr.mxu0 %v11461_v10  ;;  %5967 = vmatprep.subr.mxu1 %v12393_v22 }
 0x8c7   :  { %3739 = vmatpush1.msra.mxu0 %v11468_v32  ;;  %5968 = vmatpush3.msra.mxu1 %v11474_v13 }
 0x8c8   :  { %3740 = vmatprep.subr.mxu0 %v11480_v21  ;;  %5969 = vmatprep.subr.mxu1 %v12393_v22 }
 0x8c9   :  { %3741 = vmatpush1.msra.mxu0 %v11488_v19  ;;  %5970 = vmatpush3.msra.mxu1 %v11494_v18 }
 0x8ca   :  { %3742 = vmatprep.subr.mxu0 %v11500_v45  ;;  %5971 = vmatprep.subr.mxu1 %v12393_v22  ;;  %v6321_v45 = vpop.eup %6320 }
 0x8cb   :  { %3743 = vmatpush1.msra.mxu0 %v11507_v57  ;;  %5972 = vmatpush3.msra.mxu1 %v11513_v61  ;;  %v11526_v57 = vld [vmem:[%s11982_s7 + $0xc0] sm:$0xff]  ;;  %v11532_v61 = vld [vmem:[%s11982_s7 + $0xd0] sm:$0xff]  ;;  %v6323_v18 = vpop.eup %6322  ;;  %v3414_v19 = vsub.f32 1.0, %v6321_v45 }
 0x8cc   :  { %3744 = vmatprep.subr.mxu0 %v11519_v52  ;;  %5973 = vmatprep.subr.mxu1 %v12393_v22  ;;  %13001 = vst [vmem:[#allocation76_spill] sm:$0xff] %v11526_v57  ;;  %13002 = vst [vmem:[#allocation85_spill] sm:$0xff] %v11532_v61  ;;  %v11538_v52 = vld [vmem:[%s11982_s7 + $0xb0] sm:$0xff] }
 0x8cd   :  { %3745 = vmatpush1.msra.mxu0 %v11526_v57  ;;  %5974 = vmatpush3.msra.mxu1 %v11532_v61  ;;  %13003 = vst [vmem:[#allocation93_spill] sm:$0xff] %v11538_v52  ;;  %v11545_v57 = vld [vmem:[%s11982_s7 + $0xa8] sm:$0xff]  ;;  %v11551_v61 = vld [vmem:[%s11982_s7 + $0xb8] sm:$0xff]  ;;  %v3415_v21 = vmul.f32 %v6323_v18, %v3414_v19  ;;  %v3416_v18 = vmul.f32 %v6321_v45, %v10739_v16  ;;  %v11688_v45 = vld [vmem:[%s11982_s7 + $0x10] sm:$0xff] }
 0x8ce   :  { %3746 = vmatprep.subr.mxu0 %v11538_v52  ;;  %5975 = vmatprep.subr.mxu1 %v12393_v22  ;;  %13004 = vst [vmem:[#allocation94_spill] sm:$0xff] %v11545_v57  ;;  %13005 = vst [vmem:[#allocation95_spill] sm:$0xff] %v11551_v61  ;;  %v11557_v52 = vld [vmem:[%s11982_s7 + $0x98] sm:$0xff]  ;;  %v11665_v19 = vld [vmem:[%s11982_s7 + $0x28] sm:$0xff] }
 0x8cf   :  { %3747 = vmatpush1.msra.mxu0 %v11545_v57  ;;  %5976 = vmatpush3.msra.mxu1 %v11551_v61  ;;  %13006 = vst [vmem:[#allocation96_spill] sm:$0xff] %v11557_v52  ;;  %v11564_v57 = vld [vmem:[%s11982_s7 + $0x90] sm:$0xff]  ;;  %v11570_v61 = vld [vmem:[%s11982_s7 + $0xa0] sm:$0xff]  ;;  %13022 = vst [vmem:[#allocation112_spill] sm:$0xff] %v11665_v19 }
 0x8d0   :  { %3748 = vmatprep.subr.mxu0 %v11557_v52  ;;  %5977 = vmatprep.subr.mxu1 %v12393_v22  ;;  %13007 = vst [vmem:[#allocation97_spill] sm:$0xff] %v11564_v57  ;;  %13008 = vst [vmem:[#allocation98_spill] sm:$0xff] %v11570_v61  ;;  %v11576_v52 = vld [vmem:[%s11982_s7 + $0x80] sm:$0xff] }
 0x8d1   :  { %3749 = vmatpush1.msra.mxu0 %v11564_v57  ;;  %5978 = vmatpush3.msra.mxu1 %v11570_v61  ;;  %13009 = vst [vmem:[#allocation99_spill] sm:$0xff] %v11576_v52  ;;  %v11583_v57 = vld [vmem:[%s11982_s7 + $0x78] sm:$0xff]  ;;  %v11589_v61 = vld [vmem:[%s11982_s7 + $0x88] sm:$0xff] }
 0x8d2   :  { %3750 = vmatprep.subr.mxu0 %v11576_v52  ;;  %5979 = vmatprep.subr.mxu1 %v12393_v22  ;;  %13010 = vst [vmem:[#allocation100_spill] sm:$0xff] %v11583_v57  ;;  %13011 = vst [vmem:[#allocation101_spill] sm:$0xff] %v11589_v61  ;;  %v11595_v52 = vld [vmem:[%s11982_s7 + $0x68] sm:$0xff] }
 0x8d3   :  { %3751 = vmatpush1.msra.mxu0 %v11583_v57  ;;  %5980 = vmatpush3.msra.mxu1 %v11589_v61  ;;  %13012 = vst [vmem:[#allocation102_spill] sm:$0xff] %v11595_v52  ;;  %v11602_v57 = vld [vmem:[%s11982_s7 + $0x60] sm:$0xff]  ;;  %v11608_v61 = vld [vmem:[%s11982_s7 + $0x70] sm:$0xff] }
 0x8d4   :  { %3752 = vmatprep.subr.mxu0 %v11595_v52  ;;  %5981 = vmatprep.subr.mxu1 %v12393_v22  ;;  %13013 = vst [vmem:[#allocation103_spill] sm:$0xff] %v11602_v57  ;;  %13014 = vst [vmem:[#allocation104_spill] sm:$0xff] %v11608_v61  ;;  %v11614_v52 = vld [vmem:[%s11982_s7 + $0x50] sm:$0xff] }
 0x8d5   :  { %3753 = vmatpush1.msra.mxu0 %v11602_v57  ;;  %5982 = vmatpush3.msra.mxu1 %v11608_v61  ;;  %13015 = vst [vmem:[#allocation105_spill] sm:$0xff] %v11614_v52  ;;  %v11621_v57 = vld [vmem:[%s11982_s7 + $0x48] sm:$0xff]  ;;  %v11627_v61 = vld [vmem:[%s11982_s7 + $0x58] sm:$0xff] }
 0x8d6   :  { %3754 = vmatprep.subr.mxu0 %v11614_v52  ;;  %5983 = vmatprep.subr.mxu1 %v12393_v22  ;;  %13016 = vst [vmem:[#allocation106_spill] sm:$0xff] %v11621_v57  ;;  %13017 = vst [vmem:[#allocation107_spill] sm:$0xff] %v11627_v61  ;;  %v11633_v52 = vld [vmem:[%s11982_s7 + $0x38] sm:$0xff] }
 0x8d7   :  { %3755 = vmatpush1.msra.mxu0 %v11621_v57  ;;  %5984 = vmatpush3.msra.mxu1 %v11627_v61  ;;  %13018 = vst [vmem:[#allocation108_spill] sm:$0xff] %v11633_v52  ;;  %v11640_v57 = vld [vmem:[%s11982_s7 + $0x30] sm:$0xff]  ;;  %v11646_v61 = vld [vmem:[%s11982_s7 + $0x40] sm:$0xff] }
 0x8d8   :  { %3756 = vmatprep.subr.mxu0 %v11633_v52  ;;  %5985 = vmatprep.subr.mxu1 %v12393_v22  ;;  %13019 = vst [vmem:[#allocation109_spill] sm:$0xff] %v11640_v57  ;;  %v11652_v52 = vld [vmem:[%s11982_s7 + $0x20] sm:$0xff] }
 0x8d9   :  { %3757 = vmatpush1.msra.mxu0 %v11640_v57  ;;  %5986 = vmatpush3.msra.mxu1 %v11646_v61  ;;  %13020 = vst [vmem:[#allocation110_spill] sm:$0xff] %v11652_v52  ;;  %v11659_v57 = vld [vmem:[%s11982_s7 + $0x18] sm:$0xff] }
 0x8da   :  { %3758 = vmatprep.subr.mxu0 %v11652_v52  ;;  %5987 = vmatprep.subr.mxu1 %v12393_v22  ;;  %13021 = vst [vmem:[#allocation111_spill] sm:$0xff] %v11659_v57  ;;  %v11672_v52 = vld [vmem:[%s11982_s7 + $0x8] sm:$0xff] }
 0x8db   :  { %3759 = vmatpush1.msra.mxu0 %v11659_v57  ;;  %5988 = vmatpush3.msra.mxu1 %v11665_v19  ;;  %v11679_v57 = vld [vmem:[%s11982_s7] sm:$0xff]  ;;  %v11683_v19 = vadd.f32 %v3416_v18, %v3415_v21  ;;  %v13060_v21 = vld [vmem:[#allocation49_spill] sm:$0xff]  ;;  %v13061_v18 = vld [vmem:[#allocation50_spill] sm:$0xff] }
 0x8dc   :  { %3760 = vmatprep.subr.mxu0 %v11672_v52  ;;  %5989 = vmatprep.subr.mxu1 %v12393_v22 }
 0x8dd   :  { %3761 = vmatpush1.msra.mxu0 %v11679_v57  ;;  %3794 = vmatprep.mubr.f32.mxu0 %v12393_v22 }
 0x8de   :  { %5990 = vmatpush3.msra.mxu1 %v11688_v45  ;;  %5991 = vmatprep.mubr.msk.f32.mxu1 %vm6863_vm0, %v12393_v22 }
 0x8df   :  { %3795 = vmatmul.mubr.f32.vlgmr.msra.gmra.mxu0 %v11683_v19  ;;  %5992 = vmatmul.mubr.f32.vlgmr.msra.gmra.mxu1 %v11683_v19 }
 0x8e0   :  { %3901 = vmatprep.subr.mxu0 %v10749_v20  ;;  %5994 = vmatprep.subr.mxu1 %v12393_v22  ;;  %v13023_v20 = vld [vmem:[#allocation86_spill] sm:$0xff] }
 0x8e1   :  { %3902 = vmatpush1.msra.mxu0 %v10756_v24  ;;  %5995 = vmatpush3.msra.mxu1 %v10762_v9  ;;  %v13024_v24 = vld [vmem:[#allocation77_spill] sm:$0xff]  ;;  %v13025_v9 = vld [vmem:[#allocation78_spill] sm:$0xff] }
 0x8e2   :  { %3903 = vmatprep.subr.mxu0 %v10768_v26  ;;  %5996 = vmatprep.subr.mxu1 %v12393_v22  ;;  %v13026_v26 = vld [vmem:[#allocation88_spill] sm:$0xff] }
 0x8e3   :  { %3904 = vmatpush1.msra.mxu0 %v10775_v42  ;;  %5997 = vmatpush3.msra.mxu1 %v10781_v25  ;;  %v13027_v42 = vld [vmem:[#allocation15_spill] sm:$0xff] }
 0x8e4   :  { %3905 = vmatprep.subr.mxu0 %v10787_v28  ;;  %5998 = vmatprep.subr.mxu1 %v12393_v22  ;;  %v13028_v25 = vld [vmem:[#allocation19_spill] sm:$0xff]  ;;  %v13029_v28 = vld [vmem:[#allocation16_spill] sm:$0xff] }
 0x8e5   :  { %3906 = vmatpush1.msra.mxu0 %v10794_v44  ;;  %5999 = vmatpush3.msra.mxu1 %v10800_v43  ;;  %v13030_v44 = vld [vmem:[#allocation17_spill] sm:$0xff]  ;;  %v13031_v43 = vld [vmem:[#allocation20_spill] sm:$0xff] }
 0x8e6   :  { %3907 = vmatprep.subr.mxu0 %v10806_v38  ;;  %6000 = vmatprep.subr.mxu1 %v12393_v22  ;;  %v13032_v38 = vld [vmem:[#allocation21_spill] sm:$0xff] }
 0x8e7   :  { %3908 = vmatpush1.msra.mxu0 %v10813_v53  ;;  %6001 = vmatpush3.msra.mxu1 %v10819_v36  ;;  %v13033_v53 = vld [vmem:[#allocation22_spill] sm:$0xff]  ;;  %v13034_v36 = vld [vmem:[#allocation23_spill] sm:$0xff] }
 0x8e8   :  { %3909 = vmatprep.subr.mxu0 %v10825_v39  ;;  %6002 = vmatprep.subr.mxu1 %v12393_v22  ;;  %v13035_v39 = vld [vmem:[#allocation24_spill] sm:$0xff] }
 0x8e9   :  { %3910 = vmatpush1.msra.mxu0 %v10832_v55  ;;  %6003 = vmatpush3.msra.mxu1 %v10838_v63  ;;  %v13036_v55 = vld [vmem:[#allocation25_spill] sm:$0xff]  ;;  %v13037_v63 = vld [vmem:[#allocation26_spill] sm:$0xff] }
 0x8ea   :  { %3911 = vmatprep.subr.mxu0 %v10844_v17  ;;  %6004 = vmatprep.subr.mxu1 %v12393_v22  ;;  %v13038_v17 = vld [vmem:[#allocation27_spill] sm:$0xff] }
 0x8eb   :  { %3912 = vmatpush1.msra.mxu0 %v10851_v34  ;;  %6005 = vmatpush3.msra.mxu1 %v10857_v37  ;;  %v13039_v34 = vld [vmem:[#allocation29_spill] sm:$0xff]  ;;  %v13040_v37 = vld [vmem:[#allocation28_spill] sm:$0xff] }
 0x8ec   :  { %3913 = vmatprep.subr.mxu0 %v10863_v59  ;;  %6006 = vmatprep.subr.mxu1 %v12393_v22  ;;  %v13041_v59 = vld [vmem:[#allocation30_spill] sm:$0xff] }
 0x8ed   :  { %3914 = vmatpush1.msra.mxu0 %v10870_v47  ;;  %6007 = vmatpush3.msra.mxu1 %v10876_v1  ;;  %v13042_v47 = vld [vmem:[#allocation31_spill] sm:$0xff]  ;;  %v13043_v1 = vld [vmem:[#allocation32_spill] sm:$0xff] }
 0x8ee   :  { %3915 = vmatprep.subr.mxu0 %v10882_v51  ;;  %6008 = vmatprep.subr.mxu1 %v12393_v22  ;;  %v13044_v51 = vld [vmem:[#allocation33_spill] sm:$0xff] }
 0x8ef   :  { %3916 = vmatpush1.msra.mxu0 %v10889_v41  ;;  %6009 = vmatpush3.msra.mxu1 %v10895_v6  ;;  %v13045_v41 = vld [vmem:[#allocation34_spill] sm:$0xff]  ;;  %v13046_v6 = vld [vmem:[#allocation35_spill] sm:$0xff] }
 0x8f0   :  { %3917 = vmatprep.subr.mxu0 %v10901_v56  ;;  %6010 = vmatprep.subr.mxu1 %v12393_v22  ;;  %v13047_v56 = vld [vmem:[#allocation36_spill] sm:$0xff] }
 0x8f1   :  { %3918 = vmatpush1.msra.mxu0 %v10908_v2  ;;  %6011 = vmatpush3.msra.mxu1 %v10914_v4  ;;  %v13048_v2 = vld [vmem:[#allocation37_spill] sm:$0xff]  ;;  %v13049_v4 = vld [vmem:[#allocation38_spill] sm:$0xff] }
 0x8f2   :  { %3919 = vmatprep.subr.mxu0 %v10920_v62  ;;  %6012 = vmatprep.subr.mxu1 %v12393_v22  ;;  %v13050_v62 = vld [vmem:[#allocation39_spill] sm:$0xff] }
 0x8f3   :  { %3920 = vmatpush1.msra.mxu0 %v10927_v0  ;;  %6013 = vmatpush3.msra.mxu1 %v10933_v46  ;;  %v13051_v0 = vld [vmem:[#allocation40_spill] sm:$0xff]  ;;  %v13052_v46 = vld [vmem:[#allocation41_spill] sm:$0xff] }
 0x8f4   :  { %3921 = vmatprep.subr.mxu0 %v10939_v23  ;;  %6014 = vmatprep.subr.mxu1 %v12393_v22  ;;  %v13053_v23 = vld [vmem:[#allocation42_spill] sm:$0xff] }
 0x8f5   :  { %3922 = vmatpush1.msra.mxu0 %v10946_v14  ;;  %6015 = vmatpush3.msra.mxu1 %v10952_v12  ;;  %v13054_v14 = vld [vmem:[#allocation43_spill] sm:$0xff]  ;;  %v13055_v12 = vld [vmem:[#allocation44_spill] sm:$0xff] }
 0x8f6   :  { %3923 = vmatprep.subr.mxu0 %v10958_v8  ;;  %6016 = vmatprep.subr.mxu1 %v12393_v22  ;;  %v13056_v8 = vld [vmem:[#allocation45_spill] sm:$0xff] }
 0x8f7   :  { %3924 = vmatpush1.msra.mxu0 %v10965_v54  ;;  %6017 = vmatpush3.msra.mxu1 %v10971_v33  ;;  %v13057_v54 = vld [vmem:[#allocation46_spill] sm:$0xff]  ;;  %v13058_v33 = vld [vmem:[#allocation47_spill] sm:$0xff] }
 0x8f8   :  { %3925 = vmatprep.subr.mxu0 %v10977_v58  ;;  %6018 = vmatprep.subr.mxu1 %v12393_v22  ;;  %v13059_v58 = vld [vmem:[#allocation48_spill] sm:$0xff] }
 0x8f9   :  { %3926 = vmatpush1.msra.mxu0 %v13023_v20  ;;  %6019 = vmatpush3.msra.mxu1 %v13024_v24  ;;  %v13062_v20 = vld [vmem:[#allocation51_spill] sm:$0xff]  ;;  %v13063_v24 = vld [vmem:[#allocation52_spill] sm:$0xff] }
 0x8fa   :  { %3927 = vmatprep.subr.mxu0 %v13025_v9  ;;  %6020 = vmatprep.subr.mxu1 %v12393_v22  ;;  %v13064_v9 = vld [vmem:[#allocation53_spill] sm:$0xff] }
 0x8fb   :  { %3928 = vmatpush1.msra.mxu0 %v13026_v26  ;;  %6021 = vmatpush3.msra.mxu1 %v13027_v42  ;;  %v13065_v26 = vld [vmem:[#allocation54_spill] sm:$0xff]  ;;  %v13066_v42 = vld [vmem:[#allocation55_spill] sm:$0xff] }
 0x8fc   :  { %3929 = vmatprep.subr.mxu0 %v13028_v25  ;;  %6022 = vmatprep.subr.mxu1 %v12393_v22  ;;  %v13067_v25 = vld [vmem:[#allocation56_spill] sm:$0xff] }
 0x8fd   :  { %3930 = vmatpush1.msra.mxu0 %v13029_v28  ;;  %6023 = vmatpush3.msra.mxu1 %v13030_v44  ;;  %v13068_v28 = vld [vmem:[#allocation57_spill] sm:$0xff]  ;;  %v13069_v44 = vld [vmem:[#allocation58_spill] sm:$0xff] }
 0x8fe   :  { %3931 = vmatprep.subr.mxu0 %v13031_v43  ;;  %6024 = vmatprep.subr.mxu1 %v12393_v22  ;;  %v13070_v43 = vld [vmem:[#allocation59_spill] sm:$0xff] }
 0x8ff   :  { %3932 = vmatpush1.msra.mxu0 %v13032_v38  ;;  %3965 = vmatprep.mubr.f32.mxu0 %v12393_v22  ;;  %v13071_v38 = vld [vmem:[#allocation60_spill] sm:$0xff] }
 0x900   :  { %6025 = vmatpush3.msra.mxu1 %v13033_v53  ;;  %6026 = vmatprep.mubr.msk.f32.mxu1 %vm6863_vm0, %v12393_v22  ;;  %v13072_v53 = vld [vmem:[#allocation61_spill] sm:$0xff] }
 0x901   :  { %3966 = vmatmul.mubr.f32.vlgmr.msra.gmra.mxu0 %v11385_v27  ;;  %6027 = vmatmul.mubr.f32.vlgmr.msra.gmra.mxu1 %v11385_v27 }
 0x902   :  { %4064 = vmatprep.subr.mxu0 %v13034_v36  ;;  %6029 = vmatprep.subr.mxu1 %v12393_v22  ;;  %v13073_v36 = vld [vmem:[#allocation62_spill] sm:$0xff] }
 0x903   :  { %4065 = vmatpush1.msra.mxu0 %v13035_v39  ;;  %6030 = vmatpush3.msra.mxu1 %v13036_v55  ;;  %v13074_v39 = vld [vmem:[#allocation63_spill] sm:$0xff]  ;;  %v13075_v55 = vld [vmem:[#allocation64_spill] sm:$0xff] }
 0x904   :  { %4066 = vmatprep.subr.mxu0 %v13037_v63  ;;  %6031 = vmatprep.subr.mxu1 %v12393_v22  ;;  %v13076_v63 = vld [vmem:[#allocation65_spill] sm:$0xff] }
 0x905   :  { %4067 = vmatpush1.msra.mxu0 %v13038_v17  ;;  %6032 = vmatpush3.msra.mxu1 %v13039_v34  ;;  %v13077_v17 = vld [vmem:[#allocation66_spill] sm:$0xff]  ;;  %v13078_v34 = vld [vmem:[#allocation67_spill] sm:$0xff] }
 0x906   :  { %4068 = vmatprep.subr.mxu0 %v13040_v37  ;;  %6033 = vmatprep.subr.mxu1 %v12393_v22  ;;  %v13079_v37 = vld [vmem:[#allocation68_spill] sm:$0xff] }
 0x907   :  { %4069 = vmatpush1.msra.mxu0 %v13041_v59  ;;  %6034 = vmatpush3.msra.mxu1 %v13042_v47  ;;  %v13080_v59 = vld [vmem:[#allocation69_spill] sm:$0xff]  ;;  %v13081_v47 = vld [vmem:[#allocation70_spill] sm:$0xff] }
 0x908   :  { %4070 = vmatprep.subr.mxu0 %v13043_v1  ;;  %6035 = vmatprep.subr.mxu1 %v12393_v22  ;;  %v13082_v1 = vld [vmem:[#allocation71_spill] sm:$0xff] }
 0x909   :  { %4071 = vmatpush1.msra.mxu0 %v13044_v51  ;;  %6036 = vmatpush3.msra.mxu1 %v13045_v41 }
 0x90a   :  { %4072 = vmatprep.subr.mxu0 %v13046_v6  ;;  %6037 = vmatprep.subr.mxu1 %v12393_v22 }
 0x90b   :  { %4073 = vmatpush1.msra.mxu0 %v13047_v56  ;;  %6038 = vmatpush3.msra.mxu1 %v13048_v2  ;;  %v13083_v2 = vld [vmem:[#allocation13_spill] sm:$0xff] }
 0x90c   :  { %4074 = vmatprep.subr.mxu0 %v13049_v4  ;;  %6039 = vmatprep.subr.mxu1 %v12393_v22 }
 0x90d   :  { %4075 = vmatpush1.msra.mxu0 %v13050_v62  ;;  %6040 = vmatpush3.msra.mxu1 %v13051_v0 }
 0x90e   :  { %4076 = vmatprep.subr.mxu0 %v13052_v46  ;;  %6041 = vmatprep.subr.mxu1 %v12393_v22 }
 0x90f   :  { %4077 = vmatpush1.msra.mxu0 %v13053_v23  ;;  %6042 = vmatpush3.msra.mxu1 %v13054_v14 }
 0x910   :  { %4078 = vmatprep.subr.mxu0 %v13055_v12  ;;  %6043 = vmatprep.subr.mxu1 %v12393_v22 }
 0x911   :  { %4079 = vmatpush1.msra.mxu0 %v13056_v8  ;;  %6044 = vmatpush3.msra.mxu1 %v13057_v54 }
 0x912   :  { %4080 = vmatprep.subr.mxu0 %v13058_v33  ;;  %6045 = vmatprep.subr.mxu1 %v12393_v22  ;;  %v11837_v33 = vld [vmem:[%s11984_s9] ss:$0 sm:$0xff] }
 0x913   :  { %4081 = vmatpush1.msra.mxu0 %v13059_v58  ;;  %6046 = vmatpush3.msra.mxu1 %v13060_v21 }
 0x914   :  { %4082 = vmatprep.subr.mxu0 %v13061_v18  ;;  %6047 = vmatprep.subr.mxu1 %v12393_v22 }
 0x915   :  { %4083 = vmatpush1.msra.mxu0 %v13062_v20  ;;  %6048 = vmatpush3.msra.mxu1 %v13063_v24 }
 0x916   :  { %4084 = vmatprep.subr.mxu0 %v13064_v9  ;;  %6049 = vmatprep.subr.mxu1 %v12393_v22 }
 0x917   :  { %4085 = vmatpush1.msra.mxu0 %v13065_v26  ;;  %6050 = vmatpush3.msra.mxu1 %v13066_v42  ;;  %v13084_v26 = vld [vmem:[#allocation83_spill] sm:$0xff] }
 0x918   :  { %4086 = vmatprep.subr.mxu0 %v13067_v25  ;;  %6051 = vmatprep.subr.mxu1 %v12393_v22 }
 0x919   :  { %4087 = vmatpush1.msra.mxu0 %v13068_v28  ;;  %6052 = vmatpush3.msra.mxu1 %v13069_v44 }
 0x91a   :  { %4088 = vmatprep.subr.mxu0 %v13070_v43  ;;  %6053 = vmatprep.subr.mxu1 %v12393_v22 }
 0x91b   :  { %4089 = vmatpush1.msra.mxu0 %v13071_v38  ;;  %6054 = vmatpush3.msra.mxu1 %v13072_v53  ;;  %v13085_v38 = vld [vmem:[#allocation84_spill] sm:$0xff] }
 0x91c   :  { %4090 = vmatprep.subr.mxu0 %v13073_v36  ;;  %6055 = vmatprep.subr.mxu1 %v12393_v22 }
 0x91d   :  { %4091 = vmatpush1.msra.mxu0 %v13074_v39  ;;  %6056 = vmatpush3.msra.mxu1 %v13075_v55 }
 0x91e   :  { %4092 = vmatprep.subr.mxu0 %v13076_v63  ;;  %6057 = vmatprep.subr.mxu1 %v12393_v22 }
 0x91f   :  { %4093 = vmatpush1.msra.mxu0 %v13077_v17  ;;  %6058 = vmatpush3.msra.mxu1 %v13078_v34 }
 0x920   :  { %4094 = vmatprep.subr.mxu0 %v13079_v37  ;;  %6059 = vmatprep.subr.mxu1 %v12393_v22 }
 0x921   :  { %4095 = vmatpush1.msra.mxu0 %v13080_v59  ;;  %6060 = vmatpush3.msra.mxu1 %v13081_v47 }
 0x922   :  { %4128 = vmatprep.mubr.f32.mxu0 %v12393_v22  ;;  %6061 = vmatprep.mubr.msk.f32.mxu1 %vm6863_vm0, %v12393_v22 }
 0x923   :  { %4205 = vmatprep.subr.mxu0 %v13082_v1  ;;  %6064 = vmatprep.subr.mxu1 %v12393_v22  ;;  %v13086_v1 = vld [vmem:[#allocation89_spill] sm:$0xff] }
 0x97e   :  { %v3726_v51 = vpop.f32.mrf.mxu1  ;;  %v3655_v6 = vpop.f32.mrf.mxu0 }
 0x97f   :  { %v3656_v4 = vadd.f32 %v3655_v6, %v13083_v2  ;;  %v3727_v24 = vadd.f32 %v3726_v51, %v8308_v35 }
 0x980   :  { %v5958_v41 = vpop.f32.mrf.mxu1  ;;  %v3657_v56 = vpop.f32.mrf.mxu0 }
 0x981   :  { %v3658_v47 = vadd.f32 %v3657_v56, %v8316_v7  ;;  %v13101_v56 = vld [vmem:[#allocation98_spill] sm:$0xff] }
 0x99f   :  { %v3796_v62 = vpop.f32.mrf.mxu0  ;;  %v3867_v0 = vpop.f32.mrf.mxu1 }
 0x9a0   :  { %v3871_v46 = vadd.f32 %v3796_v62, %v3656_v4  ;;  %v3885_v58 = vadd.f32 %v11837_v33, %v3867_v0 }
 0x9a1   :  { %v5993_v23 = vpop.f32.mrf.mxu1  ;;  %v3798_v54 = vpop.f32.mrf.mxu0 }
 0x9a2   :  { %v4727_v14 = vmul.f32 -1.442695, %v3871_v46  ;;  %v3878_v41 = vadd.f32 %v3798_v54, %v3658_v47  ;;  %v13104_v54 = vld [vmem:[#allocation101_spill] sm:$0xff] }
 0x9a3   :  { %v4387_v47 = vld [vmem:[#allocation4 + $0x30] sm:$0xff] }
 0x9a4   :  { %6324 = vpow2.f32 %v4727_v14  ;;  %v4728_v6 = vmul.f32 -1.442695, %v3878_v41  ;;  %v4384_v41 = vld [vmem:[#allocation4 + $0x18] sm:$0xff] }
 0x9b1   :  { %v6325_v12 = vpop.eup %6324 }
 0x9b2   :  { %v3875_v8 = vadd.f32 1.0, %v6325_v12  ;;  %v13102_v12 = vld [vmem:[#allocation99_spill] sm:$0xff] }
 0x9b4   :  { %6326 = vrcp.f32 %v3875_v8  ;;  %v13103_v8 = vld [vmem:[#allocation100_spill] sm:$0xff] }
 0x9c1   :  { %v6327_v21 = vpop.eup %6326  ;;  %v3967_v18 = vpop.f32.mrf.mxu0 }
 0x9c2   :  { %v4038_v20 = vpop.f32.mrf.mxu1  ;;  %v3886_v9 = vmul.f32 %v6327_v21, %v3885_v58  ;;  %v4042_v42 = vadd.f32 %v3967_v18, %v13084_v26  ;;  %v13105_v21 = vld [vmem:[#allocation102_spill] sm:$0xff]  ;;  %v13106_v18 = vld [vmem:[#allocation103_spill] sm:$0xff] }
 0x9c3   :  { %v3969_v43 = vpop.f32.mrf.mxu0  ;;  %v4056_v34 = vadd.f32 %v11379_v50, %v4038_v20  ;;  %v13107_v20 = vld [vmem:[#allocation104_spill] sm:$0xff]  ;;  %v13109_v26 = vld [vmem:[#allocation106_spill] sm:$0xff] }
 0x9c4   :  { %v6028_v25 = vpop.f32.mrf.mxu1  ;;  %v3887_v28 = vadd.f32 %v3886_v9, %v3727_v24  ;;  %v4729_v44 = vmul.f32 -1.442695, %v4042_v42  ;;  %v4049_v53 = vadd.f32 %v3969_v43, %v13085_v38  ;;  %v13108_v9 = vld [vmem:[#allocation105_spill] sm:$0xff]  ;;  %v13110_v42 = vld [vmem:[#allocation107_spill] sm:$0xff]  ;;  %v13113_v38 = vld [vmem:[#allocation110_spill] sm:$0xff] }
 0x9c6   :  { %6328 = vpow2.f32 %v4729_v44  ;;  %v4730_v36 = vmul.f32 -1.442695, %v4049_v53  ;;  %v13112_v44 = vld [vmem:[#allocation109_spill] sm:$0xff]  ;;  %v13114_v53 = vld [vmem:[#allocation111_spill] sm:$0xff] }
 0x9c8   :  { %6330 = vpow2.f32 %v4730_v36  ;;  %v13115_v36 = vld [vmem:[#allocation112_spill] sm:$0xff] }
 0x9d3   :  { %v6329_v39 = vpop.eup %6328 }
 0x9d4   :  { %v4046_v55 = vadd.f32 1.0, %v6329_v39 }
 0x9d5   :  { %v6331_v63 = vpop.eup %6330 }
 0x9d6   :  { %6332 = vrcp.f32 %v4046_v55  ;;  %v4053_v17 = vadd.f32 1.0, %v6331_v63  ;;  %v4396_v55 = vld [vmem:[#allocation4 + $0x78] sm:$0xff]  ;;  %v4395_v63 = vld [vmem:[#allocation4 + $0x70] sm:$0xff] }
 0x9d8   :  { %6334 = vrcp.f32 %v4053_v17  ;;  %v4393_v17 = vld [vmem:[#allocation4 + $0x60] sm:$0xff] }
 0x9e3   :  { %v6333_v37 = vpop.eup %6332 }
 0x9e4   :  { %v4057_v59 = vmul.f32 %v6333_v37, %v4056_v34  ;;  %v4392_v34 = vld [vmem:[#allocation4 + $0x58] sm:$0xff]  ;;  %v4389_v37 = vld [vmem:[#allocation4 + $0x40] sm:$0xff] }
 0x9e5   :  { %v6335_v4 = vpop.eup %6334 }
 0x9e6   :  { %v4058_v51 = vadd.f32 %v4057_v59, %v13086_v1  ;;  %v4060_v62 = vsub.f32 1.0, %v6335_v4  ;;  %v4062_v23 = vmul.f32 %v6335_v4, %v11385_v27  ;;  %v4388_v59 = vld [vmem:[#allocation4 + $0x38] sm:$0xff]  ;;  %v4386_v1 = vld [vmem:[#allocation4 + $0x28] sm:$0xff] }
 0x9e7   :  { %v4382_v4 = vld [vmem:[#allocation4 + $0x8] sm:$0xff] }
 0x9e8   :  { %6336 = vtanh.f32 %v4058_v51  ;;  %v4385_v51 = vld [vmem:[#allocation4 + $0x20] sm:$0xff] }
 0x9e9   :  { %6338 = vpow2.f32 %v4728_v6  ;;  %v4383_v6 = vld [vmem:[#allocation4 + $0x10] sm:$0xff] }
 0x9f5   :  { %v6337_v0 = vpop.eup %6336 }
 0x9f6   :  { %v4061_v46 = vmul.f32 %v6337_v0, %v4060_v62  ;;  %v6339_v50 = vpop.eup %6338  ;;  %v4381_v62 = vld [vmem:[#allocation4] sm:$0xff] }
 0x9f7   :  { %v3882_v27 = vadd.f32 1.0, %v6339_v50  ;;  %v13117_v0 = vld [vmem:[#allocation119_spill] sm:$0xff]  ;;  %v4547_v50 = vld [vmem:[#allocation7 + $0x70] sm:$0xff] }
 0x9f8   :  { %v4063_v14 = vadd.f32 %v4062_v23, %v4061_v46  ;;  %v13118_v46 = vld [vmem:[#allocation14_spill] sm:$0xff] }
 0x9f9   :  { %6340 = vrcp.f32 %v3882_v27  ;;  %v13119_v23 = vld [vmem:[#allocation74_spill] sm:$0xff]  ;;  %v4546_v27 = vld [vmem:[#allocation7 + $0x68] sm:$0xff] }
 0x9fa   :  { %4129 = vmatmul.mubr.f32.vlgmr.msra.gmra.mxu0 %v4063_v14  ;;  %4370 = vst [vmem:[#allocation9] sm:$0xff] %v4063_v14  ;;  %6062 = vmatmul.mubr.f32.vlgmr.msra.gmra.mxu1 %v4063_v14  ;;  %6342 = vtanh.f32 %v3887_v28  ;;  %v13111_v28 = vld [vmem:[#allocation108_spill] sm:$0xff]  ;;  %v4548_v14 = vld [vmem:[#allocation7 + $0x78] sm:$0xff] }
 0x9fb   :  { %4206 = vmatpush1.msra.mxu0 %v11392_v60  ;;  %6065 = vmatpush3.msra.mxu1 %v11398_v48  ;;  %v13087_v60 = vld [vmem:[#allocation72_spill] sm:$0xff]  ;;  %v13088_v48 = vld [vmem:[#allocation91_spill] sm:$0xff] }
 0x9fc   :  { %4207 = vmatprep.subr.mxu0 %v11404_v31  ;;  %6066 = vmatprep.subr.mxu1 %v12393_v22  ;;  %v13089_v31 = vld [vmem:[#allocation92_spill] sm:$0xff] }
 0x9fd   :  { %4208 = vmatpush1.msra.mxu0 %v11411_v40  ;;  %6067 = vmatpush3.msra.mxu1 %v11417_v29  ;;  %v13090_v40 = vld [vmem:[#allocation75_spill] sm:$0xff] }
 0x9fe   :  { %4209 = vmatprep.subr.mxu0 %v11423_v30  ;;  %6068 = vmatprep.subr.mxu1 %v12393_v22  ;;  %v13091_v29 = vld [vmem:[#allocation79_spill] sm:$0xff]  ;;  %v13092_v30 = vld [vmem:[#allocation80_spill] sm:$0xff] }
 0x9ff   :  { %4210 = vmatpush1.msra.mxu0 %v11430_v49  ;;  %6069 = vmatpush3.msra.mxu1 %v11436_v5  ;;  %v13093_v49 = vld [vmem:[#allocation87_spill] sm:$0xff]  ;;  %v13094_v5 = vld [vmem:[#allocation76_spill] sm:$0xff] }
 0xa00   :  { %4211 = vmatprep.subr.mxu0 %v11442_v11  ;;  %6070 = vmatprep.subr.mxu1 %v12393_v22  ;;  %v13095_v11 = vld [vmem:[#allocation85_spill] sm:$0xff] }
 0xa01   :  { %4212 = vmatpush1.msra.mxu0 %v11449_v15  ;;  %6071 = vmatpush3.msra.mxu1 %v11455_v3  ;;  %v13096_v15 = vld [vmem:[#allocation93_spill] sm:$0xff]  ;;  %v13097_v3 = vld [vmem:[#allocation94_spill] sm:$0xff] }
 0xa02   :  { %4213 = vmatprep.subr.mxu0 %v11461_v10  ;;  %6072 = vmatprep.subr.mxu1 %v12393_v22  ;;  %v13098_v10 = vld [vmem:[#allocation95_spill] sm:$0xff] }
 0xa03   :  { %4214 = vmatpush1.msra.mxu0 %v11468_v32  ;;  %6073 = vmatpush3.msra.mxu1 %v11474_v13  ;;  %v13099_v32 = vld [vmem:[#allocation96_spill] sm:$0xff]  ;;  %v13100_v13 = vld [vmem:[#allocation97_spill] sm:$0xff] }
 0xa04   :  { %4215 = vmatprep.subr.mxu0 %v13087_v60  ;;  %6074 = vmatprep.subr.mxu1 %v12393_v22  ;;  %v4545_v60 = vld [vmem:[#allocation7 + $0x60] sm:$0xff] }
 0xa05   :  { %4216 = vmatpush1.msra.mxu0 %v13088_v48  ;;  %6075 = vmatpush3.msra.mxu1 %v13089_v31  ;;  %v4544_v48 = vld [vmem:[#allocation7 + $0x58] sm:$0xff]  ;;  %v4541_v31 = vld [vmem:[#allocation7 + $0x40] sm:$0xff] }
 0xa06   :  { %4217 = vmatprep.subr.mxu0 %v13090_v40  ;;  %6076 = vmatprep.subr.mxu1 %v12393_v22  ;;  %v6341_v58 = vpop.eup %6340  ;;  %v4540_v40 = vld [vmem:[#allocation7 + $0x38] sm:$0xff] }
 0xa07   :  { %4218 = vmatpush1.msra.mxu0 %v13091_v29  ;;  %6077 = vmatpush3.msra.mxu1 %v13092_v30  ;;  %v6343_v24 = vpop.eup %6342  ;;  %v3889_v25 = vsub.f32 1.0, %v6341_v58  ;;  %v3891_v39 = vmul.f32 %v6341_v58, %v11683_v19  ;;  %v4539_v29 = vld [vmem:[#allocation7 + $0x30] sm:$0xff]  ;;  %v4538_v30 = vld [vmem:[#allocation7 + $0x28] sm:$0xff] }
 0xa08   :  { %4219 = vmatprep.subr.mxu0 %v13093_v49  ;;  %6078 = vmatprep.subr.mxu1 %v12393_v22  ;;  %v4537_v49 = vld [vmem:[#allocation7 + $0x20] sm:$0xff] }
 0xa09   :  { %4220 = vmatpush1.msra.mxu0 %v13094_v5  ;;  %6079 = vmatpush3.msra.mxu1 %v13095_v11  ;;  %v3890_v43 = vmul.f32 %v6343_v24, %v3889_v25  ;;  %v4536_v5 = vld [vmem:[#allocation7 + $0x18] sm:$0xff]  ;;  %v4535_v11 = vld [vmem:[#allocation7 + $0x10] sm:$0xff] }
 0xa0a   :  { %4221 = vmatprep.subr.mxu0 %v13096_v15  ;;  %6080 = vmatprep.subr.mxu1 %v12393_v22  ;;  %v4534_v15 = vld [vmem:[#allocation7 + $0x8] sm:$0xff] }
 0xa0b   :  { %4222 = vmatpush1.msra.mxu0 %v13097_v3  ;;  %6081 = vmatpush3.msra.mxu1 %v13098_v10  ;;  %v4533_v3 = vld [vmem:[#allocation7] sm:$0xff] }
 0xa0c   :  { %4223 = vmatprep.subr.mxu0 %v13099_v32  ;;  %6082 = vmatprep.subr.mxu1 %v12393_v22 }
 0xa0d   :  { %4224 = vmatpush1.msra.mxu0 %v13100_v13  ;;  %6083 = vmatpush3.msra.mxu1 %v13101_v56 }
 0xa0e   :  { %4225 = vmatprep.subr.mxu0 %v13102_v12  ;;  %6084 = vmatprep.subr.mxu1 %v12393_v22 }
 0xa0f   :  { %4226 = vmatpush1.msra.mxu0 %v13103_v8  ;;  %6085 = vmatpush3.msra.mxu1 %v13104_v54 }
 0xa10   :  { %4227 = vmatprep.subr.mxu0 %v13105_v21  ;;  %6086 = vmatprep.subr.mxu1 %v12393_v22 }
 0xa11   :  { %4228 = vmatpush1.msra.mxu0 %v13106_v18  ;;  %6087 = vmatpush3.msra.mxu1 %v13107_v20 }
 0xa12   :  { %4229 = vmatprep.subr.mxu0 %v13108_v9  ;;  %6088 = vmatprep.subr.mxu1 %v12393_v22 }
 0xa13   :  { %4230 = vmatpush1.msra.mxu0 %v13109_v26  ;;  %6089 = vmatpush3.msra.mxu1 %v13110_v42 }
 0xa14   :  { %4231 = vmatprep.subr.mxu0 %v13111_v28  ;;  %6090 = vmatprep.subr.mxu1 %v12393_v22 }
 0xa15   :  { %4232 = vmatpush1.msra.mxu0 %v13112_v44  ;;  %6091 = vmatpush3.msra.mxu1 %v11646_v61  ;;  %v11910_v61 = vadd.f32 %v3891_v39, %v3890_v43 }
 0xa16   :  { %4233 = vmatprep.subr.mxu0 %v13113_v38  ;;  %6092 = vmatprep.subr.mxu1 %v12393_v22 }
 0xa17   :  { %4234 = vmatpush1.msra.mxu0 %v13114_v53  ;;  %6093 = vmatpush3.msra.mxu1 %v13115_v36 }
 0xa18   :  { %4235 = vmatprep.subr.mxu0 %v11672_v52  ;;  %6094 = vmatprep.subr.mxu1 %v12393_v22  ;;  %v13116_v52 = vld [vmem:[#allocation18_spill] sm:$0xff] }
 0xa19   :  { %4236 = vmatpush1.msra.mxu0 %v11679_v57  ;;  %4269 = vmatprep.mubr.f32.mxu0 %v12393_v22  ;;  %v4394_v57 = vld [vmem:[#allocation4 + $0x68] sm:$0xff] }
 0xa1a   :  { %6095 = vmatpush3.msra.mxu1 %v11688_v45  ;;  %6096 = vmatprep.mubr.msk.f32.mxu1 %vm6863_vm0, %v12393_v22  ;;  %v4391_v45 = vld [vmem:[#allocation4 + $0x50] sm:$0xff]  ;;  %v4390_v22 = vld [vmem:[#allocation4 + $0x48] sm:$0xff] }
 0xa1b   :  { %4270 = vmatmul.mubr.f32.vlgmr.msra.gmra.mxu0 %v11910_v61  ;;  %6097 = vmatmul.mubr.f32.vlgmr.msra.gmra.mxu1 %v11910_v61 }
 0xa1c   :  { %6099 = vmatprep.subr.mxu0 %v4396_v55  ;;  %6131 = vmatprep.mubr.f32.mxu0 %v13116_v52 }
 0xa1d   :  { %6100 = vmatpush3.msra.mxu0 %v4396_v55  ;;  %6143 = vmatprep.subr.mxu1 %v4548_v14 }
 0xa1e   :  { %6101 = vmatprep.subr.mxu0 %v4395_v63  ;;  %6144 = vmatpush3.msra.mxu1 %v4548_v14 }
 0xa1f   :  { %6102 = vmatpush3.msra.mxu0 %v4395_v63  ;;  %6145 = vmatprep.subr.mxu1 %v4547_v50 }
 0xa20   :  { %6103 = vmatprep.subr.mxu0 %v4394_v57  ;;  %6146 = vmatpush3.msra.mxu1 %v4547_v50 }
 0xa21   :  { %6104 = vmatpush3.msra.mxu0 %v4394_v57  ;;  %6147 = vmatprep.subr.mxu1 %v4546_v27 }
 0xa22   :  { %6105 = vmatprep.subr.mxu0 %v4393_v17  ;;  %6148 = vmatpush3.msra.mxu1 %v4546_v27 }
 0xa23   :  { %6106 = vmatpush3.msra.mxu0 %v4393_v17  ;;  %6149 = vmatprep.subr.mxu1 %v4545_v60 }
 0xa24   :  { %6107 = vmatprep.subr.mxu0 %v4392_v34  ;;  %6150 = vmatpush3.msra.mxu1 %v4545_v60 }
 0xa25   :  { %6108 = vmatpush3.msra.mxu0 %v4392_v34  ;;  %6151 = vmatprep.subr.mxu1 %v4544_v48 }
 0xa26   :  { %6109 = vmatprep.subr.mxu0 %v4391_v45  ;;  %6152 = vmatpush3.msra.mxu1 %v4544_v48 }
 0xa27   :  { %6110 = vmatpush3.msra.mxu0 %v4391_v45 }
 0xa28   :  { %6111 = vmatprep.subr.mxu0 %v4390_v22 }
 0xa29   :  { %6112 = vmatpush3.msra.mxu0 %v4390_v22 }
 0xa2a   :  { %6113 = vmatprep.subr.mxu0 %v4389_v37 }
 0xa2b   :  { %6114 = vmatpush3.msra.mxu0 %v4389_v37 }
 0xa2c   :  { %6115 = vmatprep.subr.mxu0 %v4388_v59 }
 0xa2d   :  { %6116 = vmatpush3.msra.mxu0 %v4388_v59 }
 0xa2e   :  { %6117 = vmatprep.subr.mxu0 %v4387_v47 }
 0xa2f   :  { %6118 = vmatpush3.msra.mxu0 %v4387_v47 }
 0xa30   :  { %6119 = vmatprep.subr.mxu0 %v4386_v1 }
 0xa31   :  { %6120 = vmatpush3.msra.mxu0 %v4386_v1 }
 0xa32   :  { %6121 = vmatprep.subr.mxu0 %v4385_v51 }
 0xa33   :  { %6122 = vmatpush3.msra.mxu0 %v4385_v51 }
 0xa34   :  { %6123 = vmatprep.subr.mxu0 %v4384_v41 }
 0xa35   :  { %6124 = vmatpush3.msra.mxu0 %v4384_v41 }
 0xa36   :  { %6125 = vmatprep.subr.mxu0 %v4383_v6 }
 0xa37   :  { %6126 = vmatpush3.msra.mxu0 %v4383_v6 }
 0xa38   :  { %6127 = vmatprep.subr.mxu0 %v4382_v4 }
 0xa39   :  { %6128 = vmatpush3.msra.mxu0 %v4382_v4 }
 0xa3a   :  { %6129 = vmatprep.subr.mxu0 %v4381_v62 }
 0xa3b   :  { %6130 = vmatpush3.msra.mxu0 %v4381_v62 }
 0xa3c   :  { %6132 = vmatmul.mubr.f32.vlgmr.msra.gmra.mxu0 %v13117_v0 }
 0xa3d   :  { %6134 = vmatprep.mubr.f32.mxu0 %v13118_v46 }
 0xa40   :  { %6135 = vmatmul.mubr.f32.gmra.mxu0 %v13119_v23 }
 0xa41   :  { %6137 = vmatprep.mubr.f32.mxu0 %v10739_v16  ;;  %v4543_v16 = vld [vmem:[#allocation7 + $0x50] sm:$0xff] }
 0xa42   :  { %6153 = vmatprep.subr.mxu1 %v4543_v16 }
 0xa43   :  { %6154 = vmatpush3.msra.mxu1 %v4543_v16 }
 0xa44   :  { %6138 = vmatmul.mubr.f32.gmra.mxu0 %v11683_v19  ;;  %v4542_v19 = vld [vmem:[#allocation7 + $0x48] sm:$0xff] }
 0xa45   :  { %6140 = vmatprep.mubr.f32.mxu0 %v11910_v61  ;;  %6155 = vmatprep.subr.mxu1 %v4542_v19 }
 0xa46   :  { %6156 = vmatpush3.msra.mxu1 %v4542_v19 }
 0xa47   :  { %6157 = vmatprep.subr.mxu1 %v4541_v31 }
 0xa48   :  { %6158 = vmatpush3.msra.mxu1 %v4541_v31  ;;  %v4734_v31 = vld [vmem:[%s11988_s13] ss:$0 sm:$0xff] }
 0xa49   :  { %6159 = vmatprep.subr.mxu1 %v4540_v40 }
 0xa4a   :  { %6160 = vmatpush3.msra.mxu1 %v4540_v40 }
 0xa4b   :  { %6161 = vmatprep.subr.mxu1 %v4539_v29 }
 0xa4c   :  { %6162 = vmatpush3.msra.mxu1 %v4539_v29 }
 0xa4d   :  { %6163 = vmatprep.subr.mxu1 %v4538_v30 }
 0xa4e   :  { %6164 = vmatpush3.msra.mxu1 %v4538_v30 }
 0xa4f   :  { %6165 = vmatprep.subr.mxu1 %v4537_v49 }
 0xa50   :  { %6166 = vmatpush3.msra.mxu1 %v4537_v49 }
 0xa51   :  { %6167 = vmatprep.subr.mxu1 %v4536_v5 }
 0xa52   :  { %6168 = vmatpush3.msra.mxu1 %v4536_v5 }
 0xa53   :  { %6169 = vmatprep.subr.mxu1 %v4535_v11 }
 0xa54   :  { %6170 = vmatpush3.msra.mxu1 %v4535_v11 }
 0xa55   :  { %6171 = vmatprep.subr.mxu1 %v4534_v15 }
 0xa56   :  { %6172 = vmatpush3.msra.mxu1 %v4534_v15 }
 0xa57   :  { %6173 = vmatprep.subr.mxu1 %v4533_v3 }
 0xa58   :  { %6174 = vmatpush3.msra.mxu1 %v4533_v3 }
 0xaba   :  { %v4201_v10 = vpop.f32.mrf.mxu1  ;;  %v4130_v13 = vpop.f32.mrf.mxu0 }
 0xabb   :  { %v4131_v12 = vadd.f32 %v4130_v13, %v13083_v2  ;;  %v11929_v2 = vld [vmem:[%s11986_s11] ss:$0 sm:$0xff]  ;;  %v4202_v36 = vadd.f32 %v4201_v10, %v8308_v35 }
 0xabc   :  { %v6063_v32 = vpop.f32.mrf.mxu1  ;;  %v4132_v56 = vpop.f32.mrf.mxu0 }
 0xabd   :  { %v4133_v24 = vadd.f32 %v4132_v56, %v8316_v7 }
 0xadb   :  { %v4271_v8 = vpop.f32.mrf.mxu0  ;;  %v4342_v54 = vpop.f32.mrf.mxu1 }
 0xadc   :  { %v4346_v58 = vadd.f32 %v4271_v8, %v4131_v12  ;;  %v4360_v43 = vadd.f32 %v11837_v33, %v4342_v54 }
 0xadd   :  { %v6098_v21 = vpop.f32.mrf.mxu1  ;;  %v4273_v20 = vpop.f32.mrf.mxu0 }
 0xade   :  { %v4731_v18 = vmul.f32 -1.442695, %v4346_v58  ;;  %v4353_v9 = vadd.f32 %v4273_v20, %v4133_v24 }
 0xae0   :  { %6344 = vpow2.f32 %v4731_v18  ;;  %v4732_v26 = vmul.f32 -1.442695, %v4353_v9 }
 0xae2   :  { %6346 = vpow2.f32 %v4732_v26 }
 0xaed   :  { %v6345_v42 = vpop.eup %6344 }
 0xaee   :  { %v4350_v25 = vadd.f32 1.0, %v6345_v42 }
 0xaef   :  { %v6347_v28 = vpop.eup %6346 }
 0xaf0   :  { %6348 = vrcp.f32 %v4350_v25  ;;  %v4357_v44 = vadd.f32 1.0, %v6347_v28 }
 0xaf2   :  { %6350 = vrcp.f32 %v4357_v44 }
 0xafc   :  { %v6133_v38 = vpop.f32.mrf.mxu0 }
 0xafd   :  { %v6349_v53 = vpop.eup %6348  ;;  %v4476_v7 = vadd.f32 %v6133_v38, %v11929_v2 }
 0xafe   :  { %v4361_v39 = vmul.f32 %v6349_v53, %v4360_v43  ;;  %v4470_v55 = vpop.f32.mrf.mxu0 }
 0xaff   :  { %v4471_v63 = vadd.f32 %v11929_v2, %v4470_v55  ;;  %v4518_v57 = vmul.f32 0.01, %v4476_v7  ;;  %vm4510_vm1 = vcmp.ge.f32.partialorder %v4476_v7, 0.0  ;;  %v6351_v23 = vpop.eup %6350 }
 0xb00   :  { %v4362_v52 = vadd.f32 %v4361_v39, %v4202_v36  ;;  %v6136_v17 = vpop.f32.mrf.mxu0  ;;  %v4364_v27 = vsub.f32 1.0, %v6351_v23  ;;  %v4366_v16 = vmul.f32 %v6351_v23, %v11910_v61 }
 0xb01   :  { %v4517_v34 = vmul.f32 0.01, %v4471_v63  ;;  %v4486_v45 = vadd.f32 %v6136_v17, %v11929_v2  ;;  %vm4509_vm2 = vcmp.ge.f32.partialorder %v4471_v63, 0.0  ;;  %v4526_v47 = vsel %vm4510_vm1, %v4476_v7, %v4518_v57 }
 0xb02   :  { %6352 = vtanh.f32 %v4362_v52  ;;  %v4480_v33 = vpop.f32.mrf.mxu0 }
 0xb03   :  { %v4481_v22 = vadd.f32 %v11929_v2, %v4480_v33  ;;  %v4525_v37 = vsel %vm4509_vm2, %v4471_v63, %v4517_v34  ;;  %v4520_v59 = vmul.f32 0.01, %v4486_v45  ;;  %vm4512_vm4 = vcmp.ge.f32.partialorder %v4486_v45, 0.0 }
 0xb04   :  { %v6139_v35 = vpop.f32.mrf.mxu0  ;;  %6175 = vmatprep.mubr.f32.mxu1 %v4525_v37 }
 0xb05   :  { %v4519_v1 = vmul.f32 0.01, %v4481_v22  ;;  %v4496_v51 = vadd.f32 %v6139_v35, %v11929_v2  ;;  %6176 = vmatmul.mubr.f32.vlgmr.msra.gmra.mxu1 %v4526_v47  ;;  %vm4511_vm3 = vcmp.ge.f32.partialorder %v4481_v22, 0.0  ;;  %v4528_v0 = vsel %vm4512_vm4, %v4486_v45, %v4520_v59 }
 0xb06   :  { %v4490_v41 = vpop.f32.mrf.mxu0 }
 0xb07   :  { %v4491_v6 = vadd.f32 %v11929_v2, %v4490_v41  ;;  %v4527_v4 = vsel %vm4511_vm3, %v4481_v22, %v4519_v1  ;;  %v4522_v62 = vmul.f32 0.01, %v4496_v51  ;;  %vm4514_vm6 = vcmp.ge.f32.partialorder %v4496_v51, 0.0 }
 0xb08   :  { %6178 = vmatprep.mubr.f32.mxu1 %v4527_v4 }
 0xb09   :  { %v4521_v46 = vmul.f32 0.01, %v4491_v6  ;;  %6179 = vmatmul.mubr.f32.gmra.mxu1 %v4528_v0  ;;  %vm4513_vm5 = vcmp.ge.f32.partialorder %v4491_v6, 0.0  ;;  %v4530_v50 = vsel %vm4514_vm6, %v4496_v51, %v4522_v62 }
 0xb0b   :  { %v4529_v14 = vsel %vm4513_vm5, %v4491_v6, %v4521_v46 }
 0xb0c   :  { %6181 = vmatprep.mubr.f32.mxu1 %v4529_v14 }
 0xb0d   :  { %6182 = vmatmul.mubr.f32.gmra.mxu1 %v4530_v50 }
 0xb0f   :  { %v6353_v60 = vpop.eup %6352 }
 0xb10   :  { %v4365_v48 = vmul.f32 %v6353_v60, %v4364_v27 }
 0xb12   :  { %v4367_v19 = vadd.f32 %v4366_v16, %v4365_v48 }
 0xb14   :  { %6141 = vmatmul.mubr.f32.gmra.mxu0 %v4367_v19  ;;  %4372 = vst [vmem:[#allocation9 + $0x8] sm:$0xff] %v4367_v19 }
 0xbc5   :  { %v6177_v40 = vpop.f32.mrf.mxu1 }
 0xbc6   :  { %v4628_v29 = vadd.f32 %v6177_v40, %v4734_v31 }
 0xbc7   :  { %v4622_v30 = vpop.f32.mrf.mxu1 }
 0xbc8   :  { %4662 = vst [vmem:[%s11989_s14 + $0x8] sm:$0xff] %v4628_v29  ;;  %v4623_v49 = vadd.f32 %v4734_v31, %v4622_v30 }
 0xbc9   :  { %v6180_v5 = vpop.f32.mrf.mxu1 }
 0xbca   :  { %4661 = vst [vmem:[%s11989_s14] sm:$0xff] %v4623_v49  ;;  %v4638_v61 = vadd.f32 %v6180_v5, %v4734_v31 }
 0xbcb   :  { %v4632_v11 = vpop.f32.mrf.mxu1 }
 0xbcc   :  { %4664 = vst [vmem:[%s11989_s14 + $0x18] sm:$0xff] %v4638_v61  ;;  %v4633_v15 = vadd.f32 %v4734_v31, %v4632_v11 }
 0xbcd   :  { %v6183_v3 = vpop.f32.mrf.mxu1 }
 0xbce   :  { %4663 = vst [vmem:[%s11989_s14 + $0x10] sm:$0xff] %v4633_v15  ;;  %v4648_v10 = vadd.f32 %v6183_v3, %v4734_v31 }
 0xbcf   :  { %v4642_v32 = vpop.f32.mrf.mxu1 }
 0xbd0   :  { %4666 = vst [vmem:[%s11989_s14 + $0x28] sm:$0xff] %v4648_v10  ;;  %v4643_v13 = vadd.f32 %v4734_v31, %v4642_v32 }
 0xbd2   :  { %4665 = vst [vmem:[%s11989_s14 + $0x20] sm:$0xff] %v4643_v13 }
 0xbd4   :  { %v6142_v56 = vpop.f32.mrf.mxu0 }
 0xbd5   :  { %v4506_v12 = vadd.f32 %v6142_v56, %v11929_v2 }
 0xbd6   :  { %v4500_v8 = vpop.f32.mrf.mxu0 }
 0xbd7   :  { %v4501_v54 = vadd.f32 %v11929_v2, %v4500_v8  ;;  %v4524_v58 = vmul.f32 0.01, %v4506_v12  ;;  %vm4516_vm8 = vcmp.ge.f32.partialorder %v4506_v12, 0.0 }
 0xbd9   :  { %v4523_v21 = vmul.f32 0.01, %v4501_v54  ;;  %vm4515_vm7 = vcmp.ge.f32.partialorder %v4501_v54, 0.0  ;;  %v4532_v20 = vsel %vm4516_vm8, %v4506_v12, %v4524_v58 }
 0xbdb   :  { %v4531_v18 = vsel %vm4515_vm7, %v4501_v54, %v4523_v21 }
 0xbdc   :  { %6184 = vmatprep.mubr.f32.mxu1 %v4531_v18 }
 0xbdd   :  { %6185 = vmatmul.mubr.f32.gmra.mxu1 %v4532_v20 }
 0xbde   :  { %6843 = shalt.err (!%p6840_p0)
}
 0xbdf   :  { %4682 = dma.vmem_to_hbm [thread:$0]  %s4677_s20, 256, %s11990_s15, [#allocation6], %s6859_s21, %s6859_s21, %s6860_s22  }
 0xc9d   :  { %v6186_v24 = vpop.f32.mrf.mxu1 }
 0xc9e   :  { %v4658_v9 = vadd.f32 %v6186_v24, %v4734_v31 }
 0xc9f   :  { %v4652_v26 = vpop.f32.mrf.mxu1 }
 0xca0   :  { %4668 = vst [vmem:[%s11989_s14 + $0x38] sm:$0xff] %v4658_v9  ;;  %v4653_v42 = vadd.f32 %v4734_v31, %v4652_v26 }
 0xca2   :  { %4667 = vst [vmem:[%s11989_s14 + $0x30] sm:$0xff] %v4653_v42 }
 0xca3   :  { %6856 = dma.done.wait [#allocation6], 256  }
 0xca4   :  { %6857 = vsyncadd [#allocation6], 4294967040 }
 0xca5   :  { %4688 = vsyncpa [#allocation5], 1 }
 0xca6   :  { %4689 = vsyncpa [#allocation8], 1 }
 0xca7   :  { %4690 = vsyncpa [#allocation6], 1 }

</bundles_post_ra>
